<compile_context>
chip_gen: v7x
topology: tpu7x:2x2x1
jax: 0.10.0
libtpu: 0.0.40
codegen_flags: <defaults>
</compile_context>

<pallas_src>
import math
import functools

import jax
import jax.numpy as jnp
from jax.experimental import pallas as pl
from jax.experimental.pallas import tpu as pltpu

# ----------------------------------------------------------------------------
# Small, self-consistent configuration (scaled-down analog of the original:
# hidden_dim == node_feature*4, protein conv flatten feeds cond/Protein_FC).
# ----------------------------------------------------------------------------
B = 2                      # batch (number of graphs / proteins)
F_NODE = 8                 # drug node features            (orig 94)
H = F_NODE * 4             # hidden dim                    (orig 376 = 94*4)
OUT_DIM = 16               # drug / protein final vector   (orig 128)
FF = 64                    # transformer FFN dim           (orig 1024)
HEADS = 4                  # attention heads               (orig 8)
LAYERS = 2                 # encoder/decoder layers        (orig 8)

PROT_LEN = 16              # protein token-seq length == Conv1d in_channels (orig 1000)
PROT_VOCAB_TABLE = 7       # protein_f + 1                 (orig 26)
EMB = 16                   # protein embedding dim (conv length axis, orig 128)
NF = 4                     # Num_Filters                   (orig 32)
K = 3                      # kernel size                   (orig 8)
L1 = EMB - K + 1
L2 = L1 - K + 1
L3 = L2 - K + 1
C3 = NF * 3
FLAT = C3 * L3             # analog of 96*107

VOCAB = 20                 # tokenizer size
T_TGT = 8                  # target SMILES length
PAD, SOS, EOS = 0, 1, 2

NODES = [5, 4]             # nodes per graph
N_TOTAL = sum(NODES)
T_MAX = max(NODES)
S_FUSE = 2 * T_MAX         # fused (vss | zzs) sequence length
PE_MAX_LEN = 64
LN_EPS = 1e-5


# ----------------------------------------------------------------------------
# Generic single-step pallas_call helper (whole operands as one VMEM block)
# ----------------------------------------------------------------------------
def _zero_map(n):
    def idx(i):
        return (0,) * n
    return idx


def fused_call(kernel, args, out_shape):
    args = [jnp.asarray(a, jnp.float32) for a in args]
    in_specs = [pl.BlockSpec(a.shape, _zero_map(a.ndim)) for a in args]
    if isinstance(out_shape, (tuple, list)):
        out_specs = tuple(pl.BlockSpec(o.shape, _zero_map(len(o.shape)))
                          for o in out_shape)
        out_shape = tuple(out_shape)
    else:
        out_specs = pl.BlockSpec(out_shape.shape, _zero_map(len(out_shape.shape)))
    return pl.pallas_call(
        kernel,
        out_shape=out_shape,
        grid=(1,),
        in_specs=in_specs,
        out_specs=out_specs,
        compiler_params=pltpu.CompilerParams(dimension_semantics=("parallel",)),
    )(*args)


def r2(v):
    return jnp.asarray(v, jnp.float32).reshape(1, -1)


# ----------------------------------------------------------------------------
# In-kernel helpers (plain functions used inside kernel bodies)
# ----------------------------------------------------------------------------
def _dot(a, b):
    return jnp.dot(a, b, preferred_element_type=jnp.float32)


def _ln(x, g, b, eps=LN_EPS):
    mu = jnp.mean(x, axis=-1, keepdims=True)
    var = jnp.mean((x - mu) ** 2, axis=-1, keepdims=True)
    return (x - mu) * jax.lax.rsqrt(var + eps) * g + b


def _attend(q, k, v, wo, bias, heads, dh):
    """q:[Tq,D] k,v:[Tk,D] wo:[D,D]; bias additive, broadcastable to [Tq,Tk].
    Per-head softmax attention; the output projection is accumulated per head
    (dot with the matching row-block of wo), so no in-kernel concatenation."""
    scale = dh ** -0.5
    acc = None
    for hd in range(heads):
        sl = slice(hd * dh, (hd + 1) * dh)
        s = jax.lax.dot_general(q[:, sl], k[:, sl],
                                (((1,), (1,)), ((), ())),
                                preferred_element_type=jnp.float32) * scale
        s = s + bias
        s = s - jnp.max(s, axis=-1, keepdims=True)
        p = jnp.exp(s)
        p = p / jnp.sum(p, axis=-1, keepdims=True)
        oh = _dot(p, v[:, sl])                       # [Tq, dh]
        contrib = _dot(oh, wo[sl, :])                # [Tq, D]
        acc = contrib if acc is None else acc + contrib
    return acc


# ----------------------------------------------------------------------------
# Fused Pallas kernels
# ----------------------------------------------------------------------------
def _gated_cnn_kernel(x_ref, w1_ref, b1_ref, w2_ref, b2_ref, w3_ref, b3_ref,
                      o_ref, *, ksize, nb):
    """Whole 3-block GatedCNN.  x: [B, L, Cin] (length-major); each weight is
    stacked [K, Cin, 2*Cout] with conv|gate fused along the output dim."""
    def block(xs, w_ref, b_ref):
        wk = [w_ref[k] for k in range(ksize)]        # each [Cin, 2*Cout]
        bb = b_ref[...]                              # [1, 2*Cout]
        cout = w_ref.shape[2] // 2
        lout = xs[0].shape[0] - ksize + 1
        outs = []
        for xb in xs:                                # [L_in, C_in]
            y = None
            for k in range(ksize):
                t = _dot(xb[k:k + lout, :], wk[k])
                y = t if y is None else y + t
            y = y + bb
            conv, gate = y[:, :cout], y[:, cout:]
            outs.append(jnp.maximum(conv * jax.nn.sigmoid(gate), 0.0))
        return outs

    xs = [x_ref[b] for b in range(nb)]
    h = block(xs, w1_ref, b1_ref)
    h = block(h, w2_ref, b2_ref)
    h = block(h, w3_ref, b3_ref)
    for b in range(nb):
        o_ref[b] = h[b]                              # [L3, C3]


def _linear_kernel(x_ref, w_ref, b_ref, o_ref, *, act=None):
    y = _dot(x_ref[...], w_ref[...]) + b_ref[...]
    if act == "relu":
        y = jnp.maximum(y, 0.0)
    o_ref[...] = y


def _drug_gcn_kernel(x_ref, a_ref, madd_ref,
                     w1_ref, b1_ref, w2_ref, b2_ref, w3_ref, b3_ref,
                     wfa_ref, bfa_ref, wfb_ref, bfb_ref,
                     xo_ref, pmvo_ref, *, n_graphs):
    """3x GCN layers (relu(A_hat (X W) + b)) + global max pool + Drug_FCs."""
    A = a_ref[...]
    h = x_ref[...]
    for w_r, b_r in ((w1_ref, b1_ref), (w2_ref, b2_ref), (w3_ref, b3_ref)):
        h = jnp.maximum(_dot(A, _dot(h, w_r[...])) + b_r[...], 0.0)
    xo_ref[...] = h                                  # relu'd node features
    # global max pool via additive mask (0 for members, -1e30 otherwise);
    # valid because h >= 0 after ReLU.
    pooled = []
    for g in range(n_graphs):
        pooled.append(jnp.max(h + madd_ref[g], axis=0, keepdims=True))  # [1,H]
    x2 = jnp.concatenate(pooled, axis=0)             # [G, H]
    hf = jnp.maximum(_dot(x2, wfa_ref[...]) + bfa_ref[...], 0.0)
    pmvo_ref[...] = _dot(hf, wfb_ref[...]) + bfb_ref[...]


def _vae_kernel(d_ref, cond_ref, a_ref, eps_ref,
                wmv1_ref, bmv1_ref, wm2_ref, bm2_ref, wv2_ref, bv2_ref,
                z_ref, kl_ref, *, hdim):
    """Fused mean/var MLPs (shared input, concatenated first layer) +
    reparameterize + condition/affinity add (z + cond + a)."""
    d = d_ref[...]
    h1 = jnp.maximum(_dot(d, wmv1_ref[...]) + bmv1_ref[...], 0.0)   # [M, 2H]
    mu = _dot(h1[:, :hdim], wm2_ref[...]) + bm2_ref[...]
    lv = _dot(h1[:, hdim:], wv2_ref[...]) + bv2_ref[...]
    zlv = -jnp.abs(lv)
    # NOTE: the /64 normalization is hard-coded in the reference PyTorch code.
    kl = -0.5 * jnp.sum(1.0 + zlv - mu * mu - jnp.exp(zlv)) / 64.0
    z = mu + jnp.exp(0.5 * zlv) * eps_ref[...]
    z_ref[...] = z + cond_ref[...] + a_ref[...]
    kl_ref[...] = jnp.reshape(kl, (1, 1))


def _enc_layer_kernel(x_ref, bias_ref,
                      g1_ref, be1_ref, wqkv_ref, bqkv_ref, wo_ref, bo_ref,
                      g2_ref, be2_ref, wf1_ref, bf1_ref, wf2_ref, bf2_ref,
                      o_ref, *, heads):
    """Whole pre-norm TransformerEncoderLayer: LN -> fused-QKV -> MHA ->
    out-proj -> residual -> LN -> FFN -> residual."""
    nb, _, D = x_ref.shape
    dh = D // heads
    wqkv = wqkv_ref[...]; bqkv = bqkv_ref[...]
    wo = wo_ref[...]; bo = bo_ref[...]
    wf1 = wf1_ref[...]; bf1 = bf1_ref[...]
    wf2 = wf2_ref[...]; bf2 = bf2_ref[...]
    g1 = g1_ref[...]; be1 = be1_ref[...]
    g2 = g2_ref[...]; be2 = be2_ref[...]
    for b in range(nb):
        x = x_ref[b]                                    # [T, D]
        h = _ln(x, g1, be1)
        qkv = _dot(h, wqkv) + bqkv                      # [T, 3D]
        q, k, v = qkv[:, :D], qkv[:, D:2 * D], qkv[:, 2 * D:]
        x = x + _attend(q, k, v, wo, bias_ref[b], heads, dh) + bo
        h = _ln(x, g2, be2)
        f = jnp.maximum(_dot(h, wf1) + bf1, 0.0)
        f = _dot(f, wf2) + bf2
        o_ref[b] = x + f


def _dec_layer_kernel(x_ref, mem_ref, sbias_ref, cbias_ref,
                      gs_ref, bs_ref, wqkv_ref, bqkv_ref, wos_ref, bos_ref,
                      gc_ref, bc_ref, wqc_ref, bqc_ref, wkvc_ref, bkvc_ref,
                      woc_ref, boc_ref,
                      gf_ref, bfn_ref, wf1_ref, bf1_ref, wf2_ref, bf2_ref,
                      o_ref, *, heads):
    """Whole pre-norm TransformerDecoderLayer: causal self-attn, cross-attn
    (fused K|V projection of memory), FFN; all with residuals."""
    nb, _, D = x_ref.shape
    dh = D // heads
    sbias = sbias_ref[...]
    wqkv = wqkv_ref[...]; bqkv = bqkv_ref[...]
    wos = wos_ref[...]; bos = bos_ref[...]
    wqc = wqc_ref[...]; bqc = bqc_ref[...]
    wkvc = wkvc_ref[...]; bkvc = bkvc_ref[...]
    woc = woc_ref[...]; boc = boc_ref[...]
    wf1 = wf1_ref[...]; bf1 = bf1_ref[...]
    wf2 = wf2_ref[...]; bf2 = bf2_ref[...]
    gs = gs_ref[...]; bs = bs_ref[...]
    gc = gc_ref[...]; bc = bc_ref[...]
    gf = gf_ref[...]; bfn = bfn_ref[...]
    for b in range(nb):
        x = x_ref[b]                                    # [Lt, D]
        mem = mem_ref[b]                                # [S, D]
        # causal self-attention
        h = _ln(x, gs, bs)
        qkv = _dot(h, wqkv) + bqkv
        q, k, v = qkv[:, :D], qkv[:, D:2 * D], qkv[:, 2 * D:]
        x = x + _attend(q, k, v, wos, sbias, heads, dh) + bos
        # cross-attention over encoder memory
        h = _ln(x, gc, bc)
        qc = _dot(h, wqc) + bqc                         # [Lt, D]
        kvc = _dot(mem, wkvc) + bkvc                    # [S, 2D]
        kc, vc = kvc[:, :D], kvc[:, D:]
        x = x + _attend(qc, kc, vc, woc, cbias_ref[b], heads, dh) + boc
        # FFN
        h = _ln(x, gf, bfn)
        f = jnp.maximum(_dot(h, wf1) + bf1, 0.0)
        f = _dot(f, wf2) + bf2
        o_ref[b] = x + f


def _ln_kernel(x_ref, g_ref, b_ref, o_ref):
    o_ref[...] = _ln(x_ref[...], g_ref[...], b_ref[...])


def _wordpred_kernel(x_ref, gd_ref, bd_ref,
                     w1_ref, b1_ref, a_ref, gw_ref, bw_ref, w2_ref, b2_ref,
                     o_ref):
    """Fused decoder-final LayerNorm + word_pred (Linear -> PReLU -> LN -> Linear)."""
    x = _ln(x_ref[...], gd_ref[...], bd_ref[...])
    h = _dot(x, w1_ref[...]) + b1_ref[...]
    h = jnp.where(h >= 0.0, h, a_ref[...] * h)          # PReLU (scalar slope)
    h = _ln(h, gw_ref[...], bw_ref[...])
    o_ref[...] = _dot(h, w2_ref[...]) + b2_ref[...]


def _fc_head_kernel(x_ref, w1_ref, b1_ref, w2_ref, b2_ref,
                    w3_ref, b3_ref, w4_ref, b4_ref, o_ref):
    x = x_ref[...]
    x = jnp.maximum(_dot(x, w1_ref[...]) + b1_ref[...], 0.0)
    x = jnp.maximum(_dot(x, w2_ref[...]) + b2_ref[...], 0.0)
    x = jnp.maximum(_dot(x, w3_ref[...]) + b3_ref[...], 0.0)
    o_ref[...] = _dot(x, w4_ref[...]) + b4_ref[...]


def _ce_kernel(logits_ref, onehot_ref, valid_ref, o_ref):
    lg = logits_ref[...]
    m = jnp.max(lg, axis=-1, keepdims=True)
    lse = jnp.log(jnp.sum(jnp.exp(lg - m), axis=-1, keepdims=True)) + m
    nll = jnp.sum(onehot_ref[...] * (lse - lg), axis=-1, keepdims=True)
    valid = valid_ref[...]
    total = jnp.sum(nll * valid)
    count = jnp.sum(valid)
    o_ref[...] = jnp.reshape(total / jnp.maximum(count, 1.0), (1, 1))


# ----------------------------------------------------------------------------
# Glue built on the kernels
# ----------------------------------------------------------------------------
def positional_encoding_table(max_len, d_model):
    position = jnp.arange(max_len, dtype=jnp.float32)[:, None]
    div_term = jnp.exp(jnp.arange(0, d_model, 2, dtype=jnp.float32)
                       * (-math.log(10000.0) / d_model))
    pe = jnp.zeros((max_len, d_model), jnp.float32)
    pe = pe.at[:, 0::2].set(jnp.sin(position * div_term))
    pe = pe.at[:, 1::2].set(jnp.cos(position * div_term))
    return pe                                            # [max_len, d_model]


def prep_conv_pair(cp, gp):
    """PyTorch [Cout,Cin,K] conv weights -> stacked [K, Cin, 2*Cout] (conv|gate)."""
    w = jnp.concatenate([cp["w"], gp["w"]], axis=0)      # [2*Cout, Cin, K]
    w = jnp.transpose(w, (2, 1, 0))                      # [K, Cin, 2*Cout]
    b = r2(jnp.concatenate([cp["b"], gp["b"]], axis=0))
    return w, b


def gated_cnn(target_ids, p):
    emb = p["prot_embed"][target_ids]                    # [B, PROT_LEN, EMB] (NCL)
    emb_lm = emb.transpose(0, 2, 1)                      # length-major [B, EMB, PROT_LEN]
    w1, b1 = prep_conv_pair(p["conv1"], p["gate1"])
    w2, b2 = prep_conv_pair(p["conv2"], p["gate2"])
    w3, b3 = prep_conv_pair(p["conv3"], p["gate3"])
    h3 = fused_call(
        functools.partial(_gated_cnn_kernel, ksize=K, nb=B),
        [emb_lm, w1, b1, w2, b2, w3, b3],
        jax.ShapeDtypeStruct((B, L3, C3), jnp.float32))  # [B, L3, C3]
    con_flat = h3.transpose(0, 2, 1).reshape(B, FLAT)    # PyTorch [B, C3*L3] order
    # fused Protein_FC | cond heads (shared input con_flat)
    w_ph = jnp.concatenate([p["prot_fc"]["w"], p["cond"]["w"]], axis=1)
    b_ph = r2(jnp.concatenate([p["prot_fc"]["b"], p["cond"]["b"]], axis=0))
    heads = fused_call(_linear_kernel, [con_flat, w_ph, b_ph],
                       jax.ShapeDtypeStruct((B, OUT_DIM + H), jnp.float32))
    protein_vec = heads[:, :OUT_DIM]
    con_emb = heads[:, OUT_DIM:]
    return protein_vec, con_emb


def drug_encoder(x_nodes, A_hat, batch_onehot, y, con_emb, p, eps):
    # additive pooling mask: 0 for member nodes, -1e30 otherwise
    madd = ((batch_onehot - 1.0) * 1e30).reshape(B, N_TOTAL, 1)
    x_gcn, PMVO = fused_call(
        functools.partial(_drug_gcn_kernel, n_graphs=B),
        [x_nodes, A_hat, madd,
         p["gcn1"]["w"], r2(p["gcn1"]["b"]),
         p["gcn2"]["w"], r2(p["gcn2"]["b"]),
         p["gcn3"]["w"], r2(p["gcn3"]["b"]),
         p["drug_fc1"]["w"], r2(p["drug_fc1"]["b"]),
         p["drug_fc2"]["w"], r2(p["drug_fc2"]["b"])],
        (jax.ShapeDtypeStruct((N_TOTAL, H), jnp.float32),
         jax.ShapeDtypeStruct((B, OUT_DIM), jnp.float32)))

    # process_p: pad per-graph node sequences to T_MAX with -999 (batch-first).
    segs, start = [], 0
    for n in NODES:
        seg = x_gcn[start:start + n]
        if T_MAX - n > 0:
            seg = jnp.concatenate(
                [seg, jnp.full((T_MAX - n, H), -999.0, jnp.float32)], axis=0)
        segs.append(seg)
        start += n
    d_bf = jnp.stack(segs, axis=0)                       # [B, T_MAX, H]
    padding_mask = d_bf[:, :, 0] == -999.0               # [B, T_MAX]
    d_seq = d_bf + p["pp_seg"]                           # vss

    # fused mean/var + reparameterize + (z + cond + a)
    M = B * T_MAX
    wmv1 = jnp.concatenate([p["mean1"]["w"], p["var1"]["w"]], axis=1)
    bmv1 = r2(jnp.concatenate([p["mean1"]["b"], p["var1"]["b"]], axis=0))
    cond_b = jnp.broadcast_to(con_emb[:, None, :], (B, T_MAX, H)).reshape(M, H)
    a_b = jnp.broadcast_to(y.reshape(B, 1, 1), (B, T_MAX, 1)).reshape(M, 1)
    amvo_flat, kl = fused_call(
        functools.partial(_vae_kernel, hdim=H),
        [d_seq.reshape(M, H), cond_b, a_b, eps.reshape(M, H),
         wmv1, bmv1, p["mean2"]["w"], r2(p["mean2"]["b"]),
         p["var2"]["w"], r2(p["var2"]["b"])],
        (jax.ShapeDtypeStruct((M, H), jnp.float32),
         jax.ShapeDtypeStruct((1, 1), jnp.float32)))
    AMVO = amvo_flat.reshape(B, T_MAX, H)
    return d_seq, AMVO, padding_mask, PMVO, kl[0, 0]


def enc_layer_call(x, bias, lp):
    args = [x, bias,
            r2(lp["ln1"]["g"]), r2(lp["ln1"]["b"]),
            lp["attn"]["qkv"]["w"], r2(lp["attn"]["qkv"]["b"]),
            lp["attn"]["o"]["w"], r2(lp["attn"]["o"]["b"]),
            r2(lp["ln2"]["g"]), r2(lp["ln2"]["b"]),
            lp["fc1"]["w"], r2(lp["fc1"]["b"]),
            lp["fc2"]["w"], r2(lp["fc2"]["b"])]
    return fused_call(functools.partial(_enc_layer_kernel, heads=HEADS),
                      args, jax.ShapeDtypeStruct(x.shape, jnp.float32))


def dec_layer_call(x, mem, sbias, cbias, lp):
    args = [x, mem, sbias, cbias,
            r2(lp["ln_self"]["g"]), r2(lp["ln_self"]["b"]),
            lp["self_attn"]["qkv"]["w"], r2(lp["self_attn"]["qkv"]["b"]),
            lp["self_attn"]["o"]["w"], r2(lp["self_attn"]["o"]["b"]),
            r2(lp["ln_cross"]["g"]), r2(lp["ln_cross"]["b"]),
            lp["cross_attn"]["q"]["w"], r2(lp["cross_attn"]["q"]["b"]),
            lp["cross_attn"]["kv"]["w"], r2(lp["cross_attn"]["kv"]["b"]),
            lp["cross_attn"]["o"]["w"], r2(lp["cross_attn"]["o"]["b"]),
            r2(lp["ln_ffn"]["g"]), r2(lp["ln_ffn"]["b"]),
            lp["fc1"]["w"], r2(lp["fc1"]["b"]),
            lp["fc2"]["w"], r2(lp["fc2"]["b"])]
    return fused_call(functools.partial(_dec_layer_kernel, heads=HEADS),
                      args, jax.ShapeDtypeStruct(x.shape, jnp.float32))


def layer_norm_call(x2d, lnp):
    return fused_call(_ln_kernel, [x2d, r2(lnp["g"]), r2(lnp["b"])],
                      jax.ShapeDtypeStruct(x2d.shape, jnp.float32))


def expand_then_fusing(AMVO, padding_mask, vss, p):
    zzs = AMVO + p["zz_seg"]
    full_mask = jnp.concatenate(
        [padding_mask, jnp.zeros((B, T_MAX), bool)], axis=1)   # [B, S]
    zzz = jnp.concatenate([vss, zzs], axis=1)                  # [B, S, H]
    enc_bias = jnp.where(full_mask, -1e9, 0.0).astype(jnp.float32)
    enc_bias = enc_bias.reshape(B, 1, S_FUSE)
    for lp in p["denc_layers"]:
        zzz = enc_layer_call(zzz, enc_bias, lp)
    zzz = layer_norm_call(zzz.reshape(B * S_FUSE, H),
                          p["denc_ln"]).reshape(B, S_FUSE, H)
    return zzz, enc_bias


def forward(params, x_nodes, A_hat, batch_onehot, y, target, target_seq, eps):
    # 1. protein GatedCNN (fused) -> Protein_FC | cond heads (fused)
    protein_vec, con_emb = gated_cnn(target, params)
    # 2. drug graph VAE encoder (fused GCN+pool+FC, fused mean/var+reparam)
    vss, AMVO, mask, PMVO, kl_loss = drug_encoder(
        x_nodes, A_hat, batch_onehot, y, con_emb, params, eps)
    # 3. fusion transformer encoder
    zzz, enc_bias = expand_then_fusing(AMVO, mask, vss, params)
    # 4. transformer decoder over target SMILES
    Lt = target_seq.shape[1]
    causal_bias = jnp.triu(jnp.full((Lt, Lt), -1e9, jnp.float32), k=1)
    pe = positional_encoding_table(PE_MAX_LEN, H)
    x = params["word_embed"][target_seq] + pe[:Lt][None, :, :]   # [B, Lt, H]
    for lp in params["dec_layers"]:
        x = dec_layer_call(x, zzz, causal_bias, enc_bias, lp)
    # 5. fused decoder-final LN + word_pred
    scores_flat = fused_call(
        _wordpred_kernel,
        [x.reshape(B * Lt, H),
         r2(params["dec_ln"]["g"]), r2(params["dec_ln"]["b"]),
         params["wp1"]["w"], r2(params["wp1"]["b"]),
         params["prelu_a"].reshape(1, 1),
         r2(params["wp_ln"]["g"]), r2(params["wp_ln"]["b"]),
         params["wp2"]["w"], r2(params["wp2"]["b"])],
        jax.ShapeDtypeStruct((B * Lt, VOCAB), jnp.float32))
    prediction_scores = scores_flat.reshape(B, Lt, VOCAB)
    # 6. LM loss (shifted, ignore PAD)
    shifted = prediction_scores[:, :-1, :].reshape(-1, VOCAB)
    tgt_shift = target_seq[:, 1:].reshape(-1)
    onehot = jax.nn.one_hot(tgt_shift, VOCAB, dtype=jnp.float32)
    valid = (tgt_shift != PAD).astype(jnp.float32).reshape(-1, 1)
    lm_loss = fused_call(_ce_kernel, [shifted, onehot, valid],
                         jax.ShapeDtypeStruct((1, 1), jnp.float32))[0, 0]
    # 7. affinity prediction head (4 chained linears, fused)
    combined = jnp.concatenate([PMVO, protein_vec], axis=1)
    prediction = fused_call(
        _fc_head_kernel,
        [combined,
         params["fc1"]["w"], r2(params["fc1"]["b"]),
         params["fc2"]["w"], r2(params["fc2"]["b"]),
         params["fc3"]["w"], r2(params["fc3"]["b"]),
         params["fc4"]["w"], r2(params["fc4"]["b"])],
        jax.ShapeDtypeStruct((B, 1), jnp.float32))
    return prediction, prediction_scores, lm_loss, kl_loss


# ----------------------------------------------------------------------------
# Deterministic parameter init
# ----------------------------------------------------------------------------
def init_params(key):
    keys = iter(jax.random.split(key, 1024))

    def nk():
        return next(keys)

    def lin(din, dout, scale=0.05):
        return {"w": jax.random.normal(nk(), (din, dout), jnp.float32) * scale,
                "b": jax.random.normal(nk(), (dout,), jnp.float32) * scale}

    def ln(d):
        return {"g": jnp.ones((d,), jnp.float32), "b": jnp.zeros((d,), jnp.float32)}

    def self_attn_p(d):
        return {"qkv": lin(d, 3 * d), "o": lin(d, d)}

    def cross_attn_p(d):
        return {"q": lin(d, d), "kv": lin(d, 2 * d), "o": lin(d, d)}

    def enc_layer_p(d, ff):
        return {"attn": self_attn_p(d), "ln1": ln(d),
                "fc1": lin(d, ff), "fc2": lin(ff, d), "ln2": ln(d)}

    def dec_layer_p(d, ff):
        return {"self_attn": self_attn_p(d), "ln_self": ln(d),
                "cross_attn": cross_attn_p(d), "ln_cross": ln(d),
                "fc1": lin(d, ff), "fc2": lin(ff, d), "ln_ffn": ln(d)}

    def conv_p(cin, cout, k):
        return {"w": jax.random.normal(nk(), (cout, cin, k), jnp.float32) * 0.05,
                "b": jax.random.normal(nk(), (cout,), jnp.float32) * 0.05}

    p = {}
    # GatedCNN
    p["prot_embed"] = jax.random.normal(nk(), (PROT_VOCAB_TABLE, EMB), jnp.float32) * 0.05
    p["conv1"], p["gate1"] = conv_p(PROT_LEN, NF, K), conv_p(PROT_LEN, NF, K)
    p["conv2"], p["gate2"] = conv_p(NF, 2 * NF, K), conv_p(NF, 2 * NF, K)
    p["conv3"], p["gate3"] = conv_p(2 * NF, 3 * NF, K), conv_p(2 * NF, 3 * NF, K)
    p["prot_fc"] = lin(FLAT, OUT_DIM)
    # Drug encoder
    p["gcn1"] = lin(F_NODE, F_NODE * 2)
    p["gcn2"] = lin(F_NODE * 2, F_NODE * 3)
    p["gcn3"] = lin(F_NODE * 3, F_NODE * 4)
    p["cond"] = lin(FLAT, H)
    p["mean1"], p["mean2"] = lin(H, H), lin(H, H)
    p["var1"], p["var2"] = lin(H, H), lin(H, H)
    p["drug_fc1"], p["drug_fc2"] = lin(H, 64), lin(64, OUT_DIM)
    p["pp_seg"] = jax.random.normal(nk(), (H,), jnp.float32)
    p["zz_seg"] = jax.random.normal(nk(), (H,), jnp.float32)
    # fusion encoder + decoder
    p["denc_layers"] = [enc_layer_p(H, FF) for _ in range(LAYERS)]
    p["denc_ln"] = ln(H)
    p["dec_layers"] = [dec_layer_p(H, FF) for _ in range(LAYERS)]
    p["dec_ln"] = ln(H)
    # word_pred (final bias zeroed as in torch.nn.init.zeros_)
    p["wp1"] = lin(H, H)
    p["prelu_a"] = jnp.array(0.25, jnp.float32)
    p["wp_ln"] = ln(H)
    p["wp2"] = {"w": jax.random.normal(nk(), (H, VOCAB), jnp.float32) * 0.05,
                "b": jnp.zeros((VOCAB,), jnp.float32)}
    p["word_embed"] = jax.random.normal(nk(), (VOCAB, H), jnp.float32) * 0.05
    # FC affinity head (scaled-down 1024/512/256)
    p["fc1"], p["fc2"] = lin(2 * OUT_DIM, 64), lin(64, 48)
    p["fc3"], p["fc4"] = lin(48, 24), lin(24, 1)
    return p


def build_norm_adj(edge_src, edge_dst, n):
    # GCNConv normalization: A_hat = D^{-1/2} (A + I) D^{-1/2}
    A = jnp.zeros((n, n), jnp.float32)
    A = A.at[edge_src, edge_dst].set(1.0)
    A = A + jnp.eye(n, dtype=jnp.float32)
    deg = jnp.sum(A, axis=1)
    dinv = 1.0 / jnp.sqrt(deg)
    return A * dinv[:, None] * dinv[None, :]


# ----------------------------------------------------------------------------
if __name__ == "__main__":
    root = jax.random.PRNGKey(0)
    pkey, k1, k2, k3, k4 = jax.random.split(root, 5)
    params = init_params(pkey)

    # graph node features + chain-graph edges (bidirectional) per molecule
    x_nodes = jax.random.normal(k1, (N_TOTAL, F_NODE), jnp.float32)
    src, dst, off = [], [], 0
    for n in NODES:
        for i in range(n - 1):
            src += [off + i, off + i + 1]
            dst += [off + i + 1, off + i]
        off += n
    A_hat = build_norm_adj(jnp.array(src), jnp.array(dst), N_TOTAL)

    batch_vec = jnp.array(sum(([g] * n for g, n in enumerate(NODES)), []))
    batch_onehot = (batch_vec[None, :] == jnp.arange(B)[:, None]).astype(jnp.float32)

    y = jax.random.normal(k2, (B,), jnp.float32)                         # affinity
    target = jax.random.randint(k3, (B, PROT_LEN), 0, PROT_VOCAB_TABLE)  # protein tokens
    target_seq = jnp.array([[SOS, 5, 7, 3, 9, 11, EOS, PAD],
                            [SOS, 4, 6, 8, EOS, PAD, PAD, PAD]], dtype=jnp.int32)
    eps = jax.random.normal(k4, (B, T_MAX, H), jnp.float32)              # reparam noise

    fwd = jax.jit(forward)
    pred, scores, lm_loss, kl_loss = fwd(
        params, x_nodes, A_hat, batch_onehot, y, target, target_seq, eps)
    jax.block_until_ready((pred, scores, lm_loss, kl_loss))

    assert pred.shape == (B, 1)
    assert scores.shape == (B, T_TGT, VOCAB)
    assert jnp.isfinite(lm_loss) and jnp.isfinite(kl_loss)
    print("KERNEL_OK")
</pallas_src>

<mosaic_0001>
module attributes {stable_mosaic.version = 11 : i64} {
  func.func @_gated_cnn_kernel(%arg0: i32, %arg1: memref<2x16x16xf32, #tpu.memory_space<vmem>>, %arg2: memref<3x16x8xf32, #tpu.memory_space<vmem>>, %arg3: memref<1x8xf32, #tpu.memory_space<vmem>>, %arg4: memref<3x4x16xf32, #tpu.memory_space<vmem>>, %arg5: memref<1x16xf32, #tpu.memory_space<vmem>>, %arg6: memref<3x8x24xf32, #tpu.memory_space<vmem>>, %arg7: memref<1x24xf32, #tpu.memory_space<vmem>>, %arg8: memref<2x10x12xf32, #tpu.memory_space<vmem>>) attributes {dimension_semantics = [#tpu.dimension_semantics<parallel>], iteration_bounds = array<i64: 1>, scalar_prefetch = 0 : i64, scratch_operands = 0 : i64, tpu.core_type = #tpu.core_type<tc>, window_params = [{pipeline_mode = #tpu.pipeline_mode<synchronous>, transform_indices = @transform_0, window_bounds = array<i64: 2, 16, 16>}, {pipeline_mode = #tpu.pipeline_mode<synchronous>, transform_indices = @transform_1, window_bounds = array<i64: 3, 16, 8>}, {pipeline_mode = #tpu.pipeline_mode<synchronous>, transform_indices = @transform_2, window_bounds = array<i64: 1, 8>}, {pipeline_mode = #tpu.pipeline_mode<synchronous>, transform_indices = @transform_3, window_bounds = array<i64: 3, 4, 16>}, {pipeline_mode = #tpu.pipeline_mode<synchronous>, transform_indices = @transform_4, window_bounds = array<i64: 1, 16>}, {pipeline_mode = #tpu.pipeline_mode<synchronous>, transform_indices = @transform_5, window_bounds = array<i64: 3, 8, 24>}, {pipeline_mode = #tpu.pipeline_mode<synchronous>, transform_indices = @transform_6, window_bounds = array<i64: 1, 24>}, {pipeline_mode = #tpu.pipeline_mode<synchronous>, transform_indices = @transform_7, window_bounds = array<i64: 2, 10, 12>}]} {
    %c0 = arith.constant 0 : index
    %c0_0 = arith.constant 0 : index
    %c0_1 = arith.constant 0 : index
    %0 = vector.load %arg1[%c0, %c0_0, %c0_1] : memref<2x16x16xf32, #tpu.memory_space<vmem>>, vector<1x16x16xf32>
    %1 = vector.shape_cast %0 : vector<1x16x16xf32> to vector<16x16xf32>
    %c1 = arith.constant 1 : index
    %c0_2 = arith.constant 0 : index
    %c0_3 = arith.constant 0 : index
    %2 = vector.load %arg1[%c1, %c0_2, %c0_3] : memref<2x16x16xf32, #tpu.memory_space<vmem>>, vector<1x16x16xf32>
    %3 = vector.shape_cast %2 : vector<1x16x16xf32> to vector<16x16xf32>
    %c0_4 = arith.constant 0 : index
    %c0_5 = arith.constant 0 : index
    %c0_6 = arith.constant 0 : index
    %4 = vector.load %arg2[%c0_4, %c0_5, %c0_6] : memref<3x16x8xf32, #tpu.memory_space<vmem>>, vector<1x16x8xf32>
    %5 = vector.shape_cast %4 : vector<1x16x8xf32> to vector<16x8xf32>
    %c1_7 = arith.constant 1 : index
    %c0_8 = arith.constant 0 : index
    %c0_9 = arith.constant 0 : index
    %6 = vector.load %arg2[%c1_7, %c0_8, %c0_9] : memref<3x16x8xf32, #tpu.memory_space<vmem>>, vector<1x16x8xf32>
    %7 = vector.shape_cast %6 : vector<1x16x8xf32> to vector<16x8xf32>
    %c2 = arith.constant 2 : index
    %c0_10 = arith.constant 0 : index
    %c0_11 = arith.constant 0 : index
    %8 = vector.load %arg2[%c2, %c0_10, %c0_11] : memref<3x16x8xf32, #tpu.memory_space<vmem>>, vector<1x16x8xf32>
    %9 = vector.shape_cast %8 : vector<1x16x8xf32> to vector<16x8xf32>
    %c0_12 = arith.constant 0 : index
    %c0_13 = arith.constant 0 : index
    %10 = vector.load %arg3[%c0_12, %c0_13] : memref<1x8xf32, #tpu.memory_space<vmem>>, vector<1x8xf32>
    %11 = vector.extract_strided_slice %1 {offsets = [0, 0], sizes = [14, 16], strides = [1, 1]} : vector<16x16xf32> to vector<14x16xf32>
    %cst = arith.constant dense<0.000000e+00> : vector<14x8xf32>
    %12 = tpu.matmul %11, %5, %cst {dimension_numbers = #tpu.dot_dimension_numbers<[1], [0], [0], [1], [0, 0, 1, 1], [], []>} : vector<14x16xf32>, vector<16x8xf32>, vector<14x8xf32> -> vector<14x8xf32>
    %13 = vector.extract_strided_slice %1 {offsets = [1, 0], sizes = [14, 16], strides = [1, 1]} : vector<16x16xf32> to vector<14x16xf32>
    %cst_14 = arith.constant dense<0.000000e+00> : vector<14x8xf32>
    %14 = tpu.matmul %13, %7, %cst_14 {dimension_numbers = #tpu.dot_dimension_numbers<[1], [0], [0], [1], [0, 0, 1, 1], [], []>} : vector<14x16xf32>, vector<16x8xf32>, vector<14x8xf32> -> vector<14x8xf32>
    %15 = arith.addf %12, %14 : vector<14x8xf32>
    %16 = vector.extract_strided_slice %1 {offsets = [2, 0], sizes = [14, 16], strides = [1, 1]} : vector<16x16xf32> to vector<14x16xf32>
    %cst_15 = arith.constant dense<0.000000e+00> : vector<14x8xf32>
    %17 = tpu.matmul %16, %9, %cst_15 {dimension_numbers = #tpu.dot_dimension_numbers<[1], [0], [0], [1], [0, 0, 1, 1], [], []>} : vector<14x16xf32>, vector<16x8xf32>, vector<14x8xf32> -> vector<14x8xf32>
    %18 = arith.addf %15, %17 : vector<14x8xf32>
    %19 = vector.broadcast %10 : vector<1x8xf32> to vector<14x8xf32>
    %20 = arith.addf %18, %19 : vector<14x8xf32>
    %21 = vector.extract_strided_slice %20 {offsets = [0, 0], sizes = [14, 4], strides = [1, 1]} : vector<14x8xf32> to vector<14x4xf32>
    %22 = vector.extract_strided_slice %20 {offsets = [0, 4], sizes = [14, 4], strides = [1, 1]} : vector<14x8xf32> to vector<14x4xf32>
    %23 = arith.negf %22 : vector<14x4xf32>
    %24 = math.exp %23 : vector<14x4xf32>
    %cst_16 = arith.constant 1.000000e+00 : f32
    %25 = vector.broadcast %cst_16 : f32 to vector<14x4xf32>
    %26 = arith.addf %25, %24 : vector<14x4xf32>
    %27 = arith.divf %25, %26 : vector<14x4xf32>
    %28 = arith.mulf %21, %27 : vector<14x4xf32>
    %cst_17 = arith.constant 0.000000e+00 : f32
    %29 = vector.broadcast %cst_17 : f32 to vector<14x4xf32>
    %30 = arith.maximumf %28, %29 : vector<14x4xf32>
    %31 = vector.extract_strided_slice %3 {offsets = [0, 0], sizes = [14, 16], strides = [1, 1]} : vector<16x16xf32> to vector<14x16xf32>
    %cst_18 = arith.constant dense<0.000000e+00> : vector<14x8xf32>
    %32 = tpu.matmul %31, %5, %cst_18 {dimension_numbers = #tpu.dot_dimension_numbers<[1], [0], [0], [1], [0, 0, 1, 1], [], []>} : vector<14x16xf32>, vector<16x8xf32>, vector<14x8xf32> -> vector<14x8xf32>
    %33 = vector.extract_strided_slice %3 {offsets = [1, 0], sizes = [14, 16], strides = [1, 1]} : vector<16x16xf32> to vector<14x16xf32>
    %cst_19 = arith.constant dense<0.000000e+00> : vector<14x8xf32>
    %34 = tpu.matmul %33, %7, %cst_19 {dimension_numbers = #tpu.dot_dimension_numbers<[1], [0], [0], [1], [0, 0, 1, 1], [], []>} : vector<14x16xf32>, vector<16x8xf32>, vector<14x8xf32> -> vector<14x8xf32>
    %35 = arith.addf %32, %34 : vector<14x8xf32>
    %36 = vector.extract_strided_slice %3 {offsets = [2, 0], sizes = [14, 16], strides = [1, 1]} : vector<16x16xf32> to vector<14x16xf32>
    %cst_20 = arith.constant dense<0.000000e+00> : vector<14x8xf32>
    %37 = tpu.matmul %36, %9, %cst_20 {dimension_numbers = #tpu.dot_dimension_numbers<[1], [0], [0], [1], [0, 0, 1, 1], [], []>} : vector<14x16xf32>, vector<16x8xf32>, vector<14x8xf32> -> vector<14x8xf32>
    %38 = arith.addf %35, %37 : vector<14x8xf32>
    %39 = vector.broadcast %10 : vector<1x8xf32> to vector<14x8xf32>
    %40 = arith.addf %38, %39 : vector<14x8xf32>
    %41 = vector.extract_strided_slice %40 {offsets = [0, 0], sizes = [14, 4], strides = [1, 1]} : vector<14x8xf32> to vector<14x4xf32>
    %42 = vector.extract_strided_slice %40 {offsets = [0, 4], sizes = [14, 4], strides = [1, 1]} : vector<14x8xf32> to vector<14x4xf32>
    %43 = arith.negf %42 : vector<14x4xf32>
    %44 = math.exp %43 : vector<14x4xf32>
    %cst_21 = arith.constant 1.000000e+00 : f32
    %45 = vector.broadcast %cst_21 : f32 to vector<14x4xf32>
    %46 = arith.addf %45, %44 : vector<14x4xf32>
    %47 = arith.divf %45, %46 : vector<14x4xf32>
    %48 = arith.mulf %41, %47 : vector<14x4xf32>
    %cst_22 = arith.constant 0.000000e+00 : f32
    %49 = vector.broadcast %cst_22 : f32 to vector<14x4xf32>
    %50 = arith.maximumf %48, %49 : vector<14x4xf32>
    %c0_23 = arith.constant 0 : index
    %c0_24 = arith.constant 0 : index
    %c0_25 = arith.constant 0 : index
    %51 = vector.load %arg4[%c0_23, %c0_24, %c0_25] : memref<3x4x16xf32, #tpu.memory_space<vmem>>, vector<1x4x16xf32>
    %52 = vector.shape_cast %51 : vector<1x4x16xf32> to vector<4x16xf32>
    %c1_26 = arith.constant 1 : index
    %c0_27 = arith.constant 0 : index
    %c0_28 = arith.constant 0 : index
    %53 = vector.load %arg4[%c1_26, %c0_27, %c0_28] : memref<3x4x16xf32, #tpu.memory_space<vmem>>, vector<1x4x16xf32>
    %54 = vector.shape_cast %53 : vector<1x4x16xf32> to vector<4x16xf32>
    %c2_29 = arith.constant 2 : index
    %c0_30 = arith.constant 0 : index
    %c0_31 = arith.constant 0 : index
    %55 = vector.load %arg4[%c2_29, %c0_30, %c0_31] : memref<3x4x16xf32, #tpu.memory_space<vmem>>, vector<1x4x16xf32>
    %56 = vector.shape_cast %55 : vector<1x4x16xf32> to vector<4x16xf32>
    %c0_32 = arith.constant 0 : index
    %c0_33 = arith.constant 0 : index
    %57 = vector.load %arg5[%c0_32, %c0_33] : memref<1x16xf32, #tpu.memory_space<vmem>>, vector<1x16xf32>
    %58 = vector.extract_strided_slice %30 {offsets = [0, 0], sizes = [12, 4], strides = [1, 1]} : vector<14x4xf32> to vector<12x4xf32>
    %cst_34 = arith.constant dense<0.000000e+00> : vector<12x16xf32>
    %59 = tpu.matmul %58, %52, %cst_34 {dimension_numbers = #tpu.dot_dimension_numbers<[1], [0], [0], [1], [0, 0, 1, 1], [], []>} : vector<12x4xf32>, vector<4x16xf32>, vector<12x16xf32> -> vector<12x16xf32>
    %60 = vector.extract_strided_slice %30 {offsets = [1, 0], sizes = [12, 4], strides = [1, 1]} : vector<14x4xf32> to vector<12x4xf32>
    %cst_35 = arith.constant dense<0.000000e+00> : vector<12x16xf32>
    %61 = tpu.matmul %60, %54, %cst_35 {dimension_numbers = #tpu.dot_dimension_numbers<[1], [0], [0], [1], [0, 0, 1, 1], [], []>} : vector<12x4xf32>, vector<4x16xf32>, vector<12x16xf32> -> vector<12x16xf32>
    %62 = arith.addf %59, %61 : vector<12x16xf32>
    %63 = vector.extract_strided_slice %30 {offsets = [2, 0], sizes = [12, 4], strides = [1, 1]} : vector<14x4xf32> to vector<12x4xf32>
    %cst_36 = arith.constant dense<0.000000e+00> : vector<12x16xf32>
    %64 = tpu.matmul %63, %56, %cst_36 {dimension_numbers = #tpu.dot_dimension_numbers<[1], [0], [0], [1], [0, 0, 1, 1], [], []>} : vector<12x4xf32>, vector<4x16xf32>, vector<12x16xf32> -> vector<12x16xf32>
    %65 = arith.addf %62, %64 : vector<12x16xf32>
    %66 = vector.broadcast %57 : vector<1x16xf32> to vector<12x16xf32>
    %67 = arith.addf %65, %66 : vector<12x16xf32>
    %68 = vector.extract_strided_slice %67 {offsets = [0, 0], sizes = [12, 8], strides = [1, 1]} : vector<12x16xf32> to vector<12x8xf32>
    %69 = vector.extract_strided_slice %67 {offsets = [0, 8], sizes = [12, 8], strides = [1, 1]} : vector<12x16xf32> to vector<12x8xf32>
    %70 = arith.negf %69 : vector<12x8xf32>
    %71 = math.exp %70 : vector<12x8xf32>
    %cst_37 = arith.constant 1.000000e+00 : f32
    %72 = vector.broadcast %cst_37 : f32 to vector<12x8xf32>
    %73 = arith.addf %72, %71 : vector<12x8xf32>
    %74 = arith.divf %72, %73 : vector<12x8xf32>
    %75 = arith.mulf %68, %74 : vector<12x8xf32>
    %cst_38 = arith.constant 0.000000e+00 : f32
    %76 = vector.broadcast %cst_38 : f32 to vector<12x8xf32>
    %77 = arith.maximumf %75, %76 : vector<12x8xf32>
    %78 = vector.extract_strided_slice %50 {offsets = [0, 0], sizes = [12, 4], strides = [1, 1]} : vector<14x4xf32> to vector<12x4xf32>
    %cst_39 = arith.constant dense<0.000000e+00> : vector<12x16xf32>
    %79 = tpu.matmul %78, %52, %cst_39 {dimension_numbers = #tpu.dot_dimension_numbers<[1], [0], [0], [1], [0, 0, 1, 1], [], []>} : vector<12x4xf32>, vector<4x16xf32>, vector<12x16xf32> -> vector<12x16xf32>
    %80 = vector.extract_strided_slice %50 {offsets = [1, 0], sizes = [12, 4], strides = [1, 1]} : vector<14x4xf32> to vector<12x4xf32>
    %cst_40 = arith.constant dense<0.000000e+00> : vector<12x16xf32>
    %81 = tpu.matmul %80, %54, %cst_40 {dimension_numbers = #tpu.dot_dimension_numbers<[1], [0], [0], [1], [0, 0, 1, 1], [], []>} : vector<12x4xf32>, vector<4x16xf32>, vector<12x16xf32> -> vector<12x16xf32>
    %82 = arith.addf %79, %81 : vector<12x16xf32>
    %83 = vector.extract_strided_slice %50 {offsets = [2, 0], sizes = [12, 4], strides = [1, 1]} : vector<14x4xf32> to vector<12x4xf32>
    %cst_41 = arith.constant dense<0.000000e+00> : vector<12x16xf32>
    %84 = tpu.matmul %83, %56, %cst_41 {dimension_numbers = #tpu.dot_dimension_numbers<[1], [0], [0], [1], [0, 0, 1, 1], [], []>} : vector<12x4xf32>, vector<4x16xf32>, vector<12x16xf32> -> vector<12x16xf32>
    %85 = arith.addf %82, %84 : vector<12x16xf32>
    %86 = vector.broadcast %57 : vector<1x16xf32> to vector<12x16xf32>
    %87 = arith.addf %85, %86 : vector<12x16xf32>
    %88 = vector.extract_strided_slice %87 {offsets = [0, 0], sizes = [12, 8], strides = [1, 1]} : vector<12x16xf32> to vector<12x8xf32>
    %89 = vector.extract_strided_slice %87 {offsets = [0, 8], sizes = [12, 8], strides = [1, 1]} : vector<12x16xf32> to vector<12x8xf32>
    %90 = arith.negf %89 : vector<12x8xf32>
    %91 = math.exp %90 : vector<12x8xf32>
    %cst_42 = arith.constant 1.000000e+00 : f32
    %92 = vector.broadcast %cst_42 : f32 to vector<12x8xf32>
    %93 = arith.addf %92, %91 : vector<12x8xf32>
    %94 = arith.divf %92, %93 : vector<12x8xf32>
    %95 = arith.mulf %88, %94 : vector<12x8xf32>
    %cst_43 = arith.constant 0.000000e+00 : f32
    %96 = vector.broadcast %cst_43 : f32 to vector<12x8xf32>
    %97 = arith.maximumf %95, %96 : vector<12x8xf32>
    %c0_44 = arith.constant 0 : index
    %c0_45 = arith.constant 0 : index
    %c0_46 = arith.constant 0 : index
    %98 = vector.load %arg6[%c0_44, %c0_45, %c0_46] : memref<3x8x24xf32, #tpu.memory_space<vmem>>, vector<1x8x24xf32>
    %99 = vector.shape_cast %98 : vector<1x8x24xf32> to vector<8x24xf32>
    %c1_47 = arith.constant 1 : index
    %c0_48 = arith.constant 0 : index
    %c0_49 = arith.constant 0 : index
    %100 = vector.load %arg6[%c1_47, %c0_48, %c0_49] : memref<3x8x24xf32, #tpu.memory_space<vmem>>, vector<1x8x24xf32>
    %101 = vector.shape_cast %100 : vector<1x8x24xf32> to vector<8x24xf32>
    %c2_50 = arith.constant 2 : index
    %c0_51 = arith.constant 0 : index
    %c0_52 = arith.constant 0 : index
    %102 = vector.load %arg6[%c2_50, %c0_51, %c0_52] : memref<3x8x24xf32, #tpu.memory_space<vmem>>, vector<1x8x24xf32>
    %103 = vector.shape_cast %102 : vector<1x8x24xf32> to vector<8x24xf32>
    %c0_53 = arith.constant 0 : index
    %c0_54 = arith.constant 0 : index
    %104 = vector.load %arg7[%c0_53, %c0_54] : memref<1x24xf32, #tpu.memory_space<vmem>>, vector<1x24xf32>
    %105 = vector.extract_strided_slice %77 {offsets = [0, 0], sizes = [10, 8], strides = [1, 1]} : vector<12x8xf32> to vector<10x8xf32>
    %cst_55 = arith.constant dense<0.000000e+00> : vector<10x24xf32>
    %106 = tpu.matmul %105, %99, %cst_55 {dimension_numbers = #tpu.dot_dimension_numbers<[1], [0], [0], [1], [0, 0, 1, 1], [], []>} : vector<10x8xf32>, vector<8x24xf32>, vector<10x24xf32> -> vector<10x24xf32>
    %107 = vector.extract_strided_slice %77 {offsets = [1, 0], sizes = [10, 8], strides = [1, 1]} : vector<12x8xf32> to vector<10x8xf32>
    %cst_56 = arith.constant dense<0.000000e+00> : vector<10x24xf32>
    %108 = tpu.matmul %107, %101, %cst_56 {dimension_numbers = #tpu.dot_dimension_numbers<[1], [0], [0], [1], [0, 0, 1, 1], [], []>} : vector<10x8xf32>, vector<8x24xf32>, vector<10x24xf32> -> vector<10x24xf32>
    %109 = arith.addf %106, %108 : vector<10x24xf32>
    %110 = vector.extract_strided_slice %77 {offsets = [2, 0], sizes = [10, 8], strides = [1, 1]} : vector<12x8xf32> to vector<10x8xf32>
    %cst_57 = arith.constant dense<0.000000e+00> : vector<10x24xf32>
    %111 = tpu.matmul %110, %103, %cst_57 {dimension_numbers = #tpu.dot_dimension_numbers<[1], [0], [0], [1], [0, 0, 1, 1], [], []>} : vector<10x8xf32>, vector<8x24xf32>, vector<10x24xf32> -> vector<10x24xf32>
    %112 = arith.addf %109, %111 : vector<10x24xf32>
    %113 = vector.broadcast %104 : vector<1x24xf32> to vector<10x24xf32>
    %114 = arith.addf %112, %113 : vector<10x24xf32>
    %115 = vector.extract_strided_slice %114 {offsets = [0, 0], sizes = [10, 12], strides = [1, 1]} : vector<10x24xf32> to vector<10x12xf32>
    %116 = vector.extract_strided_slice %114 {offsets = [0, 12], sizes = [10, 12], strides = [1, 1]} : vector<10x24xf32> to vector<10x12xf32>
    %117 = arith.negf %116 : vector<10x12xf32>
    %118 = math.exp %117 : vector<10x12xf32>
    %cst_58 = arith.constant 1.000000e+00 : f32
    %119 = vector.broadcast %cst_58 : f32 to vector<10x12xf32>
    %120 = arith.addf %119, %118 : vector<10x12xf32>
    %121 = arith.divf %119, %120 : vector<10x12xf32>
    %122 = arith.mulf %115, %121 : vector<10x12xf32>
    %cst_59 = arith.constant 0.000000e+00 : f32
    %123 = vector.broadcast %cst_59 : f32 to vector<10x12xf32>
    %124 = arith.maximumf %122, %123 : vector<10x12xf32>
    %125 = vector.extract_strided_slice %97 {offsets = [0, 0], sizes = [10, 8], strides = [1, 1]} : vector<12x8xf32> to vector<10x8xf32>
    %cst_60 = arith.constant dense<0.000000e+00> : vector<10x24xf32>
    %126 = tpu.matmul %125, %99, %cst_60 {dimension_numbers = #tpu.dot_dimension_numbers<[1], [0], [0], [1], [0, 0, 1, 1], [], []>} : vector<10x8xf32>, vector<8x24xf32>, vector<10x24xf32> -> vector<10x24xf32>
    %127 = vector.extract_strided_slice %97 {offsets = [1, 0], sizes = [10, 8], strides = [1, 1]} : vector<12x8xf32> to vector<10x8xf32>
    %cst_61 = arith.constant dense<0.000000e+00> : vector<10x24xf32>
    %128 = tpu.matmul %127, %101, %cst_61 {dimension_numbers = #tpu.dot_dimension_numbers<[1], [0], [0], [1], [0, 0, 1, 1], [], []>} : vector<10x8xf32>, vector<8x24xf32>, vector<10x24xf32> -> vector<10x24xf32>
    %129 = arith.addf %126, %128 : vector<10x24xf32>
    %130 = vector.extract_strided_slice %97 {offsets = [2, 0], sizes = [10, 8], strides = [1, 1]} : vector<12x8xf32> to vector<10x8xf32>
    %cst_62 = arith.constant dense<0.000000e+00> : vector<10x24xf32>
    %131 = tpu.matmul %130, %103, %cst_62 {dimension_numbers = #tpu.dot_dimension_numbers<[1], [0], [0], [1], [0, 0, 1, 1], [], []>} : vector<10x8xf32>, vector<8x24xf32>, vector<10x24xf32> -> vector<10x24xf32>
    %132 = arith.addf %129, %131 : vector<10x24xf32>
    %133 = vector.broadcast %104 : vector<1x24xf32> to vector<10x24xf32>
    %134 = arith.addf %132, %133 : vector<10x24xf32>
    %135 = vector.extract_strided_slice %134 {offsets = [0, 0], sizes = [10, 12], strides = [1, 1]} : vector<10x24xf32> to vector<10x12xf32>
    %136 = vector.extract_strided_slice %134 {offsets = [0, 12], sizes = [10, 12], strides = [1, 1]} : vector<10x24xf32> to vector<10x12xf32>
    %137 = arith.negf %136 : vector<10x12xf32>
    %138 = math.exp %137 : vector<10x12xf32>
    %cst_63 = arith.constant 1.000000e+00 : f32
    %139 = vector.broadcast %cst_63 : f32 to vector<10x12xf32>
    %140 = arith.addf %139, %138 : vector<10x12xf32>
    %141 = arith.divf %139, %140 : vector<10x12xf32>
    %142 = arith.mulf %135, %141 : vector<10x12xf32>
    %cst_64 = arith.constant 0.000000e+00 : f32
    %143 = vector.broadcast %cst_64 : f32 to vector<10x12xf32>
    %144 = arith.maximumf %142, %143 : vector<10x12xf32>
    %c0_65 = arith.constant 0 : index
    %c0_66 = arith.constant 0 : index
    %c0_67 = arith.constant 0 : index
    %145 = vector.load %arg8[%c0_65, %c0_66, %c0_67] : memref<2x10x12xf32, #tpu.memory_space<vmem>>, vector<1x10x12xf32>
    %146 = vector.shape_cast %145 : vector<1x10x12xf32> to vector<10x12xf32>
    %147 = vector.shape_cast %124 : vector<10x12xf32> to vector<1x10x12xf32>
    tpu.vector_store %arg8[%c0_65, %c0_66, %c0_67], %147 {strides = array<i32>} : memref<2x10x12xf32, #tpu.memory_space<vmem>>, vector<1x10x12xf32>,
    %c1_68 = arith.constant 1 : index
    %c0_69 = arith.constant 0 : index
    %c0_70 = arith.constant 0 : index
    %148 = vector.load %arg8[%c1_68, %c0_69, %c0_70] : memref<2x10x12xf32, #tpu.memory_space<vmem>>, vector<1x10x12xf32>
    %149 = vector.shape_cast %148 : vector<1x10x12xf32> to vector<10x12xf32>
    %150 = vector.shape_cast %144 : vector<10x12xf32> to vector<1x10x12xf32>
    tpu.vector_store %arg8[%c1_68, %c0_69, %c0_70], %150 {strides = array<i32>} : memref<2x10x12xf32, #tpu.memory_space<vmem>>, vector<1x10x12xf32>,
    return
  }
  func.func @transform_0(%arg0: i32) -> (i32, i32, i32) {
    %c0_i32 = arith.constant 0 : i32
    %c0_i32_0 = arith.constant 0 : i32
    %c0_i32_1 = arith.constant 0 : i32
    %c0_i32_2 = arith.constant 0 : i32
    return %c0_i32, %c0_i32_0, %c0_i32_1 : i32, i32, i32
  }
  func.func @transform_1(%arg0: i32) -> (i32, i32, i32) {
    %c0_i32 = arith.constant 0 : i32
    %c0_i32_0 = arith.constant 0 : i32
    %c0_i32_1 = arith.constant 0 : i32
    %c0_i32_2 = arith.constant 0 : i32
    return %c0_i32, %c0_i32_0, %c0_i32_1 : i32, i32, i32
  }
  func.func @transform_2(%arg0: i32) -> (i32, i32) {
    %c0_i32 = arith.constant 0 : i32
    %c0_i32_0 = arith.constant 0 : i32
    %c0_i32_1 = arith.constant 0 : i32
    return %c0_i32, %c0_i32_0 : i32, i32
  }
  func.func @transform_3(%arg0: i32) -> (i32, i32, i32) {
    %c0_i32 = arith.constant 0 : i32
    %c0_i32_0 = arith.constant 0 : i32
    %c0_i32_1 = arith.constant 0 : i32
    %c0_i32_2 = arith.constant 0 : i32
    return %c0_i32, %c0_i32_0, %c0_i32_1 : i32, i32, i32
  }
  func.func @transform_4(%arg0: i32) -> (i32, i32) {
    %c0_i32 = arith.constant 0 : i32
    %c0_i32_0 = arith.constant 0 : i32
    %c0_i32_1 = arith.constant 0 : i32
    return %c0_i32, %c0_i32_0 : i32, i32
  }
  func.func @transform_5(%arg0: i32) -> (i32, i32, i32) {
    %c0_i32 = arith.constant 0 : i32
    %c0_i32_0 = arith.constant 0 : i32
    %c0_i32_1 = arith.constant 0 : i32
    %c0_i32_2 = arith.constant 0 : i32
    return %c0_i32, %c0_i32_0, %c0_i32_1 : i32, i32, i32
  }
  func.func @transform_6(%arg0: i32) -> (i32, i32) {
    %c0_i32 = arith.constant 0 : i32
    %c0_i32_0 = arith.constant 0 : i32
    %c0_i32_1 = arith.constant 0 : i32
    return %c0_i32, %c0_i32_0 : i32, i32
  }
  func.func @transform_7(%arg0: i32) -> (i32, i32, i32) {
    %c0_i32 = arith.constant 0 : i32
    %c0_i32_0 = arith.constant 0 : i32
    %c0_i32_1 = arith.constant 0 : i32
    %c0_i32_2 = arith.constant 0 : i32
    return %c0_i32, %c0_i32_0, %c0_i32_1 : i32, i32, i32
  }
}

module attributes {stable_mosaic.version = 11 : i64} {
  func.func @_linear_kernel(%arg0: i32, %arg1: memref<2x120xf32, #tpu.memory_space<vmem>>, %arg2: memref<120x48xf32, #tpu.memory_space<vmem>>, %arg3: memref<1x48xf32, #tpu.memory_space<vmem>>, %arg4: memref<2x48xf32, #tpu.memory_space<vmem>>) attributes {dimension_semantics = [#tpu.dimension_semantics<parallel>], iteration_bounds = array<i64: 1>, scalar_prefetch = 0 : i64, scratch_operands = 0 : i64, tpu.core_type = #tpu.core_type<tc>, window_params = [{pipeline_mode = #tpu.pipeline_mode<synchronous>, transform_indices = @transform_0, window_bounds = array<i64: 2, 120>}, {pipeline_mode = #tpu.pipeline_mode<synchronous>, transform_indices = @transform_1, window_bounds = array<i64: 120, 48>}, {pipeline_mode = #tpu.pipeline_mode<synchronous>, transform_indices = @transform_2, window_bounds = array<i64: 1, 48>}, {pipeline_mode = #tpu.pipeline_mode<synchronous>, transform_indices = @transform_3, window_bounds = array<i64: 2, 48>}]} {
    %c0 = arith.constant 0 : index
    %c0_0 = arith.constant 0 : index
    %0 = vector.load %arg1[%c0, %c0_0] : memref<2x120xf32, #tpu.memory_space<vmem>>, vector<2x120xf32>
    %c0_1 = arith.constant 0 : index
    %c0_2 = arith.constant 0 : index
    %1 = vector.load %arg2[%c0_1, %c0_2] : memref<120x48xf32, #tpu.memory_space<vmem>>, vector<120x48xf32>
    %cst = arith.constant dense<0.000000e+00> : vector<2x48xf32>
    %2 = tpu.matmul %0, %1, %cst {dimension_numbers = #tpu.dot_dimension_numbers<[1], [0], [0], [1], [0, 0, 1, 1], [], []>} : vector<2x120xf32>, vector<120x48xf32>, vector<2x48xf32> -> vector<2x48xf32>
    %c0_3 = arith.constant 0 : index
    %c0_4 = arith.constant 0 : index
    %3 = vector.load %arg3[%c0_3, %c0_4] : memref<1x48xf32, #tpu.memory_space<vmem>>, vector<1x48xf32>
    %4 = vector.broadcast %3 : vector<1x48xf32> to vector<2x48xf32>
    %5 = arith.addf %2, %4 : vector<2x48xf32>
    %c0_5 = arith.constant 0 : index
    %c0_6 = arith.constant 0 : index
    %6 = vector.load %arg4[%c0_5, %c0_6] : memref<2x48xf32, #tpu.memory_space<vmem>>, vector<2x48xf32>
    tpu.vector_store %arg4[%c0_5, %c0_6], %5 {strides = array<i32>} : memref<2x48xf32, #tpu.memory_space<vmem>>, vector<2x48xf32>,
    return
  }
  func.func @transform_0(%arg0: i32) -> (i32, i32) {
    %c0_i32 = arith.constant 0 : i32
    %c0_i32_0 = arith.constant 0 : i32
    %c0_i32_1 = arith.constant 0 : i32
    return %c0_i32, %c0_i32_0 : i32, i32
  }
  func.func @transform_1(%arg0: i32) -> (i32, i32) {
    %c0_i32 = arith.constant 0 : i32
    %c0_i32_0 = arith.constant 0 : i32
    %c0_i32_1 = arith.constant 0 : i32
    return %c0_i32, %c0_i32_0 : i32, i32
  }
  func.func @transform_2(%arg0: i32) -> (i32, i32) {
    %c0_i32 = arith.constant 0 : i32
    %c0_i32_0 = arith.constant 0 : i32
    %c0_i32_1 = arith.constant 0 : i32
    return %c0_i32, %c0_i32_0 : i32, i32
  }
  func.func @transform_3(%arg0: i32) -> (i32, i32) {
    %c0_i32 = arith.constant 0 : i32
    %c0_i32_0 = arith.constant 0 : i32
    %c0_i32_1 = arith.constant 0 : i32
    return %c0_i32, %c0_i32_0 : i32, i32
  }
}

module attributes {stable_mosaic.version = 11 : i64} {
  func.func @_drug_gcn_kernel(%arg0: i32, %arg1: memref<9x8xf32, #tpu.memory_space<vmem>>, %arg2: memref<9x9xf32, #tpu.memory_space<vmem>>, %arg3: memref<2x9x1xf32, #tpu.memory_space<vmem>>, %arg4: memref<8x16xf32, #tpu.memory_space<vmem>>, %arg5: memref<1x16xf32, #tpu.memory_space<vmem>>, %arg6: memref<16x24xf32, #tpu.memory_space<vmem>>, %arg7: memref<1x24xf32, #tpu.memory_space<vmem>>, %arg8: memref<24x32xf32, #tpu.memory_space<vmem>>, %arg9: memref<1x32xf32, #tpu.memory_space<vmem>>, %arg10: memref<32x64xf32, #tpu.memory_space<vmem>>, %arg11: memref<1x64xf32, #tpu.memory_space<vmem>>, %arg12: memref<64x16xf32, #tpu.memory_space<vmem>>, %arg13: memref<1x16xf32, #tpu.memory_space<vmem>>, %arg14: memref<9x32xf32, #tpu.memory_space<vmem>>, %arg15: memref<2x16xf32, #tpu.memory_space<vmem>>) attributes {dimension_semantics = [#tpu.dimension_semantics<parallel>], iteration_bounds = array<i64: 1>, scalar_prefetch = 0 : i64, scratch_operands = 0 : i64, tpu.core_type = #tpu.core_type<tc>, window_params = [{pipeline_mode = #tpu.pipeline_mode<synchronous>, transform_indices = @transform_0, window_bounds = array<i64: 9, 8>}, {pipeline_mode = #tpu.pipeline_mode<synchronous>, transform_indices = @transform_1, window_bounds = array<i64: 9, 9>}, {pipeline_mode = #tpu.pipeline_mode<synchronous>, transform_indices = @transform_2, window_bounds = array<i64: 2, 9, 1>}, {pipeline_mode = #tpu.pipeline_mode<synchronous>, transform_indices = @transform_3, window_bounds = array<i64: 8, 16>}, {pipeline_mode = #tpu.pipeline_mode<synchronous>, transform_indices = @transform_4, window_bounds = array<i64: 1, 16>}, {pipeline_mode = #tpu.pipeline_mode<synchronous>, transform_indices = @transform_5, window_bounds = array<i64: 16, 24>}, {pipeline_mode = #tpu.pipeline_mode<synchronous>, transform_indices = @transform_6, window_bounds = array<i64: 1, 24>}, {pipeline_mode = #tpu.pipeline_mode<synchronous>, transform_indices = @transform_7, window_bounds = array<i64: 24, 32>}, {pipeline_mode = #tpu.pipeline_mode<synchronous>, transform_indices = @transform_8, window_bounds = array<i64: 1, 32>}, {pipeline_mode = #tpu.pipeline_mode<synchronous>, transform_indices = @transform_9, window_bounds = array<i64: 32, 64>}, {pipeline_mode = #tpu.pipeline_mode<synchronous>, transform_indices = @transform_10, window_bounds = array<i64: 1, 64>}, {pipeline_mode = #tpu.pipeline_mode<synchronous>, transform_indices = @transform_11, window_bounds = array<i64: 64, 16>}, {pipeline_mode = #tpu.pipeline_mode<synchronous>, transform_indices = @transform_12, window_bounds = array<i64: 1, 16>}, {pipeline_mode = #tpu.pipeline_mode<synchronous>, transform_indices = @transform_13, window_bounds = array<i64: 9, 32>}, {pipeline_mode = #tpu.pipeline_mode<synchronous>, transform_indices = @transform_14, window_bounds = array<i64: 2, 16>}]} {
    %c0 = arith.constant 0 : index
    %c0_0 = arith.constant 0 : index
    %0 = vector.load %arg2[%c0, %c0_0] : memref<9x9xf32, #tpu.memory_space<vmem>>, vector<9x9xf32>
    %c0_1 = arith.constant 0 : index
    %c0_2 = arith.constant 0 : index
    %1 = vector.load %arg1[%c0_1, %c0_2] : memref<9x8xf32, #tpu.memory_space<vmem>>, vector<9x8xf32>
    %c0_3 = arith.constant 0 : index
    %c0_4 = arith.constant 0 : index
    %2 = vector.load %arg4[%c0_3, %c0_4] : memref<8x16xf32, #tpu.memory_space<vmem>>, vector<8x16xf32>
    %cst = arith.constant dense<0.000000e+00> : vector<9x16xf32>
    %3 = tpu.matmul %1, %2, %cst {dimension_numbers = #tpu.dot_dimension_numbers<[1], [0], [0], [1], [0, 0, 1, 1], [], []>} : vector<9x8xf32>, vector<8x16xf32>, vector<9x16xf32> -> vector<9x16xf32>
    %cst_5 = arith.constant dense<0.000000e+00> : vector<9x16xf32>
    %4 = tpu.matmul %0, %3, %cst_5 {dimension_numbers = #tpu.dot_dimension_numbers<[1], [0], [0], [1], [0, 0, 1, 1], [], []>} : vector<9x9xf32>, vector<9x16xf32>, vector<9x16xf32> -> vector<9x16xf32>
    %c0_6 = arith.constant 0 : index
    %c0_7 = arith.constant 0 : index
    %5 = vector.load %arg5[%c0_6, %c0_7] : memref<1x16xf32, #tpu.memory_space<vmem>>, vector<1x16xf32>
    %6 = vector.broadcast %5 : vector<1x16xf32> to vector<9x16xf32>
    %7 = arith.addf %4, %6 : vector<9x16xf32>
    %cst_8 = arith.constant 0.000000e+00 : f32
    %8 = vector.broadcast %cst_8 : f32 to vector<9x16xf32>
    %9 = arith.maximumf %7, %8 : vector<9x16xf32>
    %c0_9 = arith.constant 0 : index
    %c0_10 = arith.constant 0 : index
    %10 = vector.load %arg6[%c0_9, %c0_10] : memref<16x24xf32, #tpu.memory_space<vmem>>, vector<16x24xf32>
    %cst_11 = arith.constant dense<0.000000e+00> : vector<9x24xf32>
    %11 = tpu.matmul %9, %10, %cst_11 {dimension_numbers = #tpu.dot_dimension_numbers<[1], [0], [0], [1], [0, 0, 1, 1], [], []>} : vector<9x16xf32>, vector<16x24xf32>, vector<9x24xf32> -> vector<9x24xf32>
    %cst_12 = arith.constant dense<0.000000e+00> : vector<9x24xf32>
    %12 = tpu.matmul %0, %11, %cst_12 {dimension_numbers = #tpu.dot_dimension_numbers<[1], [0], [0], [1], [0, 0, 1, 1], [], []>} : vector<9x9xf32>, vector<9x24xf32>, vector<9x24xf32> -> vector<9x24xf32>
    %c0_13 = arith.constant 0 : index
    %c0_14 = arith.constant 0 : index
    %13 = vector.load %arg7[%c0_13, %c0_14] : memref<1x24xf32, #tpu.memory_space<vmem>>, vector<1x24xf32>
    %14 = vector.broadcast %13 : vector<1x24xf32> to vector<9x24xf32>
    %15 = arith.addf %12, %14 : vector<9x24xf32>
    %cst_15 = arith.constant 0.000000e+00 : f32
    %16 = vector.broadcast %cst_15 : f32 to vector<9x24xf32>
    %17 = arith.maximumf %15, %16 : vector<9x24xf32>
    %c0_16 = arith.constant 0 : index
    %c0_17 = arith.constant 0 : index
    %18 = vector.load %arg8[%c0_16, %c0_17] : memref<24x32xf32, #tpu.memory_space<vmem>>, vector<24x32xf32>
    %cst_18 = arith.constant dense<0.000000e+00> : vector<9x32xf32>
    %19 = tpu.matmul %17, %18, %cst_18 {dimension_numbers = #tpu.dot_dimension_numbers<[1], [0], [0], [1], [0, 0, 1, 1], [], []>} : vector<9x24xf32>, vector<24x32xf32>, vector<9x32xf32> -> vector<9x32xf32>
    %cst_19 = arith.constant dense<0.000000e+00> : vector<9x32xf32>
    %20 = tpu.matmul %0, %19, %cst_19 {dimension_numbers = #tpu.dot_dimension_numbers<[1], [0], [0], [1], [0, 0, 1, 1], [], []>} : vector<9x9xf32>, vector<9x32xf32>, vector<9x32xf32> -> vector<9x32xf32>
    %c0_20 = arith.constant 0 : index
    %c0_21 = arith.constant 0 : index
    %21 = vector.load %arg9[%c0_20, %c0_21] : memref<1x32xf32, #tpu.memory_space<vmem>>, vector<1x32xf32>
    %22 = vector.broadcast %21 : vector<1x32xf32> to vector<9x32xf32>
    %23 = arith.addf %20, %22 : vector<9x32xf32>
    %cst_22 = arith.constant 0.000000e+00 : f32
    %24 = vector.broadcast %cst_22 : f32 to vector<9x32xf32>
    %25 = arith.maximumf %23, %24 : vector<9x32xf32>
    %c0_23 = arith.constant 0 : index
    %c0_24 = arith.constant 0 : index
    %26 = vector.load %arg14[%c0_23, %c0_24] : memref<9x32xf32, #tpu.memory_space<vmem>>, vector<9x32xf32>
    tpu.vector_store %arg14[%c0_23, %c0_24], %25 {strides = array<i32>} : memref<9x32xf32, #tpu.memory_space<vmem>>, vector<9x32xf32>,
    %c0_25 = arith.constant 0 : index
    %c0_26 = arith.constant 0 : index
    %c0_27 = arith.constant 0 : index
    %27 = vector.load %arg3[%c0_25, %c0_26, %c0_27] : memref<2x9x1xf32, #tpu.memory_space<vmem>>, vector<1x9x1xf32>
    %28 = vector.shape_cast %27 : vector<1x9x1xf32> to vector<9x1xf32>
    %29 = vector.broadcast %28 : vector<9x1xf32> to vector<9x32xf32>
    %30 = arith.addf %25, %29 : vector<9x32xf32>
    %cst_28 = arith.constant dense<0xFF800000> : vector<32xf32>
    %31 = vector.multi_reduction <maximumf>, %30, %cst_28 [0] : vector<9x32xf32> to vector<32xf32>
    %32 = vector.shape_cast %31 : vector<32xf32> to vector<1x32xf32>
    %c1 = arith.constant 1 : index
    %c0_29 = arith.constant 0 : index
    %c0_30 = arith.constant 0 : index
    %33 = vector.load %arg3[%c1, %c0_29, %c0_30] : memref<2x9x1xf32, #tpu.memory_space<vmem>>, vector<1x9x1xf32>
    %34 = vector.shape_cast %33 : vector<1x9x1xf32> to vector<9x1xf32>
    %35 = vector.broadcast %34 : vector<9x1xf32> to vector<9x32xf32>
    %36 = arith.addf %25, %35 : vector<9x32xf32>
    %cst_31 = arith.constant dense<0xFF800000> : vector<32xf32>
    %37 = vector.multi_reduction <maximumf>, %36, %cst_31 [0] : vector<9x32xf32> to vector<32xf32>
    %38 = vector.shape_cast %37 : vector<32xf32> to vector<1x32xf32>
    %39 = tpu.concatenate %32, %38 in 0 : vector<1x32xf32>, vector<1x32xf32> -> vector<2x32xf32>
    %c0_32 = arith.constant 0 : index
    %c0_33 = arith.constant 0 : index
    %40 = vector.load %arg10[%c0_32, %c0_33] : memref<32x64xf32, #tpu.memory_space<vmem>>, vector<32x64xf32>
    %cst_34 = arith.constant dense<0.000000e+00> : vector<2x64xf32>
    %41 = tpu.matmul %39, %40, %cst_34 {dimension_numbers = #tpu.dot_dimension_numbers<[1], [0], [0], [1], [0, 0, 1, 1], [], []>} : vector<2x32xf32>, vector<32x64xf32>, vector<2x64xf32> -> vector<2x64xf32>
    %c0_35 = arith.constant 0 : index
    %c0_36 = arith.constant 0 : index
    %42 = vector.load %arg11[%c0_35, %c0_36] : memref<1x64xf32, #tpu.memory_space<vmem>>, vector<1x64xf32>
    %43 = vector.broadcast %42 : vector<1x64xf32> to vector<2x64xf32>
    %44 = arith.addf %41, %43 : vector<2x64xf32>
    %cst_37 = arith.constant 0.000000e+00 : f32
    %45 = vector.broadcast %cst_37 : f32 to vector<2x64xf32>
    %46 = arith.maximumf %44, %45 : vector<2x64xf32>
    %c0_38 = arith.constant 0 : index
    %c0_39 = arith.constant 0 : index
    %47 = vector.load %arg12[%c0_38, %c0_39] : memref<64x16xf32, #tpu.memory_space<vmem>>, vector<64x16xf32>
    %cst_40 = arith.constant dense<0.000000e+00> : vector<2x16xf32>
    %48 = tpu.matmul %46, %47, %cst_40 {dimension_numbers = #tpu.dot_dimension_numbers<[1], [0], [0], [1], [0, 0, 1, 1], [], []>} : vector<2x64xf32>, vector<64x16xf32>, vector<2x16xf32> -> vector<2x16xf32>
    %c0_41 = arith.constant 0 : index
    %c0_42 = arith.constant 0 : index
    %49 = vector.load %arg13[%c0_41, %c0_42] : memref<1x16xf32, #tpu.memory_space<vmem>>, vector<1x16xf32>
    %50 = vector.broadcast %49 : vector<1x16xf32> to vector<2x16xf32>
    %51 = arith.addf %48, %50 : vector<2x16xf32>
    %c0_43 = arith.constant 0 : index
    %c0_44 = arith.constant 0 : index
    %52 = vector.load %arg15[%c0_43, %c0_44] : memref<2x16xf32, #tpu.memory_space<vmem>>, vector<2x16xf32>
    tpu.vector_store %arg15[%c0_43, %c0_44], %51 {strides = array<i32>} : memref<2x16xf32, #tpu.memory_space<vmem>>, vector<2x16xf32>,
    return
  }
  func.func @transform_0(%arg0: i32) -> (i32, i32) {
    %c0_i32 = arith.constant 0 : i32
    %c0_i32_0 = arith.constant 0 : i32
    %c0_i32_1 = arith.constant 0 : i32
    return %c0_i32, %c0_i32_0 : i32, i32
  }
  func.func @transform_1(%arg0: i32) -> (i32, i32) {
    %c0_i32 = arith.constant 0 : i32
    %c0_i32_0 = arith.constant 0 : i32
    %c0_i32_1 = arith.constant 0 : i32
    return %c0_i32, %c0_i32_0 : i32, i32
  }
  func.func @transform_2(%arg0: i32) -> (i32, i32, i32) {
    %c0_i32 = arith.constant 0 : i32
    %c0_i32_0 = arith.constant 0 : i32
    %c0_i32_1 = arith.constant 0 : i32
    %c0_i32_2 = arith.constant 0 : i32
    return %c0_i32, %c0_i32_0, %c0_i32_1 : i32, i32, i32
  }
  func.func @transform_3(%arg0: i32) -> (i32, i32) {
    %c0_i32 = arith.constant 0 : i32
    %c0_i32_0 = arith.constant 0 : i32
    %c0_i32_1 = arith.constant 0 : i32
    return %c0_i32, %c0_i32_0 : i32, i32
  }
  func.func @transform_4(%arg0: i32) -> (i32, i32) {
    %c0_i32 = arith.constant 0 : i32
    %c0_i32_0 = arith.constant 0 : i32
    %c0_i32_1 = arith.constant 0 : i32
    return %c0_i32, %c0_i32_0 : i32, i32
  }
  func.func @transform_5(%arg0: i32) -> (i32, i32) {
    %c0_i32 = arith.constant 0 : i32
    %c0_i32_0 = arith.constant 0 : i32
    %c0_i32_1 = arith.constant 0 : i32
    return %c0_i32, %c0_i32_0 : i32, i32
  }
  func.func @transform_6(%arg0: i32) -> (i32, i32) {
    %c0_i32 = arith.constant 0 : i32
    %c0_i32_0 = arith.constant 0 : i32
    %c0_i32_1 = arith.constant 0 : i32
    return %c0_i32, %c0_i32_0 : i32, i32
  }
  func.func @transform_7(%arg0: i32) -> (i32, i32) {
    %c0_i32 = arith.constant 0 : i32
    %c0_i32_0 = arith.constant 0 : i32
    %c0_i32_1 = arith.constant 0 : i32
    return %c0_i32, %c0_i32_0 : i32, i32
  }
  func.func @transform_8(%arg0: i32) -> (i32, i32) {
    %c0_i32 = arith.constant 0 : i32
    %c0_i32_0 = arith.constant 0 : i32
    %c0_i32_1 = arith.constant 0 : i32
    return %c0_i32, %c0_i32_0 : i32, i32
  }
  func.func @transform_9(%arg0: i32) -> (i32, i32) {
    %c0_i32 = arith.constant 0 : i32
    %c0_i32_0 = arith.constant 0 : i32
    %c0_i32_1 = arith.constant 0 : i32
    return %c0_i32, %c0_i32_0 : i32, i32
  }
  func.func @transform_10(%arg0: i32) -> (i32, i32) {
    %c0_i32 = arith.constant 0 : i32
    %c0_i32_0 = arith.constant 0 : i32
    %c0_i32_1 = arith.constant 0 : i32
    return %c0_i32, %c0_i32_0 : i32, i32
  }
  func.func @transform_11(%arg0: i32) -> (i32, i32) {
    %c0_i32 = arith.constant 0 : i32
    %c0_i32_0 = arith.constant 0 : i32
    %c0_i32_1 = arith.constant 0 : i32
    return %c0_i32, %c0_i32_0 : i32, i32
  }
  func.func @transform_12(%arg0: i32) -> (i32, i32) {
    %c0_i32 = arith.constant 0 : i32
    %c0_i32_0 = arith.constant 0 : i32
    %c0_i32_1 = arith.constant 0 : i32
    return %c0_i32, %c0_i32_0 : i32, i32
  }
  func.func @transform_13(%arg0: i32) -> (i32, i32) {
    %c0_i32 = arith.constant 0 : i32
    %c0_i32_0 = arith.constant 0 : i32
    %c0_i32_1 = arith.constant 0 : i32
    return %c0_i32, %c0_i32_0 : i32, i32
  }
  func.func @transform_14(%arg0: i32) -> (i32, i32) {
    %c0_i32 = arith.constant 0 : i32
    %c0_i32_0 = arith.constant 0 : i32
    %c0_i32_1 = arith.constant 0 : i32
    return %c0_i32, %c0_i32_0 : i32, i32
  }
}

module attributes {stable_mosaic.version = 11 : i64} {
  func.func @_fc_head_kernel(%arg0: i32, %arg1: memref<2x32xf32, #tpu.memory_space<vmem>>, %arg2: memref<32x64xf32, #tpu.memory_space<vmem>>, %arg3: memref<1x64xf32, #tpu.memory_space<vmem>>, %arg4: memref<64x48xf32, #tpu.memory_space<vmem>>, %arg5: memref<1x48xf32, #tpu.memory_space<vmem>>, %arg6: memref<48x24xf32, #tpu.memory_space<vmem>>, %arg7: memref<1x24xf32, #tpu.memory_space<vmem>>, %arg8: memref<24x1xf32, #tpu.memory_space<vmem>>, %arg9: memref<1x1xf32, #tpu.memory_space<vmem>>, %arg10: memref<2x1xf32, #tpu.memory_space<vmem>>) attributes {dimension_semantics = [#tpu.dimension_semantics<parallel>], iteration_bounds = array<i64: 1>, scalar_prefetch = 0 : i64, scratch_operands = 0 : i64, tpu.core_type = #tpu.core_type<tc>, window_params = [{pipeline_mode = #tpu.pipeline_mode<synchronous>, transform_indices = @transform_0, window_bounds = array<i64: 2, 32>}, {pipeline_mode = #tpu.pipeline_mode<synchronous>, transform_indices = @transform_1, window_bounds = array<i64: 32, 64>}, {pipeline_mode = #tpu.pipeline_mode<synchronous>, transform_indices = @transform_2, window_bounds = array<i64: 1, 64>}, {pipeline_mode = #tpu.pipeline_mode<synchronous>, transform_indices = @transform_3, window_bounds = array<i64: 64, 48>}, {pipeline_mode = #tpu.pipeline_mode<synchronous>, transform_indices = @transform_4, window_bounds = array<i64: 1, 48>}, {pipeline_mode = #tpu.pipeline_mode<synchronous>, transform_indices = @transform_5, window_bounds = array<i64: 48, 24>}, {pipeline_mode = #tpu.pipeline_mode<synchronous>, transform_indices = @transform_6, window_bounds = array<i64: 1, 24>}, {pipeline_mode = #tpu.pipeline_mode<synchronous>, transform_indices = @transform_7, window_bounds = array<i64: 24, 1>}, {pipeline_mode = #tpu.pipeline_mode<synchronous>, transform_indices = @transform_8, window_bounds = array<i64: 1, 1>}, {pipeline_mode = #tpu.pipeline_mode<synchronous>, transform_indices = @transform_9, window_bounds = array<i64: 2, 1>}]} {
    %c0 = arith.constant 0 : index
    %c0_0 = arith.constant 0 : index
    %0 = vector.load %arg1[%c0, %c0_0] : memref<2x32xf32, #tpu.memory_space<vmem>>, vector<2x32xf32>
    %c0_1 = arith.constant 0 : index
    %c0_2 = arith.constant 0 : index
    %1 = vector.load %arg2[%c0_1, %c0_2] : memref<32x64xf32, #tpu.memory_space<vmem>>, vector<32x64xf32>
    %cst = arith.constant dense<0.000000e+00> : vector<2x64xf32>
    %2 = tpu.matmul %0, %1, %cst {dimension_numbers = #tpu.dot_dimension_numbers<[1], [0], [0], [1], [0, 0, 1, 1], [], []>} : vector<2x32xf32>, vector<32x64xf32>, vector<2x64xf32> -> vector<2x64xf32>
    %c0_3 = arith.constant 0 : index
    %c0_4 = arith.constant 0 : index
    %3 = vector.load %arg3[%c0_3, %c0_4] : memref<1x64xf32, #tpu.memory_space<vmem>>, vector<1x64xf32>
    %4 = vector.broadcast %3 : vector<1x64xf32> to vector<2x64xf32>
    %5 = arith.addf %2, %4 : vector<2x64xf32>
    %cst_5 = arith.constant 0.000000e+00 : f32
    %6 = vector.broadcast %cst_5 : f32 to vector<2x64xf32>
    %7 = arith.maximumf %5, %6 : vector<2x64xf32>
    %c0_6 = arith.constant 0 : index
    %c0_7 = arith.constant 0 : index
    %8 = vector.load %arg4[%c0_6, %c0_7] : memref<64x48xf32, #tpu.memory_space<vmem>>, vector<64x48xf32>
    %cst_8 = arith.constant dense<0.000000e+00> : vector<2x48xf32>
    %9 = tpu.matmul %7, %8, %cst_8 {dimension_numbers = #tpu.dot_dimension_numbers<[1], [0], [0], [1], [0, 0, 1, 1], [], []>} : vector<2x64xf32>, vector<64x48xf32>, vector<2x48xf32> -> vector<2x48xf32>
    %c0_9 = arith.constant 0 : index
    %c0_10 = arith.constant 0 : index
    %10 = vector.load %arg5[%c0_9, %c0_10] : memref<1x48xf32, #tpu.memory_space<vmem>>, vector<1x48xf32>
    %11 = vector.broadcast %10 : vector<1x48xf32> to vector<2x48xf32>
    %12 = arith.addf %9, %11 : vector<2x48xf32>
    %cst_11 = arith.constant 0.000000e+00 : f32
    %13 = vector.broadcast %cst_11 : f32 to vector<2x48xf32>
    %14 = arith.maximumf %12, %13 : vector<2x48xf32>
    %c0_12 = arith.constant 0 : index
    %c0_13 = arith.constant 0 : index
    %15 = vector.load %arg6[%c0_12, %c0_13] : memref<48x24xf32, #tpu.memory_space<vmem>>, vector<48x24xf32>
    %cst_14 = arith.constant dense<0.000000e+00> : vector<2x24xf32>
    %16 = tpu.matmul %14, %15, %cst_14 {dimension_numbers = #tpu.dot_dimension_numbers<[1], [0], [0], [1], [0, 0, 1, 1], [], []>} : vector<2x48xf32>, vector<48x24xf32>, vector<2x24xf32> -> vector<2x24xf32>
    %c0_15 = arith.constant 0 : index
    %c0_16 = arith.constant 0 : index
    %17 = vector.load %arg7[%c0_15, %c0_16] : memref<1x24xf32, #tpu.memory_space<vmem>>, vector<1x24xf32>
    %18 = vector.broadcast %17 : vector<1x24xf32> to vector<2x24xf32>
    %19 = arith.addf %16, %18 : vector<2x24xf32>
    %cst_17 = arith.constant 0.000000e+00 : f32
    %20 = vector.broadcast %cst_17 : f32 to vector<2x24xf32>
    %21 = arith.maximumf %19, %20 : vector<2x24xf32>
    %c0_18 = arith.constant 0 : index
    %c0_19 = arith.constant 0 : index
    %22 = vector.load %arg8[%c0_18, %c0_19] : memref<24x1xf32, #tpu.memory_space<vmem>>, vector<24x1xf32>
    %cst_20 = arith.constant dense<0.000000e+00> : vector<2x1xf32>
    %23 = tpu.matmul %21, %22, %cst_20 {dimension_numbers = #tpu.dot_dimension_numbers<[1], [0], [0], [1], [0, 0, 1, 1], [], []>} : vector<2x24xf32>, vector<24x1xf32>, vector<2x1xf32> -> vector<2x1xf32>
    %c0_21 = arith.constant 0 : index
    %c0_22 = arith.constant 0 : index
    %24 = vector.load %arg9[%c0_21, %c0_22] : memref<1x1xf32, #tpu.memory_space<vmem>>, vector<1x1xf32>
    %25 = vector.broadcast %24 : vector<1x1xf32> to vector<2x1xf32>
    %26 = arith.addf %23, %25 : vector<2x1xf32>
    %c0_23 = arith.constant 0 : index
    %c0_24 = arith.constant 0 : index
    %27 = vector.load %arg10[%c0_23, %c0_24] : memref<2x1xf32, #tpu.memory_space<vmem>>, vector<2x1xf32>
    tpu.vector_store %arg10[%c0_23, %c0_24], %26 {strides = array<i32>} : memref<2x1xf32, #tpu.memory_space<vmem>>, vector<2x1xf32>,
    return
  }
  func.func @transform_0(%arg0: i32) -> (i32, i32) {
    %c0_i32 = arith.constant 0 : i32
    %c0_i32_0 = arith.constant 0 : i32
    %c0_i32_1 = arith.constant 0 : i32
    return %c0_i32, %c0_i32_0 : i32, i32
  }
  func.func @transform_1(%arg0: i32) -> (i32, i32) {
    %c0_i32 = arith.constant 0 : i32
    %c0_i32_0 = arith.constant 0 : i32
    %c0_i32_1 = arith.constant 0 : i32
    return %c0_i32, %c0_i32_0 : i32, i32
  }
  func.func @transform_2(%arg0: i32) -> (i32, i32) {
    %c0_i32 = arith.constant 0 : i32
    %c0_i32_0 = arith.constant 0 : i32
    %c0_i32_1 = arith.constant 0 : i32
    return %c0_i32, %c0_i32_0 : i32, i32
  }
  func.func @transform_3(%arg0: i32) -> (i32, i32) {
    %c0_i32 = arith.constant 0 : i32
    %c0_i32_0 = arith.constant 0 : i32
    %c0_i32_1 = arith.constant 0 : i32
    return %c0_i32, %c0_i32_0 : i32, i32
  }
  func.func @transform_4(%arg0: i32) -> (i32, i32) {
    %c0_i32 = arith.constant 0 : i32
    %c0_i32_0 = arith.constant 0 : i32
    %c0_i32_1 = arith.constant 0 : i32
    return %c0_i32, %c0_i32_0 : i32, i32
  }
  func.func @transform_5(%arg0: i32) -> (i32, i32) {
    %c0_i32 = arith.constant 0 : i32
    %c0_i32_0 = arith.constant 0 : i32
    %c0_i32_1 = arith.constant 0 : i32
    return %c0_i32, %c0_i32_0 : i32, i32
  }
  func.func @transform_6(%arg0: i32) -> (i32, i32) {
    %c0_i32 = arith.constant 0 : i32
    %c0_i32_0 = arith.constant 0 : i32
    %c0_i32_1 = arith.constant 0 : i32
    return %c0_i32, %c0_i32_0 : i32, i32
  }
  func.func @transform_7(%arg0: i32) -> (i32, i32) {
    %c0_i32 = arith.constant 0 : i32
    %c0_i32_0 = arith.constant 0 : i32
    %c0_i32_1 = arith.constant 0 : i32
    return %c0_i32, %c0_i32_0 : i32, i32
  }
  func.func @transform_8(%arg0: i32) -> (i32, i32) {
    %c0_i32 = arith.constant 0 : i32
    %c0_i32_0 = arith.constant 0 : i32
    %c0_i32_1 = arith.constant 0 : i32
    return %c0_i32, %c0_i32_0 : i32, i32
  }
  func.func @transform_9(%arg0: i32) -> (i32, i32) {
    %c0_i32 = arith.constant 0 : i32
    %c0_i32_0 = arith.constant 0 : i32
    %c0_i32_1 = arith.constant 0 : i32
    return %c0_i32, %c0_i32_0 : i32, i32
  }
}

module attributes {stable_mosaic.version = 11 : i64} {
  func.func @_enc_layer_kernel(%arg0: i32, %arg1: memref<2x10x32xf32, #tpu.memory_space<vmem>>, %arg2: memref<2x1x10xf32, #tpu.memory_space<vmem>>, %arg3: memref<1x32xf32, #tpu.memory_space<vmem>>, %arg4: memref<1x32xf32, #tpu.memory_space<vmem>>, %arg5: memref<32x96xf32, #tpu.memory_space<vmem>>, %arg6: memref<1x96xf32, #tpu.memory_space<vmem>>, %arg7: memref<32x32xf32, #tpu.memory_space<vmem>>, %arg8: memref<1x32xf32, #tpu.memory_space<vmem>>, %arg9: memref<1x32xf32, #tpu.memory_space<vmem>>, %arg10: memref<1x32xf32, #tpu.memory_space<vmem>>, %arg11: memref<32x64xf32, #tpu.memory_space<vmem>>, %arg12: memref<1x64xf32, #tpu.memory_space<vmem>>, %arg13: memref<64x32xf32, #tpu.memory_space<vmem>>, %arg14: memref<1x32xf32, #tpu.memory_space<vmem>>, %arg15: memref<2x10x32xf32, #tpu.memory_space<vmem>>) attributes {dimension_semantics = [#tpu.dimension_semantics<parallel>], iteration_bounds = array<i64: 1>, scalar_prefetch = 0 : i64, scratch_operands = 0 : i64, tpu.core_type = #tpu.core_type<tc>, window_params = [{pipeline_mode = #tpu.pipeline_mode<synchronous>, transform_indices = @transform_0, window_bounds = array<i64: 2, 10, 32>}, {pipeline_mode = #tpu.pipeline_mode<synchronous>, transform_indices = @transform_1, window_bounds = array<i64: 2, 1, 10>}, {pipeline_mode = #tpu.pipeline_mode<synchronous>, transform_indices = @transform_2, window_bounds = array<i64: 1, 32>}, {pipeline_mode = #tpu.pipeline_mode<synchronous>, transform_indices = @transform_3, window_bounds = array<i64: 1, 32>}, {pipeline_mode = #tpu.pipeline_mode<synchronous>, transform_indices = @transform_4, window_bounds = array<i64: 32, 96>}, {pipeline_mode = #tpu.pipeline_mode<synchronous>, transform_indices = @transform_5, window_bounds = array<i64: 1, 96>}, {pipeline_mode = #tpu.pipeline_mode<synchronous>, transform_indices = @transform_6, window_bounds = array<i64: 32, 32>}, {pipeline_mode = #tpu.pipeline_mode<synchronous>, transform_indices = @transform_7, window_bounds = array<i64: 1, 32>}, {pipeline_mode = #tpu.pipeline_mode<synchronous>, transform_indices = @transform_8, window_bounds = array<i64: 1, 32>}, {pipeline_mode = #tpu.pipeline_mode<synchronous>, transform_indices = @transform_9, window_bounds = array<i64: 1, 32>}, {pipeline_mode = #tpu.pipeline_mode<synchronous>, transform_indices = @transform_10, window_bounds = array<i64: 32, 64>}, {pipeline_mode = #tpu.pipeline_mode<synchronous>, transform_indices = @transform_11, window_bounds = array<i64: 1, 64>}, {pipeline_mode = #tpu.pipeline_mode<synchronous>, transform_indices = @transform_12, window_bounds = array<i64: 64, 32>}, {pipeline_mode = #tpu.pipeline_mode<synchronous>, transform_indices = @transform_13, window_bounds = array<i64: 1, 32>}, {pipeline_mode = #tpu.pipeline_mode<synchronous>, transform_indices = @transform_14, window_bounds = array<i64: 2, 10, 32>}]} {
    %c0 = arith.constant 0 : index
    %c0_0 = arith.constant 0 : index
    %0 = vector.load %arg5[%c0, %c0_0] : memref<32x96xf32, #tpu.memory_space<vmem>>, vector<32x96xf32>
    %c0_1 = arith.constant 0 : index
    %c0_2 = arith.constant 0 : index
    %1 = vector.load %arg6[%c0_1, %c0_2] : memref<1x96xf32, #tpu.memory_space<vmem>>, vector<1x96xf32>
    %c0_3 = arith.constant 0 : index
    %c0_4 = arith.constant 0 : index
    %2 = vector.load %arg7[%c0_3, %c0_4] : memref<32x32xf32, #tpu.memory_space<vmem>>, vector<32x32xf32>
    %c0_5 = arith.constant 0 : index
    %c0_6 = arith.constant 0 : index
    %3 = vector.load %arg8[%c0_5, %c0_6] : memref<1x32xf32, #tpu.memory_space<vmem>>, vector<1x32xf32>
    %c0_7 = arith.constant 0 : index
    %c0_8 = arith.constant 0 : index
    %4 = vector.load %arg11[%c0_7, %c0_8] : memref<32x64xf32, #tpu.memory_space<vmem>>, vector<32x64xf32>
    %c0_9 = arith.constant 0 : index
    %c0_10 = arith.constant 0 : index
    %5 = vector.load %arg12[%c0_9, %c0_10] : memref<1x64xf32, #tpu.memory_space<vmem>>, vector<1x64xf32>
    %c0_11 = arith.constant 0 : index
    %c0_12 = arith.constant 0 : index
    %6 = vector.load %arg13[%c0_11, %c0_12] : memref<64x32xf32, #tpu.memory_space<vmem>>, vector<64x32xf32>
    %c0_13 = arith.constant 0 : index
    %c0_14 = arith.constant 0 : index
    %7 = vector.load %arg14[%c0_13, %c0_14] : memref<1x32xf32, #tpu.memory_space<vmem>>, vector<1x32xf32>
    %c0_15 = arith.constant 0 : index
    %c0_16 = arith.constant 0 : index
    %8 = vector.load %arg3[%c0_15, %c0_16] : memref<1x32xf32, #tpu.memory_space<vmem>>, vector<1x32xf32>
    %c0_17 = arith.constant 0 : index
    %c0_18 = arith.constant 0 : index
    %9 = vector.load %arg4[%c0_17, %c0_18] : memref<1x32xf32, #tpu.memory_space<vmem>>, vector<1x32xf32>
    %c0_19 = arith.constant 0 : index
    %c0_20 = arith.constant 0 : index
    %10 = vector.load %arg9[%c0_19, %c0_20] : memref<1x32xf32, #tpu.memory_space<vmem>>, vector<1x32xf32>
    %c0_21 = arith.constant 0 : index
    %c0_22 = arith.constant 0 : index
    %11 = vector.load %arg10[%c0_21, %c0_22] : memref<1x32xf32, #tpu.memory_space<vmem>>, vector<1x32xf32>
    %c0_23 = arith.constant 0 : index
    %c0_24 = arith.constant 0 : index
    %c0_25 = arith.constant 0 : index
    %12 = vector.load %arg1[%c0_23, %c0_24, %c0_25] : memref<2x10x32xf32, #tpu.memory_space<vmem>>, vector<1x10x32xf32>
    %13 = vector.shape_cast %12 : vector<1x10x32xf32> to vector<10x32xf32>
    %cst = arith.constant dense<0.000000e+00> : vector<10xf32>
    %14 = vector.multi_reduction <add>, %13, %cst [1] : vector<10x32xf32> to vector<10xf32>
    %15 = vector.shape_cast %14 : vector<10xf32> to vector<10x1xf32>
    %cst_26 = arith.constant 3.200000e+01 : f32
    %16 = vector.broadcast %cst_26 : f32 to vector<10x1xf32>
    %17 = arith.divf %15, %16 : vector<10x1xf32>
    %18 = vector.broadcast %17 : vector<10x1xf32> to vector<10x32xf32>
    %19 = arith.subf %13, %18 : vector<10x32xf32>
    %20 = arith.mulf %19, %19 : vector<10x32xf32>
    %cst_27 = arith.constant dense<0.000000e+00> : vector<10xf32>
    %21 = vector.multi_reduction <add>, %20, %cst_27 [1] : vector<10x32xf32> to vector<10xf32>
    %22 = vector.shape_cast %21 : vector<10xf32> to vector<10x1xf32>
    %cst_28 = arith.constant 3.200000e+01 : f32
    %23 = vector.broadcast %cst_28 : f32 to vector<10x1xf32>
    %24 = arith.divf %22, %23 : vector<10x1xf32>
    %25 = vector.broadcast %17 : vector<10x1xf32> to vector<10x32xf32>
    %26 = arith.subf %13, %25 : vector<10x32xf32>
    %cst_29 = arith.constant 9.99999974E-6 : f32
    %27 = vector.broadcast %cst_29 : f32 to vector<10x1xf32>
    %28 = arith.addf %24, %27 : vector<10x1xf32>
    %29 = math.rsqrt %28 : vector<10x1xf32>
    %30 = vector.broadcast %29 : vector<10x1xf32> to vector<10x32xf32>
    %31 = arith.mulf %26, %30 : vector<10x32xf32>
    %32 = vector.broadcast %8 : vector<1x32xf32> to vector<10x32xf32>
    %33 = arith.mulf %31, %32 : vector<10x32xf32>
    %34 = vector.broadcast %9 : vector<1x32xf32> to vector<10x32xf32>
    %35 = arith.addf %33, %34 : vector<10x32xf32>
    %cst_30 = arith.constant dense<0.000000e+00> : vector<10x96xf32>
    %36 = tpu.matmul %35, %0, %cst_30 {dimension_numbers = #tpu.dot_dimension_numbers<[1], [0], [0], [1], [0, 0, 1, 1], [], []>} : vector<10x32xf32>, vector<32x96xf32>, vector<10x96xf32> -> vector<10x96xf32>
    %37 = vector.broadcast %1 : vector<1x96xf32> to vector<10x96xf32>
    %38 = arith.addf %36, %37 : vector<10x96xf32>
    %39 = vector.extract_strided_slice %38 {offsets = [0, 0], sizes = [10, 32], strides = [1, 1]} : vector<10x96xf32> to vector<10x32xf32>
    %40 = vector.extract_strided_slice %38 {offsets = [0, 32], sizes = [10, 32], strides = [1, 1]} : vector<10x96xf32> to vector<10x32xf32>
    %41 = vector.extract_strided_slice %38 {offsets = [0, 64], sizes = [10, 32], strides = [1, 1]} : vector<10x96xf32> to vector<10x32xf32>
    %c0_31 = arith.constant 0 : index
    %c0_32 = arith.constant 0 : index
    %c0_33 = arith.constant 0 : index
    %42 = vector.load %arg2[%c0_31, %c0_32, %c0_33] : memref<2x1x10xf32, #tpu.memory_space<vmem>>, vector<1x1x10xf32>
    %43 = vector.shape_cast %42 : vector<1x1x10xf32> to vector<1x10xf32>
    %44 = vector.extract_strided_slice %39 {offsets = [0, 0], sizes = [10, 8], strides = [1, 1]} : vector<10x32xf32> to vector<10x8xf32>
    %45 = vector.extract_strided_slice %40 {offsets = [0, 0], sizes = [10, 8], strides = [1, 1]} : vector<10x32xf32> to vector<10x8xf32>
    %cst_34 = arith.constant dense<0.000000e+00> : vector<10x10xf32>
    %46 = tpu.matmul %44, %45, %cst_34 {dimension_numbers = #tpu.dot_dimension_numbers<[1], [1], [0], [0], [0, 0, 1, 0], [], []>} : vector<10x8xf32>, vector<10x8xf32>, vector<10x10xf32> -> vector<10x10xf32>
    %cst_35 = arith.constant 0.353553385 : f32
    %47 = vector.broadcast %cst_35 : f32 to vector<10x10xf32>
    %48 = arith.mulf %46, %47 : vector<10x10xf32>
    %49 = vector.broadcast %43 : vector<1x10xf32> to vector<10x10xf32>
    %50 = arith.addf %48, %49 : vector<10x10xf32>
    %cst_36 = arith.constant dense<0xFF800000> : vector<10xf32>
    %51 = vector.multi_reduction <maximumf>, %50, %cst_36 [1] : vector<10x10xf32> to vector<10xf32>
    %52 = vector.shape_cast %51 : vector<10xf32> to vector<10x1xf32>
    %53 = vector.broadcast %52 : vector<10x1xf32> to vector<10x10xf32>
    %54 = arith.subf %50, %53 : vector<10x10xf32>
    %55 = math.exp %54 : vector<10x10xf32>
    %cst_37 = arith.constant dense<0.000000e+00> : vector<10xf32>
    %56 = vector.multi_reduction <add>, %55, %cst_37 [1] : vector<10x10xf32> to vector<10xf32>
    %57 = vector.shape_cast %56 : vector<10xf32> to vector<10x1xf32>
    %58 = vector.broadcast %57 : vector<10x1xf32> to vector<10x10xf32>
    %59 = arith.divf %55, %58 : vector<10x10xf32>
    %60 = vector.extract_strided_slice %41 {offsets = [0, 0], sizes = [10, 8], strides = [1, 1]} : vector<10x32xf32> to vector<10x8xf32>
    %cst_38 = arith.constant dense<0.000000e+00> : vector<10x8xf32>
    %61 = tpu.matmul %59, %60, %cst_38 {dimension_numbers = #tpu.dot_dimension_numbers<[1], [0], [0], [1], [0, 0, 1, 1], [], []>} : vector<10x10xf32>, vector<10x8xf32>, vector<10x8xf32> -> vector<10x8xf32>
    %62 = vector.extract_strided_slice %2 {offsets = [0, 0], sizes = [8, 32], strides = [1, 1]} : vector<32x32xf32> to vector<8x32xf32>
    %cst_39 = arith.constant dense<0.000000e+00> : vector<10x32xf32>
    %63 = tpu.matmul %61, %62, %cst_39 {dimension_numbers = #tpu.dot_dimension_numbers<[1], [0], [0], [1], [0, 0, 1, 1], [], []>} : vector<10x8xf32>, vector<8x32xf32>, vector<10x32xf32> -> vector<10x32xf32>
    %64 = vector.extract_strided_slice %39 {offsets = [0, 8], sizes = [10, 8], strides = [1, 1]} : vector<10x32xf32> to vector<10x8xf32>
    %65 = vector.extract_strided_slice %40 {offsets = [0, 8], sizes = [10, 8], strides = [1, 1]} : vector<10x32xf32> to vector<10x8xf32>
    %cst_40 = arith.constant dense<0.000000e+00> : vector<10x10xf32>
    %66 = tpu.matmul %64, %65, %cst_40 {dimension_numbers = #tpu.dot_dimension_numbers<[1], [1], [0], [0], [0, 0, 1, 0], [], []>} : vector<10x8xf32>, vector<10x8xf32>, vector<10x10xf32> -> vector<10x10xf32>
    %cst_41 = arith.constant 0.353553385 : f32
    %67 = vector.broadcast %cst_41 : f32 to vector<10x10xf32>
    %68 = arith.mulf %66, %67 : vector<10x10xf32>
    %69 = vector.broadcast %43 : vector<1x10xf32> to vector<10x10xf32>
    %70 = arith.addf %68, %69 : vector<10x10xf32>
    %cst_42 = arith.constant dense<0xFF800000> : vector<10xf32>
    %71 = vector.multi_reduction <maximumf>, %70, %cst_42 [1] : vector<10x10xf32> to vector<10xf32>
    %72 = vector.shape_cast %71 : vector<10xf32> to vector<10x1xf32>
    %73 = vector.broadcast %72 : vector<10x1xf32> to vector<10x10xf32>
    %74 = arith.subf %70, %73 : vector<10x10xf32>
    %75 = math.exp %74 : vector<10x10xf32>
    %cst_43 = arith.constant dense<0.000000e+00> : vector<10xf32>
    %76 = vector.multi_reduction <add>, %75, %cst_43 [1] : vector<10x10xf32> to vector<10xf32>
    %77 = vector.shape_cast %76 : vector<10xf32> to vector<10x1xf32>
    %78 = vector.broadcast %77 : vector<10x1xf32> to vector<10x10xf32>
    %79 = arith.divf %75, %78 : vector<10x10xf32>
    %80 = vector.extract_strided_slice %41 {offsets = [0, 8], sizes = [10, 8], strides = [1, 1]} : vector<10x32xf32> to vector<10x8xf32>
    %cst_44 = arith.constant dense<0.000000e+00> : vector<10x8xf32>
    %81 = tpu.matmul %79, %80, %cst_44 {dimension_numbers = #tpu.dot_dimension_numbers<[1], [0], [0], [1], [0, 0, 1, 1], [], []>} : vector<10x10xf32>, vector<10x8xf32>, vector<10x8xf32> -> vector<10x8xf32>
    %82 = vector.extract_strided_slice %2 {offsets = [8, 0], sizes = [8, 32], strides = [1, 1]} : vector<32x32xf32> to vector<8x32xf32>
    %cst_45 = arith.constant dense<0.000000e+00> : vector<10x32xf32>
    %83 = tpu.matmul %81, %82, %cst_45 {dimension_numbers = #tpu.dot_dimension_numbers<[1], [0], [0], [1], [0, 0, 1, 1], [], []>} : vector<10x8xf32>, vector<8x32xf32>, vector<10x32xf32> -> vector<10x32xf32>
    %84 = arith.addf %63, %83 : vector<10x32xf32>
    %85 = vector.extract_strided_slice %39 {offsets = [0, 16], sizes = [10, 8], strides = [1, 1]} : vector<10x32xf32> to vector<10x8xf32>
    %86 = vector.extract_strided_slice %40 {offsets = [0, 16], sizes = [10, 8], strides = [1, 1]} : vector<10x32xf32> to vector<10x8xf32>
    %cst_46 = arith.constant dense<0.000000e+00> : vector<10x10xf32>
    %87 = tpu.matmul %85, %86, %cst_46 {dimension_numbers = #tpu.dot_dimension_numbers<[1], [1], [0], [0], [0, 0, 1, 0], [], []>} : vector<10x8xf32>, vector<10x8xf32>, vector<10x10xf32> -> vector<10x10xf32>
    %cst_47 = arith.constant 0.353553385 : f32
    %88 = vector.broadcast %cst_47 : f32 to vector<10x10xf32>
    %89 = arith.mulf %87, %88 : vector<10x10xf32>
    %90 = vector.broadcast %43 : vector<1x10xf32> to vector<10x10xf32>
    %91 = arith.addf %89, %90 : vector<10x10xf32>
    %cst_48 = arith.constant dense<0xFF800000> : vector<10xf32>
    %92 = vector.multi_reduction <maximumf>, %91, %cst_48 [1] : vector<10x10xf32> to vector<10xf32>
    %93 = vector.shape_cast %92 : vector<10xf32> to vector<10x1xf32>
    %94 = vector.broadcast %93 : vector<10x1xf32> to vector<10x10xf32>
    %95 = arith.subf %91, %94 : vector<10x10xf32>
    %96 = math.exp %95 : vector<10x10xf32>
    %cst_49 = arith.constant dense<0.000000e+00> : vector<10xf32>
    %97 = vector.multi_reduction <add>, %96, %cst_49 [1] : vector<10x10xf32> to vector<10xf32>
    %98 = vector.shape_cast %97 : vector<10xf32> to vector<10x1xf32>
    %99 = vector.broadcast %98 : vector<10x1xf32> to vector<10x10xf32>
    %100 = arith.divf %96, %99 : vector<10x10xf32>
    %101 = vector.extract_strided_slice %41 {offsets = [0, 16], sizes = [10, 8], strides = [1, 1]} : vector<10x32xf32> to vector<10x8xf32>
    %cst_50 = arith.constant dense<0.000000e+00> : vector<10x8xf32>
    %102 = tpu.matmul %100, %101, %cst_50 {dimension_numbers = #tpu.dot_dimension_numbers<[1], [0], [0], [1], [0, 0, 1, 1], [], []>} : vector<10x10xf32>, vector<10x8xf32>, vector<10x8xf32> -> vector<10x8xf32>
    %103 = vector.extract_strided_slice %2 {offsets = [16, 0], sizes = [8, 32], strides = [1, 1]} : vector<32x32xf32> to vector<8x32xf32>
    %cst_51 = arith.constant dense<0.000000e+00> : vector<10x32xf32>
    %104 = tpu.matmul %102, %103, %cst_51 {dimension_numbers = #tpu.dot_dimension_numbers<[1], [0], [0], [1], [0, 0, 1, 1], [], []>} : vector<10x8xf32>, vector<8x32xf32>, vector<10x32xf32> -> vector<10x32xf32>
    %105 = arith.addf %84, %104 : vector<10x32xf32>
    %106 = vector.extract_strided_slice %39 {offsets = [0, 24], sizes = [10, 8], strides = [1, 1]} : vector<10x32xf32> to vector<10x8xf32>
    %107 = vector.extract_strided_slice %40 {offsets = [0, 24], sizes = [10, 8], strides = [1, 1]} : vector<10x32xf32> to vector<10x8xf32>
    %cst_52 = arith.constant dense<0.000000e+00> : vector<10x10xf32>
    %108 = tpu.matmul %106, %107, %cst_52 {dimension_numbers = #tpu.dot_dimension_numbers<[1], [1], [0], [0], [0, 0, 1, 0], [], []>} : vector<10x8xf32>, vector<10x8xf32>, vector<10x10xf32> -> vector<10x10xf32>
    %cst_53 = arith.constant 0.353553385 : f32
    %109 = vector.broadcast %cst_53 : f32 to vector<10x10xf32>
    %110 = arith.mulf %108, %109 : vector<10x10xf32>
    %111 = vector.broadcast %43 : vector<1x10xf32> to vector<10x10xf32>
    %112 = arith.addf %110, %111 : vector<10x10xf32>
    %cst_54 = arith.constant dense<0xFF800000> : vector<10xf32>
    %113 = vector.multi_reduction <maximumf>, %112, %cst_54 [1] : vector<10x10xf32> to vector<10xf32>
    %114 = vector.shape_cast %113 : vector<10xf32> to vector<10x1xf32>
    %115 = vector.broadcast %114 : vector<10x1xf32> to vector<10x10xf32>
    %116 = arith.subf %112, %115 : vector<10x10xf32>
    %117 = math.exp %116 : vector<10x10xf32>
    %cst_55 = arith.constant dense<0.000000e+00> : vector<10xf32>
    %118 = vector.multi_reduction <add>, %117, %cst_55 [1] : vector<10x10xf32> to vector<10xf32>
    %119 = vector.shape_cast %118 : vector<10xf32> to vector<10x1xf32>
    %120 = vector.broadcast %119 : vector<10x1xf32> to vector<10x10xf32>
    %121 = arith.divf %117, %120 : vector<10x10xf32>
    %122 = vector.extract_strided_slice %41 {offsets = [0, 24], sizes = [10, 8], strides = [1, 1]} : vector<10x32xf32> to vector<10x8xf32>
    %cst_56 = arith.constant dense<0.000000e+00> : vector<10x8xf32>
    %123 = tpu.matmul %121, %122, %cst_56 {dimension_numbers = #tpu.dot_dimension_numbers<[1], [0], [0], [1], [0, 0, 1, 1], [], []>} : vector<10x10xf32>, vector<10x8xf32>, vector<10x8xf32> -> vector<10x8xf32>
    %124 = vector.extract_strided_slice %2 {offsets = [24, 0], sizes = [8, 32], strides = [1, 1]} : vector<32x32xf32> to vector<8x32xf32>
    %cst_57 = arith.constant dense<0.000000e+00> : vector<10x32xf32>
    %125 = tpu.matmul %123, %124, %cst_57 {dimension_numbers = #tpu.dot_dimension_numbers<[1], [0], [0], [1], [0, 0, 1, 1], [], []>} : vector<10x8xf32>, vector<8x32xf32>, vector<10x32xf32> -> vector<10x32xf32>
    %126 = arith.addf %105, %125 : vector<10x32xf32>
    %127 = arith.addf %13, %126 : vector<10x32xf32>
    %128 = vector.broadcast %3 : vector<1x32xf32> to vector<10x32xf32>
    %129 = arith.addf %127, %128 : vector<10x32xf32>
    %cst_58 = arith.constant dense<0.000000e+00> : vector<10xf32>
    %130 = vector.multi_reduction <add>, %129, %cst_58 [1] : vector<10x32xf32> to vector<10xf32>
    %131 = vector.shape_cast %130 : vector<10xf32> to vector<10x1xf32>
    %cst_59 = arith.constant 3.200000e+01 : f32
    %132 = vector.broadcast %cst_59 : f32 to vector<10x1xf32>
    %133 = arith.divf %131, %132 : vector<10x1xf32>
    %134 = vector.broadcast %133 : vector<10x1xf32> to vector<10x32xf32>
    %135 = arith.subf %129, %134 : vector<10x32xf32>
    %136 = arith.mulf %135, %135 : vector<10x32xf32>
    %cst_60 = arith.constant dense<0.000000e+00> : vector<10xf32>
    %137 = vector.multi_reduction <add>, %136, %cst_60 [1] : vector<10x32xf32> to vector<10xf32>
    %138 = vector.shape_cast %137 : vector<10xf32> to vector<10x1xf32>
    %cst_61 = arith.constant 3.200000e+01 : f32
    %139 = vector.broadcast %cst_61 : f32 to vector<10x1xf32>
    %140 = arith.divf %138, %139 : vector<10x1xf32>
    %141 = vector.broadcast %133 : vector<10x1xf32> to vector<10x32xf32>
    %142 = arith.subf %129, %141 : vector<10x32xf32>
    %cst_62 = arith.constant 9.99999974E-6 : f32
    %143 = vector.broadcast %cst_62 : f32 to vector<10x1xf32>
    %144 = arith.addf %140, %143 : vector<10x1xf32>
    %145 = math.rsqrt %144 : vector<10x1xf32>
    %146 = vector.broadcast %145 : vector<10x1xf32> to vector<10x32xf32>
    %147 = arith.mulf %142, %146 : vector<10x32xf32>
    %148 = vector.broadcast %10 : vector<1x32xf32> to vector<10x32xf32>
    %149 = arith.mulf %147, %148 : vector<10x32xf32>
    %150 = vector.broadcast %11 : vector<1x32xf32> to vector<10x32xf32>
    %151 = arith.addf %149, %150 : vector<10x32xf32>
    %cst_63 = arith.constant dense<0.000000e+00> : vector<10x64xf32>
    %152 = tpu.matmul %151, %4, %cst_63 {dimension_numbers = #tpu.dot_dimension_numbers<[1], [0], [0], [1], [0, 0, 1, 1], [], []>} : vector<10x32xf32>, vector<32x64xf32>, vector<10x64xf32> -> vector<10x64xf32>
    %153 = vector.broadcast %5 : vector<1x64xf32> to vector<10x64xf32>
    %154 = arith.addf %152, %153 : vector<10x64xf32>
    %cst_64 = arith.constant 0.000000e+00 : f32
    %155 = vector.broadcast %cst_64 : f32 to vector<10x64xf32>
    %156 = arith.maximumf %154, %155 : vector<10x64xf32>
    %cst_65 = arith.constant dense<0.000000e+00> : vector<10x32xf32>
    %157 = tpu.matmul %156, %6, %cst_65 {dimension_numbers = #tpu.dot_dimension_numbers<[1], [0], [0], [1], [0, 0, 1, 1], [], []>} : vector<10x64xf32>, vector<64x32xf32>, vector<10x32xf32> -> vector<10x32xf32>
    %158 = vector.broadcast %7 : vector<1x32xf32> to vector<10x32xf32>
    %159 = arith.addf %157, %158 : vector<10x32xf32>
    %160 = arith.addf %129, %159 : vector<10x32xf32>
    %c0_66 = arith.constant 0 : index
    %c0_67 = arith.constant 0 : index
    %c0_68 = arith.constant 0 : index
    %161 = vector.load %arg15[%c0_66, %c0_67, %c0_68] : memref<2x10x32xf32, #tpu.memory_space<vmem>>, vector<1x10x32xf32>
    %162 = vector.shape_cast %161 : vector<1x10x32xf32> to vector<10x32xf32>
    %163 = vector.shape_cast %160 : vector<10x32xf32> to vector<1x10x32xf32>
    tpu.vector_store %arg15[%c0_66, %c0_67, %c0_68], %163 {strides = array<i32>} : memref<2x10x32xf32, #tpu.memory_space<vmem>>, vector<1x10x32xf32>,
    %c1 = arith.constant 1 : index
    %c0_69 = arith.constant 0 : index
    %c0_70 = arith.constant 0 : index
    %164 = vector.load %arg1[%c1, %c0_69, %c0_70] : memref<2x10x32xf32, #tpu.memory_space<vmem>>, vector<1x10x32xf32>
    %165 = vector.shape_cast %164 : vector<1x10x32xf32> to vector<10x32xf32>
    %cst_71 = arith.constant dense<0.000000e+00> : vector<10xf32>
    %166 = vector.multi_reduction <add>, %165, %cst_71 [1] : vector<10x32xf32> to vector<10xf32>
    %167 = vector.shape_cast %166 : vector<10xf32> to vector<10x1xf32>
    %cst_72 = arith.constant 3.200000e+01 : f32
    %168 = vector.broadcast %cst_72 : f32 to vector<10x1xf32>
    %169 = arith.divf %167, %168 : vector<10x1xf32>
    %170 = vector.broadcast %169 : vector<10x1xf32> to vector<10x32xf32>
    %171 = arith.subf %165, %170 : vector<10x32xf32>
    %172 = arith.mulf %171, %171 : vector<10x32xf32>
    %cst_73 = arith.constant dense<0.000000e+00> : vector<10xf32>
    %173 = vector.multi_reduction <add>, %172, %cst_73 [1] : vector<10x32xf32> to vector<10xf32>
    %174 = vector.shape_cast %173 : vector<10xf32> to vector<10x1xf32>
    %cst_74 = arith.constant 3.200000e+01 : f32
    %175 = vector.broadcast %cst_74 : f32 to vector<10x1xf32>
    %176 = arith.divf %174, %175 : vector<10x1xf32>
    %177 = vector.broadcast %169 : vector<10x1xf32> to vector<10x32xf32>
    %178 = arith.subf %165, %177 : vector<10x32xf32>
    %cst_75 = arith.constant 9.99999974E-6 : f32
    %179 = vector.broadcast %cst_75 : f32 to vector<10x1xf32>
    %180 = arith.addf %176, %179 : vector<10x1xf32>
    %181 = math.rsqrt %180 : vector<10x1xf32>
    %182 = vector.broadcast %181 : vector<10x1xf32> to vector<10x32xf32>
    %183 = arith.mulf %178, %182 : vector<10x32xf32>
    %184 = vector.broadcast %8 : vector<1x32xf32> to vector<10x32xf32>
    %185 = arith.mulf %183, %184 : vector<10x32xf32>
    %186 = vector.broadcast %9 : vector<1x32xf32> to vector<10x32xf32>
    %187 = arith.addf %185, %186 : vector<10x32xf32>
    %cst_76 = arith.constant dense<0.000000e+00> : vector<10x96xf32>
    %188 = tpu.matmul %187, %0, %cst_76 {dimension_numbers = #tpu.dot_dimension_numbers<[1], [0], [0], [1], [0, 0, 1, 1], [], []>} : vector<10x32xf32>, vector<32x96xf32>, vector<10x96xf32> -> vector<10x96xf32>
    %189 = vector.broadcast %1 : vector<1x96xf32> to vector<10x96xf32>
    %190 = arith.addf %188, %189 : vector<10x96xf32>
    %191 = vector.extract_strided_slice %190 {offsets = [0, 0], sizes = [10, 32], strides = [1, 1]} : vector<10x96xf32> to vector<10x32xf32>
    %192 = vector.extract_strided_slice %190 {offsets = [0, 32], sizes = [10, 32], strides = [1, 1]} : vector<10x96xf32> to vector<10x32xf32>
    %193 = vector.extract_strided_slice %190 {offsets = [0, 64], sizes = [10, 32], strides = [1, 1]} : vector<10x96xf32> to vector<10x32xf32>
    %c1_77 = arith.constant 1 : index
    %c0_78 = arith.constant 0 : index
    %c0_79 = arith.constant 0 : index
    %194 = vector.load %arg2[%c1_77, %c0_78, %c0_79] : memref<2x1x10xf32, #tpu.memory_space<vmem>>, vector<1x1x10xf32>
    %195 = vector.shape_cast %194 : vector<1x1x10xf32> to vector<1x10xf32>
    %196 = vector.extract_strided_slice %191 {offsets = [0, 0], sizes = [10, 8], strides = [1, 1]} : vector<10x32xf32> to vector<10x8xf32>
    %197 = vector.extract_strided_slice %192 {offsets = [0, 0], sizes = [10, 8], strides = [1, 1]} : vector<10x32xf32> to vector<10x8xf32>
    %cst_80 = arith.constant dense<0.000000e+00> : vector<10x10xf32>
    %198 = tpu.matmul %196, %197, %cst_80 {dimension_numbers = #tpu.dot_dimension_numbers<[1], [1], [0], [0], [0, 0, 1, 0], [], []>} : vector<10x8xf32>, vector<10x8xf32>, vector<10x10xf32> -> vector<10x10xf32>
    %cst_81 = arith.constant 0.353553385 : f32
    %199 = vector.broadcast %cst_81 : f32 to vector<10x10xf32>
    %200 = arith.mulf %198, %199 : vector<10x10xf32>
    %201 = vector.broadcast %195 : vector<1x10xf32> to vector<10x10xf32>
    %202 = arith.addf %200, %201 : vector<10x10xf32>
    %cst_82 = arith.constant dense<0xFF800000> : vector<10xf32>
    %203 = vector.multi_reduction <maximumf>, %202, %cst_82 [1] : vector<10x10xf32> to vector<10xf32>
    %204 = vector.shape_cast %203 : vector<10xf32> to vector<10x1xf32>
    %205 = vector.broadcast %204 : vector<10x1xf32> to vector<10x10xf32>
    %206 = arith.subf %202, %205 : vector<10x10xf32>
    %207 = math.exp %206 : vector<10x10xf32>
    %cst_83 = arith.constant dense<0.000000e+00> : vector<10xf32>
    %208 = vector.multi_reduction <add>, %207, %cst_83 [1] : vector<10x10xf32> to vector<10xf32>
    %209 = vector.shape_cast %208 : vector<10xf32> to vector<10x1xf32>
    %210 = vector.broadcast %209 : vector<10x1xf32> to vector<10x10xf32>
    %211 = arith.divf %207, %210 : vector<10x10xf32>
    %212 = vector.extract_strided_slice %193 {offsets = [0, 0], sizes = [10, 8], strides = [1, 1]} : vector<10x32xf32> to vector<10x8xf32>
    %cst_84 = arith.constant dense<0.000000e+00> : vector<10x8xf32>
    %213 = tpu.matmul %211, %212, %cst_84 {dimension_numbers = #tpu.dot_dimension_numbers<[1], [0], [0], [1], [0, 0, 1, 1], [], []>} : vector<10x10xf32>, vector<10x8xf32>, vector<10x8xf32> -> vector<10x8xf32>
    %214 = vector.extract_strided_slice %2 {offsets = [0, 0], sizes = [8, 32], strides = [1, 1]} : vector<32x32xf32> to vector<8x32xf32>
    %cst_85 = arith.constant dense<0.000000e+00> : vector<10x32xf32>
    %215 = tpu.matmul %213, %214, %cst_85 {dimension_numbers = #tpu.dot_dimension_numbers<[1], [0], [0], [1], [0, 0, 1, 1], [], []>} : vector<10x8xf32>, vector<8x32xf32>, vector<10x32xf32> -> vector<10x32xf32>
    %216 = vector.extract_strided_slice %191 {offsets = [0, 8], sizes = [10, 8], strides = [1, 1]} : vector<10x32xf32> to vector<10x8xf32>
    %217 = vector.extract_strided_slice %192 {offsets = [0, 8], sizes = [10, 8], strides = [1, 1]} : vector<10x32xf32> to vector<10x8xf32>
    %cst_86 = arith.constant dense<0.000000e+00> : vector<10x10xf32>
    %218 = tpu.matmul %216, %217, %cst_86 {dimension_numbers = #tpu.dot_dimension_numbers<[1], [1], [0], [0], [0, 0, 1, 0], [], []>} : vector<10x8xf32>, vector<10x8xf32>, vector<10x10xf32> -> vector<10x10xf32>
    %cst_87 = arith.constant 0.353553385 : f32
    %219 = vector.broadcast %cst_87 : f32 to vector<10x10xf32>
    %220 = arith.mulf %218, %219 : vector<10x10xf32>
    %221 = vector.broadcast %195 : vector<1x10xf32> to vector<10x10xf32>
    %222 = arith.addf %220, %221 : vector<10x10xf32>
    %cst_88 = arith.constant dense<0xFF800000> : vector<10xf32>
    %223 = vector.multi_reduction <maximumf>, %222, %cst_88 [1] : vector<10x10xf32> to vector<10xf32>
    %224 = vector.shape_cast %223 : vector<10xf32> to vector<10x1xf32>
    %225 = vector.broadcast %224 : vector<10x1xf32> to vector<10x10xf32>
    %226 = arith.subf %222, %225 : vector<10x10xf32>
    %227 = math.exp %226 : vector<10x10xf32>
    %cst_89 = arith.constant dense<0.000000e+00> : vector<10xf32>
    %228 = vector.multi_reduction <add>, %227, %cst_89 [1] : vector<10x10xf32> to vector<10xf32>
    %229 = vector.shape_cast %228 : vector<10xf32> to vector<10x1xf32>
    %230 = vector.broadcast %229 : vector<10x1xf32> to vector<10x10xf32>
    %231 = arith.divf %227, %230 : vector<10x10xf32>
    %232 = vector.extract_strided_slice %193 {offsets = [0, 8], sizes = [10, 8], strides = [1, 1]} : vector<10x32xf32> to vector<10x8xf32>
    %cst_90 = arith.constant dense<0.000000e+00> : vector<10x8xf32>
    %233 = tpu.matmul %231, %232, %cst_90 {dimension_numbers = #tpu.dot_dimension_numbers<[1], [0], [0], [1], [0, 0, 1, 1], [], []>} : vector<10x10xf32>, vector<10x8xf32>, vector<10x8xf32> -> vector<10x8xf32>
    %234 = vector.extract_strided_slice %2 {offsets = [8, 0], sizes = [8, 32], strides = [1, 1]} : vector<32x32xf32> to vector<8x32xf32>
    %cst_91 = arith.constant dense<0.000000e+00> : vector<10x32xf32>
    %235 = tpu.matmul %233, %234, %cst_91 {dimension_numbers = #tpu.dot_dimension_numbers<[1], [0], [0], [1], [0, 0, 1, 1], [], []>} : vector<10x8xf32>, vector<8x32xf32>, vector<10x32xf32> -> vector<10x32xf32>
    %236 = arith.addf %215, %235 : vector<10x32xf32>
    %237 = vector.extract_strided_slice %191 {offsets = [0, 16], sizes = [10, 8], strides = [1, 1]} : vector<10x32xf32> to vector<10x8xf32>
    %238 = vector.extract_strided_slice %192 {offsets = [0, 16], sizes = [10, 8], strides = [1, 1]} : vector<10x32xf32> to vector<10x8xf32>
    %cst_92 = arith.constant dense<0.000000e+00> : vector<10x10xf32>
    %239 = tpu.matmul %237, %238, %cst_92 {dimension_numbers = #tpu.dot_dimension_numbers<[1], [1], [0], [0], [0, 0, 1, 0], [], []>} : vector<10x8xf32>, vector<10x8xf32>, vector<10x10xf32> -> vector<10x10xf32>
    %cst_93 = arith.constant 0.353553385 : f32
    %240 = vector.broadcast %cst_93 : f32 to vector<10x10xf32>
    %241 = arith.mulf %239, %240 : vector<10x10xf32>
    %242 = vector.broadcast %195 : vector<1x10xf32> to vector<10x10xf32>
    %243 = arith.addf %241, %242 : vector<10x10xf32>
    %cst_94 = arith.constant dense<0xFF800000> : vector<10xf32>
    %244 = vector.multi_reduction <maximumf>, %243, %cst_94 [1] : vector<10x10xf32> to vector<10xf32>
    %245 = vector.shape_cast %244 : vector<10xf32> to vector<10x1xf32>
    %246 = vector.broadcast %245 : vector<10x1xf32> to vector<10x10xf32>
    %247 = arith.subf %243, %246 : vector<10x10xf32>
    %248 = math.exp %247 : vector<10x10xf32>
    %cst_95 = arith.constant dense<0.000000e+00> : vector<10xf32>
    %249 = vector.multi_reduction <add>, %248, %cst_95 [1] : vector<10x10xf32> to vector<10xf32>
    %250 = vector.shape_cast %249 : vector<10xf32> to vector<10x1xf32>
    %251 = vector.broadcast %250 : vector<10x1xf32> to vector<10x10xf32>
    %252 = arith.divf %248, %251 : vector<10x10xf32>
    %253 = vector.extract_strided_slice %193 {offsets = [0, 16], sizes = [10, 8], strides = [1, 1]} : vector<10x32xf32> to vector<10x8xf32>
    %cst_96 = arith.constant dense<0.000000e+00> : vector<10x8xf32>
    %254 = tpu.matmul %252, %253, %cst_96 {dimension_numbers = #tpu.dot_dimension_numbers<[1], [0], [0], [1], [0, 0, 1, 1], [], []>} : vector<10x10xf32>, vector<10x8xf32>, vector<10x8xf32> -> vector<10x8xf32>
    %255 = vector.extract_strided_slice %2 {offsets = [16, 0], sizes = [8, 32], strides = [1, 1]} : vector<32x32xf32> to vector<8x32xf32>
    %cst_97 = arith.constant dense<0.000000e+00> : vector<10x32xf32>
    %256 = tpu.matmul %254, %255, %cst_97 {dimension_numbers = #tpu.dot_dimension_numbers<[1], [0], [0], [1], [0, 0, 1, 1], [], []>} : vector<10x8xf32>, vector<8x32xf32>, vector<10x32xf32> -> vector<10x32xf32>
    %257 = arith.addf %236, %256 : vector<10x32xf32>
    %258 = vector.extract_strided_slice %191 {offsets = [0, 24], sizes = [10, 8], strides = [1, 1]} : vector<10x32xf32> to vector<10x8xf32>
    %259 = vector.extract_strided_slice %192 {offsets = [0, 24], sizes = [10, 8], strides = [1, 1]} : vector<10x32xf32> to vector<10x8xf32>
    %cst_98 = arith.constant dense<0.000000e+00> : vector<10x10xf32>
    %260 = tpu.matmul %258, %259, %cst_98 {dimension_numbers = #tpu.dot_dimension_numbers<[1], [1], [0], [0], [0, 0, 1, 0], [], []>} : vector<10x8xf32>, vector<10x8xf32>, vector<10x10xf32> -> vector<10x10xf32>
    %cst_99 = arith.constant 0.353553385 : f32
    %261 = vector.broadcast %cst_99 : f32 to vector<10x10xf32>
    %262 = arith.mulf %260, %261 : vector<10x10xf32>
    %263 = vector.broadcast %195 : vector<1x10xf32> to vector<10x10xf32>
    %264 = arith.addf %262, %263 : vector<10x10xf32>
    %cst_100 = arith.constant dense<0xFF800000> : vector<10xf32>
    %265 = vector.multi_reduction <maximumf>, %264, %cst_100 [1] : vector<10x10xf32> to vector<10xf32>
    %266 = vector.shape_cast %265 : vector<10xf32> to vector<10x1xf32>
    %267 = vector.broadcast %266 : vector<10x1xf32> to vector<10x10xf32>
    %268 = arith.subf %264, %267 : vector<10x10xf32>
    %269 = math.exp %268 : vector<10x10xf32>
    %cst_101 = arith.constant dense<0.000000e+00> : vector<10xf32>
    %270 = vector.multi_reduction <add>, %269, %cst_101 [1] : vector<10x10xf32> to vector<10xf32>
    %271 = vector.shape_cast %270 : vector<10xf32> to vector<10x1xf32>
    %272 = vector.broadcast %271 : vector<10x1xf32> to vector<10x10xf32>
    %273 = arith.divf %269, %272 : vector<10x10xf32>
    %274 = vector.extract_strided_slice %193 {offsets = [0, 24], sizes = [10, 8], strides = [1, 1]} : vector<10x32xf32> to vector<10x8xf32>
    %cst_102 = arith.constant dense<0.000000e+00> : vector<10x8xf32>
    %275 = tpu.matmul %273, %274, %cst_102 {dimension_numbers = #tpu.dot_dimension_numbers<[1], [0], [0], [1], [0, 0, 1, 1], [], []>} : vector<10x10xf32>, vector<10x8xf32>, vector<10x8xf32> -> vector<10x8xf32>
    %276 = vector.extract_strided_slice %2 {offsets = [24, 0], sizes = [8, 32], strides = [1, 1]} : vector<32x32xf32> to vector<8x32xf32>
    %cst_103 = arith.constant dense<0.000000e+00> : vector<10x32xf32>
    %277 = tpu.matmul %275, %276, %cst_103 {dimension_numbers = #tpu.dot_dimension_numbers<[1], [0], [0], [1], [0, 0, 1, 1], [], []>} : vector<10x8xf32>, vector<8x32xf32>, vector<10x32xf32> -> vector<10x32xf32>
    %278 = arith.addf %257, %277 : vector<10x32xf32>
    %279 = arith.addf %165, %278 : vector<10x32xf32>
    %280 = vector.broadcast %3 : vector<1x32xf32> to vector<10x32xf32>
    %281 = arith.addf %279, %280 : vector<10x32xf32>
    %cst_104 = arith.constant dense<0.000000e+00> : vector<10xf32>
    %282 = vector.multi_reduction <add>, %281, %cst_104 [1] : vector<10x32xf32> to vector<10xf32>
    %283 = vector.shape_cast %282 : vector<10xf32> to vector<10x1xf32>
    %cst_105 = arith.constant 3.200000e+01 : f32
    %284 = vector.broadcast %cst_105 : f32 to vector<10x1xf32>
    %285 = arith.divf %283, %284 : vector<10x1xf32>
    %286 = vector.broadcast %285 : vector<10x1xf32> to vector<10x32xf32>
    %287 = arith.subf %281, %286 : vector<10x32xf32>
    %288 = arith.mulf %287, %287 : vector<10x32xf32>
    %cst_106 = arith.constant dense<0.000000e+00> : vector<10xf32>
    %289 = vector.multi_reduction <add>, %288, %cst_106 [1] : vector<10x32xf32> to vector<10xf32>
    %290 = vector.shape_cast %289 : vector<10xf32> to vector<10x1xf32>
    %cst_107 = arith.constant 3.200000e+01 : f32
    %291 = vector.broadcast %cst_107 : f32 to vector<10x1xf32>
    %292 = arith.divf %290, %291 : vector<10x1xf32>
    %293 = vector.broadcast %285 : vector<10x1xf32> to vector<10x32xf32>
    %294 = arith.subf %281, %293 : vector<10x32xf32>
    %cst_108 = arith.constant 9.99999974E-6 : f32
    %295 = vector.broadcast %cst_108 : f32 to vector<10x1xf32>
    %296 = arith.addf %292, %295 : vector<10x1xf32>
    %297 = math.rsqrt %296 : vector<10x1xf32>
    %298 = vector.broadcast %297 : vector<10x1xf32> to vector<10x32xf32>
    %299 = arith.mulf %294, %298 : vector<10x32xf32>
    %300 = vector.broadcast %10 : vector<1x32xf32> to vector<10x32xf32>
    %301 = arith.mulf %299, %300 : vector<10x32xf32>
    %302 = vector.broadcast %11 : vector<1x32xf32> to vector<10x32xf32>
    %303 = arith.addf %301, %302 : vector<10x32xf32>
    %cst_109 = arith.constant dense<0.000000e+00> : vector<10x64xf32>
    %304 = tpu.matmul %303, %4, %cst_109 {dimension_numbers = #tpu.dot_dimension_numbers<[1], [0], [0], [1], [0, 0, 1, 1], [], []>} : vector<10x32xf32>, vector<32x64xf32>, vector<10x64xf32> -> vector<10x64xf32>
    %305 = vector.broadcast %5 : vector<1x64xf32> to vector<10x64xf32>
    %306 = arith.addf %304, %305 : vector<10x64xf32>
    %cst_110 = arith.constant 0.000000e+00 : f32
    %307 = vector.broadcast %cst_110 : f32 to vector<10x64xf32>
    %308 = arith.maximumf %306, %307 : vector<10x64xf32>
    %cst_111 = arith.constant dense<0.000000e+00> : vector<10x32xf32>
    %309 = tpu.matmul %308, %6, %cst_111 {dimension_numbers = #tpu.dot_dimension_numbers<[1], [0], [0], [1], [0, 0, 1, 1], [], []>} : vector<10x64xf32>, vector<64x32xf32>, vector<10x32xf32> -> vector<10x32xf32>
    %310 = vector.broadcast %7 : vector<1x32xf32> to vector<10x32xf32>
    %311 = arith.addf %309, %310 : vector<10x32xf32>
    %312 = arith.addf %281, %311 : vector<10x32xf32>
    %c1_112 = arith.constant 1 : index
    %c0_113 = arith.constant 0 : index
    %c0_114 = arith.constant 0 : index
    %313 = vector.load %arg15[%c1_112, %c0_113, %c0_114] : memref<2x10x32xf32, #tpu.memory_space<vmem>>, vector<1x10x32xf32>
    %314 = vector.shape_cast %313 : vector<1x10x32xf32> to vector<10x32xf32>
    %315 = vector.shape_cast %312 : vector<10x32xf32> to vector<1x10x32xf32>
    tpu.vector_store %arg15[%c1_112, %c0_113, %c0_114], %315 {strides = array<i32>} : memref<2x10x32xf32, #tpu.memory_space<vmem>>, vector<1x10x32xf32>,
    return
  }
  func.func @transform_0(%arg0: i32) -> (i32, i32, i32) {
    %c0_i32 = arith.constant 0 : i32
    %c0_i32_0 = arith.constant 0 : i32
    %c0_i32_1 = arith.constant 0 : i32
    %c0_i32_2 = arith.constant 0 : i32
    return %c0_i32, %c0_i32_0, %c0_i32_1 : i32, i32, i32
  }
  func.func @transform_1(%arg0: i32) -> (i32, i32, i32) {
    %c0_i32 = arith.constant 0 : i32
    %c0_i32_0 = arith.constant 0 : i32
    %c0_i32_1 = arith.constant 0 : i32
    %c0_i32_2 = arith.constant 0 : i32
    return %c0_i32, %c0_i32_0, %c0_i32_1 : i32, i32, i32
  }
  func.func @transform_2(%arg0: i32) -> (i32, i32) {
    %c0_i32 = arith.constant 0 : i32
    %c0_i32_0 = arith.constant 0 : i32
    %c0_i32_1 = arith.constant 0 : i32
    return %c0_i32, %c0_i32_0 : i32, i32
  }
  func.func @transform_3(%arg0: i32) -> (i32, i32) {
    %c0_i32 = arith.constant 0 : i32
    %c0_i32_0 = arith.constant 0 : i32
    %c0_i32_1 = arith.constant 0 : i32
    return %c0_i32, %c0_i32_0 : i32, i32
  }
  func.func @transform_4(%arg0: i32) -> (i32, i32) {
    %c0_i32 = arith.constant 0 : i32
    %c0_i32_0 = arith.constant 0 : i32
    %c0_i32_1 = arith.constant 0 : i32
    return %c0_i32, %c0_i32_0 : i32, i32
  }
  func.func @transform_5(%arg0: i32) -> (i32, i32) {
    %c0_i32 = arith.constant 0 : i32
    %c0_i32_0 = arith.constant 0 : i32
    %c0_i32_1 = arith.constant 0 : i32
    return %c0_i32, %c0_i32_0 : i32, i32
  }
  func.func @transform_6(%arg0: i32) -> (i32, i32) {
    %c0_i32 = arith.constant 0 : i32
    %c0_i32_0 = arith.constant 0 : i32
    %c0_i32_1 = arith.constant 0 : i32
    return %c0_i32, %c0_i32_0 : i32, i32
  }
  func.func @transform_7(%arg0: i32) -> (i32, i32) {
    %c0_i32 = arith.constant 0 : i32
    %c0_i32_0 = arith.constant 0 : i32
    %c0_i32_1 = arith.constant 0 : i32
    return %c0_i32, %c0_i32_0 : i32, i32
  }
  func.func @transform_8(%arg0: i32) -> (i32, i32) {
    %c0_i32 = arith.constant 0 : i32
    %c0_i32_0 = arith.constant 0 : i32
    %c0_i32_1 = arith.constant 0 : i32
    return %c0_i32, %c0_i32_0 : i32, i32
  }
  func.func @transform_9(%arg0: i32) -> (i32, i32) {
    %c0_i32 = arith.constant 0 : i32
    %c0_i32_0 = arith.constant 0 : i32
    %c0_i32_1 = arith.constant 0 : i32
    return %c0_i32, %c0_i32_0 : i32, i32
  }
  func.func @transform_10(%arg0: i32) -> (i32, i32) {
    %c0_i32 = arith.constant 0 : i32
    %c0_i32_0 = arith.constant 0 : i32
    %c0_i32_1 = arith.constant 0 : i32
    return %c0_i32, %c0_i32_0 : i32, i32
  }
  func.func @transform_11(%arg0: i32) -> (i32, i32) {
    %c0_i32 = arith.constant 0 : i32
    %c0_i32_0 = arith.constant 0 : i32
    %c0_i32_1 = arith.constant 0 : i32
    return %c0_i32, %c0_i32_0 : i32, i32
  }
  func.func @transform_12(%arg0: i32) -> (i32, i32) {
    %c0_i32 = arith.constant 0 : i32
    %c0_i32_0 = arith.constant 0 : i32
    %c0_i32_1 = arith.constant 0 : i32
    return %c0_i32, %c0_i32_0 : i32, i32
  }
  func.func @transform_13(%arg0: i32) -> (i32, i32) {
    %c0_i32 = arith.constant 0 : i32
    %c0_i32_0 = arith.constant 0 : i32
    %c0_i32_1 = arith.constant 0 : i32
    return %c0_i32, %c0_i32_0 : i32, i32
  }
  func.func @transform_14(%arg0: i32) -> (i32, i32, i32) {
    %c0_i32 = arith.constant 0 : i32
    %c0_i32_0 = arith.constant 0 : i32
    %c0_i32_1 = arith.constant 0 : i32
    %c0_i32_2 = arith.constant 0 : i32
    return %c0_i32, %c0_i32_0, %c0_i32_1 : i32, i32, i32
  }
}

module attributes {stable_mosaic.version = 11 : i64} {
  func.func @_ln_kernel(%arg0: i32, %arg1: memref<20x32xf32, #tpu.memory_space<vmem>>, %arg2: memref<1x32xf32, #tpu.memory_space<vmem>>, %arg3: memref<1x32xf32, #tpu.memory_space<vmem>>, %arg4: memref<20x32xf32, #tpu.memory_space<vmem>>) attributes {dimension_semantics = [#tpu.dimension_semantics<parallel>], iteration_bounds = array<i64: 1>, scalar_prefetch = 0 : i64, scratch_operands = 0 : i64, tpu.core_type = #tpu.core_type<tc>, window_params = [{pipeline_mode = #tpu.pipeline_mode<synchronous>, transform_indices = @transform_0, window_bounds = array<i64: 20, 32>}, {pipeline_mode = #tpu.pipeline_mode<synchronous>, transform_indices = @transform_1, window_bounds = array<i64: 1, 32>}, {pipeline_mode = #tpu.pipeline_mode<synchronous>, transform_indices = @transform_2, window_bounds = array<i64: 1, 32>}, {pipeline_mode = #tpu.pipeline_mode<synchronous>, transform_indices = @transform_3, window_bounds = array<i64: 20, 32>}]} {
    %c0 = arith.constant 0 : index
    %c0_0 = arith.constant 0 : index
    %0 = vector.load %arg1[%c0, %c0_0] : memref<20x32xf32, #tpu.memory_space<vmem>>, vector<20x32xf32>
    %c0_1 = arith.constant 0 : index
    %c0_2 = arith.constant 0 : index
    %1 = vector.load %arg2[%c0_1, %c0_2] : memref<1x32xf32, #tpu.memory_space<vmem>>, vector<1x32xf32>
    %c0_3 = arith.constant 0 : index
    %c0_4 = arith.constant 0 : index
    %2 = vector.load %arg3[%c0_3, %c0_4] : memref<1x32xf32, #tpu.memory_space<vmem>>, vector<1x32xf32>
    %cst = arith.constant dense<0.000000e+00> : vector<20xf32>
    %3 = vector.multi_reduction <add>, %0, %cst [1] : vector<20x32xf32> to vector<20xf32>
    %4 = vector.shape_cast %3 : vector<20xf32> to vector<20x1xf32>
    %cst_5 = arith.constant 3.200000e+01 : f32
    %5 = vector.broadcast %cst_5 : f32 to vector<20x1xf32>
    %6 = arith.divf %4, %5 : vector<20x1xf32>
    %7 = vector.broadcast %6 : vector<20x1xf32> to vector<20x32xf32>
    %8 = arith.subf %0, %7 : vector<20x32xf32>
    %9 = arith.mulf %8, %8 : vector<20x32xf32>
    %cst_6 = arith.constant dense<0.000000e+00> : vector<20xf32>
    %10 = vector.multi_reduction <add>, %9, %cst_6 [1] : vector<20x32xf32> to vector<20xf32>
    %11 = vector.shape_cast %10 : vector<20xf32> to vector<20x1xf32>
    %cst_7 = arith.constant 3.200000e+01 : f32
    %12 = vector.broadcast %cst_7 : f32 to vector<20x1xf32>
    %13 = arith.divf %11, %12 : vector<20x1xf32>
    %14 = vector.broadcast %6 : vector<20x1xf32> to vector<20x32xf32>
    %15 = arith.subf %0, %14 : vector<20x32xf32>
    %cst_8 = arith.constant 9.99999974E-6 : f32
    %16 = vector.broadcast %cst_8 : f32 to vector<20x1xf32>
    %17 = arith.addf %13, %16 : vector<20x1xf32>
    %18 = math.rsqrt %17 : vector<20x1xf32>
    %19 = vector.broadcast %18 : vector<20x1xf32> to vector<20x32xf32>
    %20 = arith.mulf %15, %19 : vector<20x32xf32>
    %21 = vector.broadcast %1 : vector<1x32xf32> to vector<20x32xf32>
    %22 = arith.mulf %20, %21 : vector<20x32xf32>
    %23 = vector.broadcast %2 : vector<1x32xf32> to vector<20x32xf32>
    %24 = arith.addf %22, %23 : vector<20x32xf32>
    %c0_9 = arith.constant 0 : index
    %c0_10 = arith.constant 0 : index
    %25 = vector.load %arg4[%c0_9, %c0_10] : memref<20x32xf32, #tpu.memory_space<vmem>>, vector<20x32xf32>
    tpu.vector_store %arg4[%c0_9, %c0_10], %24 {strides = array<i32>} : memref<20x32xf32, #tpu.memory_space<vmem>>, vector<20x32xf32>,
    return
  }
  func.func @transform_0(%arg0: i32) -> (i32, i32) {
    %c0_i32 = arith.constant 0 : i32
    %c0_i32_0 = arith.constant 0 : i32
    %c0_i32_1 = arith.constant 0 : i32
    return %c0_i32, %c0_i32_0 : i32, i32
  }
  func.func @transform_1(%arg0: i32) -> (i32, i32) {
    %c0_i32 = arith.constant 0 : i32
    %c0_i32_0 = arith.constant 0 : i32
    %c0_i32_1 = arith.constant 0 : i32
    return %c0_i32, %c0_i32_0 : i32, i32
  }
  func.func @transform_2(%arg0: i32) -> (i32, i32) {
    %c0_i32 = arith.constant 0 : i32
    %c0_i32_0 = arith.constant 0 : i32
    %c0_i32_1 = arith.constant 0 : i32
    return %c0_i32, %c0_i32_0 : i32, i32
  }
  func.func @transform_3(%arg0: i32) -> (i32, i32) {
    %c0_i32 = arith.constant 0 : i32
    %c0_i32_0 = arith.constant 0 : i32
    %c0_i32_1 = arith.constant 0 : i32
    return %c0_i32, %c0_i32_0 : i32, i32
  }
}

module attributes {stable_mosaic.version = 11 : i64} {
  func.func @_vae_kernel(%arg0: i32, %arg1: memref<10x32xf32, #tpu.memory_space<vmem>>, %arg2: memref<10x32xf32, #tpu.memory_space<vmem>>, %arg3: memref<10x1xf32, #tpu.memory_space<vmem>>, %arg4: memref<10x32xf32, #tpu.memory_space<vmem>>, %arg5: memref<32x64xf32, #tpu.memory_space<vmem>>, %arg6: memref<1x64xf32, #tpu.memory_space<vmem>>, %arg7: memref<32x32xf32, #tpu.memory_space<vmem>>, %arg8: memref<1x32xf32, #tpu.memory_space<vmem>>, %arg9: memref<32x32xf32, #tpu.memory_space<vmem>>, %arg10: memref<1x32xf32, #tpu.memory_space<vmem>>, %arg11: memref<10x32xf32, #tpu.memory_space<vmem>>, %arg12: memref<1x1xf32, #tpu.memory_space<vmem>>) attributes {dimension_semantics = [#tpu.dimension_semantics<parallel>], iteration_bounds = array<i64: 1>, scalar_prefetch = 0 : i64, scratch_operands = 0 : i64, tpu.core_type = #tpu.core_type<tc>, window_params = [{pipeline_mode = #tpu.pipeline_mode<synchronous>, transform_indices = @transform_0, window_bounds = array<i64: 10, 32>}, {pipeline_mode = #tpu.pipeline_mode<synchronous>, transform_indices = @transform_1, window_bounds = array<i64: 10, 32>}, {pipeline_mode = #tpu.pipeline_mode<synchronous>, transform_indices = @transform_2, window_bounds = array<i64: 10, 1>}, {pipeline_mode = #tpu.pipeline_mode<synchronous>, transform_indices = @transform_3, window_bounds = array<i64: 10, 32>}, {pipeline_mode = #tpu.pipeline_mode<synchronous>, transform_indices = @transform_4, window_bounds = array<i64: 32, 64>}, {pipeline_mode = #tpu.pipeline_mode<synchronous>, transform_indices = @transform_5, window_bounds = array<i64: 1, 64>}, {pipeline_mode = #tpu.pipeline_mode<synchronous>, transform_indices = @transform_6, window_bounds = array<i64: 32, 32>}, {pipeline_mode = #tpu.pipeline_mode<synchronous>, transform_indices = @transform_7, window_bounds = array<i64: 1, 32>}, {pipeline_mode = #tpu.pipeline_mode<synchronous>, transform_indices = @transform_8, window_bounds = array<i64: 32, 32>}, {pipeline_mode = #tpu.pipeline_mode<synchronous>, transform_indices = @transform_9, window_bounds = array<i64: 1, 32>}, {pipeline_mode = #tpu.pipeline_mode<synchronous>, transform_indices = @transform_10, window_bounds = array<i64: 10, 32>}, {pipeline_mode = #tpu.pipeline_mode<synchronous>, transform_indices = @transform_11, window_bounds = array<i64: 1, 1>}]} {
    %c0 = arith.constant 0 : index
    %c0_0 = arith.constant 0 : index
    %0 = vector.load %arg1[%c0, %c0_0] : memref<10x32xf32, #tpu.memory_space<vmem>>, vector<10x32xf32>
    %c0_1 = arith.constant 0 : index
    %c0_2 = arith.constant 0 : index
    %1 = vector.load %arg5[%c0_1, %c0_2] : memref<32x64xf32, #tpu.memory_space<vmem>>, vector<32x64xf32>
    %cst = arith.constant dense<0.000000e+00> : vector<10x64xf32>
    %2 = tpu.matmul %0, %1, %cst {dimension_numbers = #tpu.dot_dimension_numbers<[1], [0], [0], [1], [0, 0, 1, 1], [], []>} : vector<10x32xf32>, vector<32x64xf32>, vector<10x64xf32> -> vector<10x64xf32>
    %c0_3 = arith.constant 0 : index
    %c0_4 = arith.constant 0 : index
    %3 = vector.load %arg6[%c0_3, %c0_4] : memref<1x64xf32, #tpu.memory_space<vmem>>, vector<1x64xf32>
    %4 = vector.broadcast %3 : vector<1x64xf32> to vector<10x64xf32>
    %5 = arith.addf %2, %4 : vector<10x64xf32>
    %cst_5 = arith.constant 0.000000e+00 : f32
    %6 = vector.broadcast %cst_5 : f32 to vector<10x64xf32>
    %7 = arith.maximumf %5, %6 : vector<10x64xf32>
    %8 = vector.extract_strided_slice %7 {offsets = [0, 0], sizes = [10, 32], strides = [1, 1]} : vector<10x64xf32> to vector<10x32xf32>
    %c0_6 = arith.constant 0 : index
    %c0_7 = arith.constant 0 : index
    %9 = vector.load %arg7[%c0_6, %c0_7] : memref<32x32xf32, #tpu.memory_space<vmem>>, vector<32x32xf32>
    %cst_8 = arith.constant dense<0.000000e+00> : vector<10x32xf32>
    %10 = tpu.matmul %8, %9, %cst_8 {dimension_numbers = #tpu.dot_dimension_numbers<[1], [0], [0], [1], [0, 0, 1, 1], [], []>} : vector<10x32xf32>, vector<32x32xf32>, vector<10x32xf32> -> vector<10x32xf32>
    %c0_9 = arith.constant 0 : index
    %c0_10 = arith.constant 0 : index
    %11 = vector.load %arg8[%c0_9, %c0_10] : memref<1x32xf32, #tpu.memory_space<vmem>>, vector<1x32xf32>
    %12 = vector.broadcast %11 : vector<1x32xf32> to vector<10x32xf32>
    %13 = arith.addf %10, %12 : vector<10x32xf32>
    %14 = vector.extract_strided_slice %7 {offsets = [0, 32], sizes = [10, 32], strides = [1, 1]} : vector<10x64xf32> to vector<10x32xf32>
    %c0_11 = arith.constant 0 : index
    %c0_12 = arith.constant 0 : index
    %15 = vector.load %arg9[%c0_11, %c0_12] : memref<32x32xf32, #tpu.memory_space<vmem>>, vector<32x32xf32>
    %cst_13 = arith.constant dense<0.000000e+00> : vector<10x32xf32>
    %16 = tpu.matmul %14, %15, %cst_13 {dimension_numbers = #tpu.dot_dimension_numbers<[1], [0], [0], [1], [0, 0, 1, 1], [], []>} : vector<10x32xf32>, vector<32x32xf32>, vector<10x32xf32> -> vector<10x32xf32>
    %c0_14 = arith.constant 0 : index
    %c0_15 = arith.constant 0 : index
    %17 = vector.load %arg10[%c0_14, %c0_15] : memref<1x32xf32, #tpu.memory_space<vmem>>, vector<1x32xf32>
    %18 = vector.broadcast %17 : vector<1x32xf32> to vector<10x32xf32>
    %19 = arith.addf %16, %18 : vector<10x32xf32>
    %20 = math.absf %19 : vector<10x32xf32>
    %cst_16 = arith.constant 0.000000e+00 : f32
    %21 = vector.broadcast %cst_16 : f32 to vector<10x32xf32>
    %22 = arith.subf %21, %20 : vector<10x32xf32>
    %cst_17 = arith.constant 1.000000e+00 : f32
    %23 = vector.broadcast %cst_17 : f32 to vector<10x32xf32>
    %24 = arith.addf %23, %22 : vector<10x32xf32>
    %25 = arith.mulf %13, %13 : vector<10x32xf32>
    %26 = arith.subf %24, %25 : vector<10x32xf32>
    %27 = math.exp %22 : vector<10x32xf32>
    %28 = arith.subf %26, %27 : vector<10x32xf32>
    %29 = vector.shape_cast %28 : vector<10x32xf32> to vector<1x10x32xf32>
    %cst_18 = arith.constant dense<0.000000e+00> : vector<1xf32>
    %30 = vector.multi_reduction <add>, %29, %cst_18 [1, 2] : vector<1x10x32xf32> to vector<1xf32>
    %31 = vector.shape_cast %30 : vector<1xf32> to vector<1x1x1xf32>
    %32 = vector.extract %31[0, 0, 0] : f32 from vector<1x1x1xf32>
    %cst_19 = arith.constant -5.000000e-01 : f32
    %33 = arith.mulf %cst_19, %32 : f32
    %cst_20 = arith.constant 6.400000e+01 : f32
    %34 = arith.divf %33, %cst_20 : f32
    %cst_21 = arith.constant 5.000000e-01 : f32
    %35 = vector.broadcast %cst_21 : f32 to vector<10x32xf32>
    %36 = arith.mulf %35, %22 : vector<10x32xf32>
    %37 = math.exp %36 : vector<10x32xf32>
    %c0_22 = arith.constant 0 : index
    %c0_23 = arith.constant 0 : index
    %38 = vector.load %arg4[%c0_22, %c0_23] : memref<10x32xf32, #tpu.memory_space<vmem>>, vector<10x32xf32>
    %39 = arith.mulf %37, %38 : vector<10x32xf32>
    %40 = arith.addf %13, %39 : vector<10x32xf32>
    %c0_24 = arith.constant 0 : index
    %c0_25 = arith.constant 0 : index
    %41 = vector.load %arg2[%c0_24, %c0_25] : memref<10x32xf32, #tpu.memory_space<vmem>>, vector<10x32xf32>
    %42 = arith.addf %40, %41 : vector<10x32xf32>
    %c0_26 = arith.constant 0 : index
    %c0_27 = arith.constant 0 : index
    %43 = vector.load %arg3[%c0_26, %c0_27] : memref<10x1xf32, #tpu.memory_space<vmem>>, vector<10x1xf32>
    %44 = vector.broadcast %43 : vector<10x1xf32> to vector<10x32xf32>
    %45 = arith.addf %42, %44 : vector<10x32xf32>
    %c0_28 = arith.constant 0 : index
    %c0_29 = arith.constant 0 : index
    %46 = vector.load %arg11[%c0_28, %c0_29] : memref<10x32xf32, #tpu.memory_space<vmem>>, vector<10x32xf32>
    tpu.vector_store %arg11[%c0_28, %c0_29], %45 {strides = array<i32>} : memref<10x32xf32, #tpu.memory_space<vmem>>, vector<10x32xf32>,
    %47 = vector.broadcast %34 : f32 to vector<1x1xf32>
    %c0_30 = arith.constant 0 : index
    %c0_31 = arith.constant 0 : index
    %48 = vector.load %arg12[%c0_30, %c0_31] : memref<1x1xf32, #tpu.memory_space<vmem>>, vector<1x1xf32>
    tpu.vector_store %arg12[%c0_30, %c0_31], %47 {strides = array<i32>} : memref<1x1xf32, #tpu.memory_space<vmem>>, vector<1x1xf32>,
    return
  }
  func.func @transform_0(%arg0: i32) -> (i32, i32) {
    %c0_i32 = arith.constant 0 : i32
    %c0_i32_0 = arith.constant 0 : i32
    %c0_i32_1 = arith.constant 0 : i32
    return %c0_i32, %c0_i32_0 : i32, i32
  }
  func.func @transform_1(%arg0: i32) -> (i32, i32) {
    %c0_i32 = arith.constant 0 : i32
    %c0_i32_0 = arith.constant 0 : i32
    %c0_i32_1 = arith.constant 0 : i32
    return %c0_i32, %c0_i32_0 : i32, i32
  }
  func.func @transform_2(%arg0: i32) -> (i32, i32) {
    %c0_i32 = arith.constant 0 : i32
    %c0_i32_0 = arith.constant 0 : i32
    %c0_i32_1 = arith.constant 0 : i32
    return %c0_i32, %c0_i32_0 : i32, i32
  }
  func.func @transform_3(%arg0: i32) -> (i32, i32) {
    %c0_i32 = arith.constant 0 : i32
    %c0_i32_0 = arith.constant 0 : i32
    %c0_i32_1 = arith.constant 0 : i32
    return %c0_i32, %c0_i32_0 : i32, i32
  }
  func.func @transform_4(%arg0: i32) -> (i32, i32) {
    %c0_i32 = arith.constant 0 : i32
    %c0_i32_0 = arith.constant 0 : i32
    %c0_i32_1 = arith.constant 0 : i32
    return %c0_i32, %c0_i32_0 : i32, i32
  }
  func.func @transform_5(%arg0: i32) -> (i32, i32) {
    %c0_i32 = arith.constant 0 : i32
    %c0_i32_0 = arith.constant 0 : i32
    %c0_i32_1 = arith.constant 0 : i32
    return %c0_i32, %c0_i32_0 : i32, i32
  }
  func.func @transform_6(%arg0: i32) -> (i32, i32) {
    %c0_i32 = arith.constant 0 : i32
    %c0_i32_0 = arith.constant 0 : i32
    %c0_i32_1 = arith.constant 0 : i32
    return %c0_i32, %c0_i32_0 : i32, i32
  }
  func.func @transform_7(%arg0: i32) -> (i32, i32) {
    %c0_i32 = arith.constant 0 : i32
    %c0_i32_0 = arith.constant 0 : i32
    %c0_i32_1 = arith.constant 0 : i32
    return %c0_i32, %c0_i32_0 : i32, i32
  }
  func.func @transform_8(%arg0: i32) -> (i32, i32) {
    %c0_i32 = arith.constant 0 : i32
    %c0_i32_0 = arith.constant 0 : i32
    %c0_i32_1 = arith.constant 0 : i32
    return %c0_i32, %c0_i32_0 : i32, i32
  }
  func.func @transform_9(%arg0: i32) -> (i32, i32) {
    %c0_i32 = arith.constant 0 : i32
    %c0_i32_0 = arith.constant 0 : i32
    %c0_i32_1 = arith.constant 0 : i32
    return %c0_i32, %c0_i32_0 : i32, i32
  }
  func.func @transform_10(%arg0: i32) -> (i32, i32) {
    %c0_i32 = arith.constant 0 : i32
    %c0_i32_0 = arith.constant 0 : i32
    %c0_i32_1 = arith.constant 0 : i32
    return %c0_i32, %c0_i32_0 : i32, i32
  }
  func.func @transform_11(%arg0: i32) -> (i32, i32) {
    %c0_i32 = arith.constant 0 : i32
    %c0_i32_0 = arith.constant 0 : i32
    %c0_i32_1 = arith.constant 0 : i32
    return %c0_i32, %c0_i32_0 : i32, i32
  }
}

module attributes {stable_mosaic.version = 11 : i64} {
  func.func @_dec_layer_kernel(%arg0: i32, %arg1: memref<2x8x32xf32, #tpu.memory_space<vmem>>, %arg2: memref<2x10x32xf32, #tpu.memory_space<vmem>>, %arg3: memref<8x8xf32, #tpu.memory_space<vmem>>, %arg4: memref<2x1x10xf32, #tpu.memory_space<vmem>>, %arg5: memref<1x32xf32, #tpu.memory_space<vmem>>, %arg6: memref<1x32xf32, #tpu.memory_space<vmem>>, %arg7: memref<32x96xf32, #tpu.memory_space<vmem>>, %arg8: memref<1x96xf32, #tpu.memory_space<vmem>>, %arg9: memref<32x32xf32, #tpu.memory_space<vmem>>, %arg10: memref<1x32xf32, #tpu.memory_space<vmem>>, %arg11: memref<1x32xf32, #tpu.memory_space<vmem>>, %arg12: memref<1x32xf32, #tpu.memory_space<vmem>>, %arg13: memref<32x32xf32, #tpu.memory_space<vmem>>, %arg14: memref<1x32xf32, #tpu.memory_space<vmem>>, %arg15: memref<32x64xf32, #tpu.memory_space<vmem>>, %arg16: memref<1x64xf32, #tpu.memory_space<vmem>>, %arg17: memref<32x32xf32, #tpu.memory_space<vmem>>, %arg18: memref<1x32xf32, #tpu.memory_space<vmem>>, %arg19: memref<1x32xf32, #tpu.memory_space<vmem>>, %arg20: memref<1x32xf32, #tpu.memory_space<vmem>>, %arg21: memref<32x64xf32, #tpu.memory_space<vmem>>, %arg22: memref<1x64xf32, #tpu.memory_space<vmem>>, %arg23: memref<64x32xf32, #tpu.memory_space<vmem>>, %arg24: memref<1x32xf32, #tpu.memory_space<vmem>>, %arg25: memref<2x8x32xf32, #tpu.memory_space<vmem>>) attributes {dimension_semantics = [#tpu.dimension_semantics<parallel>], iteration_bounds = array<i64: 1>, scalar_prefetch = 0 : i64, scratch_operands = 0 : i64, tpu.core_type = #tpu.core_type<tc>, window_params = [{pipeline_mode = #tpu.pipeline_mode<synchronous>, transform_indices = @transform_0, window_bounds = array<i64: 2, 8, 32>}, {pipeline_mode = #tpu.pipeline_mode<synchronous>, transform_indices = @transform_1, window_bounds = array<i64: 2, 10, 32>}, {pipeline_mode = #tpu.pipeline_mode<synchronous>, transform_indices = @transform_2, window_bounds = array<i64: 8, 8>}, {pipeline_mode = #tpu.pipeline_mode<synchronous>, transform_indices = @transform_3, window_bounds = array<i64: 2, 1, 10>}, {pipeline_mode = #tpu.pipeline_mode<synchronous>, transform_indices = @transform_4, window_bounds = array<i64: 1, 32>}, {pipeline_mode = #tpu.pipeline_mode<synchronous>, transform_indices = @transform_5, window_bounds = array<i64: 1, 32>}, {pipeline_mode = #tpu.pipeline_mode<synchronous>, transform_indices = @transform_6, window_bounds = array<i64: 32, 96>}, {pipeline_mode = #tpu.pipeline_mode<synchronous>, transform_indices = @transform_7, window_bounds = array<i64: 1, 96>}, {pipeline_mode = #tpu.pipeline_mode<synchronous>, transform_indices = @transform_8, window_bounds = array<i64: 32, 32>}, {pipeline_mode = #tpu.pipeline_mode<synchronous>, transform_indices = @transform_9, window_bounds = array<i64: 1, 32>}, {pipeline_mode = #tpu.pipeline_mode<synchronous>, transform_indices = @transform_10, window_bounds = array<i64: 1, 32>}, {pipeline_mode = #tpu.pipeline_mode<synchronous>, transform_indices = @transform_11, window_bounds = array<i64: 1, 32>}, {pipeline_mode = #tpu.pipeline_mode<synchronous>, transform_indices = @transform_12, window_bounds = array<i64: 32, 32>}, {pipeline_mode = #tpu.pipeline_mode<synchronous>, transform_indices = @transform_13, window_bounds = array<i64: 1, 32>}, {pipeline_mode = #tpu.pipeline_mode<synchronous>, transform_indices = @transform_14, window_bounds = array<i64: 32, 64>}, {pipeline_mode = #tpu.pipeline_mode<synchronous>, transform_indices = @transform_15, window_bounds = array<i64: 1, 64>}, {pipeline_mode = #tpu.pipeline_mode<synchronous>, transform_indices = @transform_16, window_bounds = array<i64: 32, 32>}, {pipeline_mode = #tpu.pipeline_mode<synchronous>, transform_indices = @transform_17, window_bounds = array<i64: 1, 32>}, {pipeline_mode = #tpu.pipeline_mode<synchronous>, transform_indices = @transform_18, window_bounds = array<i64: 1, 32>}, {pipeline_mode = #tpu.pipeline_mode<synchronous>, transform_indices = @transform_19, window_bounds = array<i64: 1, 32>}, {pipeline_mode = #tpu.pipeline_mode<synchronous>, transform_indices = @transform_20, window_bounds = array<i64: 32, 64>}, {pipeline_mode = #tpu.pipeline_mode<synchronous>, transform_indices = @transform_21, window_bounds = array<i64: 1, 64>}, {pipeline_mode = #tpu.pipeline_mode<synchronous>, transform_indices = @transform_22, window_bounds = array<i64: 64, 32>}, {pipeline_mode = #tpu.pipeline_mode<synchronous>, transform_indices = @transform_23, window_bounds = array<i64: 1, 32>}, {pipeline_mode = #tpu.pipeline_mode<synchronous>, transform_indices = @transform_24, window_bounds = array<i64: 2, 8, 32>}]} {
    %c0 = arith.constant 0 : index
    %c0_0 = arith.constant 0 : index
    %0 = vector.load %arg3[%c0, %c0_0] : memref<8x8xf32, #tpu.memory_space<vmem>>, vector<8x8xf32>
    %c0_1 = arith.constant 0 : index
    %c0_2 = arith.constant 0 : index
    %1 = vector.load %arg7[%c0_1, %c0_2] : memref<32x96xf32, #tpu.memory_space<vmem>>, vector<32x96xf32>
    %c0_3 = arith.constant 0 : index
    %c0_4 = arith.constant 0 : index
    %2 = vector.load %arg8[%c0_3, %c0_4] : memref<1x96xf32, #tpu.memory_space<vmem>>, vector<1x96xf32>
    %c0_5 = arith.constant 0 : index
    %c0_6 = arith.constant 0 : index
    %3 = vector.load %arg9[%c0_5, %c0_6] : memref<32x32xf32, #tpu.memory_space<vmem>>, vector<32x32xf32>
    %c0_7 = arith.constant 0 : index
    %c0_8 = arith.constant 0 : index
    %4 = vector.load %arg10[%c0_7, %c0_8] : memref<1x32xf32, #tpu.memory_space<vmem>>, vector<1x32xf32>
    %c0_9 = arith.constant 0 : index
    %c0_10 = arith.constant 0 : index
    %5 = vector.load %arg13[%c0_9, %c0_10] : memref<32x32xf32, #tpu.memory_space<vmem>>, vector<32x32xf32>
    %c0_11 = arith.constant 0 : index
    %c0_12 = arith.constant 0 : index
    %6 = vector.load %arg14[%c0_11, %c0_12] : memref<1x32xf32, #tpu.memory_space<vmem>>, vector<1x32xf32>
    %c0_13 = arith.constant 0 : index
    %c0_14 = arith.constant 0 : index
    %7 = vector.load %arg15[%c0_13, %c0_14] : memref<32x64xf32, #tpu.memory_space<vmem>>, vector<32x64xf32>
    %c0_15 = arith.constant 0 : index
    %c0_16 = arith.constant 0 : index
    %8 = vector.load %arg16[%c0_15, %c0_16] : memref<1x64xf32, #tpu.memory_space<vmem>>, vector<1x64xf32>
    %c0_17 = arith.constant 0 : index
    %c0_18 = arith.constant 0 : index
    %9 = vector.load %arg17[%c0_17, %c0_18] : memref<32x32xf32, #tpu.memory_space<vmem>>, vector<32x32xf32>
    %c0_19 = arith.constant 0 : index
    %c0_20 = arith.constant 0 : index
    %10 = vector.load %arg18[%c0_19, %c0_20] : memref<1x32xf32, #tpu.memory_space<vmem>>, vector<1x32xf32>
    %c0_21 = arith.constant 0 : index
    %c0_22 = arith.constant 0 : index
    %11 = vector.load %arg21[%c0_21, %c0_22] : memref<32x64xf32, #tpu.memory_space<vmem>>, vector<32x64xf32>
    %c0_23 = arith.constant 0 : index
    %c0_24 = arith.constant 0 : index
    %12 = vector.load %arg22[%c0_23, %c0_24] : memref<1x64xf32, #tpu.memory_space<vmem>>, vector<1x64xf32>
    %c0_25 = arith.constant 0 : index
    %c0_26 = arith.constant 0 : index
    %13 = vector.load %arg23[%c0_25, %c0_26] : memref<64x32xf32, #tpu.memory_space<vmem>>, vector<64x32xf32>
    %c0_27 = arith.constant 0 : index
    %c0_28 = arith.constant 0 : index
    %14 = vector.load %arg24[%c0_27, %c0_28] : memref<1x32xf32, #tpu.memory_space<vmem>>, vector<1x32xf32>
    %c0_29 = arith.constant 0 : index
    %c0_30 = arith.constant 0 : index
    %15 = vector.load %arg5[%c0_29, %c0_30] : memref<1x32xf32, #tpu.memory_space<vmem>>, vector<1x32xf32>
    %c0_31 = arith.constant 0 : index
    %c0_32 = arith.constant 0 : index
    %16 = vector.load %arg6[%c0_31, %c0_32] : memref<1x32xf32, #tpu.memory_space<vmem>>, vector<1x32xf32>
    %c0_33 = arith.constant 0 : index
    %c0_34 = arith.constant 0 : index
    %17 = vector.load %arg11[%c0_33, %c0_34] : memref<1x32xf32, #tpu.memory_space<vmem>>, vector<1x32xf32>
    %c0_35 = arith.constant 0 : index
    %c0_36 = arith.constant 0 : index
    %18 = vector.load %arg12[%c0_35, %c0_36] : memref<1x32xf32, #tpu.memory_space<vmem>>, vector<1x32xf32>
    %c0_37 = arith.constant 0 : index
    %c0_38 = arith.constant 0 : index
    %19 = vector.load %arg19[%c0_37, %c0_38] : memref<1x32xf32, #tpu.memory_space<vmem>>, vector<1x32xf32>
    %c0_39 = arith.constant 0 : index
    %c0_40 = arith.constant 0 : index
    %20 = vector.load %arg20[%c0_39, %c0_40] : memref<1x32xf32, #tpu.memory_space<vmem>>, vector<1x32xf32>
    %c0_41 = arith.constant 0 : index
    %c0_42 = arith.constant 0 : index
    %c0_43 = arith.constant 0 : index
    %21 = vector.load %arg1[%c0_41, %c0_42, %c0_43] : memref<2x8x32xf32, #tpu.memory_space<vmem>>, vector<1x8x32xf32>
    %22 = vector.shape_cast %21 : vector<1x8x32xf32> to vector<8x32xf32>
    %c0_44 = arith.constant 0 : index
    %c0_45 = arith.constant 0 : index
    %c0_46 = arith.constant 0 : index
    %23 = vector.load %arg2[%c0_44, %c0_45, %c0_46] : memref<2x10x32xf32, #tpu.memory_space<vmem>>, vector<1x10x32xf32>
    %24 = vector.shape_cast %23 : vector<1x10x32xf32> to vector<10x32xf32>
    %cst = arith.constant dense<0.000000e+00> : vector<8xf32>
    %25 = vector.multi_reduction <add>, %22, %cst [1] : vector<8x32xf32> to vector<8xf32>
    %26 = vector.shape_cast %25 : vector<8xf32> to vector<8x1xf32>
    %cst_47 = arith.constant 3.200000e+01 : f32
    %27 = vector.broadcast %cst_47 : f32 to vector<8x1xf32>
    %28 = arith.divf %26, %27 : vector<8x1xf32>
    %29 = vector.broadcast %28 : vector<8x1xf32> to vector<8x32xf32>
    %30 = arith.subf %22, %29 : vector<8x32xf32>
    %31 = arith.mulf %30, %30 : vector<8x32xf32>
    %cst_48 = arith.constant dense<0.000000e+00> : vector<8xf32>
    %32 = vector.multi_reduction <add>, %31, %cst_48 [1] : vector<8x32xf32> to vector<8xf32>
    %33 = vector.shape_cast %32 : vector<8xf32> to vector<8x1xf32>
    %cst_49 = arith.constant 3.200000e+01 : f32
    %34 = vector.broadcast %cst_49 : f32 to vector<8x1xf32>
    %35 = arith.divf %33, %34 : vector<8x1xf32>
    %36 = vector.broadcast %28 : vector<8x1xf32> to vector<8x32xf32>
    %37 = arith.subf %22, %36 : vector<8x32xf32>
    %cst_50 = arith.constant 9.99999974E-6 : f32
    %38 = vector.broadcast %cst_50 : f32 to vector<8x1xf32>
    %39 = arith.addf %35, %38 : vector<8x1xf32>
    %40 = math.rsqrt %39 : vector<8x1xf32>
    %41 = vector.broadcast %40 : vector<8x1xf32> to vector<8x32xf32>
    %42 = arith.mulf %37, %41 : vector<8x32xf32>
    %43 = vector.broadcast %15 : vector<1x32xf32> to vector<8x32xf32>
    %44 = arith.mulf %42, %43 : vector<8x32xf32>
    %45 = vector.broadcast %16 : vector<1x32xf32> to vector<8x32xf32>
    %46 = arith.addf %44, %45 : vector<8x32xf32>
    %cst_51 = arith.constant dense<0.000000e+00> : vector<8x96xf32>
    %47 = tpu.matmul %46, %1, %cst_51 {dimension_numbers = #tpu.dot_dimension_numbers<[1], [0], [0], [1], [0, 0, 1, 1], [], []>} : vector<8x32xf32>, vector<32x96xf32>, vector<8x96xf32> -> vector<8x96xf32>
    %48 = vector.broadcast %2 : vector<1x96xf32> to vector<8x96xf32>
    %49 = arith.addf %47, %48 : vector<8x96xf32>
    %50 = vector.extract_strided_slice %49 {offsets = [0, 0], sizes = [8, 32], strides = [1, 1]} : vector<8x96xf32> to vector<8x32xf32>
    %51 = vector.extract_strided_slice %49 {offsets = [0, 32], sizes = [8, 32], strides = [1, 1]} : vector<8x96xf32> to vector<8x32xf32>
    %52 = vector.extract_strided_slice %49 {offsets = [0, 64], sizes = [8, 32], strides = [1, 1]} : vector<8x96xf32> to vector<8x32xf32>
    %53 = vector.extract_strided_slice %50 {offsets = [0, 0], sizes = [8, 8], strides = [1, 1]} : vector<8x32xf32> to vector<8x8xf32>
    %54 = vector.extract_strided_slice %51 {offsets = [0, 0], sizes = [8, 8], strides = [1, 1]} : vector<8x32xf32> to vector<8x8xf32>
    %cst_52 = arith.constant dense<0.000000e+00> : vector<8x8xf32>
    %55 = tpu.matmul %53, %54, %cst_52 {dimension_numbers = #tpu.dot_dimension_numbers<[1], [1], [0], [0], [0, 0, 1, 0], [], []>} : vector<8x8xf32>, vector<8x8xf32>, vector<8x8xf32> -> vector<8x8xf32>
    %cst_53 = arith.constant 0.353553385 : f32
    %56 = vector.broadcast %cst_53 : f32 to vector<8x8xf32>
    %57 = arith.mulf %55, %56 : vector<8x8xf32>
    %58 = arith.addf %57, %0 : vector<8x8xf32>
    %cst_54 = arith.constant dense<0xFF800000> : vector<8xf32>
    %59 = vector.multi_reduction <maximumf>, %58, %cst_54 [1] : vector<8x8xf32> to vector<8xf32>
    %60 = vector.shape_cast %59 : vector<8xf32> to vector<8x1xf32>
    %61 = vector.broadcast %60 : vector<8x1xf32> to vector<8x8xf32>
    %62 = arith.subf %58, %61 : vector<8x8xf32>
    %63 = math.exp %62 : vector<8x8xf32>
    %cst_55 = arith.constant dense<0.000000e+00> : vector<8xf32>
    %64 = vector.multi_reduction <add>, %63, %cst_55 [1] : vector<8x8xf32> to vector<8xf32>
    %65 = vector.shape_cast %64 : vector<8xf32> to vector<8x1xf32>
    %66 = vector.broadcast %65 : vector<8x1xf32> to vector<8x8xf32>
    %67 = arith.divf %63, %66 : vector<8x8xf32>
    %68 = vector.extract_strided_slice %52 {offsets = [0, 0], sizes = [8, 8], strides = [1, 1]} : vector<8x32xf32> to vector<8x8xf32>
    %cst_56 = arith.constant dense<0.000000e+00> : vector<8x8xf32>
    %69 = tpu.matmul %67, %68, %cst_56 {dimension_numbers = #tpu.dot_dimension_numbers<[1], [0], [0], [1], [0, 0, 1, 1], [], []>} : vector<8x8xf32>, vector<8x8xf32>, vector<8x8xf32> -> vector<8x8xf32>
    %70 = vector.extract_strided_slice %3 {offsets = [0, 0], sizes = [8, 32], strides = [1, 1]} : vector<32x32xf32> to vector<8x32xf32>
    %cst_57 = arith.constant dense<0.000000e+00> : vector<8x32xf32>
    %71 = tpu.matmul %69, %70, %cst_57 {dimension_numbers = #tpu.dot_dimension_numbers<[1], [0], [0], [1], [0, 0, 1, 1], [], []>} : vector<8x8xf32>, vector<8x32xf32>, vector<8x32xf32> -> vector<8x32xf32>
    %72 = vector.extract_strided_slice %50 {offsets = [0, 8], sizes = [8, 8], strides = [1, 1]} : vector<8x32xf32> to vector<8x8xf32>
    %73 = vector.extract_strided_slice %51 {offsets = [0, 8], sizes = [8, 8], strides = [1, 1]} : vector<8x32xf32> to vector<8x8xf32>
    %cst_58 = arith.constant dense<0.000000e+00> : vector<8x8xf32>
    %74 = tpu.matmul %72, %73, %cst_58 {dimension_numbers = #tpu.dot_dimension_numbers<[1], [1], [0], [0], [0, 0, 1, 0], [], []>} : vector<8x8xf32>, vector<8x8xf32>, vector<8x8xf32> -> vector<8x8xf32>
    %cst_59 = arith.constant 0.353553385 : f32
    %75 = vector.broadcast %cst_59 : f32 to vector<8x8xf32>
    %76 = arith.mulf %74, %75 : vector<8x8xf32>
    %77 = arith.addf %76, %0 : vector<8x8xf32>
    %cst_60 = arith.constant dense<0xFF800000> : vector<8xf32>
    %78 = vector.multi_reduction <maximumf>, %77, %cst_60 [1] : vector<8x8xf32> to vector<8xf32>
    %79 = vector.shape_cast %78 : vector<8xf32> to vector<8x1xf32>
    %80 = vector.broadcast %79 : vector<8x1xf32> to vector<8x8xf32>
    %81 = arith.subf %77, %80 : vector<8x8xf32>
    %82 = math.exp %81 : vector<8x8xf32>
    %cst_61 = arith.constant dense<0.000000e+00> : vector<8xf32>
    %83 = vector.multi_reduction <add>, %82, %cst_61 [1] : vector<8x8xf32> to vector<8xf32>
    %84 = vector.shape_cast %83 : vector<8xf32> to vector<8x1xf32>
    %85 = vector.broadcast %84 : vector<8x1xf32> to vector<8x8xf32>
    %86 = arith.divf %82, %85 : vector<8x8xf32>
    %87 = vector.extract_strided_slice %52 {offsets = [0, 8], sizes = [8, 8], strides = [1, 1]} : vector<8x32xf32> to vector<8x8xf32>
    %cst_62 = arith.constant dense<0.000000e+00> : vector<8x8xf32>
    %88 = tpu.matmul %86, %87, %cst_62 {dimension_numbers = #tpu.dot_dimension_numbers<[1], [0], [0], [1], [0, 0, 1, 1], [], []>} : vector<8x8xf32>, vector<8x8xf32>, vector<8x8xf32> -> vector<8x8xf32>
    %89 = vector.extract_strided_slice %3 {offsets = [8, 0], sizes = [8, 32], strides = [1, 1]} : vector<32x32xf32> to vector<8x32xf32>
    %cst_63 = arith.constant dense<0.000000e+00> : vector<8x32xf32>
    %90 = tpu.matmul %88, %89, %cst_63 {dimension_numbers = #tpu.dot_dimension_numbers<[1], [0], [0], [1], [0, 0, 1, 1], [], []>} : vector<8x8xf32>, vector<8x32xf32>, vector<8x32xf32> -> vector<8x32xf32>
    %91 = arith.addf %71, %90 : vector<8x32xf32>
    %92 = vector.extract_strided_slice %50 {offsets = [0, 16], sizes = [8, 8], strides = [1, 1]} : vector<8x32xf32> to vector<8x8xf32>
    %93 = vector.extract_strided_slice %51 {offsets = [0, 16], sizes = [8, 8], strides = [1, 1]} : vector<8x32xf32> to vector<8x8xf32>
    %cst_64 = arith.constant dense<0.000000e+00> : vector<8x8xf32>
    %94 = tpu.matmul %92, %93, %cst_64 {dimension_numbers = #tpu.dot_dimension_numbers<[1], [1], [0], [0], [0, 0, 1, 0], [], []>} : vector<8x8xf32>, vector<8x8xf32>, vector<8x8xf32> -> vector<8x8xf32>
    %cst_65 = arith.constant 0.353553385 : f32
    %95 = vector.broadcast %cst_65 : f32 to vector<8x8xf32>
    %96 = arith.mulf %94, %95 : vector<8x8xf32>
    %97 = arith.addf %96, %0 : vector<8x8xf32>
    %cst_66 = arith.constant dense<0xFF800000> : vector<8xf32>
    %98 = vector.multi_reduction <maximumf>, %97, %cst_66 [1] : vector<8x8xf32> to vector<8xf32>
    %99 = vector.shape_cast %98 : vector<8xf32> to vector<8x1xf32>
    %100 = vector.broadcast %99 : vector<8x1xf32> to vector<8x8xf32>
    %101 = arith.subf %97, %100 : vector<8x8xf32>
    %102 = math.exp %101 : vector<8x8xf32>
    %cst_67 = arith.constant dense<0.000000e+00> : vector<8xf32>
    %103 = vector.multi_reduction <add>, %102, %cst_67 [1] : vector<8x8xf32> to vector<8xf32>
    %104 = vector.shape_cast %103 : vector<8xf32> to vector<8x1xf32>
    %105 = vector.broadcast %104 : vector<8x1xf32> to vector<8x8xf32>
    %106 = arith.divf %102, %105 : vector<8x8xf32>
    %107 = vector.extract_strided_slice %52 {offsets = [0, 16], sizes = [8, 8], strides = [1, 1]} : vector<8x32xf32> to vector<8x8xf32>
    %cst_68 = arith.constant dense<0.000000e+00> : vector<8x8xf32>
    %108 = tpu.matmul %106, %107, %cst_68 {dimension_numbers = #tpu.dot_dimension_numbers<[1], [0], [0], [1], [0, 0, 1, 1], [], []>} : vector<8x8xf32>, vector<8x8xf32>, vector<8x8xf32> -> vector<8x8xf32>
    %109 = vector.extract_strided_slice %3 {offsets = [16, 0], sizes = [8, 32], strides = [1, 1]} : vector<32x32xf32> to vector<8x32xf32>
    %cst_69 = arith.constant dense<0.000000e+00> : vector<8x32xf32>
    %110 = tpu.matmul %108, %109, %cst_69 {dimension_numbers = #tpu.dot_dimension_numbers<[1], [0], [0], [1], [0, 0, 1, 1], [], []>} : vector<8x8xf32>, vector<8x32xf32>, vector<8x32xf32> -> vector<8x32xf32>
    %111 = arith.addf %91, %110 : vector<8x32xf32>
    %112 = vector.extract_strided_slice %50 {offsets = [0, 24], sizes = [8, 8], strides = [1, 1]} : vector<8x32xf32> to vector<8x8xf32>
    %113 = vector.extract_strided_slice %51 {offsets = [0, 24], sizes = [8, 8], strides = [1, 1]} : vector<8x32xf32> to vector<8x8xf32>
    %cst_70 = arith.constant dense<0.000000e+00> : vector<8x8xf32>
    %114 = tpu.matmul %112, %113, %cst_70 {dimension_numbers = #tpu.dot_dimension_numbers<[1], [1], [0], [0], [0, 0, 1, 0], [], []>} : vector<8x8xf32>, vector<8x8xf32>, vector<8x8xf32> -> vector<8x8xf32>
    %cst_71 = arith.constant 0.353553385 : f32
    %115 = vector.broadcast %cst_71 : f32 to vector<8x8xf32>
    %116 = arith.mulf %114, %115 : vector<8x8xf32>
    %117 = arith.addf %116, %0 : vector<8x8xf32>
    %cst_72 = arith.constant dense<0xFF800000> : vector<8xf32>
    %118 = vector.multi_reduction <maximumf>, %117, %cst_72 [1] : vector<8x8xf32> to vector<8xf32>
    %119 = vector.shape_cast %118 : vector<8xf32> to vector<8x1xf32>
    %120 = vector.broadcast %119 : vector<8x1xf32> to vector<8x8xf32>
    %121 = arith.subf %117, %120 : vector<8x8xf32>
    %122 = math.exp %121 : vector<8x8xf32>
    %cst_73 = arith.constant dense<0.000000e+00> : vector<8xf32>
    %123 = vector.multi_reduction <add>, %122, %cst_73 [1] : vector<8x8xf32> to vector<8xf32>
    %124 = vector.shape_cast %123 : vector<8xf32> to vector<8x1xf32>
    %125 = vector.broadcast %124 : vector<8x1xf32> to vector<8x8xf32>
    %126 = arith.divf %122, %125 : vector<8x8xf32>
    %127 = vector.extract_strided_slice %52 {offsets = [0, 24], sizes = [8, 8], strides = [1, 1]} : vector<8x32xf32> to vector<8x8xf32>
    %cst_74 = arith.constant dense<0.000000e+00> : vector<8x8xf32>
    %128 = tpu.matmul %126, %127, %cst_74 {dimension_numbers = #tpu.dot_dimension_numbers<[1], [0], [0], [1], [0, 0, 1, 1], [], []>} : vector<8x8xf32>, vector<8x8xf32>, vector<8x8xf32> -> vector<8x8xf32>
    %129 = vector.extract_strided_slice %3 {offsets = [24, 0], sizes = [8, 32], strides = [1, 1]} : vector<32x32xf32> to vector<8x32xf32>
    %cst_75 = arith.constant dense<0.000000e+00> : vector<8x32xf32>
    %130 = tpu.matmul %128, %129, %cst_75 {dimension_numbers = #tpu.dot_dimension_numbers<[1], [0], [0], [1], [0, 0, 1, 1], [], []>} : vector<8x8xf32>, vector<8x32xf32>, vector<8x32xf32> -> vector<8x32xf32>
    %131 = arith.addf %111, %130 : vector<8x32xf32>
    %132 = arith.addf %22, %131 : vector<8x32xf32>
    %133 = vector.broadcast %4 : vector<1x32xf32> to vector<8x32xf32>
    %134 = arith.addf %132, %133 : vector<8x32xf32>
    %cst_76 = arith.constant dense<0.000000e+00> : vector<8xf32>
    %135 = vector.multi_reduction <add>, %134, %cst_76 [1] : vector<8x32xf32> to vector<8xf32>
    %136 = vector.shape_cast %135 : vector<8xf32> to vector<8x1xf32>
    %cst_77 = arith.constant 3.200000e+01 : f32
    %137 = vector.broadcast %cst_77 : f32 to vector<8x1xf32>
    %138 = arith.divf %136, %137 : vector<8x1xf32>
    %139 = vector.broadcast %138 : vector<8x1xf32> to vector<8x32xf32>
    %140 = arith.subf %134, %139 : vector<8x32xf32>
    %141 = arith.mulf %140, %140 : vector<8x32xf32>
    %cst_78 = arith.constant dense<0.000000e+00> : vector<8xf32>
    %142 = vector.multi_reduction <add>, %141, %cst_78 [1] : vector<8x32xf32> to vector<8xf32>
    %143 = vector.shape_cast %142 : vector<8xf32> to vector<8x1xf32>
    %cst_79 = arith.constant 3.200000e+01 : f32
    %144 = vector.broadcast %cst_79 : f32 to vector<8x1xf32>
    %145 = arith.divf %143, %144 : vector<8x1xf32>
    %146 = vector.broadcast %138 : vector<8x1xf32> to vector<8x32xf32>
    %147 = arith.subf %134, %146 : vector<8x32xf32>
    %cst_80 = arith.constant 9.99999974E-6 : f32
    %148 = vector.broadcast %cst_80 : f32 to vector<8x1xf32>
    %149 = arith.addf %145, %148 : vector<8x1xf32>
    %150 = math.rsqrt %149 : vector<8x1xf32>
    %151 = vector.broadcast %150 : vector<8x1xf32> to vector<8x32xf32>
    %152 = arith.mulf %147, %151 : vector<8x32xf32>
    %153 = vector.broadcast %17 : vector<1x32xf32> to vector<8x32xf32>
    %154 = arith.mulf %152, %153 : vector<8x32xf32>
    %155 = vector.broadcast %18 : vector<1x32xf32> to vector<8x32xf32>
    %156 = arith.addf %154, %155 : vector<8x32xf32>
    %cst_81 = arith.constant dense<0.000000e+00> : vector<8x32xf32>
    %157 = tpu.matmul %156, %5, %cst_81 {dimension_numbers = #tpu.dot_dimension_numbers<[1], [0], [0], [1], [0, 0, 1, 1], [], []>} : vector<8x32xf32>, vector<32x32xf32>, vector<8x32xf32> -> vector<8x32xf32>
    %158 = vector.broadcast %6 : vector<1x32xf32> to vector<8x32xf32>
    %159 = arith.addf %157, %158 : vector<8x32xf32>
    %cst_82 = arith.constant dense<0.000000e+00> : vector<10x64xf32>
    %160 = tpu.matmul %24, %7, %cst_82 {dimension_numbers = #tpu.dot_dimension_numbers<[1], [0], [0], [1], [0, 0, 1, 1], [], []>} : vector<10x32xf32>, vector<32x64xf32>, vector<10x64xf32> -> vector<10x64xf32>
    %161 = vector.broadcast %8 : vector<1x64xf32> to vector<10x64xf32>
    %162 = arith.addf %160, %161 : vector<10x64xf32>
    %163 = vector.extract_strided_slice %162 {offsets = [0, 0], sizes = [10, 32], strides = [1, 1]} : vector<10x64xf32> to vector<10x32xf32>
    %164 = vector.extract_strided_slice %162 {offsets = [0, 32], sizes = [10, 32], strides = [1, 1]} : vector<10x64xf32> to vector<10x32xf32>
    %c0_83 = arith.constant 0 : index
    %c0_84 = arith.constant 0 : index
    %c0_85 = arith.constant 0 : index
    %165 = vector.load %arg4[%c0_83, %c0_84, %c0_85] : memref<2x1x10xf32, #tpu.memory_space<vmem>>, vector<1x1x10xf32>
    %166 = vector.shape_cast %165 : vector<1x1x10xf32> to vector<1x10xf32>
    %167 = vector.extract_strided_slice %159 {offsets = [0, 0], sizes = [8, 8], strides = [1, 1]} : vector<8x32xf32> to vector<8x8xf32>
    %168 = vector.extract_strided_slice %163 {offsets = [0, 0], sizes = [10, 8], strides = [1, 1]} : vector<10x32xf32> to vector<10x8xf32>
    %cst_86 = arith.constant dense<0.000000e+00> : vector<8x10xf32>
    %169 = tpu.matmul %167, %168, %cst_86 {dimension_numbers = #tpu.dot_dimension_numbers<[1], [1], [0], [0], [0, 0, 1, 0], [], []>} : vector<8x8xf32>, vector<10x8xf32>, vector<8x10xf32> -> vector<8x10xf32>
    %cst_87 = arith.constant 0.353553385 : f32
    %170 = vector.broadcast %cst_87 : f32 to vector<8x10xf32>
    %171 = arith.mulf %169, %170 : vector<8x10xf32>
    %172 = vector.broadcast %166 : vector<1x10xf32> to vector<8x10xf32>
    %173 = arith.addf %171, %172 : vector<8x10xf32>
    %cst_88 = arith.constant dense<0xFF800000> : vector<8xf32>
    %174 = vector.multi_reduction <maximumf>, %173, %cst_88 [1] : vector<8x10xf32> to vector<8xf32>
    %175 = vector.shape_cast %174 : vector<8xf32> to vector<8x1xf32>
    %176 = vector.broadcast %175 : vector<8x1xf32> to vector<8x10xf32>
    %177 = arith.subf %173, %176 : vector<8x10xf32>
    %178 = math.exp %177 : vector<8x10xf32>
    %cst_89 = arith.constant dense<0.000000e+00> : vector<8xf32>
    %179 = vector.multi_reduction <add>, %178, %cst_89 [1] : vector<8x10xf32> to vector<8xf32>
    %180 = vector.shape_cast %179 : vector<8xf32> to vector<8x1xf32>
    %181 = vector.broadcast %180 : vector<8x1xf32> to vector<8x10xf32>
    %182 = arith.divf %178, %181 : vector<8x10xf32>
    %183 = vector.extract_strided_slice %164 {offsets = [0, 0], sizes = [10, 8], strides = [1, 1]} : vector<10x32xf32> to vector<10x8xf32>
    %cst_90 = arith.constant dense<0.000000e+00> : vector<8x8xf32>
    %184 = tpu.matmul %182, %183, %cst_90 {dimension_numbers = #tpu.dot_dimension_numbers<[1], [0], [0], [1], [0, 0, 1, 1], [], []>} : vector<8x10xf32>, vector<10x8xf32>, vector<8x8xf32> -> vector<8x8xf32>
    %185 = vector.extract_strided_slice %9 {offsets = [0, 0], sizes = [8, 32], strides = [1, 1]} : vector<32x32xf32> to vector<8x32xf32>
    %cst_91 = arith.constant dense<0.000000e+00> : vector<8x32xf32>
    %186 = tpu.matmul %184, %185, %cst_91 {dimension_numbers = #tpu.dot_dimension_numbers<[1], [0], [0], [1], [0, 0, 1, 1], [], []>} : vector<8x8xf32>, vector<8x32xf32>, vector<8x32xf32> -> vector<8x32xf32>
    %187 = vector.extract_strided_slice %159 {offsets = [0, 8], sizes = [8, 8], strides = [1, 1]} : vector<8x32xf32> to vector<8x8xf32>
    %188 = vector.extract_strided_slice %163 {offsets = [0, 8], sizes = [10, 8], strides = [1, 1]} : vector<10x32xf32> to vector<10x8xf32>
    %cst_92 = arith.constant dense<0.000000e+00> : vector<8x10xf32>
    %189 = tpu.matmul %187, %188, %cst_92 {dimension_numbers = #tpu.dot_dimension_numbers<[1], [1], [0], [0], [0, 0, 1, 0], [], []>} : vector<8x8xf32>, vector<10x8xf32>, vector<8x10xf32> -> vector<8x10xf32>
    %cst_93 = arith.constant 0.353553385 : f32
    %190 = vector.broadcast %cst_93 : f32 to vector<8x10xf32>
    %191 = arith.mulf %189, %190 : vector<8x10xf32>
    %192 = vector.broadcast %166 : vector<1x10xf32> to vector<8x10xf32>
    %193 = arith.addf %191, %192 : vector<8x10xf32>
    %cst_94 = arith.constant dense<0xFF800000> : vector<8xf32>
    %194 = vector.multi_reduction <maximumf>, %193, %cst_94 [1] : vector<8x10xf32> to vector<8xf32>
    %195 = vector.shape_cast %194 : vector<8xf32> to vector<8x1xf32>
    %196 = vector.broadcast %195 : vector<8x1xf32> to vector<8x10xf32>
    %197 = arith.subf %193, %196 : vector<8x10xf32>
    %198 = math.exp %197 : vector<8x10xf32>
    %cst_95 = arith.constant dense<0.000000e+00> : vector<8xf32>
    %199 = vector.multi_reduction <add>, %198, %cst_95 [1] : vector<8x10xf32> to vector<8xf32>
    %200 = vector.shape_cast %199 : vector<8xf32> to vector<8x1xf32>
    %201 = vector.broadcast %200 : vector<8x1xf32> to vector<8x10xf32>
    %202 = arith.divf %198, %201 : vector<8x10xf32>
    %203 = vector.extract_strided_slice %164 {offsets = [0, 8], sizes = [10, 8], strides = [1, 1]} : vector<10x32xf32> to vector<10x8xf32>
    %cst_96 = arith.constant dense<0.000000e+00> : vector<8x8xf32>
    %204 = tpu.matmul %202, %203, %cst_96 {dimension_numbers = #tpu.dot_dimension_numbers<[1], [0], [0], [1], [0, 0, 1, 1], [], []>} : vector<8x10xf32>, vector<10x8xf32>, vector<8x8xf32> -> vector<8x8xf32>
    %205 = vector.extract_strided_slice %9 {offsets = [8, 0], sizes = [8, 32], strides = [1, 1]} : vector<32x32xf32> to vector<8x32xf32>
    %cst_97 = arith.constant dense<0.000000e+00> : vector<8x32xf32>
    %206 = tpu.matmul %204, %205, %cst_97 {dimension_numbers = #tpu.dot_dimension_numbers<[1], [0], [0], [1], [0, 0, 1, 1], [], []>} : vector<8x8xf32>, vector<8x32xf32>, vector<8x32xf32> -> vector<8x32xf32>
    %207 = arith.addf %186, %206 : vector<8x32xf32>
    %208 = vector.extract_strided_slice %159 {offsets = [0, 16], sizes = [8, 8], strides = [1, 1]} : vector<8x32xf32> to vector<8x8xf32>
    %209 = vector.extract_strided_slice %163 {offsets = [0, 16], sizes = [10, 8], strides = [1, 1]} : vector<10x32xf32> to vector<10x8xf32>
    %cst_98 = arith.constant dense<0.000000e+00> : vector<8x10xf32>
    %210 = tpu.matmul %208, %209, %cst_98 {dimension_numbers = #tpu.dot_dimension_numbers<[1], [1], [0], [0], [0, 0, 1, 0], [], []>} : vector<8x8xf32>, vector<10x8xf32>, vector<8x10xf32> -> vector<8x10xf32>
    %cst_99 = arith.constant 0.353553385 : f32
    %211 = vector.broadcast %cst_99 : f32 to vector<8x10xf32>
    %212 = arith.mulf %210, %211 : vector<8x10xf32>
    %213 = vector.broadcast %166 : vector<1x10xf32> to vector<8x10xf32>
    %214 = arith.addf %212, %213 : vector<8x10xf32>
    %cst_100 = arith.constant dense<0xFF800000> : vector<8xf32>
    %215 = vector.multi_reduction <maximumf>, %214, %cst_100 [1] : vector<8x10xf32> to vector<8xf32>
    %216 = vector.shape_cast %215 : vector<8xf32> to vector<8x1xf32>
    %217 = vector.broadcast %216 : vector<8x1xf32> to vector<8x10xf32>
    %218 = arith.subf %214, %217 : vector<8x10xf32>
    %219 = math.exp %218 : vector<8x10xf32>
    %cst_101 = arith.constant dense<0.000000e+00> : vector<8xf32>
    %220 = vector.multi_reduction <add>, %219, %cst_101 [1] : vector<8x10xf32> to vector<8xf32>
    %221 = vector.shape_cast %220 : vector<8xf32> to vector<8x1xf32>
    %222 = vector.broadcast %221 : vector<8x1xf32> to vector<8x10xf32>
    %223 = arith.divf %219, %222 : vector<8x10xf32>
    %224 = vector.extract_strided_slice %164 {offsets = [0, 16], sizes = [10, 8], strides = [1, 1]} : vector<10x32xf32> to vector<10x8xf32>
    %cst_102 = arith.constant dense<0.000000e+00> : vector<8x8xf32>
    %225 = tpu.matmul %223, %224, %cst_102 {dimension_numbers = #tpu.dot_dimension_numbers<[1], [0], [0], [1], [0, 0, 1, 1], [], []>} : vector<8x10xf32>, vector<10x8xf32>, vector<8x8xf32> -> vector<8x8xf32>
    %226 = vector.extract_strided_slice %9 {offsets = [16, 0], sizes = [8, 32], strides = [1, 1]} : vector<32x32xf32> to vector<8x32xf32>
    %cst_103 = arith.constant dense<0.000000e+00> : vector<8x32xf32>
    %227 = tpu.matmul %225, %226, %cst_103 {dimension_numbers = #tpu.dot_dimension_numbers<[1], [0], [0], [1], [0, 0, 1, 1], [], []>} : vector<8x8xf32>, vector<8x32xf32>, vector<8x32xf32> -> vector<8x32xf32>
    %228 = arith.addf %207, %227 : vector<8x32xf32>
    %229 = vector.extract_strided_slice %159 {offsets = [0, 24], sizes = [8, 8], strides = [1, 1]} : vector<8x32xf32> to vector<8x8xf32>
    %230 = vector.extract_strided_slice %163 {offsets = [0, 24], sizes = [10, 8], strides = [1, 1]} : vector<10x32xf32> to vector<10x8xf32>
    %cst_104 = arith.constant dense<0.000000e+00> : vector<8x10xf32>
    %231 = tpu.matmul %229, %230, %cst_104 {dimension_numbers = #tpu.dot_dimension_numbers<[1], [1], [0], [0], [0, 0, 1, 0], [], []>} : vector<8x8xf32>, vector<10x8xf32>, vector<8x10xf32> -> vector<8x10xf32>
    %cst_105 = arith.constant 0.353553385 : f32
    %232 = vector.broadcast %cst_105 : f32 to vector<8x10xf32>
    %233 = arith.mulf %231, %232 : vector<8x10xf32>
    %234 = vector.broadcast %166 : vector<1x10xf32> to vector<8x10xf32>
    %235 = arith.addf %233, %234 : vector<8x10xf32>
    %cst_106 = arith.constant dense<0xFF800000> : vector<8xf32>
    %236 = vector.multi_reduction <maximumf>, %235, %cst_106 [1] : vector<8x10xf32> to vector<8xf32>
    %237 = vector.shape_cast %236 : vector<8xf32> to vector<8x1xf32>
    %238 = vector.broadcast %237 : vector<8x1xf32> to vector<8x10xf32>
    %239 = arith.subf %235, %238 : vector<8x10xf32>
    %240 = math.exp %239 : vector<8x10xf32>
    %cst_107 = arith.constant dense<0.000000e+00> : vector<8xf32>
    %241 = vector.multi_reduction <add>, %240, %cst_107 [1] : vector<8x10xf32> to vector<8xf32>
    %242 = vector.shape_cast %241 : vector<8xf32> to vector<8x1xf32>
    %243 = vector.broadcast %242 : vector<8x1xf32> to vector<8x10xf32>
    %244 = arith.divf %240, %243 : vector<8x10xf32>
    %245 = vector.extract_strided_slice %164 {offsets = [0, 24], sizes = [10, 8], strides = [1, 1]} : vector<10x32xf32> to vector<10x8xf32>
    %cst_108 = arith.constant dense<0.000000e+00> : vector<8x8xf32>
    %246 = tpu.matmul %244, %245, %cst_108 {dimension_numbers = #tpu.dot_dimension_numbers<[1], [0], [0], [1], [0, 0, 1, 1], [], []>} : vector<8x10xf32>, vector<10x8xf32>, vector<8x8xf32> -> vector<8x8xf32>
    %247 = vector.extract_strided_slice %9 {offsets = [24, 0], sizes = [8, 32], strides = [1, 1]} : vector<32x32xf32> to vector<8x32xf32>
    %cst_109 = arith.constant dense<0.000000e+00> : vector<8x32xf32>
    %248 = tpu.matmul %246, %247, %cst_109 {dimension_numbers = #tpu.dot_dimension_numbers<[1], [0], [0], [1], [0, 0, 1, 1], [], []>} : vector<8x8xf32>, vector<8x32xf32>, vector<8x32xf32> -> vector<8x32xf32>
    %249 = arith.addf %228, %248 : vector<8x32xf32>
    %250 = arith.addf %134, %249 : vector<8x32xf32>
    %251 = vector.broadcast %10 : vector<1x32xf32> to vector<8x32xf32>
    %252 = arith.addf %250, %251 : vector<8x32xf32>
    %cst_110 = arith.constant dense<0.000000e+00> : vector<8xf32>
    %253 = vector.multi_reduction <add>, %252, %cst_110 [1] : vector<8x32xf32> to vector<8xf32>
    %254 = vector.shape_cast %253 : vector<8xf32> to vector<8x1xf32>
    %cst_111 = arith.constant 3.200000e+01 : f32
    %255 = vector.broadcast %cst_111 : f32 to vector<8x1xf32>
    %256 = arith.divf %254, %255 : vector<8x1xf32>
    %257 = vector.broadcast %256 : vector<8x1xf32> to vector<8x32xf32>
    %258 = arith.subf %252, %257 : vector<8x32xf32>
    %259 = arith.mulf %258, %258 : vector<8x32xf32>
    %cst_112 = arith.constant dense<0.000000e+00> : vector<8xf32>
    %260 = vector.multi_reduction <add>, %259, %cst_112 [1] : vector<8x32xf32> to vector<8xf32>
    %261 = vector.shape_cast %260 : vector<8xf32> to vector<8x1xf32>
    %cst_113 = arith.constant 3.200000e+01 : f32
    %262 = vector.broadcast %cst_113 : f32 to vector<8x1xf32>
    %263 = arith.divf %261, %262 : vector<8x1xf32>
    %264 = vector.broadcast %256 : vector<8x1xf32> to vector<8x32xf32>
    %265 = arith.subf %252, %264 : vector<8x32xf32>
    %cst_114 = arith.constant 9.99999974E-6 : f32
    %266 = vector.broadcast %cst_114 : f32 to vector<8x1xf32>
    %267 = arith.addf %263, %266 : vector<8x1xf32>
    %268 = math.rsqrt %267 : vector<8x1xf32>
    %269 = vector.broadcast %268 : vector<8x1xf32> to vector<8x32xf32>
    %270 = arith.mulf %265, %269 : vector<8x32xf32>
    %271 = vector.broadcast %19 : vector<1x32xf32> to vector<8x32xf32>
    %272 = arith.mulf %270, %271 : vector<8x32xf32>
    %273 = vector.broadcast %20 : vector<1x32xf32> to vector<8x32xf32>
    %274 = arith.addf %272, %273 : vector<8x32xf32>
    %cst_115 = arith.constant dense<0.000000e+00> : vector<8x64xf32>
    %275 = tpu.matmul %274, %11, %cst_115 {dimension_numbers = #tpu.dot_dimension_numbers<[1], [0], [0], [1], [0, 0, 1, 1], [], []>} : vector<8x32xf32>, vector<32x64xf32>, vector<8x64xf32> -> vector<8x64xf32>
    %276 = vector.broadcast %12 : vector<1x64xf32> to vector<8x64xf32>
    %277 = arith.addf %275, %276 : vector<8x64xf32>
    %cst_116 = arith.constant 0.000000e+00 : f32
    %278 = vector.broadcast %cst_116 : f32 to vector<8x64xf32>
    %279 = arith.maximumf %277, %278 : vector<8x64xf32>
    %cst_117 = arith.constant dense<0.000000e+00> : vector<8x32xf32>
    %280 = tpu.matmul %279, %13, %cst_117 {dimension_numbers = #tpu.dot_dimension_numbers<[1], [0], [0], [1], [0, 0, 1, 1], [], []>} : vector<8x64xf32>, vector<64x32xf32>, vector<8x32xf32> -> vector<8x32xf32>
    %281 = vector.broadcast %14 : vector<1x32xf32> to vector<8x32xf32>
    %282 = arith.addf %280, %281 : vector<8x32xf32>
    %283 = arith.addf %252, %282 : vector<8x32xf32>
    %c0_118 = arith.constant 0 : index
    %c0_119 = arith.constant 0 : index
    %c0_120 = arith.constant 0 : index
    %284 = vector.load %arg25[%c0_118, %c0_119, %c0_120] : memref<2x8x32xf32, #tpu.memory_space<vmem>>, vector<1x8x32xf32>
    %285 = vector.shape_cast %284 : vector<1x8x32xf32> to vector<8x32xf32>
    %286 = vector.shape_cast %283 : vector<8x32xf32> to vector<1x8x32xf32>
    tpu.vector_store %arg25[%c0_118, %c0_119, %c0_120], %286 {strides = array<i32>} : memref<2x8x32xf32, #tpu.memory_space<vmem>>, vector<1x8x32xf32>,
    %c1 = arith.constant 1 : index
    %c0_121 = arith.constant 0 : index
    %c0_122 = arith.constant 0 : index
    %287 = vector.load %arg1[%c1, %c0_121, %c0_122] : memref<2x8x32xf32, #tpu.memory_space<vmem>>, vector<1x8x32xf32>
    %288 = vector.shape_cast %287 : vector<1x8x32xf32> to vector<8x32xf32>
    %c1_123 = arith.constant 1 : index
    %c0_124 = arith.constant 0 : index
    %c0_125 = arith.constant 0 : index
    %289 = vector.load %arg2[%c1_123, %c0_124, %c0_125] : memref<2x10x32xf32, #tpu.memory_space<vmem>>, vector<1x10x32xf32>
    %290 = vector.shape_cast %289 : vector<1x10x32xf32> to vector<10x32xf32>
    %cst_126 = arith.constant dense<0.000000e+00> : vector<8xf32>
    %291 = vector.multi_reduction <add>, %288, %cst_126 [1] : vector<8x32xf32> to vector<8xf32>
    %292 = vector.shape_cast %291 : vector<8xf32> to vector<8x1xf32>
    %cst_127 = arith.constant 3.200000e+01 : f32
    %293 = vector.broadcast %cst_127 : f32 to vector<8x1xf32>
    %294 = arith.divf %292, %293 : vector<8x1xf32>
    %295 = vector.broadcast %294 : vector<8x1xf32> to vector<8x32xf32>
    %296 = arith.subf %288, %295 : vector<8x32xf32>
    %297 = arith.mulf %296, %296 : vector<8x32xf32>
    %cst_128 = arith.constant dense<0.000000e+00> : vector<8xf32>
    %298 = vector.multi_reduction <add>, %297, %cst_128 [1] : vector<8x32xf32> to vector<8xf32>
    %299 = vector.shape_cast %298 : vector<8xf32> to vector<8x1xf32>
    %cst_129 = arith.constant 3.200000e+01 : f32
    %300 = vector.broadcast %cst_129 : f32 to vector<8x1xf32>
    %301 = arith.divf %299, %300 : vector<8x1xf32>
    %302 = vector.broadcast %294 : vector<8x1xf32> to vector<8x32xf32>
    %303 = arith.subf %288, %302 : vector<8x32xf32>
    %cst_130 = arith.constant 9.99999974E-6 : f32
    %304 = vector.broadcast %cst_130 : f32 to vector<8x1xf32>
    %305 = arith.addf %301, %304 : vector<8x1xf32>
    %306 = math.rsqrt %305 : vector<8x1xf32>
    %307 = vector.broadcast %306 : vector<8x1xf32> to vector<8x32xf32>
    %308 = arith.mulf %303, %307 : vector<8x32xf32>
    %309 = vector.broadcast %15 : vector<1x32xf32> to vector<8x32xf32>
    %310 = arith.mulf %308, %309 : vector<8x32xf32>
    %311 = vector.broadcast %16 : vector<1x32xf32> to vector<8x32xf32>
    %312 = arith.addf %310, %311 : vector<8x32xf32>
    %cst_131 = arith.constant dense<0.000000e+00> : vector<8x96xf32>
    %313 = tpu.matmul %312, %1, %cst_131 {dimension_numbers = #tpu.dot_dimension_numbers<[1], [0], [0], [1], [0, 0, 1, 1], [], []>} : vector<8x32xf32>, vector<32x96xf32>, vector<8x96xf32> -> vector<8x96xf32>
    %314 = vector.broadcast %2 : vector<1x96xf32> to vector<8x96xf32>
    %315 = arith.addf %313, %314 : vector<8x96xf32>
    %316 = vector.extract_strided_slice %315 {offsets = [0, 0], sizes = [8, 32], strides = [1, 1]} : vector<8x96xf32> to vector<8x32xf32>
    %317 = vector.extract_strided_slice %315 {offsets = [0, 32], sizes = [8, 32], strides = [1, 1]} : vector<8x96xf32> to vector<8x32xf32>
    %318 = vector.extract_strided_slice %315 {offsets = [0, 64], sizes = [8, 32], strides = [1, 1]} : vector<8x96xf32> to vector<8x32xf32>
    %319 = vector.extract_strided_slice %316 {offsets = [0, 0], sizes = [8, 8], strides = [1, 1]} : vector<8x32xf32> to vector<8x8xf32>
    %320 = vector.extract_strided_slice %317 {offsets = [0, 0], sizes = [8, 8], strides = [1, 1]} : vector<8x32xf32> to vector<8x8xf32>
    %cst_132 = arith.constant dense<0.000000e+00> : vector<8x8xf32>
    %321 = tpu.matmul %319, %320, %cst_132 {dimension_numbers = #tpu.dot_dimension_numbers<[1], [1], [0], [0], [0, 0, 1, 0], [], []>} : vector<8x8xf32>, vector<8x8xf32>, vector<8x8xf32> -> vector<8x8xf32>
    %cst_133 = arith.constant 0.353553385 : f32
    %322 = vector.broadcast %cst_133 : f32 to vector<8x8xf32>
    %323 = arith.mulf %321, %322 : vector<8x8xf32>
    %324 = arith.addf %323, %0 : vector<8x8xf32>
    %cst_134 = arith.constant dense<0xFF800000> : vector<8xf32>
    %325 = vector.multi_reduction <maximumf>, %324, %cst_134 [1] : vector<8x8xf32> to vector<8xf32>
    %326 = vector.shape_cast %325 : vector<8xf32> to vector<8x1xf32>
    %327 = vector.broadcast %326 : vector<8x1xf32> to vector<8x8xf32>
    %328 = arith.subf %324, %327 : vector<8x8xf32>
    %329 = math.exp %328 : vector<8x8xf32>
    %cst_135 = arith.constant dense<0.000000e+00> : vector<8xf32>
    %330 = vector.multi_reduction <add>, %329, %cst_135 [1] : vector<8x8xf32> to vector<8xf32>
    %331 = vector.shape_cast %330 : vector<8xf32> to vector<8x1xf32>
    %332 = vector.broadcast %331 : vector<8x1xf32> to vector<8x8xf32>
    %333 = arith.divf %329, %332 : vector<8x8xf32>
    %334 = vector.extract_strided_slice %318 {offsets = [0, 0], sizes = [8, 8], strides = [1, 1]} : vector<8x32xf32> to vector<8x8xf32>
    %cst_136 = arith.constant dense<0.000000e+00> : vector<8x8xf32>
    %335 = tpu.matmul %333, %334, %cst_136 {dimension_numbers = #tpu.dot_dimension_numbers<[1], [0], [0], [1], [0, 0, 1, 1], [], []>} : vector<8x8xf32>, vector<8x8xf32>, vector<8x8xf32> -> vector<8x8xf32>
    %336 = vector.extract_strided_slice %3 {offsets = [0, 0], sizes = [8, 32], strides = [1, 1]} : vector<32x32xf32> to vector<8x32xf32>
    %cst_137 = arith.constant dense<0.000000e+00> : vector<8x32xf32>
    %337 = tpu.matmul %335, %336, %cst_137 {dimension_numbers = #tpu.dot_dimension_numbers<[1], [0], [0], [1], [0, 0, 1, 1], [], []>} : vector<8x8xf32>, vector<8x32xf32>, vector<8x32xf32> -> vector<8x32xf32>
    %338 = vector.extract_strided_slice %316 {offsets = [0, 8], sizes = [8, 8], strides = [1, 1]} : vector<8x32xf32> to vector<8x8xf32>
    %339 = vector.extract_strided_slice %317 {offsets = [0, 8], sizes = [8, 8], strides = [1, 1]} : vector<8x32xf32> to vector<8x8xf32>
    %cst_138 = arith.constant dense<0.000000e+00> : vector<8x8xf32>
    %340 = tpu.matmul %338, %339, %cst_138 {dimension_numbers = #tpu.dot_dimension_numbers<[1], [1], [0], [0], [0, 0, 1, 0], [], []>} : vector<8x8xf32>, vector<8x8xf32>, vector<8x8xf32> -> vector<8x8xf32>
    %cst_139 = arith.constant 0.353553385 : f32
    %341 = vector.broadcast %cst_139 : f32 to vector<8x8xf32>
    %342 = arith.mulf %340, %341 : vector<8x8xf32>
    %343 = arith.addf %342, %0 : vector<8x8xf32>
    %cst_140 = arith.constant dense<0xFF800000> : vector<8xf32>
    %344 = vector.multi_reduction <maximumf>, %343, %cst_140 [1] : vector<8x8xf32> to vector<8xf32>
    %345 = vector.shape_cast %344 : vector<8xf32> to vector<8x1xf32>
    %346 = vector.broadcast %345 : vector<8x1xf32> to vector<8x8xf32>
    %347 = arith.subf %343, %346 : vector<8x8xf32>
    %348 = math.exp %347 : vector<8x8xf32>
    %cst_141 = arith.constant dense<0.000000e+00> : vector<8xf32>
    %349 = vector.multi_reduction <add>, %348, %cst_141 [1] : vector<8x8xf32> to vector<8xf32>
    %350 = vector.shape_cast %349 : vector<8xf32> to vector<8x1xf32>
    %351 = vector.broadcast %350 : vector<8x1xf32> to vector<8x8xf32>
    %352 = arith.divf %348, %351 : vector<8x8xf32>
    %353 = vector.extract_strided_slice %318 {offsets = [0, 8], sizes = [8, 8], strides = [1, 1]} : vector<8x32xf32> to vector<8x8xf32>
    %cst_142 = arith.constant dense<0.000000e+00> : vector<8x8xf32>
    %354 = tpu.matmul %352, %353, %cst_142 {dimension_numbers = #tpu.dot_dimension_numbers<[1], [0], [0], [1], [0, 0, 1, 1], [], []>} : vector<8x8xf32>, vector<8x8xf32>, vector<8x8xf32> -> vector<8x8xf32>
    %355 = vector.extract_strided_slice %3 {offsets = [8, 0], sizes = [8, 32], strides = [1, 1]} : vector<32x32xf32> to vector<8x32xf32>
    %cst_143 = arith.constant dense<0.000000e+00> : vector<8x32xf32>
    %356 = tpu.matmul %354, %355, %cst_143 {dimension_numbers = #tpu.dot_dimension_numbers<[1], [0], [0], [1], [0, 0, 1, 1], [], []>} : vector<8x8xf32>, vector<8x32xf32>, vector<8x32xf32> -> vector<8x32xf32>
    %357 = arith.addf %337, %356 : vector<8x32xf32>
    %358 = vector.extract_strided_slice %316 {offsets = [0, 16], sizes = [8, 8], strides = [1, 1]} : vector<8x32xf32> to vector<8x8xf32>
    %359 = vector.extract_strided_slice %317 {offsets = [0, 16], sizes = [8, 8], strides = [1, 1]} : vector<8x32xf32> to vector<8x8xf32>
    %cst_144 = arith.constant dense<0.000000e+00> : vector<8x8xf32>
    %360 = tpu.matmul %358, %359, %cst_144 {dimension_numbers = #tpu.dot_dimension_numbers<[1], [1], [0], [0], [0, 0, 1, 0], [], []>} : vector<8x8xf32>, vector<8x8xf32>, vector<8x8xf32> -> vector<8x8xf32>
    %cst_145 = arith.constant 0.353553385 : f32
    %361 = vector.broadcast %cst_145 : f32 to vector<8x8xf32>
    %362 = arith.mulf %360, %361 : vector<8x8xf32>
    %363 = arith.addf %362, %0 : vector<8x8xf32>
    %cst_146 = arith.constant dense<0xFF800000> : vector<8xf32>
    %364 = vector.multi_reduction <maximumf>, %363, %cst_146 [1] : vector<8x8xf32> to vector<8xf32>
    %365 = vector.shape_cast %364 : vector<8xf32> to vector<8x1xf32>
    %366 = vector.broadcast %365 : vector<8x1xf32> to vector<8x8xf32>
    %367 = arith.subf %363, %366 : vector<8x8xf32>
    %368 = math.exp %367 : vector<8x8xf32>
    %cst_147 = arith.constant dense<0.000000e+00> : vector<8xf32>
    %369 = vector.multi_reduction <add>, %368, %cst_147 [1] : vector<8x8xf32> to vector<8xf32>
    %370 = vector.shape_cast %369 : vector<8xf32> to vector<8x1xf32>
    %371 = vector.broadcast %370 : vector<8x1xf32> to vector<8x8xf32>
    %372 = arith.divf %368, %371 : vector<8x8xf32>
    %373 = vector.extract_strided_slice %318 {offsets = [0, 16], sizes = [8, 8], strides = [1, 1]} : vector<8x32xf32> to vector<8x8xf32>
    %cst_148 = arith.constant dense<0.000000e+00> : vector<8x8xf32>
    %374 = tpu.matmul %372, %373, %cst_148 {dimension_numbers = #tpu.dot_dimension_numbers<[1], [0], [0], [1], [0, 0, 1, 1], [], []>} : vector<8x8xf32>, vector<8x8xf32>, vector<8x8xf32> -> vector<8x8xf32>
    %375 = vector.extract_strided_slice %3 {offsets = [16, 0], sizes = [8, 32], strides = [1, 1]} : vector<32x32xf32> to vector<8x32xf32>
    %cst_149 = arith.constant dense<0.000000e+00> : vector<8x32xf32>
    %376 = tpu.matmul %374, %375, %cst_149 {dimension_numbers = #tpu.dot_dimension_numbers<[1], [0], [0], [1], [0, 0, 1, 1], [], []>} : vector<8x8xf32>, vector<8x32xf32>, vector<8x32xf32> -> vector<8x32xf32>
    %377 = arith.addf %357, %376 : vector<8x32xf32>
    %378 = vector.extract_strided_slice %316 {offsets = [0, 24], sizes = [8, 8], strides = [1, 1]} : vector<8x32xf32> to vector<8x8xf32>
    %379 = vector.extract_strided_slice %317 {offsets = [0, 24], sizes = [8, 8], strides = [1, 1]} : vector<8x32xf32> to vector<8x8xf32>
    %cst_150 = arith.constant dense<0.000000e+00> : vector<8x8xf32>
    %380 = tpu.matmul %378, %379, %cst_150 {dimension_numbers = #tpu.dot_dimension_numbers<[1], [1], [0], [0], [0, 0, 1, 0], [], []>} : vector<8x8xf32>, vector<8x8xf32>, vector<8x8xf32> -> vector<8x8xf32>
    %cst_151 = arith.constant 0.353553385 : f32
    %381 = vector.broadcast %cst_151 : f32 to vector<8x8xf32>
    %382 = arith.mulf %380, %381 : vector<8x8xf32>
    %383 = arith.addf %382, %0 : vector<8x8xf32>
    %cst_152 = arith.constant dense<0xFF800000> : vector<8xf32>
    %384 = vector.multi_reduction <maximumf>, %383, %cst_152 [1] : vector<8x8xf32> to vector<8xf32>
    %385 = vector.shape_cast %384 : vector<8xf32> to vector<8x1xf32>
    %386 = vector.broadcast %385 : vector<8x1xf32> to vector<8x8xf32>
    %387 = arith.subf %383, %386 : vector<8x8xf32>
    %388 = math.exp %387 : vector<8x8xf32>
    %cst_153 = arith.constant dense<0.000000e+00> : vector<8xf32>
    %389 = vector.multi_reduction <add>, %388, %cst_153 [1] : vector<8x8xf32> to vector<8xf32>
    %390 = vector.shape_cast %389 : vector<8xf32> to vector<8x1xf32>
    %391 = vector.broadcast %390 : vector<8x1xf32> to vector<8x8xf32>
    %392 = arith.divf %388, %391 : vector<8x8xf32>
    %393 = vector.extract_strided_slice %318 {offsets = [0, 24], sizes = [8, 8], strides = [1, 1]} : vector<8x32xf32> to vector<8x8xf32>
    %cst_154 = arith.constant dense<0.000000e+00> : vector<8x8xf32>
    %394 = tpu.matmul %392, %393, %cst_154 {dimension_numbers = #tpu.dot_dimension_numbers<[1], [0], [0], [1], [0, 0, 1, 1], [], []>} : vector<8x8xf32>, vector<8x8xf32>, vector<8x8xf32> -> vector<8x8xf32>
    %395 = vector.extract_strided_slice %3 {offsets = [24, 0], sizes = [8, 32], strides = [1, 1]} : vector<32x32xf32> to vector<8x32xf32>
    %cst_155 = arith.constant dense<0.000000e+00> : vector<8x32xf32>
    %396 = tpu.matmul %394, %395, %cst_155 {dimension_numbers = #tpu.dot_dimension_numbers<[1], [0], [0], [1], [0, 0, 1, 1], [], []>} : vector<8x8xf32>, vector<8x32xf32>, vector<8x32xf32> -> vector<8x32xf32>
    %397 = arith.addf %377, %396 : vector<8x32xf32>
    %398 = arith.addf %288, %397 : vector<8x32xf32>
    %399 = vector.broadcast %4 : vector<1x32xf32> to vector<8x32xf32>
    %400 = arith.addf %398, %399 : vector<8x32xf32>
    %cst_156 = arith.constant dense<0.000000e+00> : vector<8xf32>
    %401 = vector.multi_reduction <add>, %400, %cst_156 [1] : vector<8x32xf32> to vector<8xf32>
    %402 = vector.shape_cast %401 : vector<8xf32> to vector<8x1xf32>
    %cst_157 = arith.constant 3.200000e+01 : f32
    %403 = vector.broadcast %cst_157 : f32 to vector<8x1xf32>
    %404 = arith.divf %402, %403 : vector<8x1xf32>
    %405 = vector.broadcast %404 : vector<8x1xf32> to vector<8x32xf32>
    %406 = arith.subf %400, %405 : vector<8x32xf32>
    %407 = arith.mulf %406, %406 : vector<8x32xf32>
    %cst_158 = arith.constant dense<0.000000e+00> : vector<8xf32>
    %408 = vector.multi_reduction <add>, %407, %cst_158 [1] : vector<8x32xf32> to vector<8xf32>
    %409 = vector.shape_cast %408 : vector<8xf32> to vector<8x1xf32>
    %cst_159 = arith.constant 3.200000e+01 : f32
    %410 = vector.broadcast %cst_159 : f32 to vector<8x1xf32>
    %411 = arith.divf %409, %410 : vector<8x1xf32>
    %412 = vector.broadcast %404 : vector<8x1xf32> to vector<8x32xf32>
    %413 = arith.subf %400, %412 : vector<8x32xf32>
    %cst_160 = arith.constant 9.99999974E-6 : f32
    %414 = vector.broadcast %cst_160 : f32 to vector<8x1xf32>
    %415 = arith.addf %411, %414 : vector<8x1xf32>
    %416 = math.rsqrt %415 : vector<8x1xf32>
    %417 = vector.broadcast %416 : vector<8x1xf32> to vector<8x32xf32>
    %418 = arith.mulf %413, %417 : vector<8x32xf32>
    %419 = vector.broadcast %17 : vector<1x32xf32> to vector<8x32xf32>
    %420 = arith.mulf %418, %419 : vector<8x32xf32>
    %421 = vector.broadcast %18 : vector<1x32xf32> to vector<8x32xf32>
    %422 = arith.addf %420, %421 : vector<8x32xf32>
    %cst_161 = arith.constant dense<0.000000e+00> : vector<8x32xf32>
    %423 = tpu.matmul %422, %5, %cst_161 {dimension_numbers = #tpu.dot_dimension_numbers<[1], [0], [0], [1], [0, 0, 1, 1], [], []>} : vector<8x32xf32>, vector<32x32xf32>, vector<8x32xf32> -> vector<8x32xf32>
    %424 = vector.broadcast %6 : vector<1x32xf32> to vector<8x32xf32>
    %425 = arith.addf %423, %424 : vector<8x32xf32>
    %cst_162 = arith.constant dense<0.000000e+00> : vector<10x64xf32>
    %426 = tpu.matmul %290, %7, %cst_162 {dimension_numbers = #tpu.dot_dimension_numbers<[1], [0], [0], [1], [0, 0, 1, 1], [], []>} : vector<10x32xf32>, vector<32x64xf32>, vector<10x64xf32> -> vector<10x64xf32>
    %427 = vector.broadcast %8 : vector<1x64xf32> to vector<10x64xf32>
    %428 = arith.addf %426, %427 : vector<10x64xf32>
    %429 = vector.extract_strided_slice %428 {offsets = [0, 0], sizes = [10, 32], strides = [1, 1]} : vector<10x64xf32> to vector<10x32xf32>
    %430 = vector.extract_strided_slice %428 {offsets = [0, 32], sizes = [10, 32], strides = [1, 1]} : vector<10x64xf32> to vector<10x32xf32>
    %c1_163 = arith.constant 1 : index
    %c0_164 = arith.constant 0 : index
    %c0_165 = arith.constant 0 : index
    %431 = vector.load %arg4[%c1_163, %c0_164, %c0_165] : memref<2x1x10xf32, #tpu.memory_space<vmem>>, vector<1x1x10xf32>
    %432 = vector.shape_cast %431 : vector<1x1x10xf32> to vector<1x10xf32>
    %433 = vector.extract_strided_slice %425 {offsets = [0, 0], sizes = [8, 8], strides = [1, 1]} : vector<8x32xf32> to vector<8x8xf32>
    %434 = vector.extract_strided_slice %429 {offsets = [0, 0], sizes = [10, 8], strides = [1, 1]} : vector<10x32xf32> to vector<10x8xf32>
    %cst_166 = arith.constant dense<0.000000e+00> : vector<8x10xf32>
    %435 = tpu.matmul %433, %434, %cst_166 {dimension_numbers = #tpu.dot_dimension_numbers<[1], [1], [0], [0], [0, 0, 1, 0], [], []>} : vector<8x8xf32>, vector<10x8xf32>, vector<8x10xf32> -> vector<8x10xf32>
    %cst_167 = arith.constant 0.353553385 : f32
    %436 = vector.broadcast %cst_167 : f32 to vector<8x10xf32>
    %437 = arith.mulf %435, %436 : vector<8x10xf32>
    %438 = vector.broadcast %432 : vector<1x10xf32> to vector<8x10xf32>
    %439 = arith.addf %437, %438 : vector<8x10xf32>
    %cst_168 = arith.constant dense<0xFF800000> : vector<8xf32>
    %440 = vector.multi_reduction <maximumf>, %439, %cst_168 [1] : vector<8x10xf32> to vector<8xf32>
    %441 = vector.shape_cast %440 : vector<8xf32> to vector<8x1xf32>
    %442 = vector.broadcast %441 : vector<8x1xf32> to vector<8x10xf32>
    %443 = arith.subf %439, %442 : vector<8x10xf32>
    %444 = math.exp %443 : vector<8x10xf32>
    %cst_169 = arith.constant dense<0.000000e+00> : vector<8xf32>
    %445 = vector.multi_reduction <add>, %444, %cst_169 [1] : vector<8x10xf32> to vector<8xf32>
    %446 = vector.shape_cast %445 : vector<8xf32> to vector<8x1xf32>
    %447 = vector.broadcast %446 : vector<8x1xf32> to vector<8x10xf32>
    %448 = arith.divf %444, %447 : vector<8x10xf32>
    %449 = vector.extract_strided_slice %430 {offsets = [0, 0], sizes = [10, 8], strides = [1, 1]} : vector<10x32xf32> to vector<10x8xf32>
    %cst_170 = arith.constant dense<0.000000e+00> : vector<8x8xf32>
    %450 = tpu.matmul %448, %449, %cst_170 {dimension_numbers = #tpu.dot_dimension_numbers<[1], [0], [0], [1], [0, 0, 1, 1], [], []>} : vector<8x10xf32>, vector<10x8xf32>, vector<8x8xf32> -> vector<8x8xf32>
    %451 = vector.extract_strided_slice %9 {offsets = [0, 0], sizes = [8, 32], strides = [1, 1]} : vector<32x32xf32> to vector<8x32xf32>
    %cst_171 = arith.constant dense<0.000000e+00> : vector<8x32xf32>
    %452 = tpu.matmul %450, %451, %cst_171 {dimension_numbers = #tpu.dot_dimension_numbers<[1], [0], [0], [1], [0, 0, 1, 1], [], []>} : vector<8x8xf32>, vector<8x32xf32>, vector<8x32xf32> -> vector<8x32xf32>
    %453 = vector.extract_strided_slice %425 {offsets = [0, 8], sizes = [8, 8], strides = [1, 1]} : vector<8x32xf32> to vector<8x8xf32>
    %454 = vector.extract_strided_slice %429 {offsets = [0, 8], sizes = [10, 8], strides = [1, 1]} : vector<10x32xf32> to vector<10x8xf32>
    %cst_172 = arith.constant dense<0.000000e+00> : vector<8x10xf32>
    %455 = tpu.matmul %453, %454, %cst_172 {dimension_numbers = #tpu.dot_dimension_numbers<[1], [1], [0], [0], [0, 0, 1, 0], [], []>} : vector<8x8xf32>, vector<10x8xf32>, vector<8x10xf32> -> vector<8x10xf32>
    %cst_173 = arith.constant 0.353553385 : f32
    %456 = vector.broadcast %cst_173 : f32 to vector<8x10xf32>
    %457 = arith.mulf %455, %456 : vector<8x10xf32>
    %458 = vector.broadcast %432 : vector<1x10xf32> to vector<8x10xf32>
    %459 = arith.addf %457, %458 : vector<8x10xf32>
    %cst_174 = arith.constant dense<0xFF800000> : vector<8xf32>
    %460 = vector.multi_reduction <maximumf>, %459, %cst_174 [1] : vector<8x10xf32> to vector<8xf32>
    %461 = vector.shape_cast %460 : vector<8xf32> to vector<8x1xf32>
    %462 = vector.broadcast %461 : vector<8x1xf32> to vector<8x10xf32>
    %463 = arith.subf %459, %462 : vector<8x10xf32>
    %464 = math.exp %463 : vector<8x10xf32>
    %cst_175 = arith.constant dense<0.000000e+00> : vector<8xf32>
    %465 = vector.multi_reduction <add>, %464, %cst_175 [1] : vector<8x10xf32> to vector<8xf32>
    %466 = vector.shape_cast %465 : vector<8xf32> to vector<8x1xf32>
    %467 = vector.broadcast %466 : vector<8x1xf32> to vector<8x10xf32>
    %468 = arith.divf %464, %467 : vector<8x10xf32>
    %469 = vector.extract_strided_slice %430 {offsets = [0, 8], sizes = [10, 8], strides = [1, 1]} : vector<10x32xf32> to vector<10x8xf32>
    %cst_176 = arith.constant dense<0.000000e+00> : vector<8x8xf32>
    %470 = tpu.matmul %468, %469, %cst_176 {dimension_numbers = #tpu.dot_dimension_numbers<[1], [0], [0], [1], [0, 0, 1, 1], [], []>} : vector<8x10xf32>, vector<10x8xf32>, vector<8x8xf32> -> vector<8x8xf32>
    %471 = vector.extract_strided_slice %9 {offsets = [8, 0], sizes = [8, 32], strides = [1, 1]} : vector<32x32xf32> to vector<8x32xf32>
    %cst_177 = arith.constant dense<0.000000e+00> : vector<8x32xf32>
    %472 = tpu.matmul %470, %471, %cst_177 {dimension_numbers = #tpu.dot_dimension_numbers<[1], [0], [0], [1], [0, 0, 1, 1], [], []>} : vector<8x8xf32>, vector<8x32xf32>, vector<8x32xf32> -> vector<8x32xf32>
    %473 = arith.addf %452, %472 : vector<8x32xf32>
    %474 = vector.extract_strided_slice %425 {offsets = [0, 16], sizes = [8, 8], strides = [1, 1]} : vector<8x32xf32> to vector<8x8xf32>
    %475 = vector.extract_strided_slice %429 {offsets = [0, 16], sizes = [10, 8], strides = [1, 1]} : vector<10x32xf32> to vector<10x8xf32>
    %cst_178 = arith.constant dense<0.000000e+00> : vector<8x10xf32>
    %476 = tpu.matmul %474, %475, %cst_178 {dimension_numbers = #tpu.dot_dimension_numbers<[1], [1], [0], [0], [0, 0, 1, 0], [], []>} : vector<8x8xf32>, vector<10x8xf32>, vector<8x10xf32> -> vector<8x10xf32>
    %cst_179 = arith.constant 0.353553385 : f32
    %477 = vector.broadcast %cst_179 : f32 to vector<8x10xf32>
    %478 = arith.mulf %476, %477 : vector<8x10xf32>
    %479 = vector.broadcast %432 : vector<1x10xf32> to vector<8x10xf32>
    %480 = arith.addf %478, %479 : vector<8x10xf32>
    %cst_180 = arith.constant dense<0xFF800000> : vector<8xf32>
    %481 = vector.multi_reduction <maximumf>, %480, %cst_180 [1] : vector<8x10xf32> to vector<8xf32>
    %482 = vector.shape_cast %481 : vector<8xf32> to vector<8x1xf32>
    %483 = vector.broadcast %482 : vector<8x1xf32> to vector<8x10xf32>
    %484 = arith.subf %480, %483 : vector<8x10xf32>
    %485 = math.exp %484 : vector<8x10xf32>
    %cst_181 = arith.constant dense<0.000000e+00> : vector<8xf32>
    %486 = vector.multi_reduction <add>, %485, %cst_181 [1] : vector<8x10xf32> to vector<8xf32>
    %487 = vector.shape_cast %486 : vector<8xf32> to vector<8x1xf32>
    %488 = vector.broadcast %487 : vector<8x1xf32> to vector<8x10xf32>
    %489 = arith.divf %485, %488 : vector<8x10xf32>
    %490 = vector.extract_strided_slice %430 {offsets = [0, 16], sizes = [10, 8], strides = [1, 1]} : vector<10x32xf32> to vector<10x8xf32>
    %cst_182 = arith.constant dense<0.000000e+00> : vector<8x8xf32>
    %491 = tpu.matmul %489, %490, %cst_182 {dimension_numbers = #tpu.dot_dimension_numbers<[1], [0], [0], [1], [0, 0, 1, 1], [], []>} : vector<8x10xf32>, vector<10x8xf32>, vector<8x8xf32> -> vector<8x8xf32>
    %492 = vector.extract_strided_slice %9 {offsets = [16, 0], sizes = [8, 32], strides = [1, 1]} : vector<32x32xf32> to vector<8x32xf32>
    %cst_183 = arith.constant dense<0.000000e+00> : vector<8x32xf32>
    %493 = tpu.matmul %491, %492, %cst_183 {dimension_numbers = #tpu.dot_dimension_numbers<[1], [0], [0], [1], [0, 0, 1, 1], [], []>} : vector<8x8xf32>, vector<8x32xf32>, vector<8x32xf32> -> vector<8x32xf32>
    %494 = arith.addf %473, %493 : vector<8x32xf32>
    %495 = vector.extract_strided_slice %425 {offsets = [0, 24], sizes = [8, 8], strides = [1, 1]} : vector<8x32xf32> to vector<8x8xf32>
    %496 = vector.extract_strided_slice %429 {offsets = [0, 24], sizes = [10, 8], strides = [1, 1]} : vector<10x32xf32> to vector<10x8xf32>
    %cst_184 = arith.constant dense<0.000000e+00> : vector<8x10xf32>
    %497 = tpu.matmul %495, %496, %cst_184 {dimension_numbers = #tpu.dot_dimension_numbers<[1], [1], [0], [0], [0, 0, 1, 0], [], []>} : vector<8x8xf32>, vector<10x8xf32>, vector<8x10xf32> -> vector<8x10xf32>
    %cst_185 = arith.constant 0.353553385 : f32
    %498 = vector.broadcast %cst_185 : f32 to vector<8x10xf32>
    %499 = arith.mulf %497, %498 : vector<8x10xf32>
    %500 = vector.broadcast %432 : vector<1x10xf32> to vector<8x10xf32>
    %501 = arith.addf %499, %500 : vector<8x10xf32>
    %cst_186 = arith.constant dense<0xFF800000> : vector<8xf32>
    %502 = vector.multi_reduction <maximumf>, %501, %cst_186 [1] : vector<8x10xf32> to vector<8xf32>
    %503 = vector.shape_cast %502 : vector<8xf32> to vector<8x1xf32>
    %504 = vector.broadcast %503 : vector<8x1xf32> to vector<8x10xf32>
    %505 = arith.subf %501, %504 : vector<8x10xf32>
    %506 = math.exp %505 : vector<8x10xf32>
    %cst_187 = arith.constant dense<0.000000e+00> : vector<8xf32>
    %507 = vector.multi_reduction <add>, %506, %cst_187 [1] : vector<8x10xf32> to vector<8xf32>
    %508 = vector.shape_cast %507 : vector<8xf32> to vector<8x1xf32>
    %509 = vector.broadcast %508 : vector<8x1xf32> to vector<8x10xf32>
    %510 = arith.divf %506, %509 : vector<8x10xf32>
    %511 = vector.extract_strided_slice %430 {offsets = [0, 24], sizes = [10, 8], strides = [1, 1]} : vector<10x32xf32> to vector<10x8xf32>
    %cst_188 = arith.constant dense<0.000000e+00> : vector<8x8xf32>
    %512 = tpu.matmul %510, %511, %cst_188 {dimension_numbers = #tpu.dot_dimension_numbers<[1], [0], [0], [1], [0, 0, 1, 1], [], []>} : vector<8x10xf32>, vector<10x8xf32>, vector<8x8xf32> -> vector<8x8xf32>
    %513 = vector.extract_strided_slice %9 {offsets = [24, 0], sizes = [8, 32], strides = [1, 1]} : vector<32x32xf32> to vector<8x32xf32>
    %cst_189 = arith.constant dense<0.000000e+00> : vector<8x32xf32>
    %514 = tpu.matmul %512, %513, %cst_189 {dimension_numbers = #tpu.dot_dimension_numbers<[1], [0], [0], [1], [0, 0, 1, 1], [], []>} : vector<8x8xf32>, vector<8x32xf32>, vector<8x32xf32> -> vector<8x32xf32>
    %515 = arith.addf %494, %514 : vector<8x32xf32>
    %516 = arith.addf %400, %515 : vector<8x32xf32>
    %517 = vector.broadcast %10 : vector<1x32xf32> to vector<8x32xf32>
    %518 = arith.addf %516, %517 : vector<8x32xf32>
    %cst_190 = arith.constant dense<0.000000e+00> : vector<8xf32>
    %519 = vector.multi_reduction <add>, %518, %cst_190 [1] : vector<8x32xf32> to vector<8xf32>
    %520 = vector.shape_cast %519 : vector<8xf32> to vector<8x1xf32>
    %cst_191 = arith.constant 3.200000e+01 : f32
    %521 = vector.broadcast %cst_191 : f32 to vector<8x1xf32>
    %522 = arith.divf %520, %521 : vector<8x1xf32>
    %523 = vector.broadcast %522 : vector<8x1xf32> to vector<8x32xf32>
    %524 = arith.subf %518, %523 : vector<8x32xf32>
    %525 = arith.mulf %524, %524 : vector<8x32xf32>
    %cst_192 = arith.constant dense<0.000000e+00> : vector<8xf32>
    %526 = vector.multi_reduction <add>, %525, %cst_192 [1] : vector<8x32xf32> to vector<8xf32>
    %527 = vector.shape_cast %526 : vector<8xf32> to vector<8x1xf32>
    %cst_193 = arith.constant 3.200000e+01 : f32
    %528 = vector.broadcast %cst_193 : f32 to vector<8x1xf32>
    %529 = arith.divf %527, %528 : vector<8x1xf32>
    %530 = vector.broadcast %522 : vector<8x1xf32> to vector<8x32xf32>
    %531 = arith.subf %518, %530 : vector<8x32xf32>
    %cst_194 = arith.constant 9.99999974E-6 : f32
    %532 = vector.broadcast %cst_194 : f32 to vector<8x1xf32>
    %533 = arith.addf %529, %532 : vector<8x1xf32>
    %534 = math.rsqrt %533 : vector<8x1xf32>
    %535 = vector.broadcast %534 : vector<8x1xf32> to vector<8x32xf32>
    %536 = arith.mulf %531, %535 : vector<8x32xf32>
    %537 = vector.broadcast %19 : vector<1x32xf32> to vector<8x32xf32>
    %538 = arith.mulf %536, %537 : vector<8x32xf32>
    %539 = vector.broadcast %20 : vector<1x32xf32> to vector<8x32xf32>
    %540 = arith.addf %538, %539 : vector<8x32xf32>
    %cst_195 = arith.constant dense<0.000000e+00> : vector<8x64xf32>
    %541 = tpu.matmul %540, %11, %cst_195 {dimension_numbers = #tpu.dot_dimension_numbers<[1], [0], [0], [1], [0, 0, 1, 1], [], []>} : vector<8x32xf32>, vector<32x64xf32>, vector<8x64xf32> -> vector<8x64xf32>
    %542 = vector.broadcast %12 : vector<1x64xf32> to vector<8x64xf32>
    %543 = arith.addf %541, %542 : vector<8x64xf32>
    %cst_196 = arith.constant 0.000000e+00 : f32
    %544 = vector.broadcast %cst_196 : f32 to vector<8x64xf32>
    %545 = arith.maximumf %543, %544 : vector<8x64xf32>
    %cst_197 = arith.constant dense<0.000000e+00> : vector<8x32xf32>
    %546 = tpu.matmul %545, %13, %cst_197 {dimension_numbers = #tpu.dot_dimension_numbers<[1], [0], [0], [1], [0, 0, 1, 1], [], []>} : vector<8x64xf32>, vector<64x32xf32>, vector<8x32xf32> -> vector<8x32xf32>
    %547 = vector.broadcast %14 : vector<1x32xf32> to vector<8x32xf32>
    %548 = arith.addf %546, %547 : vector<8x32xf32>
    %549 = arith.addf %518, %548 : vector<8x32xf32>
    %c1_198 = arith.constant 1 : index
    %c0_199 = arith.constant 0 : index
    %c0_200 = arith.constant 0 : index
    %550 = vector.load %arg25[%c1_198, %c0_199, %c0_200] : memref<2x8x32xf32, #tpu.memory_space<vmem>>, vector<1x8x32xf32>
    %551 = vector.shape_cast %550 : vector<1x8x32xf32> to vector<8x32xf32>
    %552 = vector.shape_cast %549 : vector<8x32xf32> to vector<1x8x32xf32>
    tpu.vector_store %arg25[%c1_198, %c0_199, %c0_200], %552 {strides = array<i32>} : memref<2x8x32xf32, #tpu.memory_space<vmem>>, vector<1x8x32xf32>,
    return
  }
  func.func @transform_0(%arg0: i32) -> (i32, i32, i32) {
    %c0_i32 = arith.constant 0 : i32
    %c0_i32_0 = arith.constant 0 : i32
    %c0_i32_1 = arith.constant 0 : i32
    %c0_i32_2 = arith.constant 0 : i32
    return %c0_i32, %c0_i32_0, %c0_i32_1 : i32, i32, i32
  }
  func.func @transform_1(%arg0: i32) -> (i32, i32, i32) {
    %c0_i32 = arith.constant 0 : i32
    %c0_i32_0 = arith.constant 0 : i32
    %c0_i32_1 = arith.constant 0 : i32
    %c0_i32_2 = arith.constant 0 : i32
    return %c0_i32, %c0_i32_0, %c0_i32_1 : i32, i32, i32
  }
  func.func @transform_2(%arg0: i32) -> (i32, i32) {
    %c0_i32 = arith.constant 0 : i32
    %c0_i32_0 = arith.constant 0 : i32
    %c0_i32_1 = arith.constant 0 : i32
    return %c0_i32, %c0_i32_0 : i32, i32
  }
  func.func @transform_3(%arg0: i32) -> (i32, i32, i32) {
    %c0_i32 = arith.constant 0 : i32
    %c0_i32_0 = arith.constant 0 : i32
    %c0_i32_1 = arith.constant 0 : i32
    %c0_i32_2 = arith.constant 0 : i32
    return %c0_i32, %c0_i32_0, %c0_i32_1 : i32, i32, i32
  }
  func.func @transform_4(%arg0: i32) -> (i32, i32) {
    %c0_i32 = arith.constant 0 : i32
    %c0_i32_0 = arith.constant 0 : i32
    %c0_i32_1 = arith.constant 0 : i32
    return %c0_i32, %c0_i32_0 : i32, i32
  }
  func.func @transform_5(%arg0: i32) -> (i32, i32) {
    %c0_i32 = arith.constant 0 : i32
    %c0_i32_0 = arith.constant 0 : i32
    %c0_i32_1 = arith.constant 0 : i32
    return %c0_i32, %c0_i32_0 : i32, i32
  }
  func.func @transform_6(%arg0: i32) -> (i32, i32) {
    %c0_i32 = arith.constant 0 : i32
    %c0_i32_0 = arith.constant 0 : i32
    %c0_i32_1 = arith.constant 0 : i32
    return %c0_i32, %c0_i32_0 : i32, i32
  }
  func.func @transform_7(%arg0: i32) -> (i32, i32) {
    %c0_i32 = arith.constant 0 : i32
    %c0_i32_0 = arith.constant 0 : i32
    %c0_i32_1 = arith.constant 0 : i32
    return %c0_i32, %c0_i32_0 : i32, i32
  }
  func.func @transform_8(%arg0: i32) -> (i32, i32) {
    %c0_i32 = arith.constant 0 : i32
    %c0_i32_0 = arith.constant 0 : i32
    %c0_i32_1 = arith.constant 0 : i32
    return %c0_i32, %c0_i32_0 : i32, i32
  }
  func.func @transform_9(%arg0: i32) -> (i32, i32) {
    %c0_i32 = arith.constant 0 : i32
    %c0_i32_0 = arith.constant 0 : i32
    %c0_i32_1 = arith.constant 0 : i32
    return %c0_i32, %c0_i32_0 : i32, i32
  }
  func.func @transform_10(%arg0: i32) -> (i32, i32) {
    %c0_i32 = arith.constant 0 : i32
    %c0_i32_0 = arith.constant 0 : i32
    %c0_i32_1 = arith.constant 0 : i32
    return %c0_i32, %c0_i32_0 : i32, i32
  }
  func.func @transform_11(%arg0: i32) -> (i32, i32) {
    %c0_i32 = arith.constant 0 : i32
    %c0_i32_0 = arith.constant 0 : i32
    %c0_i32_1 = arith.constant 0 : i32
    return %c0_i32, %c0_i32_0 : i32, i32
  }
  func.func @transform_12(%arg0: i32) -> (i32, i32) {
    %c0_i32 = arith.constant 0 : i32
    %c0_i32_0 = arith.constant 0 : i32
    %c0_i32_1 = arith.constant 0 : i32
    return %c0_i32, %c0_i32_0 : i32, i32
  }
  func.func @transform_13(%arg0: i32) -> (i32, i32) {
    %c0_i32 = arith.constant 0 : i32
    %c0_i32_0 = arith.constant 0 : i32
    %c0_i32_1 = arith.constant 0 : i32
    return %c0_i32, %c0_i32_0 : i32, i32
  }
  func.func @transform_14(%arg0: i32) -> (i32, i32) {
    %c0_i32 = arith.constant 0 : i32
    %c0_i32_0 = arith.constant 0 : i32
    %c0_i32_1 = arith.constant 0 : i32
    return %c0_i32, %c0_i32_0 : i32, i32
  }
  func.func @transform_15(%arg0: i32) -> (i32, i32) {
    %c0_i32 = arith.constant 0 : i32
    %c0_i32_0 = arith.constant 0 : i32
    %c0_i32_1 = arith.constant 0 : i32
    return %c0_i32, %c0_i32_0 : i32, i32
  }
  func.func @transform_16(%arg0: i32) -> (i32, i32) {
    %c0_i32 = arith.constant 0 : i32
    %c0_i32_0 = arith.constant 0 : i32
    %c0_i32_1 = arith.constant 0 : i32
    return %c0_i32, %c0_i32_0 : i32, i32
  }
  func.func @transform_17(%arg0: i32) -> (i32, i32) {
    %c0_i32 = arith.constant 0 : i32
    %c0_i32_0 = arith.constant 0 : i32
    %c0_i32_1 = arith.constant 0 : i32
    return %c0_i32, %c0_i32_0 : i32, i32
  }
  func.func @transform_18(%arg0: i32) -> (i32, i32) {
    %c0_i32 = arith.constant 0 : i32
    %c0_i32_0 = arith.constant 0 : i32
    %c0_i32_1 = arith.constant 0 : i32
    return %c0_i32, %c0_i32_0 : i32, i32
  }
  func.func @transform_19(%arg0: i32) -> (i32, i32) {
    %c0_i32 = arith.constant 0 : i32
    %c0_i32_0 = arith.constant 0 : i32
    %c0_i32_1 = arith.constant 0 : i32
    return %c0_i32, %c0_i32_0 : i32, i32
  }
  func.func @transform_20(%arg0: i32) -> (i32, i32) {
    %c0_i32 = arith.constant 0 : i32
    %c0_i32_0 = arith.constant 0 : i32
    %c0_i32_1 = arith.constant 0 : i32
    return %c0_i32, %c0_i32_0 : i32, i32
  }
  func.func @transform_21(%arg0: i32) -> (i32, i32) {
    %c0_i32 = arith.constant 0 : i32
    %c0_i32_0 = arith.constant 0 : i32
    %c0_i32_1 = arith.constant 0 : i32
    return %c0_i32, %c0_i32_0 : i32, i32
  }
  func.func @transform_22(%arg0: i32) -> (i32, i32) {
    %c0_i32 = arith.constant 0 : i32
    %c0_i32_0 = arith.constant 0 : i32
    %c0_i32_1 = arith.constant 0 : i32
    return %c0_i32, %c0_i32_0 : i32, i32
  }
  func.func @transform_23(%arg0: i32) -> (i32, i32) {
    %c0_i32 = arith.constant 0 : i32
    %c0_i32_0 = arith.constant 0 : i32
    %c0_i32_1 = arith.constant 0 : i32
    return %c0_i32, %c0_i32_0 : i32, i32
  }
  func.func @transform_24(%arg0: i32) -> (i32, i32, i32) {
    %c0_i32 = arith.constant 0 : i32
    %c0_i32_0 = arith.constant 0 : i32
    %c0_i32_1 = arith.constant 0 : i32
    %c0_i32_2 = arith.constant 0 : i32
    return %c0_i32, %c0_i32_0, %c0_i32_1 : i32, i32, i32
  }
}

module attributes {stable_mosaic.version = 11 : i64} {
  func.func @_wordpred_kernel(%arg0: i32, %arg1: memref<16x32xf32, #tpu.memory_space<vmem>>, %arg2: memref<1x32xf32, #tpu.memory_space<vmem>>, %arg3: memref<1x32xf32, #tpu.memory_space<vmem>>, %arg4: memref<32x32xf32, #tpu.memory_space<vmem>>, %arg5: memref<1x32xf32, #tpu.memory_space<vmem>>, %arg6: memref<1x1xf32, #tpu.memory_space<vmem>>, %arg7: memref<1x32xf32, #tpu.memory_space<vmem>>, %arg8: memref<1x32xf32, #tpu.memory_space<vmem>>, %arg9: memref<32x20xf32, #tpu.memory_space<vmem>>, %arg10: memref<1x20xf32, #tpu.memory_space<vmem>>, %arg11: memref<16x20xf32, #tpu.memory_space<vmem>>) attributes {dimension_semantics = [#tpu.dimension_semantics<parallel>], iteration_bounds = array<i64: 1>, scalar_prefetch = 0 : i64, scratch_operands = 0 : i64, tpu.core_type = #tpu.core_type<tc>, window_params = [{pipeline_mode = #tpu.pipeline_mode<synchronous>, transform_indices = @transform_0, window_bounds = array<i64: 16, 32>}, {pipeline_mode = #tpu.pipeline_mode<synchronous>, transform_indices = @transform_1, window_bounds = array<i64: 1, 32>}, {pipeline_mode = #tpu.pipeline_mode<synchronous>, transform_indices = @transform_2, window_bounds = array<i64: 1, 32>}, {pipeline_mode = #tpu.pipeline_mode<synchronous>, transform_indices = @transform_3, window_bounds = array<i64: 32, 32>}, {pipeline_mode = #tpu.pipeline_mode<synchronous>, transform_indices = @transform_4, window_bounds = array<i64: 1, 32>}, {pipeline_mode = #tpu.pipeline_mode<synchronous>, transform_indices = @transform_5, window_bounds = array<i64: 1, 1>}, {pipeline_mode = #tpu.pipeline_mode<synchronous>, transform_indices = @transform_6, window_bounds = array<i64: 1, 32>}, {pipeline_mode = #tpu.pipeline_mode<synchronous>, transform_indices = @transform_7, window_bounds = array<i64: 1, 32>}, {pipeline_mode = #tpu.pipeline_mode<synchronous>, transform_indices = @transform_8, window_bounds = array<i64: 32, 20>}, {pipeline_mode = #tpu.pipeline_mode<synchronous>, transform_indices = @transform_9, window_bounds = array<i64: 1, 20>}, {pipeline_mode = #tpu.pipeline_mode<synchronous>, transform_indices = @transform_10, window_bounds = array<i64: 16, 20>}]} {
    %c0 = arith.constant 0 : index
    %c0_0 = arith.constant 0 : index
    %0 = vector.load %arg1[%c0, %c0_0] : memref<16x32xf32, #tpu.memory_space<vmem>>, vector<16x32xf32>
    %c0_1 = arith.constant 0 : index
    %c0_2 = arith.constant 0 : index
    %1 = vector.load %arg2[%c0_1, %c0_2] : memref<1x32xf32, #tpu.memory_space<vmem>>, vector<1x32xf32>
    %c0_3 = arith.constant 0 : index
    %c0_4 = arith.constant 0 : index
    %2 = vector.load %arg3[%c0_3, %c0_4] : memref<1x32xf32, #tpu.memory_space<vmem>>, vector<1x32xf32>
    %cst = arith.constant dense<0.000000e+00> : vector<16xf32>
    %3 = vector.multi_reduction <add>, %0, %cst [1] : vector<16x32xf32> to vector<16xf32>
    %4 = vector.shape_cast %3 : vector<16xf32> to vector<16x1xf32>
    %cst_5 = arith.constant 3.200000e+01 : f32
    %5 = vector.broadcast %cst_5 : f32 to vector<16x1xf32>
    %6 = arith.divf %4, %5 : vector<16x1xf32>
    %7 = vector.broadcast %6 : vector<16x1xf32> to vector<16x32xf32>
    %8 = arith.subf %0, %7 : vector<16x32xf32>
    %9 = arith.mulf %8, %8 : vector<16x32xf32>
    %cst_6 = arith.constant dense<0.000000e+00> : vector<16xf32>
    %10 = vector.multi_reduction <add>, %9, %cst_6 [1] : vector<16x32xf32> to vector<16xf32>
    %11 = vector.shape_cast %10 : vector<16xf32> to vector<16x1xf32>
    %cst_7 = arith.constant 3.200000e+01 : f32
    %12 = vector.broadcast %cst_7 : f32 to vector<16x1xf32>
    %13 = arith.divf %11, %12 : vector<16x1xf32>
    %14 = vector.broadcast %6 : vector<16x1xf32> to vector<16x32xf32>
    %15 = arith.subf %0, %14 : vector<16x32xf32>
    %cst_8 = arith.constant 9.99999974E-6 : f32
    %16 = vector.broadcast %cst_8 : f32 to vector<16x1xf32>
    %17 = arith.addf %13, %16 : vector<16x1xf32>
    %18 = math.rsqrt %17 : vector<16x1xf32>
    %19 = vector.broadcast %18 : vector<16x1xf32> to vector<16x32xf32>
    %20 = arith.mulf %15, %19 : vector<16x32xf32>
    %21 = vector.broadcast %1 : vector<1x32xf32> to vector<16x32xf32>
    %22 = arith.mulf %20, %21 : vector<16x32xf32>
    %23 = vector.broadcast %2 : vector<1x32xf32> to vector<16x32xf32>
    %24 = arith.addf %22, %23 : vector<16x32xf32>
    %c0_9 = arith.constant 0 : index
    %c0_10 = arith.constant 0 : index
    %25 = vector.load %arg4[%c0_9, %c0_10] : memref<32x32xf32, #tpu.memory_space<vmem>>, vector<32x32xf32>
    %cst_11 = arith.constant dense<0.000000e+00> : vector<16x32xf32>
    %26 = tpu.matmul %24, %25, %cst_11 {dimension_numbers = #tpu.dot_dimension_numbers<[1], [0], [0], [1], [0, 0, 1, 1], [], []>} : vector<16x32xf32>, vector<32x32xf32>, vector<16x32xf32> -> vector<16x32xf32>
    %c0_12 = arith.constant 0 : index
    %c0_13 = arith.constant 0 : index
    %27 = vector.load %arg5[%c0_12, %c0_13] : memref<1x32xf32, #tpu.memory_space<vmem>>, vector<1x32xf32>
    %28 = vector.broadcast %27 : vector<1x32xf32> to vector<16x32xf32>
    %29 = arith.addf %26, %28 : vector<16x32xf32>
    %cst_14 = arith.constant 0.000000e+00 : f32
    %30 = vector.broadcast %cst_14 : f32 to vector<16x32xf32>
    %31 = arith.cmpf oge, %29, %30 : vector<16x32xf32>
    %c0_15 = arith.constant 0 : index
    %c0_16 = arith.constant 0 : index
    %32 = vector.load %arg6[%c0_15, %c0_16] : memref<1x1xf32, #tpu.memory_space<vmem>>, vector<1x1xf32>
    %33 = vector.broadcast %32 : vector<1x1xf32> to vector<16x32xf32>
    %34 = arith.mulf %33, %29 : vector<16x32xf32>
    %35 = arith.select %31, %29, %34 : vector<16x32xi1>, vector<16x32xf32>
    %c0_17 = arith.constant 0 : index
    %c0_18 = arith.constant 0 : index
    %36 = vector.load %arg7[%c0_17, %c0_18] : memref<1x32xf32, #tpu.memory_space<vmem>>, vector<1x32xf32>
    %c0_19 = arith.constant 0 : index
    %c0_20 = arith.constant 0 : index
    %37 = vector.load %arg8[%c0_19, %c0_20] : memref<1x32xf32, #tpu.memory_space<vmem>>, vector<1x32xf32>
    %cst_21 = arith.constant dense<0.000000e+00> : vector<16xf32>
    %38 = vector.multi_reduction <add>, %35, %cst_21 [1] : vector<16x32xf32> to vector<16xf32>
    %39 = vector.shape_cast %38 : vector<16xf32> to vector<16x1xf32>
    %cst_22 = arith.constant 3.200000e+01 : f32
    %40 = vector.broadcast %cst_22 : f32 to vector<16x1xf32>
    %41 = arith.divf %39, %40 : vector<16x1xf32>
    %42 = vector.broadcast %41 : vector<16x1xf32> to vector<16x32xf32>
    %43 = arith.subf %35, %42 : vector<16x32xf32>
    %44 = arith.mulf %43, %43 : vector<16x32xf32>
    %cst_23 = arith.constant dense<0.000000e+00> : vector<16xf32>
    %45 = vector.multi_reduction <add>, %44, %cst_23 [1] : vector<16x32xf32> to vector<16xf32>
    %46 = vector.shape_cast %45 : vector<16xf32> to vector<16x1xf32>
    %cst_24 = arith.constant 3.200000e+01 : f32
    %47 = vector.broadcast %cst_24 : f32 to vector<16x1xf32>
    %48 = arith.divf %46, %47 : vector<16x1xf32>
    %49 = vector.broadcast %41 : vector<16x1xf32> to vector<16x32xf32>
    %50 = arith.subf %35, %49 : vector<16x32xf32>
    %cst_25 = arith.constant 9.99999974E-6 : f32
    %51 = vector.broadcast %cst_25 : f32 to vector<16x1xf32>
    %52 = arith.addf %48, %51 : vector<16x1xf32>
    %53 = math.rsqrt %52 : vector<16x1xf32>
    %54 = vector.broadcast %53 : vector<16x1xf32> to vector<16x32xf32>
    %55 = arith.mulf %50, %54 : vector<16x32xf32>
    %56 = vector.broadcast %36 : vector<1x32xf32> to vector<16x32xf32>
    %57 = arith.mulf %55, %56 : vector<16x32xf32>
    %58 = vector.broadcast %37 : vector<1x32xf32> to vector<16x32xf32>
    %59 = arith.addf %57, %58 : vector<16x32xf32>
    %c0_26 = arith.constant 0 : index
    %c0_27 = arith.constant 0 : index
    %60 = vector.load %arg9[%c0_26, %c0_27] : memref<32x20xf32, #tpu.memory_space<vmem>>, vector<32x20xf32>
    %cst_28 = arith.constant dense<0.000000e+00> : vector<16x20xf32>
    %61 = tpu.matmul %59, %60, %cst_28 {dimension_numbers = #tpu.dot_dimension_numbers<[1], [0], [0], [1], [0, 0, 1, 1], [], []>} : vector<16x32xf32>, vector<32x20xf32>, vector<16x20xf32> -> vector<16x20xf32>
    %c0_29 = arith.constant 0 : index
    %c0_30 = arith.constant 0 : index
    %62 = vector.load %arg10[%c0_29, %c0_30] : memref<1x20xf32, #tpu.memory_space<vmem>>, vector<1x20xf32>
    %63 = vector.broadcast %62 : vector<1x20xf32> to vector<16x20xf32>
    %64 = arith.addf %61, %63 : vector<16x20xf32>
    %c0_31 = arith.constant 0 : index
    %c0_32 = arith.constant 0 : index
    %65 = vector.load %arg11[%c0_31, %c0_32] : memref<16x20xf32, #tpu.memory_space<vmem>>, vector<16x20xf32>
    tpu.vector_store %arg11[%c0_31, %c0_32], %64 {strides = array<i32>} : memref<16x20xf32, #tpu.memory_space<vmem>>, vector<16x20xf32>,
    return
  }
  func.func @transform_0(%arg0: i32) -> (i32, i32) {
    %c0_i32 = arith.constant 0 : i32
    %c0_i32_0 = arith.constant 0 : i32
    %c0_i32_1 = arith.constant 0 : i32
    return %c0_i32, %c0_i32_0 : i32, i32
  }
  func.func @transform_1(%arg0: i32) -> (i32, i32) {
    %c0_i32 = arith.constant 0 : i32
    %c0_i32_0 = arith.constant 0 : i32
    %c0_i32_1 = arith.constant 0 : i32
    return %c0_i32, %c0_i32_0 : i32, i32
  }
  func.func @transform_2(%arg0: i32) -> (i32, i32) {
    %c0_i32 = arith.constant 0 : i32
    %c0_i32_0 = arith.constant 0 : i32
    %c0_i32_1 = arith.constant 0 : i32
    return %c0_i32, %c0_i32_0 : i32, i32
  }
  func.func @transform_3(%arg0: i32) -> (i32, i32) {
    %c0_i32 = arith.constant 0 : i32
    %c0_i32_0 = arith.constant 0 : i32
    %c0_i32_1 = arith.constant 0 : i32
    return %c0_i32, %c0_i32_0 : i32, i32
  }
  func.func @transform_4(%arg0: i32) -> (i32, i32) {
    %c0_i32 = arith.constant 0 : i32
    %c0_i32_0 = arith.constant 0 : i32
    %c0_i32_1 = arith.constant 0 : i32
    return %c0_i32, %c0_i32_0 : i32, i32
  }
  func.func @transform_5(%arg0: i32) -> (i32, i32) {
    %c0_i32 = arith.constant 0 : i32
    %c0_i32_0 = arith.constant 0 : i32
    %c0_i32_1 = arith.constant 0 : i32
    return %c0_i32, %c0_i32_0 : i32, i32
  }
  func.func @transform_6(%arg0: i32) -> (i32, i32) {
    %c0_i32 = arith.constant 0 : i32
    %c0_i32_0 = arith.constant 0 : i32
    %c0_i32_1 = arith.constant 0 : i32
    return %c0_i32, %c0_i32_0 : i32, i32
  }
  func.func @transform_7(%arg0: i32) -> (i32, i32) {
    %c0_i32 = arith.constant 0 : i32
    %c0_i32_0 = arith.constant 0 : i32
    %c0_i32_1 = arith.constant 0 : i32
    return %c0_i32, %c0_i32_0 : i32, i32
  }
  func.func @transform_8(%arg0: i32) -> (i32, i32) {
    %c0_i32 = arith.constant 0 : i32
    %c0_i32_0 = arith.constant 0 : i32
    %c0_i32_1 = arith.constant 0 : i32
    return %c0_i32, %c0_i32_0 : i32, i32
  }
  func.func @transform_9(%arg0: i32) -> (i32, i32) {
    %c0_i32 = arith.constant 0 : i32
    %c0_i32_0 = arith.constant 0 : i32
    %c0_i32_1 = arith.constant 0 : i32
    return %c0_i32, %c0_i32_0 : i32, i32
  }
  func.func @transform_10(%arg0: i32) -> (i32, i32) {
    %c0_i32 = arith.constant 0 : i32
    %c0_i32_0 = arith.constant 0 : i32
    %c0_i32_1 = arith.constant 0 : i32
    return %c0_i32, %c0_i32_0 : i32, i32
  }
}

module attributes {stable_mosaic.version = 11 : i64} {
  func.func @_ce_kernel(%arg0: i32, %arg1: memref<14x20xf32, #tpu.memory_space<vmem>>, %arg2: memref<14x20xf32, #tpu.memory_space<vmem>>, %arg3: memref<14x1xf32, #tpu.memory_space<vmem>>, %arg4: memref<1x1xf32, #tpu.memory_space<vmem>>) attributes {dimension_semantics = [#tpu.dimension_semantics<parallel>], iteration_bounds = array<i64: 1>, scalar_prefetch = 0 : i64, scratch_operands = 0 : i64, tpu.core_type = #tpu.core_type<tc>, window_params = [{pipeline_mode = #tpu.pipeline_mode<synchronous>, transform_indices = @transform_0, window_bounds = array<i64: 14, 20>}, {pipeline_mode = #tpu.pipeline_mode<synchronous>, transform_indices = @transform_1, window_bounds = array<i64: 14, 20>}, {pipeline_mode = #tpu.pipeline_mode<synchronous>, transform_indices = @transform_2, window_bounds = array<i64: 14, 1>}, {pipeline_mode = #tpu.pipeline_mode<synchronous>, transform_indices = @transform_3, window_bounds = array<i64: 1, 1>}]} {
    %c0 = arith.constant 0 : index
    %c0_0 = arith.constant 0 : index
    %0 = vector.load %arg1[%c0, %c0_0] : memref<14x20xf32, #tpu.memory_space<vmem>>, vector<14x20xf32>
    %cst = arith.constant dense<0xFF800000> : vector<14xf32>
    %1 = vector.multi_reduction <maximumf>, %0, %cst [1] : vector<14x20xf32> to vector<14xf32>
    %2 = vector.shape_cast %1 : vector<14xf32> to vector<14x1xf32>
    %3 = vector.broadcast %2 : vector<14x1xf32> to vector<14x20xf32>
    %4 = arith.subf %0, %3 : vector<14x20xf32>
    %5 = math.exp %4 : vector<14x20xf32>
    %cst_1 = arith.constant dense<0.000000e+00> : vector<14xf32>
    %6 = vector.multi_reduction <add>, %5, %cst_1 [1] : vector<14x20xf32> to vector<14xf32>
    %7 = vector.shape_cast %6 : vector<14xf32> to vector<14x1xf32>
    %8 = math.log %7 : vector<14x1xf32>
    %9 = arith.addf %8, %2 : vector<14x1xf32>
    %c0_2 = arith.constant 0 : index
    %c0_3 = arith.constant 0 : index
    %10 = vector.load %arg2[%c0_2, %c0_3] : memref<14x20xf32, #tpu.memory_space<vmem>>, vector<14x20xf32>
    %11 = vector.broadcast %9 : vector<14x1xf32> to vector<14x20xf32>
    %12 = arith.subf %11, %0 : vector<14x20xf32>
    %13 = arith.mulf %10, %12 : vector<14x20xf32>
    %cst_4 = arith.constant dense<0.000000e+00> : vector<14xf32>
    %14 = vector.multi_reduction <add>, %13, %cst_4 [1] : vector<14x20xf32> to vector<14xf32>
    %15 = vector.shape_cast %14 : vector<14xf32> to vector<14x1xf32>
    %c0_5 = arith.constant 0 : index
    %c0_6 = arith.constant 0 : index
    %16 = vector.load %arg3[%c0_5, %c0_6] : memref<14x1xf32, #tpu.memory_space<vmem>>, vector<14x1xf32>
    %17 = arith.mulf %15, %16 : vector<14x1xf32>
    %18 = vector.shape_cast %17 : vector<14x1xf32> to vector<1x14x1xf32>
    %cst_7 = arith.constant dense<0.000000e+00> : vector<1xf32>
    %19 = vector.multi_reduction <add>, %18, %cst_7 [1, 2] : vector<1x14x1xf32> to vector<1xf32>
    %20 = vector.shape_cast %19 : vector<1xf32> to vector<1x1x1xf32>
    %21 = vector.extract %20[0, 0, 0] : f32 from vector<1x1x1xf32>
    %22 = vector.shape_cast %16 : vector<14x1xf32> to vector<1x14x1xf32>
    %cst_8 = arith.constant dense<0.000000e+00> : vector<1xf32>
    %23 = vector.multi_reduction <add>, %22, %cst_8 [1, 2] : vector<1x14x1xf32> to vector<1xf32>
    %24 = vector.shape_cast %23 : vector<1xf32> to vector<1x1x1xf32>
    %25 = vector.extract %24[0, 0, 0] : f32 from vector<1x1x1xf32>
    %cst_9 = arith.constant 1.000000e+00 : f32
    %26 = arith.maximumf %25, %cst_9 : f32
    %27 = arith.divf %21, %26 : f32
    %28 = vector.broadcast %27 : f32 to vector<1x1xf32>
    %c0_10 = arith.constant 0 : index
    %c0_11 = arith.constant 0 : index
    %29 = vector.load %arg4[%c0_10, %c0_11] : memref<1x1xf32, #tpu.memory_space<vmem>>, vector<1x1xf32>
    tpu.vector_store %arg4[%c0_10, %c0_11], %28 {strides = array<i32>} : memref<1x1xf32, #tpu.memory_space<vmem>>, vector<1x1xf32>,
    return
  }
  func.func @transform_0(%arg0: i32) -> (i32, i32) {
    %c0_i32 = arith.constant 0 : i32
    %c0_i32_0 = arith.constant 0 : i32
    %c0_i32_1 = arith.constant 0 : i32
    return %c0_i32, %c0_i32_0 : i32, i32
  }
  func.func @transform_1(%arg0: i32) -> (i32, i32) {
    %c0_i32 = arith.constant 0 : i32
    %c0_i32_0 = arith.constant 0 : i32
    %c0_i32_1 = arith.constant 0 : i32
    return %c0_i32, %c0_i32_0 : i32, i32
  }
  func.func @transform_2(%arg0: i32) -> (i32, i32) {
    %c0_i32 = arith.constant 0 : i32
    %c0_i32_0 = arith.constant 0 : i32
    %c0_i32_1 = arith.constant 0 : i32
    return %c0_i32, %c0_i32_0 : i32, i32
  }
  func.func @transform_3(%arg0: i32) -> (i32, i32) {
    %c0_i32 = arith.constant 0 : i32
    %c0_i32_0 = arith.constant 0 : i32
    %c0_i32_1 = arith.constant 0 : i32
    return %c0_i32, %c0_i32_0 : i32, i32
  }
}

</mosaic_0001>

<bundles_post_ra>
// kernel: forward.13
= control target key start
LH: loop header
LB: loop body
LE: loop exit
PB: predicated region body
PF: predicated region fallthrough
CT: control target
= control target key end

     0   :  { %v192_v0 = vmov 0.0|0.0   ;;  %vm193_vm0 = vmmov 0   ;;  %v194_v4 = vmov 0.0   ;;  %vm37_vm1 = vcmask 982016   ;;  %s269_s1 = inlined_call_operand.vmem [shape: f32[120,48], index: 1, kind: input, shape index: {}]   ;;  %s270_s0 = inlined_call_operand.vmem [shape: f32[2,120], index: 0, kind: input, shape index: {}]   ;;  %s271_s2 = inlined_call_operand.vmem [shape: f32[1,48], index: 2, kind: input, shape index: {}]   ;;  %s272_s3 = inlined_call_operand.vmem [shape: f32[2,48], index: 3, kind: output, shape index: {}]  }
   0x1   :  { %168 = vmatprep.subr.bf16.mxu0 %v192_v0  ;;  %v15_v1 = vld [vmem:[%s269_s1] sm:$0xff]  ;;  %v16_v2 = vld [vmem:[%s269_s1 + $0x8] sm:$0xff]  ;;  %v17_v3 = vld [vmem:[%s269_s1 + $0x10] sm:$0xff]  ;;  %165 = vmatprep.mubr.msk.f32.mxu0 %vm193_vm0, %v194_v4  ;;  %vm111_vm2 = vcmask 386048  }
   0x2   :  { %v169_v5 = vpack.c.bf16 %v16_v2, %v15_v1  ;;  %v18_v6 = vld [vmem:[%s269_s1 + $0x18] sm:$0xff]  ;;  %v19_v8 = vld [vmem:[%s269_s1 + $0x20] sm:$0xff]  ;;  %v20_v9 = vld [vmem:[%s269_s1 + $0x28] sm:$0xff] }
   0x3   :  { %v172_v7 = vpack.c.bf16 %v18_v6, %v17_v3  ;;  %v175_v10 = vpack.c.bf16 %v20_v9, %v19_v8  ;;  %v21_v11 = vld [vmem:[%s269_s1 + $0x30] sm:$0xff]  ;;  %v22_v12 = vld [vmem:[%s269_s1 + $0x38] sm:$0xff]  ;;  %v23_v14 = vld [vmem:[%s269_s1 + $0x40] sm:$0xff] }
   0x4   :  { %170 = vmatpush3.bf16.msra.mxu0 %v169_v5  ;;  %v178_v13 = vpack.c.bf16 %v22_v12, %v21_v11  ;;  %v24_v15 = vld [vmem:[%s269_s1 + $0x48] sm:$0xff]  ;;  %v25_v17 = vld [vmem:[%s269_s1 + $0x50] sm:$0xff]  ;;  %v26_v18 = vld [vmem:[%s269_s1 + $0x58] sm:$0xff] }
   0x5   :  { %171 = vmatprep.subr.bf16.mxu0 %v192_v0  ;;  %v181_v16 = vpack.c.bf16 %v24_v15, %v23_v14  ;;  %v184_v19 = vpack.c.bf16 %v26_v18, %v25_v17  ;;  %v27_v20 = vld [vmem:[%s269_s1 + $0x60] sm:$0xff]  ;;  %v28_v21 = vld [vmem:[%s269_s1 + $0x68] sm:$0xff]  ;;  %v29_v23 = vld [vmem:[%s269_s1 + $0x70] sm:$0xff] }
   0x6   :  { %v187_v22 = vpack.c.bf16 %v28_v21, %v27_v20  ;;  %v14_v24 = vld [vmem:[%s270_s0] sm:$0x3] }
   0x7   :  { %v117_v25 = vld [vmem:[%s271_s2] ss:$0 sm:$0xff] }
   0x8   :  { %173 = vmatpush3.bf16.msra.mxu0 %v172_v7 }
   0x9   :  { %174 = vmatprep.subr.bf16.mxu0 %v192_v0 }
   0xc   :  { %176 = vmatpush3.bf16.msra.mxu0 %v175_v10 }
   0xd   :  { %177 = vmatprep.subr.bf16.mxu0 %v192_v0 }
  0x10   :  { %179 = vmatpush3.bf16.msra.mxu0 %v178_v13 }
  0x11   :  { %180 = vmatprep.subr.bf16.mxu0 %v192_v0 }
  0x14   :  { %182 = vmatpush3.bf16.msra.mxu0 %v181_v16 }
  0x15   :  { %183 = vmatprep.subr.bf16.mxu0 %v192_v0 }
  0x18   :  { %185 = vmatpush3.bf16.msra.mxu0 %v184_v19 }
  0x19   :  { %186 = vmatprep.subr.bf16.mxu0 %v192_v0 }
  0x1c   :  { %188 = vmatpush3.bf16.msra.mxu0 %v187_v22 }
  0x1d   :  { %163 = vmatprep.subr.mxu0 %v194_v4 }
  0x20   :  { %164 = vmatpush3.msra.mxu0 %v29_v23 }
  0x21   :  { %166 = vmatmul.mubr.msk.f32.vlgmr.msra.gmra.mrb[0].mxu0 %vm37_vm1, %v14_v24 }
  0xf4   :  { %v107_v26 = vpop.f32.mrb[0].mxu0 }
  0xf5   :  { %v108_v27 = vadd.f32 %v117_v25, %v107_v26  ;;  %v167_v28 = vpop.f32.mrb[1].mxu0 }
  0xf7   :  { %112 = vst.msk [vmem:[%s272_s3] sm:$0x3] %vm111_vm2, %v108_v27 }

// kernel: forward.23
= control target key start
LH: loop header
LB: loop body
LE: loop exit
PB: predicated region body
PF: predicated region fallthrough
CT: control target
= control target key end

     0   :  { %v509_v0 = vmov 0.0|0.0   ;;  %vm510_vm0 = vmmov 0   ;;  %v511_v4 = vmov 0.0   ;;  %vm46_vm1 = vcmask 261120   ;;  %s652_s1 = inlined_call_operand.vmem [shape: f32[32,64], index: 1, kind: input, shape index: {}]   ;;  %s653_s3 = inlined_call_operand.vmem [shape: f32[64,48], index: 3, kind: input, shape index: {}]   ;;  %s654_s0 = inlined_call_operand.vmem [shape: f32[2,32], index: 0, kind: input, shape index: {}]   ;;  %s655_s5 = inlined_call_operand.vmem [shape: f32[48,24], index: 5, kind: input, shape index: {}]   ;;  %s656_s2 = inlined_call_operand.vmem [shape: f32[1,64], index: 2, kind: input, shape index: {}]   ;;  %s657_s7 = inlined_call_operand.vmem [shape: f32[24,1], index: 7, kind: input, shape index: {}]   ;;  %s658_s4 = inlined_call_operand.vmem [shape: f32[1,48], index: 4, kind: input, shape index: {}]   ;;  %s659_s8 = inlined_call_operand.<no memory space> [shape: f32[1,1], index: 8, kind: input, shape index: {}]   ;;  %s660_s6 = inlined_call_operand.vmem [shape: f32[1,24], index: 6, kind: input, shape index: {}]   ;;  %s661_s9 = inlined_call_operand.vmem [shape: f32[2,1], index: 9, kind: output, shape index: {}]  }
   0x1   :  { %476 = vmatprep.subr.bf16.mxu0 %v509_v0  ;;  %v35_v1 = vld [vmem:[%s652_s1] sm:$0xff]  ;;  %v36_v2 = vld [vmem:[%s652_s1 + $0x8] sm:$0xff]  ;;  %v37_v3 = vld [vmem:[%s652_s1 + $0x10] sm:$0xff]  ;;  %430 = vmatprep.mubr.msk.f32.mxu0 %vm510_vm0, %v511_v4  ;;  %vm136_vm2 = vcmask 523264   ;;  %vm224_vm3 = vcmask 392192   ;;  %v14_v44 = vstv %s659_s8  ;;  %vm309_vm4 = vcmask 195584  }
   0x2   :  { %v477_v5 = vpack.c.bf16 %v36_v2, %v35_v1  ;;  %v38_v6 = vld [vmem:[%s652_s1 + $0x18] sm:$0xff]  ;;  %482 = vmatprep.subr.bf16.mxu1 %v509_v0  ;;  %v121_v7 = vld [vmem:[%s653_s3] sm:$0xff]  ;;  %449 = vmatprep.mubr.msk.f32.mxu1 %vm510_vm0, %v511_v4  ;;  %v122_v8 = vld [vmem:[%s653_s3 + $0x8] sm:$0xff]  ;;  %15 = vst [vmem:[#allocation2] sm:$0x1] %v14_v44  ;;  %vm383_vm5 = vcmask 1024  }
   0x3   :  { %v123_v9 = vld [vmem:[%s653_s3 + $0x10] sm:$0xff]  ;;  %v124_v10 = vld [vmem:[%s653_s3 + $0x18] sm:$0xff]  ;;  %v480_v11 = vpack.c.bf16 %v38_v6, %v37_v3  ;;  %v483_v12 = vpack.c.bf16 %v122_v8, %v121_v7  ;;  %v125_v14 = vld [vmem:[%s653_s3 + $0x20] sm:$0xff] }
   0x4   :  { %478 = vmatpush3.bf16.msra.mxu0 %v477_v5  ;;  %v486_v13 = vpack.c.bf16 %v124_v10, %v123_v9  ;;  %v126_v15 = vld [vmem:[%s653_s3 + $0x28] sm:$0xff]  ;;  %v34_v16 = vld [vmem:[%s654_s0] sm:$0x3]  ;;  %v127_v18 = vld [vmem:[%s653_s3 + $0x30] sm:$0xff] }
   0x5   :  { %479 = vmatprep.subr.bf16.mxu0 %v509_v0  ;;  %484 = vmatpush3.bf16.msra.mxu1 %v483_v12  ;;  %v489_v17 = vpack.c.bf16 %v126_v15, %v125_v14  ;;  %v128_v19 = vld [vmem:[%s653_s3 + $0x38] sm:$0xff]  ;;  %v211_v21 = vld [vmem:[%s655_s5] sm:$0xff]  ;;  %v212_v22 = vld [vmem:[%s655_s5 + $0x8] sm:$0xff] }
   0x6   :  { %485 = vmatprep.subr.bf16.mxu1 %v509_v0  ;;  %v492_v20 = vpack.c.bf16 %v128_v19, %v127_v18  ;;  %v213_v23 = vld [vmem:[%s655_s5 + $0x10] sm:$0xff]  ;;  %v495_v24 = vpack.c.bf16 %v212_v22, %v211_v21  ;;  %v214_v25 = vld [vmem:[%s655_s5 + $0x18] sm:$0xff]  ;;  %v389_v27 = vld [vmem:[%s656_s2] ss:$0 sm:$0xff] }
   0x7   :  { %v498_v26 = vpack.c.bf16 %v214_v25, %v213_v23  ;;  %v215_v32 = vld [vmem:[%s655_s5 + $0x20] sm:$0xff]  ;;  %v216_v33 = vld [vmem:[%s655_s5 + $0x28] sm:$0xff]  ;;  %v301_v43 = vld [vmem:[%s657_s7 + $0x10] sm:$0xff] }
   0x8   :  { %481 = vmatpush3.bf16.msra.mxu0 %v480_v11  ;;  %v501_v34 = vpack.c.bf16 %v216_v33, %v215_v32  ;;  %v299_v35 = vld [vmem:[%s657_s7] sm:$0xff]  ;;  %v300_v36 = vld [vmem:[%s657_s7 + $0x8] sm:$0xff] }
   0x9   :  { %494 = vmatprep.subr.bf16.mxu0 %v509_v0  ;;  %487 = vmatpush3.bf16.msra.mxu1 %v486_v13  ;;  %v504_v37 = vpack.c.bf16 %v300_v36, %v299_v35  ;;  %v391_v38 = vld [vmem:[%s658_s4] ss:$0 sm:$0xff] }
   0xa   :  { %488 = vmatprep.subr.bf16.mxu1 %v509_v0  ;;  %v393_v45 = vld [vmem:[%s660_s6] ss:$0 sm:$0xff] }
   0xb   :  { %431 = vmatmul.mubr.msk.f32.vlgmr.msra.gmra.mrb[0].mxu0 %vm46_vm1, %v34_v16  ;;  %v395_v50 = vld [vmem:[#allocation2] ss:$0 sm:$0xff] }
   0xc   :  { %464 = vmatprep.mubr.msk.f32.mxu0 %vm510_vm0, %v511_v4  ;;  %496 = vmatpush3.bf16.msra.mxu0 %v495_v24 }
   0xd   :  { %490 = vmatpush3.bf16.msra.mxu1 %v489_v17  ;;  %497 = vmatprep.subr.bf16.mxu0 %v509_v0 }
   0xe   :  { %491 = vmatprep.subr.bf16.mxu1 %v509_v0 }
  0x10   :  { %499 = vmatpush3.bf16.msra.mxu0 %v498_v26 }
  0x11   :  { %493 = vmatpush3.bf16.msra.mxu1 %v492_v20  ;;  %500 = vmatprep.subr.bf16.mxu0 %v509_v0 }
  0x12   :  { %503 = vmatprep.subr.bf16.mxu1 %v509_v0 }
  0x14   :  { %502 = vmatpush3.bf16.msra.mxu0 %v501_v34 }
  0xde   :  { %v116_v28 = vpop.f32.mrb[0].mxu0 }
  0xdf   :  { %v117_v29 = vadd.f32 %v389_v27, %v116_v28  ;;  %v432_v30 = vpop.f32.mrb[1].mxu0 }
  0xe1   :  { %v120_v31 = vmax.f32 %v117_v29, 0.0 }
  0xe3   :  { %450 = vmatmul.mubr.msk.f32.vlgmr.msra.gmra.mrb[0].mxu1 %vm136_vm2, %v120_v31 }
  0xe4   :  { %473 = vmatprep.mubr.msk.f32.mxu1 %vm510_vm0, %v511_v4  ;;  %505 = vmatpush3.bf16.msra.mxu1 %v504_v37 }
  0xe5   :  { %471 = vmatprep.subr.mxu1 %v511_v4 }
  0xe8   :  { %472 = vmatpush3.msra.mxu1 %v301_v43 }
 0x1b6   :  { %v206_v39 = vpop.f32.mrb[0].mxu1 }
 0x1b7   :  { %v207_v40 = vadd.f32 %v391_v38, %v206_v39  ;;  %v451_v41 = vpop.f32.mrb[1].mxu1 }
 0x1b9   :  { %v210_v42 = vmax.f32 %v207_v40, 0.0 }
 0x1bb   :  { %465 = vmatmul.mubr.msk.f32.vlgmr.msra.gmra.mrb[2].mxu0 %vm224_vm3, %v210_v42 }
 0x28e   :  { %v294_v46 = vpop.f32.mrb[2].mxu0 }
 0x28f   :  { %v295_v47 = vadd.f32 %v393_v45, %v294_v46  ;;  %v466_v48 = vpop.f32.mrb[3].mxu0 }
 0x291   :  { %v298_v49 = vmax.f32 %v295_v47, 0.0 }
 0x293   :  { %474 = vmatmul.mubr.msk.f32.vlgmr.msra.gmra.mrb[2].mxu1 %vm309_vm4, %v298_v49 }
 0x366   :  { %v379_v51 = vpop.f32.mrb[2].mxu1 }
 0x367   :  { %v380_v52 = vadd.f32 %v395_v50, %v379_v51  ;;  %v475_v53 = vpop.f32.mrb[3].mxu1 }
 0x369   :  { %384 = vst.msk [vmem:[%s661_s9] sm:$0x3] %vm383_vm5, %v380_v52 }

// kernel: forward.14
= control target key start
LH: loop header
LB: loop body
LE: loop exit
PB: predicated region body
PF: predicated region fallthrough
CT: control target
= control target key end

     0   :  { %vm51_vm0 = vcmask 64512   ;;  %vm140_vm1 = vcmask 72704   ;;  %vm147_vm2 = vcmask 1040384   ;;  %vm992_vm3 = vmmov 1   ;;  %s1207_s3 = inlined_call_operand.vmem [shape: f32[8,16], index: 3, kind: input, shape index: {}]   ;;  %s1208_s0 = inlined_call_operand.vmem [shape: f32[9,8], index: 0, kind: input, shape index: {}]   ;;  %s1209_s1 = inlined_call_operand.vmem [shape: f32[9,9], index: 1, kind: input, shape index: {}]   ;;  %s1210_s5 = inlined_call_operand.vmem [shape: f32[16,24], index: 5, kind: input, shape index: {}]   ;;  %s1211_s4 = inlined_call_operand.vmem [shape: f32[1,16], index: 4, kind: input, shape index: {}]   ;;  %s1212_s7 = inlined_call_operand.vmem [shape: f32[24,32], index: 7, kind: input, shape index: {}]   ;;  %s1213_s6 = inlined_call_operand.vmem [shape: f32[1,24], index: 6, kind: input, shape index: {}]   ;;  %s1214_s2 = inlined_call_operand.vmem [shape: f32[2,9,1], index: 2, kind: input, shape index: {}]   ;;  %s1215_s9 = inlined_call_operand.vmem [shape: f32[32,64], index: 9, kind: input, shape index: {}]   ;;  %s1216_s11 = inlined_call_operand.vmem [shape: f32[64,16], index: 11, kind: input, shape index: {}]   ;;  %s1217_s8 = inlined_call_operand.vmem [shape: f32[1,32], index: 8, kind: input, shape index: {}]   ;;  %s1218_s13 = inlined_call_operand.vmem [shape: f32[9,32], index: 13, kind: output, shape index: {0}]   ;;  %s1219_s10 = inlined_call_operand.vmem [shape: f32[1,64], index: 10, kind: input, shape index: {}]   ;;  %s1220_s12 = inlined_call_operand.vmem [shape: f32[1,16], index: 12, kind: input, shape index: {}]   ;;  %s1221_s14 = inlined_call_operand.vmem [shape: f32[2,16], index: 14, kind: output, shape index: {1}]  }
   0x1   :  { %v50_v0 = vld [vmem:[%s1207_s3] sm:$0xff]  ;;  %v49_v2 = vld [vmem:[%s1208_s0 + $0x8] sm:$0x1]  ;;  %vm1087_vm4 = vmpackc.low %vm147_vm2, %vm992_vm3  ;;  %vm230_vm5 = vcmask 130048   ;;  %vm402_vm6 = vcmask 195584   ;;  %v993_v33 = vmov 0  }
   0x2   :  { %v48_v1 = vld [vmem:[%s1208_s0] sm:$0xff]  ;;  %869 = vmatprep.subr.mxu0 %v50_v0  ;;  %v1098_v8 = vld [vmem:[%s1209_s1 + $0x8] sm:$0x1]  ;;  %v401_v25 = vld [vmem:[%s1212_s7 + $0x10] sm:$0xff]  ;;  %991 = vset.pattern.permute.xlu1 %v993_v33  ;;  %v994_v44 = vmov 0.0|0.0   ;;  %vm995_vm7 = vmmov 0  }
   0x3   :  { %871 = vmatprep.mubr.msk.f32.mxu0 %vm51_vm0, %v48_v1  ;;  %870 = vmatpush3.msra.mxu0 %v50_v0  ;;  %v46_v3 = vld [vmem:[%s1209_s1] sm:$0xff]  ;;  %v229_v10 = vld [vmem:[%s1210_s5 + $0x8] sm:$0xff]  ;;  %v825_v34 = vld [vmem:[%s1214_s2 + $0x10] sm:$0xff]  ;;  %v996_v48 = vmov 0.0   ;;  %vm573_vm8 = vcmask 253952   ;;  %vm571_vm9 = vcmask 261120  }
   0x4   :  { %872 = vmatmul.mubr.msk.f32.vlgmr.msra.gmra.mrb[0].mxu0 %vm51_vm0, %v49_v2  ;;  %892 = vmatprep.mubr.msk.f32.mxu1 %vm140_vm1, %v46_v3  ;;  %v228_v9 = vld [vmem:[%s1210_s5] sm:$0xff]  ;;  %v400_v23 = vld [vmem:[%s1212_s7 + $0x8] sm:$0xff]  ;;  %v826_v36 = vld [vmem:[%s1214_s2 + $0x18] sm:$0x1]  ;;  %vm723_vm10 = vcmask 523264   ;;  %vm797_vm11 = vcmask 123904  }
   0x5   :  { %878 = vmatprep.mubr.msk.f32.mxu0 %vm140_vm1, %v46_v3  ;;  %v947_v11 = vpack.c.bf16 %v229_v10, %v228_v9  ;;  %v809_v12 = vld [vmem:[%s1211_s4] ss:$0 sm:$0xff]  ;;  %990 = vset.pattern.permute.xlu0 %v993_v33  ;;  %v576_v37 = vld [vmem:[%s1214_s2 + $0x8] sm:$0x1]  ;;  %v625_v45 = vld [vmem:[%s1215_s9 + $0x10] sm:$0xff] }
   0x6   :  { %v399_v22 = vld [vmem:[%s1212_s7] sm:$0xff]  ;;  %603 = vperm.xlu1 %991, %v825_v34   ;;  %v624_v42 = vld [vmem:[%s1215_s9 + $0x8] sm:$0xff]  ;;  %v626_v46 = vld [vmem:[%s1215_s9 + $0x18] sm:$0xff] }
   0x7   :  { %v957_v24 = vpack.c.bf16 %v400_v23, %v399_v22  ;;  %v815_v26 = vld [vmem:[%s1213_s6] ss:$0 sm:$0xff]  ;;  %v971_v47 = vpack.c.bf16 %v626_v46, %v625_v45  ;;  %v709_v50 = vld [vmem:[%s1216_s11 + $0x8] sm:$0xff]  ;;  %v710_v51 = vld [vmem:[%s1216_s11 + $0x10] sm:$0xff] }
   0x8   :  { %v575_v35 = vld [vmem:[%s1214_s2] sm:$0xff]  ;;  %v711_v53 = vld [vmem:[%s1216_s11 + $0x18] sm:$0xff]  ;;  %v713_v56 = vld [vmem:[%s1216_s11 + $0x28] sm:$0xff] }
   0x9   :  { %579 = vperm.xlu0 %990, %v575_v35   ;;  %v623_v41 = vld [vmem:[%s1215_s9] sm:$0xff]  ;;  %v977_v54 = vpack.c.bf16 %v711_v53, %v710_v51 }
   0xa   :  { %608 = vperm.xlu1 %991, %v826_v36   ;;  %v968_v43 = vpack.c.bf16 %v624_v42, %v623_v41  ;;  %v708_v49 = vld [vmem:[%s1216_s11] sm:$0xff] }
   0xb   :  { %v974_v52 = vpack.c.bf16 %v709_v50, %v708_v49  ;;  %v712_v55 = vld [vmem:[%s1216_s11 + $0x20] sm:$0xff] }
   0xc   :  { %v980_v57 = vpack.c.bf16 %v713_v56, %v712_v55  ;;  %v821_v60 = vld [vmem:[%s1217_s8] ss:$0 sm:$0xff] }
   0xd   :  { %584 = vperm.xlu0 %990, %v576_v37   ;;  %v829_v36 = vld [vmem:[%s1220_s12] ss:$0 sm:$0xff] }
  0x85   :  { %v604_v58 = vpop.permute.xlu1 %603 }
  0x88   :  { %v580_v59 = vpop.permute.xlu0 %579 }
  0xd7   :  { %v873_v4 = vpop.f32.mrb[0].mxu0 }
  0xd8   :  { %v124_v5 = vpop.f32.mrb[1].mxu0 }
  0xd9   :  { %v941_v7 = vpack.c.bf16 %v873_v4, %v124_v5  ;;  %v585_v4 = vpop.permute.xlu0 %584 }
  0xdb   :  { %943 = vmatprep.subr.msk.bf16.mxu0 %vm1087_vm4, %v941_v7 }
  0xdc   :  { %946 = vmatpush3.bf16.msk.msra.mxu0 %vm1087_vm4, %v941_v7 }
  0xdd   :  { %948 = vmatprep.subr.bf16.mxu0 %v947_v11 }
  0xdf   :  { %879 = vmatmul.mubr.msk.f32.vlgmr.msra.gmra.mrb[2].mxu0 %vm140_vm1, %v1098_v8 }
  0xe0   :  { %950 = vmatpush3.bf16.msra.mxu0 %v947_v11 }
  0xe1   :  { %958 = vmatprep.subr.bf16.mxu0 %v957_v24 }
 0x1b2   :  { %v880_v13 = vpop.f32.mrb[2].mxu0 }
 0x1b3   :  { %v223_v14 = vadd.f32 %v880_v13, %v809_v12  ;;  %v217_v15 = vpop.f32.mrb[3].mxu0 }
 0x1b4   :  { %v218_v16 = vadd.f32 %v809_v12, %v217_v15 }
 0x1b5   :  { %v227_v18 = vmax.f32 %v223_v14, 0.0 }
 0x1b6   :  { %v226_v17 = vmax.f32 %v218_v16, 0.0 }
 0x1b8   :  { %885 = vmatprep.mubr.msk.f32.mxu0 %vm230_vm5, %v226_v17 }
 0x1b9   :  { %886 = vmatmul.mubr.msk.f32.vlgmr.msra.gmra.mrb[4].mxu0 %vm230_vm5, %v227_v18 }
 0x1ba   :  { %960 = vmatpush3.bf16.msra.mxu0 %v957_v24 }
 0x1bb   :  { %899 = vmatprep.subr.mxu0 %v401_v25 }
 0x1be   :  { %900 = vmatpush3.msra.mxu0 %v401_v25 }
 0x1bf   :  { %967 = vmatprep.subr.bf16.mxu0 %v994_v44 }
 0x28c   :  { %v887_v19 = vpop.f32.mrb[4].mxu0 }
 0x28d   :  { %v303_v20 = vpop.f32.mrb[5].mxu0 }
 0x28e   :  { %v951_v21 = vpack.c.bf16 %v887_v19, %v303_v20 }
 0x290   :  { %953 = vmatprep.subr.msk.bf16.mxu1 %vm1087_vm4, %v951_v21 }
 0x291   :  { %956 = vmatpush3.bf16.msk.msra.mxu1 %vm1087_vm4, %v951_v21 }
 0x294   :  { %893 = vmatmul.mubr.msk.f32.vlgmr.msra.gmra.mrb[0].mxu1 %vm140_vm1, %v1098_v8 }
 0x295   :  { %908 = vmatprep.mubr.msk.f32.mxu1 %vm140_vm1, %v46_v3  ;;  %v609_v3 = vpop.permute.xlu1 %608 }
 0x367   :  { %v894_v27 = vpop.f32.mrb[0].mxu1 }
 0x368   :  { %v394_v28 = vadd.f32 %v894_v27, %v815_v26  ;;  %v388_v29 = vpop.f32.mrb[1].mxu1 }
 0x369   :  { %v389_v30 = vadd.f32 %v815_v26, %v388_v29  ;;  %v715_v29 = vld [vmem:[%s1216_s11 + $0x38] sm:$0xff] }
 0x36a   :  { %v398_v32 = vmax.f32 %v394_v28, 0.0  ;;  %v714_v28 = vld [vmem:[%s1216_s11 + $0x30] sm:$0xff] }
 0x36b   :  { %v397_v31 = vmax.f32 %v389_v30, 0.0  ;;  %v983_v30 = vpack.c.bf16 %v715_v29, %v714_v28 }
 0x36d   :  { %901 = vmatprep.mubr.msk.f32.mxu0 %vm402_vm6, %v397_v31  ;;  %v827_v31 = vld [vmem:[%s1219_s10] ss:$0 sm:$0xff] }
 0x36e   :  { %902 = vmatmul.mubr.msk.f32.vlgmr.msra.gmra.mrb[6].mxu0 %vm402_vm6, %v398_v32 }
 0x36f   :  { %969 = vmatpush3.bf16.msra.mxu0 %v968_v43  ;;  %919 = vmatprep.mubr.msk.f32.mxu0 %vm995_vm7, %v996_v48 }
 0x370   :  { %970 = vmatprep.subr.bf16.mxu0 %v994_v44 }
 0x373   :  { %972 = vmatpush3.bf16.msra.mxu0 %v971_v47 }
 0x441   :  { %v903_v38 = vpop.f32.mrb[6].mxu0 }
 0x442   :  { %v475_v39 = vpop.f32.mrb[7].mxu0 }
 0x443   :  { %v961_v40 = vpack.c.bf16 %v903_v38, %v475_v39 }
 0x445   :  { %963 = vmatprep.subr.msk.bf16.mxu1 %vm1087_vm4, %v961_v40 }
 0x446   :  { %966 = vmatpush3.bf16.msk.msra.mxu1 %vm1087_vm4, %v961_v40 }
 0x447   :  { %973 = vmatprep.subr.bf16.mxu1 %v994_v44 }
 0x449   :  { %909 = vmatmul.mubr.msk.f32.vlgmr.msra.gmra.mrb[2].mxu1 %vm140_vm1, %v1098_v8 }
 0x44a   :  { %938 = vmatprep.mubr.msk.f32.mxu1 %vm995_vm7, %v996_v48  ;;  %975 = vmatpush3.bf16.msra.mxu1 %v974_v52 }
 0x44b   :  { %976 = vmatprep.subr.bf16.mxu1 %v994_v44 }
 0x44e   :  { %978 = vmatpush3.bf16.msra.mxu1 %v977_v54 }
 0x44f   :  { %979 = vmatprep.subr.bf16.mxu1 %v994_v44 }
 0x452   :  { %981 = vmatpush3.bf16.msra.mxu1 %v980_v57 }
 0x453   :  { %982 = vmatprep.subr.bf16.mxu1 %v994_v44 }
 0x456   :  { %984 = vmatpush3.bf16.msra.mxu1 %v983_v30 }
 0x51c   :  { %v910_v61 = vpop.f32.mrb[2].mxu1 }
 0x51d   :  { %v566_v62 = vadd.f32 %v910_v61, %v821_v60  ;;  %v560_v63 = vpop.f32.mrb[3].mxu1 }
 0x51e   :  { %v561_v0 = vadd.f32 %v821_v60, %v560_v63 }
 0x51f   :  { %v570_v1 = vmax.f32 %v566_v62, 0.0 }
 0x520   :  { %v569_v2 = vmax.f32 %v561_v0, 0.0 }
 0x521   :  { %574 = vst.msk [vmem:[%s1218_s13 + $0x8] sm:$0x1] %vm573_vm8, %v570_v1  ;;  %v612_v5 = vadd.f32 %v609_v3, %v570_v1  ;;  %v588_v6 = vadd.f32 %v585_v4, %v570_v1 }
 0x522   :  { %572 = vst.msk [vmem:[%s1218_s13] sm:$0xff] %vm571_vm9, %v569_v2  ;;  %v587_v7 = vadd.f32 %v580_v59, %v569_v2  ;;  %v611_v8 = vadd.f32 %v604_v58, %v569_v2 }
 0x523   :  { %v614_v9 = vsel %vm573_vm8, %v612_v5, -inf  ;;  %v590_v10 = vsel %vm573_vm8, %v588_v6, -inf }
 0x524   :  { %v613_v11 = vsel %vm571_vm9, %v611_v8, -inf  ;;  %v589_v12 = vsel %vm571_vm9, %v587_v7, -inf }
 0x525   :  { %v615_v13 = vmax.f32 %v613_v11, %v614_v9  ;;  %v591_v14 = vmax.f32 %v589_v12, %v590_v10 }
 0x527   :  { %v616_v15 = vrot.slane %v615_v13, 4  ;;  %v592_v16 = vrot.slane %v591_v14, 4 }
 0x529   :  { %v617_v17 = vmax.f32 %v615_v13, %v616_v15  ;;  %v593_v18 = vmax.f32 %v591_v14, %v592_v16 }
 0x52b   :  { %v618_v19 = vrot.slane %v617_v17, 2  ;;  %v594_v20 = vrot.slane %v593_v18, 2 }
 0x52d   :  { %v619_v21 = vmax.f32 %v617_v17, %v618_v19  ;;  %v595_v22 = vmax.f32 %v593_v18, %v594_v20 }
 0x52f   :  { %v620_v23 = vrot.slane %v619_v21, 1  ;;  %v596_v24 = vrot.slane %v595_v22, 1 }
 0x531   :  { %v621_v25 = vmax.f32 %v619_v21, %v620_v23  ;;  %v597_v26 = vmax.f32 %v595_v22, %v596_v24 }
 0x533   :  { %v622_v27 = vsel %vm147_vm2, %v597_v26, %v621_v25 }
 0x534   :  { %920 = vmatmul.mubr.msk.f32.vlgmr.msra.gmra.mrb[8].mxu0 %vm571_vm9, %v622_v27 }
 0x607   :  { %v703_v32 = vpop.f32.mrb[8].mxu0 }
 0x608   :  { %v704_v33 = vadd.f32 %v827_v31, %v703_v32  ;;  %v921_v34 = vpop.f32.mrb[9].mxu0 }
 0x60a   :  { %v707_v35 = vmax.f32 %v704_v33, 0.0 }
 0x60c   :  { %939 = vmatmul.mubr.msk.f32.vlgmr.msra.gmra.mrb[4].mxu1 %vm723_vm10, %v707_v35 }
 0x6df   :  { %v793_v37 = vpop.f32.mrb[4].mxu1 }
 0x6e0   :  { %v794_v38 = vadd.f32 %v829_v36, %v793_v37  ;;  %v940_v39 = vpop.f32.mrb[5].mxu1 }
 0x6e2   :  { %798 = vst.msk [vmem:[%s1221_s14] sm:$0x3] %vm797_vm11, %v794_v38 }

// kernel: forward.12
= control target key start
LH: loop header
LB: loop body
LE: loop exit
PB: predicated region body
PF: predicated region fallthrough
CT: control target
= control target key end

     0   :  { %vm42_vm0 = vcmask 1046528   ;;  %vm46_vm1 = vcmask 130048   ;;  %vm205_vm2 = vcmask 1045504   ;;  %vm611_vm3 = vcmask 1043456   ;;  %s2064_s24 = smov 124   ;;  %s2065_s8 = smov 120   ;;  %s2236_s1 = inlined_call_operand.vmem [shape: f32[3,16,8], index: 1, kind: input, shape index: {}]   ;;  %s2237_s0 = inlined_call_operand.vmem [shape: f32[2,16,16], index: 0, kind: input, shape index: {}]   ;;  %s2238_s2 = inlined_call_operand.vmem [shape: f32[1,8], index: 2, kind: input, shape index: {}]   ;;  %s2239_s3 = inlined_call_operand.vmem [shape: f32[3,4,16], index: 3, kind: input, shape index: {}]   ;;  %s2240_s4 = inlined_call_operand.vmem [shape: f32[1,16], index: 4, kind: input, shape index: {}]   ;;  %s2241_s5 = inlined_call_operand.vmem [shape: f32[3,8,24], index: 5, kind: input, shape index: {}]   ;;  %s2242_s6 = inlined_call_operand.vmem [shape: f32[1,24], index: 6, kind: input, shape index: {}]   ;;  %s2243_s7 = inlined_call_operand.vmem [shape: f32[2,10,12], index: 7, kind: output, shape index: {}]  }
   0x1   :  { %v1736_v0 = vld [vmem:[%s2236_s1 + $0x10] sm:$0xff]  ;;  %v1737_v1 = vld [vmem:[%s2236_s1 + $0x18] sm:$0xff]  ;;  %v26_v2 = vld [vmem:[%s2237_s0] sm:$0xff]  ;;  %vm606_vm4 = vcmask 31744   ;;  %vm1175_vm5 = vcmask 64512   ;;  %vm1725_vm6 = vcmask 91136  }
   0x2   :  { %v1965_v3 = vpack.c.bf16 %v1737_v1, %v1736_v0  ;;  %v27_v4 = vld [vmem:[%s2237_s0 + $0x8] sm:$0xff]  ;;  %v43_v5 = vrot.slane %v26_v2, 1  ;;  %v1734_v6 = vld [vmem:[%s2237_s0 + $0x10] sm:$0xff]  ;;  %v1735_v7 = vld [vmem:[%s2237_s0 + $0x18] sm:$0xff]  ;;  %v206_v19 = vrot.slane %v26_v2, 2  ;;  %vm1723_vm7 = vcmask 97280  }
   0x3   :  { %v44_v8 = vrot.slane %v27_v4, 1  ;;  %v324_v9 = vrot.slane %v1734_v6, 1  ;;  %v325_v10 = vrot.slane %v1735_v7, 1  ;;  %v31_v11 = vld [vmem:[%s2236_s1] sm:$0xff]  ;;  %v32_v12 = vld [vmem:[%s2236_s1 + $0x8] sm:$0xff]  ;;  %v207_v20 = vrot.slane %v27_v4, 2 }
   0x4   :  { %1966 = vmatprep.subr.bf16.mxu0 %v1965_v3  ;;  %1978 = vmatprep.subr.bf16.mxu1 %v1965_v3  ;;  %v1969_v13 = vpack.c.bf16 %v32_v12, %v31_v11  ;;  %v1738_v14 = vld [vmem:[%s2236_s1 + $0x20] sm:$0xff]  ;;  %v1739_v15 = vld [vmem:[%s2236_s1 + $0x28] sm:$0xff]  ;;  %v485_v21 = vrot.slane %v1734_v6, 2  ;;  %v486_v22 = vrot.slane %v1735_v7, 2 }
   0x5   :  { %1968 = vmatpush3.bf16.msra.mxu0 %v1965_v3  ;;  %1980 = vmatpush3.bf16.msra.mxu1 %v1965_v3  ;;  %v45_v16 = vsel %vm42_vm0, %v43_v5, %v44_v8  ;;  %v326_v17 = vsel %vm42_vm0, %v324_v9, %v325_v10  ;;  %v1973_v18 = vpack.c.bf16 %v1739_v15, %v1738_v14  ;;  %v1746_v25 = vld [vmem:[%s2238_s2] ss:$0 sm:$0xff]  ;;  %v1757_v46 = vld [vmem:[%s2239_s3 + $0x4] sm:$0xf] }
   0x6   :  { %1867 = vmatprep.mubr.msk.f32.mxu0 %vm46_vm1, %v45_v16  ;;  %1888 = vmatprep.mubr.msk.f32.mxu1 %vm46_vm1, %v326_v17  ;;  %v208_v23 = vsel %vm205_vm2, %v206_v19, %v207_v20  ;;  %v487_v24 = vsel %vm205_vm2, %v485_v21, %v486_v22  ;;  %v595_v48 = vld [vmem:[%s2239_s3] sm:$0xf] }
   0x7   :  { %1970 = vmatprep.subr.bf16.mxu0 %v1969_v13  ;;  %1982 = vmatprep.subr.bf16.mxu1 %v1969_v13 }
   0x8   :  { %1868 = vmatmul.mubr.msk.f32.vlgmr.msra.gmra.mrb[0].mxu0 %vm46_vm1, %v44_v8  ;;  %1889 = vmatmul.mubr.msk.f32.vlgmr.msra.gmra.mrb[0].mxu1 %vm46_vm1, %v325_v10 }
   0x9   :  { %1972 = vmatpush3.bf16.msra.mxu0 %v1969_v13  ;;  %1984 = vmatpush3.bf16.msra.mxu1 %v1969_v13  ;;  %v1768_v13 = vld [vmem:[%s2240_s4] ss:$0 sm:$0xff] }
   0xa   :  { %1874 = vmatprep.mubr.msk.f32.mxu0 %vm46_vm1, %v26_v2  ;;  %1895 = vmatprep.mubr.msk.f32.mxu1 %vm46_vm1, %v1734_v6  ;;  %v1758_v6 = vld [vmem:[%s2239_s3 + $0x8] sm:$0xf] }
   0xb   :  { %1974 = vmatprep.subr.bf16.mxu0 %v1973_v18  ;;  %1986 = vmatprep.subr.bf16.mxu1 %v1973_v18 }
  0x10   :  { %1875 = vmatmul.mubr.msk.f32.vlgmr.msra.gmra.mrb[0].mxu0 %vm46_vm1, %v27_v4  ;;  %1896 = vmatmul.mubr.msk.f32.vlgmr.msra.gmra.mrb[0].mxu1 %vm46_vm1, %v1735_v7 }
  0x11   :  { %1976 = vmatpush3.bf16.msra.mxu0 %v1973_v18  ;;  %1988 = vmatpush3.bf16.msra.mxu1 %v1973_v18 }
  0x12   :  { %1881 = vmatprep.mubr.msk.f32.mxu0 %vm46_vm1, %v208_v23  ;;  %1902 = vmatprep.mubr.msk.f32.mxu1 %vm46_vm1, %v487_v24 }
  0x13   :  { %1905 = vmatprep.subr.msk.mxu0 %vm611_vm3, %v1757_v46  ;;  %1920 = vmatprep.subr.msk.mxu1 %vm611_vm3, %v1757_v46 }
  0x18   :  { %1882 = vmatmul.mubr.msk.f32.vlgmr.msra.gmra.mrb[0].mxu0 %vm46_vm1, %v207_v20  ;;  %1903 = vmatmul.mubr.msk.f32.vlgmr.msra.gmra.mrb[0].mxu1 %vm46_vm1, %v486_v22 }
  0x19   :  { %1906 = vmatpush3.msk.msra.mxu0 %vm611_vm3, %v1757_v46  ;;  %1921 = vmatpush3.msk.msra.mxu1 %vm611_vm3, %v1757_v46 }
  0x1a   :  { %1910 = vmatprep.subr.msk.mxu0 %vm611_vm3, %v595_v48  ;;  %1925 = vmatprep.subr.msk.mxu1 %vm611_vm3, %v595_v48 }
  0xeb   :  { %v1883_v26 = vpop.f32.mrb[0].mxu0  ;;  %v1904_v27 = vpop.f32.mrb[0].mxu1 }
  0xec   :  { %v297_v28 = vadd.f32 %v1883_v26, %v1746_v25  ;;  %v570_v29 = vadd.f32 %v1904_v27, %v1746_v25  ;;  %v279_v30 = vpop.f32.mrb[1].mxu0  ;;  %v558_v31 = vpop.f32.mrb[1].mxu1 }
  0xed   :  { %v296_v32 = vadd.f32 %v1746_v25, %v279_v30  ;;  %v569_v33 = vadd.f32 %v1746_v25, %v558_v31 }
  0xee   :  { %v1748_v34 = vmul.f32 -1.442695, %v297_v28  ;;  %v1756_v35 = vmul.f32 -1.442695, %v570_v29 }
  0xef   :  { %v1747_v36 = vmul.f32 -1.442695, %v296_v32  ;;  %v1755_v37 = vmul.f32 -1.442695, %v569_v33 }
  0xf0   :  { %2016 = vpow2.f32 %v1748_v34  ;;  %v1782_v34 = vld [vmem:[%s2241_s5 + $0x8] sm:$0xff] }
  0xf1   :  { %2018 = vpow2.f32 %v1756_v35  ;;  %v1164_v35 = vld [vmem:[%s2241_s5] sm:$0xff] }
  0xf2   :  { %2020 = vpow2.f32 %v1747_v36 }
  0xf3   :  { %2022 = vpow2.f32 %v1755_v37 }
  0xfa   :  { %v2017_v38 = vpop.eup %2016 }
  0xfb   :  { %v2019_v39 = vpop.eup %2018  ;;  %v305_v44 = vadd.f32 1.0, %v2017_v38 }
  0xfc   :  { %v2021_v40 = vpop.eup %2020  ;;  %v578_v45 = vadd.f32 1.0, %v2019_v39 }
  0xfd   :  { %v2023_v41 = vpop.eup %2022  ;;  %v304_v42 = vadd.f32 1.0, %v2021_v40 }
  0xfe   :  { %v577_v43 = vadd.f32 1.0, %v2023_v41 }
  0xff   :  { %2024 = vrcp.f32 %v304_v42 }
 0x100   :  { %2026 = vrcp.f32 %v577_v43 }
 0x101   :  { %2028 = vrcp.f32 %v305_v44 }
 0x102   :  { %2030 = vrcp.f32 %v578_v45 }
 0x109   :  { %v2025_v47 = vpop.eup %2024 }
 0x10a   :  { %v2027_v49 = vpop.eup %2026  ;;  %312 = vrot.lane.b32.xlu0 %v2025_v47, %s2064_s24 }
 0x10b   :  { %585 = vrot.lane.b32.xlu1 %v2027_v49, %s2064_s24  ;;  %v2029_v50 = vpop.eup %2028 }
 0x10c   :  { %v2031_v51 = vpop.eup %2030 }
 0x10e   :  { %314 = vrot.lane.b32.xlu0 %v2029_v50, %s2064_s24 }
 0x10f   :  { %587 = vrot.lane.b32.xlu1 %v2031_v51, %s2064_s24 }
 0x17c   :  { %v313_v52 = vpop.permute.xlu0 %312 }
 0x17d   :  { %v586_v53 = vpop.permute.xlu1 %585  ;;  %v318_v54 = vmul.f32 %v313_v52, %v296_v32 }
 0x17e   :  { %v591_v55 = vmul.f32 %v586_v53, %v569_v33 }
 0x17f   :  { %v320_v57 = vmax.f32 %v318_v54, 0.0 }
 0x180   :  { %v315_v56 = vpop.permute.xlu0 %314  ;;  %v593_v60 = vmax.f32 %v591_v55, 0.0 }
 0x181   :  { %v588_v58 = vpop.permute.xlu1 %587  ;;  %v319_v59 = vmul.f32 %v315_v56, %v297_v28  ;;  %v603_v0 = vrot.slane %v320_v57, 1  ;;  %v772_v10 = vrot.slane %v320_v57, 2  ;;  %v1783_v56 = vld [vmem:[%s2241_s5 + $0x10] sm:$0xff] }
 0x182   :  { %v592_v61 = vmul.f32 %v588_v58, %v570_v29  ;;  %v893_v2 = vrot.slane %v593_v60, 1  ;;  %v1054_v9 = vrot.slane %v593_v60, 2 }
 0x183   :  { %v321_v62 = vmax.f32 %v319_v59, 0.0 }
 0x184   :  { %v594_v63 = vmax.f32 %v592_v61, 0.0 }
 0x185   :  { %v604_v1 = vrot.slane %v321_v62, 1  ;;  %v773_v8 = vrot.slane %v321_v62, 2 }
 0x186   :  { %v894_v3 = vrot.slane %v594_v63, 1  ;;  %v1055_v7 = vrot.slane %v594_v63, 2 }
 0x187   :  { %v605_v4 = vsel %vm42_vm0, %v603_v0, %v604_v1  ;;  %v774_v11 = vsel %vm205_vm2, %v772_v10, %v773_v8 }
 0x188   :  { %1907 = vmatprep.mubr.msk.f32.mxu0 %vm606_vm4, %v605_v4  ;;  %v895_v5 = vsel %vm42_vm0, %v893_v2, %v894_v3  ;;  %v1056_v12 = vsel %vm205_vm2, %v1054_v9, %v1055_v7 }
 0x189   :  { %1922 = vmatprep.mubr.msk.f32.mxu1 %vm606_vm4, %v895_v5  ;;  %1908 = vmatmul.mubr.msk.f32.vlgmr.msra.gmra.mrb[2].mxu0 %vm606_vm4, %v604_v1  ;;  %v1790_v1 = vld [vmem:[%s2242_s6] ss:$0 sm:$0xff]  ;;  %s2066_s6 = smov 116  }
 0x18a   :  { %1923 = vmatmul.mubr.msk.f32.vlgmr.msra.gmra.mrb[2].mxu1 %vm606_vm4, %v894_v3  ;;  %1911 = vmatpush3.msk.msra.mxu0 %vm611_vm3, %v595_v48 }
 0x18b   :  { %1912 = vmatprep.mubr.msk.f32.mxu0 %vm606_vm4, %v320_v57  ;;  %1927 = vmatprep.mubr.msk.f32.mxu1 %vm606_vm4, %v593_v60 }
 0x18c   :  { %1926 = vmatpush3.msk.msra.mxu1 %vm611_vm3, %v595_v48  ;;  %1915 = vmatprep.subr.msk.mxu0 %vm611_vm3, %v1758_v6 }
 0x18d   :  { %1930 = vmatprep.subr.msk.mxu1 %vm611_vm3, %v1758_v6 }
 0x191   :  { %1913 = vmatmul.mubr.msk.f32.vlgmr.msra.gmra.mrb[2].mxu0 %vm606_vm4, %v321_v62 }
 0x192   :  { %1928 = vmatmul.mubr.msk.f32.vlgmr.msra.gmra.mrb[2].mxu1 %vm606_vm4, %v594_v63  ;;  %1916 = vmatpush3.msk.msra.mxu0 %vm611_vm3, %v1758_v6 }
 0x193   :  { %1917 = vmatprep.mubr.msk.f32.mxu0 %vm606_vm4, %v774_v11  ;;  %1932 = vmatprep.mubr.msk.f32.mxu1 %vm606_vm4, %v1056_v12 }
 0x194   :  { %1931 = vmatpush3.msk.msra.mxu1 %vm611_vm3, %v1758_v6  ;;  %1935 = vmatprep.subr.mxu0 %v1782_v34 }
 0x195   :  { %1950 = vmatprep.subr.mxu1 %v1782_v34 }
 0x199   :  { %1918 = vmatmul.mubr.msk.f32.vlgmr.msra.gmra.mrb[2].mxu0 %vm606_vm4, %v773_v8 }
 0x19a   :  { %1933 = vmatmul.mubr.msk.f32.vlgmr.msra.gmra.mrb[2].mxu1 %vm606_vm4, %v1055_v7  ;;  %1936 = vmatpush3.msra.mxu0 %v1782_v34 }
 0x19b   :  { %1951 = vmatpush3.msra.mxu1 %v1782_v34  ;;  %1940 = vmatprep.subr.mxu0 %v1164_v35 }
 0x19c   :  { %1955 = vmatprep.subr.mxu1 %v1164_v35 }
 0x26c   :  { %v1919_v14 = vpop.f32.mrb[2].mxu0 }
 0x26d   :  { %v866_v15 = vadd.f32 %v1919_v14, %v1768_v13  ;;  %v1934_v16 = vpop.f32.mrb[2].mxu1  ;;  %v848_v17 = vpop.f32.mrb[3].mxu0 }
 0x26e   :  { %v1139_v18 = vadd.f32 %v1934_v16, %v1768_v13  ;;  %v865_v19 = vadd.f32 %v1768_v13, %v848_v17  ;;  %v1127_v20 = vpop.f32.mrb[3].mxu1 }
 0x26f   :  { %v1770_v21 = vmul.f32 -1.442695, %v866_v15  ;;  %v1138_v22 = vadd.f32 %v1768_v13, %v1127_v20 }
 0x270   :  { %v1781_v23 = vmul.f32 -1.442695, %v1139_v18  ;;  %v1769_v24 = vmul.f32 -1.442695, %v865_v19 }
 0x271   :  { %2032 = vpow2.f32 %v1770_v21  ;;  %v1780_v25 = vmul.f32 -1.442695, %v1138_v22 }
 0x272   :  { %2034 = vpow2.f32 %v1781_v23 }
 0x273   :  { %2036 = vpow2.f32 %v1769_v24 }
 0x274   :  { %2038 = vpow2.f32 %v1780_v25 }
 0x27b   :  { %v2033_v26 = vpop.eup %2032 }
 0x27c   :  { %v2035_v27 = vpop.eup %2034  ;;  %v874_v28 = vadd.f32 1.0, %v2033_v26 }
 0x27d   :  { %v2037_v29 = vpop.eup %2036  ;;  %v1147_v31 = vadd.f32 1.0, %v2035_v27 }
 0x27e   :  { %v2039_v30 = vpop.eup %2038  ;;  %2040 = vrcp.f32 %v874_v28  ;;  %v873_v32 = vadd.f32 1.0, %v2037_v29 }
 0x27f   :  { %v1146_v33 = vadd.f32 1.0, %v2039_v30 }
 0x280   :  { %2042 = vrcp.f32 %v873_v32 }
 0x281   :  { %2044 = vrcp.f32 %v1147_v31 }
 0x282   :  { %2046 = vrcp.f32 %v1146_v33 }
 0x288   :  { %v2041_v36 = vpop.eup %2040 }
 0x289   :  { %883 = vrot.lane.b32.xlu1 %v2041_v36, %s2065_s8 }
 0x28a   :  { %v2043_v37 = vpop.eup %2042 }
 0x28b   :  { %881 = vrot.lane.b32.xlu0 %v2043_v37, %s2065_s8  ;;  %v2045_v38 = vpop.eup %2044 }
 0x28c   :  { %v2047_v39 = vpop.eup %2046 }
 0x28d   :  { %1156 = vrot.lane.b32.xlu1 %v2045_v38, %s2065_s8 }
 0x28f   :  { %1154 = vrot.lane.b32.xlu0 %v2047_v39, %s2065_s8 }
 0x2fb   :  { %v884_v40 = vpop.permute.xlu1 %883 }
 0x2fc   :  { %v888_v41 = vmul.f32 %v884_v40, %v866_v15 }
 0x2fd   :  { %v882_v42 = vpop.permute.xlu0 %881 }
 0x2fe   :  { %v890_v43 = vmax.f32 %v888_v41, 0.0  ;;  %v887_v44 = vmul.f32 %v882_v42, %v865_v19 }
 0x2ff   :  { %v1157_v45 = vpop.permute.xlu1 %1156 }
 0x300   :  { %v1173_v46 = vrot.slane %v890_v43, 1  ;;  %v889_v47 = vmax.f32 %v887_v44, 0.0  ;;  %v1161_v48 = vmul.f32 %v1157_v45, %v1139_v18  ;;  %v1335_v59 = vrot.slane %v890_v43, 2 }
 0x301   :  { %v1155_v49 = vpop.permute.xlu0 %1154 }
 0x302   :  { %v1172_v50 = vrot.slane %v889_v47, 1  ;;  %v1163_v51 = vmax.f32 %v1161_v48, 0.0  ;;  %v1160_v52 = vmul.f32 %v1155_v49, %v1138_v22  ;;  %v1334_v60 = vrot.slane %v889_v47, 2 }
 0x304   :  { %v1453_v53 = vrot.slane %v1163_v51, 1  ;;  %v1162_v54 = vmax.f32 %v1160_v52, 0.0  ;;  %v1174_v55 = vsel %vm42_vm0, %v1172_v50, %v1173_v46  ;;  %v1614_v61 = vrot.slane %v1163_v51, 2 }
 0x305   :  { %1937 = vmatprep.mubr.msk.f32.mxu0 %vm1175_vm5, %v1174_v55  ;;  %v1336_v63 = vsel %vm205_vm2, %v1334_v60, %v1335_v59 }
 0x306   :  { %v1452_v57 = vrot.slane %v1162_v54, 1  ;;  %1938 = vmatmul.mubr.msk.f32.vlgmr.msra.gmra.mrb[4].mxu0 %vm1175_vm5, %v1173_v46  ;;  %v1613_v62 = vrot.slane %v1162_v54, 2 }
 0x307   :  { %1941 = vmatpush3.msra.mxu0 %v1164_v35  ;;  %1942 = vmatprep.mubr.msk.f32.mxu0 %vm1175_vm5, %v889_v47 }
 0x308   :  { %v1454_v58 = vsel %vm42_vm0, %v1452_v57, %v1453_v53  ;;  %1945 = vmatprep.subr.mxu0 %v1783_v56  ;;  %v1615_v0 = vsel %vm205_vm2, %v1613_v62, %v1614_v61 }
 0x309   :  { %1952 = vmatprep.mubr.msk.f32.mxu1 %vm1175_vm5, %v1454_v58 }
 0x30a   :  { %1953 = vmatmul.mubr.msk.f32.vlgmr.msra.gmra.mrb[4].mxu1 %vm1175_vm5, %v1453_v53 }
 0x30b   :  { %1956 = vmatpush3.msra.mxu1 %v1164_v35  ;;  %1957 = vmatprep.mubr.msk.f32.mxu1 %vm1175_vm5, %v1162_v54 }
 0x30c   :  { %1960 = vmatprep.subr.mxu1 %v1783_v56 }
 0x30e   :  { %1943 = vmatmul.mubr.msk.f32.vlgmr.msra.gmra.mrb[4].mxu0 %vm1175_vm5, %v890_v43 }
 0x30f   :  { %1946 = vmatpush3.msra.mxu0 %v1783_v56  ;;  %1947 = vmatprep.mubr.msk.f32.mxu0 %vm1175_vm5, %v1336_v63 }
 0x312   :  { %1958 = vmatmul.mubr.msk.f32.vlgmr.msra.gmra.mrb[4].mxu1 %vm1175_vm5, %v1163_v51 }
 0x313   :  { %1961 = vmatpush3.msra.mxu1 %v1783_v56  ;;  %1962 = vmatprep.mubr.msk.f32.mxu1 %vm1175_vm5, %v1615_v0 }
 0x316   :  { %1948 = vmatmul.mubr.msk.f32.vlgmr.msra.gmra.mrb[4].mxu0 %vm1175_vm5, %v1335_v59 }
 0x31a   :  { %1963 = vmatmul.mubr.msk.f32.vlgmr.msra.gmra.mrb[4].mxu1 %vm1175_vm5, %v1614_v61 }
 0x3e9   :  { %v1949_v2 = vpop.f32.mrb[4].mxu0 }
 0x3ea   :  { %v1425_v3 = vadd.f32 %v1949_v2, %v1790_v1  ;;  %v1407_v4 = vpop.f32.mrb[5].mxu0 }
 0x3eb   :  { %v1424_v5 = vadd.f32 %v1790_v1, %v1407_v4 }
 0x3ec   :  { %v1792_v6 = vmul.f32 -1.442695, %v1425_v3 }
 0x3ed   :  { %v1791_v7 = vmul.f32 -1.442695, %v1424_v5  ;;  %v1964_v8 = vpop.f32.mrb[4].mxu1 }
 0x3ee   :  { %2048 = vpow2.f32 %v1792_v6  ;;  %v1698_v9 = vadd.f32 %v1964_v8, %v1790_v1  ;;  %v1686_v10 = vpop.f32.mrb[5].mxu1 }
 0x3ef   :  { %2050 = vpow2.f32 %v1791_v7  ;;  %v1697_v11 = vadd.f32 %v1790_v1, %v1686_v10 }
 0x3f0   :  { %v1800_v12 = vmul.f32 -1.442695, %v1698_v9 }
 0x3f1   :  { %v1799_v13 = vmul.f32 -1.442695, %v1697_v11 }
 0x3f2   :  { %2052 = vpow2.f32 %v1800_v12 }
 0x3f3   :  { %2054 = vpow2.f32 %v1799_v13 }
 0x3f8   :  { %v2049_v14 = vpop.eup %2048 }
 0x3f9   :  { %v2051_v15 = vpop.eup %2050  ;;  %v1433_v16 = vadd.f32 1.0, %v2049_v14 }
 0x3fa   :  { %v1432_v17 = vadd.f32 1.0, %v2051_v15 }
 0x3fb   :  { %2056 = vrcp.f32 %v1433_v16 }
 0x3fc   :  { %v2053_v18 = vpop.eup %2052  ;;  %2058 = vrcp.f32 %v1432_v17 }
 0x3fd   :  { %v2055_v19 = vpop.eup %2054  ;;  %v1706_v20 = vadd.f32 1.0, %v2053_v18 }
 0x3fe   :  { %v1705_v21 = vadd.f32 1.0, %v2055_v19 }
 0x3ff   :  { %2060 = vrcp.f32 %v1706_v20 }
 0x400   :  { %2062 = vrcp.f32 %v1705_v21 }
 0x405   :  { %v2057_v22 = vpop.eup %2056 }
 0x406   :  { %v2059_v23 = vpop.eup %2058  ;;  %1442 = vrot.lane.b32.xlu1 %v2057_v22, %s2066_s6 }
 0x407   :  { %1440 = vrot.lane.b32.xlu0 %v2059_v23, %s2066_s6 }
 0x409   :  { %v2061_v24 = vpop.eup %2060 }
 0x40a   :  { %v2063_v25 = vpop.eup %2062  ;;  %1715 = vrot.lane.b32.xlu1 %v2061_v24, %s2066_s6 }
 0x40b   :  { %1713 = vrot.lane.b32.xlu0 %v2063_v25, %s2066_s6 }
 0x478   :  { %v1443_v26 = vpop.permute.xlu1 %1442 }
 0x479   :  { %v1447_v27 = vmul.f32 %v1443_v26, %v1425_v3  ;;  %v1441_v28 = vpop.permute.xlu0 %1440 }
 0x47a   :  { %v1446_v29 = vmul.f32 %v1441_v28, %v1424_v5 }
 0x47b   :  { %v1449_v30 = vmax.f32 %v1447_v27, 0.0 }
 0x47c   :  { %v1448_v31 = vmax.f32 %v1446_v29, 0.0  ;;  %v1716_v32 = vpop.permute.xlu1 %1715 }
 0x47d   :  { %1726 = vst.msk [vmem:[%s2243_s7 + $0x8] sm:$0x3] %vm1725_vm6, %v1449_v30  ;;  %v1720_v33 = vmul.f32 %v1716_v32, %v1698_v9  ;;  %v1714_v34 = vpop.permute.xlu0 %1713 }
 0x47e   :  { %1724 = vst.msk [vmem:[%s2243_s7] sm:$0xff] %vm1723_vm7, %v1448_v31  ;;  %v1719_v35 = vmul.f32 %v1714_v34, %v1697_v11 }
 0x47f   :  { %v1722_v36 = vmax.f32 %v1720_v33, 0.0 }
 0x480   :  { %v1721_v37 = vmax.f32 %v1719_v35, 0.0 }
 0x481   :  { %1802 = vst.msk [vmem:[%s2243_s7 + $0x18] sm:$0x3] %vm1725_vm6, %v1722_v36 }
 0x482   :  { %1801 = vst.msk [vmem:[%s2243_s7 + $0x10] sm:$0xff] %vm1723_vm7, %v1721_v37 }

// kernel: forward.18
= control target key start
LH: loop header
LB: loop body
LE: loop exit
PB: predicated region body
PF: predicated region fallthrough
CT: control target
= control target key end

     0   :  { %vm19_vm0 = vcmask 261120   ;;  %vm26_vm1 = vcmask 257024   ;;  %s147_s0 = inlined_call_operand.vmem [shape: f32[20,32], index: 0, kind: input, shape index: {}]   ;;  %s148_s1 = inlined_call_operand.vmem [shape: f32[1,32], index: 1, kind: input, shape index: {}]   ;;  %s149_s2 = inlined_call_operand.vmem [shape: f32[1,32], index: 2, kind: input, shape index: {}]   ;;  %s150_s3 = inlined_call_operand.vmem [shape: f32[20,32], index: 3, kind: output, shape index: {}]  }
   0x1   :  { %v14_v0 = vld [vmem:[%s147_s0] sm:$0xff]  ;;  %v16_v1 = vld [vmem:[%s147_s0 + $0x10] sm:$0xf]  ;;  %v15_v2 = vld [vmem:[%s147_s0 + $0x8] sm:$0xff] }
   0x2   :  { %v20_v3 = vsel %vm19_vm0, %v14_v0, 0.0  ;;  %v27_v4 = vsel %vm26_vm1, %v16_v1, 0.0  ;;  %v23_v5 = vsel %vm19_vm0, %v15_v2, 0.0  ;;  %v86_v31 = vld [vmem:[%s148_s1] ss:$0 sm:$0xff] }
   0x3   :  { %21 = vadd.xlane.f32.xlu0 %v20_v3  ;;  %28 = vadd.xlane.f32.xlu1 %v27_v4  ;;  %v87_v33 = vld [vmem:[%s149_s2] ss:$0 sm:$0xff] }
   0x7   :  { %24 = vadd.xlane.f32.xlu0 %v23_v5 }
  0x90   :  { %v22_v6 = vpop.xlane.xlu0 %21  ;;  %v29_v7 = vpop.xlane.xlu1 %28 }
  0x91   :  { %v31_v8 = vmul.f32 0.03125, %v22_v6  ;;  %v33_v9 = vmul.f32 0.03125, %v29_v7 }
  0x93   :  { %v34_v10 = vsub.f32 %v14_v0, %v31_v8  ;;  %v36_v11 = vsub.f32 %v16_v1, %v33_v9 }
  0x94   :  { %v25_v12 = vpop.xlane.xlu0 %24 }
  0x95   :  { %v32_v13 = vmul.f32 0.03125, %v25_v12  ;;  %v37_v14 = vmul.f32 %v34_v10, %v34_v10  ;;  %v39_v15 = vmul.f32 %v36_v11, %v36_v11 }
  0x97   :  { %v35_v16 = vsub.f32 %v15_v2, %v32_v13  ;;  %v40_v17 = vsel %vm19_vm0, %v37_v14, 0.0  ;;  %v46_v18 = vsel %vm26_vm1, %v39_v15, 0.0 }
  0x98   :  { %41 = vadd.xlane.f32.xlu1 %v40_v17 }
  0x99   :  { %v38_v19 = vmul.f32 %v35_v16, %v35_v16 }
  0x9b   :  { %v43_v20 = vsel %vm19_vm0, %v38_v19, 0.0 }
  0x9c   :  { %47 = vadd.xlane.f32.xlu1 %v46_v18  ;;  %44 = vadd.xlane.f32.xlu0 %v43_v20 }
 0x125   :  { %v42_v21 = vpop.xlane.xlu1 %41 }
 0x126   :  { %v49_v22 = vmul.f32 0.03125, %v42_v21 }
 0x128   :  { %v52_v23 = vadd.f32 1e-05, %v49_v22 }
 0x129   :  { %v48_v24 = vpop.xlane.xlu1 %47  ;;  %v45_v25 = vpop.xlane.xlu0 %44 }
 0x12a   :  { %88 = vrsqrt.f32 %v52_v23  ;;  %v51_v26 = vmul.f32 0.03125, %v48_v24  ;;  %v50_v27 = vmul.f32 0.03125, %v45_v25 }
 0x12c   :  { %v54_v28 = vadd.f32 1e-05, %v51_v26  ;;  %v53_v29 = vadd.f32 1e-05, %v50_v27 }
 0x12e   :  { %90 = vrsqrt.f32 %v54_v28 }
 0x12f   :  { %92 = vrsqrt.f32 %v53_v29 }
 0x134   :  { %v89_v30 = vpop.eup %88 }
 0x135   :  { %v58_v32 = vmul.f32 %v89_v30, %v34_v10 }
 0x137   :  { %v67_v34 = vmul.f32 %v86_v31, %v58_v32 }
 0x138   :  { %v91_v35 = vpop.eup %90 }
 0x139   :  { %v93_v36 = vpop.eup %92  ;;  %v76_v37 = vadd.f32 %v87_v33, %v67_v34  ;;  %v60_v38 = vmul.f32 %v91_v35, %v36_v11 }
 0x13a   :  { %v59_v39 = vmul.f32 %v93_v36, %v35_v16 }
 0x13b   :  { %79 = vst.msk [vmem:[%s150_s3] sm:$0xff] %vm19_vm0, %v76_v37  ;;  %v69_v40 = vmul.f32 %v86_v31, %v60_v38 }
 0x13c   :  { %v68_v41 = vmul.f32 %v86_v31, %v59_v39 }
 0x13d   :  { %v78_v42 = vadd.f32 %v87_v33, %v69_v40 }
 0x13e   :  { %v77_v43 = vadd.f32 %v87_v33, %v68_v41 }
 0x13f   :  { %81 = vst.msk [vmem:[%s150_s3 + $0x10] sm:$0xf] %vm26_vm1, %v78_v42 }
 0x140   :  { %80 = vst.msk [vmem:[%s150_s3 + $0x8] sm:$0xff] %vm19_vm0, %v77_v43 }

// kernel: forward.15
= control target key start
LH: loop header
LB: loop body
LE: loop exit
PB: predicated region body
PF: predicated region fallthrough
CT: control target
= control target key end

     0   :  { %vm51_vm0 = vcmask 261120   ;;  %s690_s0 = inlined_call_operand.vmem [shape: f32[10,32], index: 0, kind: input, shape index: {}]   ;;  %s691_s1 = inlined_call_operand.vmem [shape: f32[10,32], index: 1, kind: input, shape index: {}]   ;;  %s692_s2 = inlined_call_operand.vmem [shape: f32[10,1], index: 2, kind: input, shape index: {}]   ;;  %s693_s3 = inlined_call_operand.vmem [shape: f32[10,32], index: 3, kind: input, shape index: {}]   ;;  %s694_s4 = inlined_call_operand.vmem [shape: f32[32,64], index: 4, kind: input, shape index: {}]   ;;  %s695_s5 = inlined_call_operand.vmem [shape: f32[1,64], index: 5, kind: input, shape index: {}]   ;;  %s696_s6 = inlined_call_operand.vmem [shape: f32[32,32], index: 6, kind: input, shape index: {}]   ;;  %s697_s7 = inlined_call_operand.vmem [shape: f32[1,32], index: 7, kind: input, shape index: {}]   ;;  %s698_s8 = inlined_call_operand.vmem [shape: f32[32,32], index: 8, kind: input, shape index: {}]   ;;  %s699_s9 = inlined_call_operand.vmem [shape: f32[1,32], index: 9, kind: input, shape index: {}]   ;;  %s700_s10 = inlined_call_operand.vmem [shape: f32[10,32], index: 10, kind: output, shape index: {0}]   ;;  %s701_s11 = inlined_call_operand.hbm [shape: f32[1,1], index: 11, kind: output, shape index: {1}]  }
   0x1   :  { %v40_v0 = vld [vmem:[%s694_s4] sm:$0xff]  ;;  %v41_v1 = vld [vmem:[%s694_s4 + $0x8] sm:$0xff]  ;;  %v42_v2 = vld [vmem:[%s694_s4 + $0x10] sm:$0xff] }
   0x2   :  { %v467_v3 = vpack.c.bf16 %v41_v1, %v40_v0  ;;  %v43_v4 = vld [vmem:[%s694_s4 + $0x18] sm:$0xff]  ;;  %v38_v5 = vld [vmem:[%s690_s0] sm:$0xff]  ;;  %v136_v8 = vld [vmem:[%s696_s6 + $0x8] sm:$0xff] }
   0x3   :  { %v471_v6 = vpack.c.bf16 %v43_v4, %v42_v2  ;;  %442 = vmatprep.mubr.msk.f32.mxu0 %vm51_vm0, %v38_v5  ;;  %v135_v7 = vld [vmem:[%s696_s6] sm:$0xff] }
   0x4   :  { %17 = vsyncpa [#allocation3], 0  ;;  %468 = vmatprep.subr.bf16.mxu0 %v467_v3  ;;  %v475_v9 = vpack.c.bf16 %v136_v8, %v135_v7  ;;  %v39_v10 = vld [vmem:[%s690_s0 + $0x8] sm:$0x3]  ;;  %v137_v11 = vld [vmem:[%s696_s6 + $0x10] sm:$0xff]  ;;  %s530_s25 = smov 96  }
   0x5   :  { %470 = vmatpush3.bf16.msra.mxu0 %v467_v3  ;;  %v138_v12 = vld [vmem:[%s696_s6 + $0x18] sm:$0xff]  ;;  %v227_v14 = vld [vmem:[%s698_s8] sm:$0xff]  ;;  %v228_v15 = vld [vmem:[%s698_s8 + $0x8] sm:$0xff]  ;;  %v531_v28 = vmov 0   ;;  %vm338_vm1 = vcmask 254976   ;;  %s532_s21 = smov [#allocation2]  }
   0x6   :  { %472 = vmatprep.subr.bf16.mxu0 %v471_v6  ;;  %476 = vmatprep.subr.bf16.mxu1 %v475_v9  ;;  %v479_v13 = vpack.c.bf16 %v138_v12, %v137_v11  ;;  %v483_v16 = vpack.c.bf16 %v228_v15, %v227_v14  ;;  %v229_v17 = vld [vmem:[%s698_s8 + $0x10] sm:$0xff]  ;;  %v230_v18 = vld [vmem:[%s698_s8 + $0x18] sm:$0xff]  ;;  %v407_v20 = vld [vmem:[%s695_s5] ss:$0 sm:$0xff]  ;;  %s397_s22 = sshll.u32 %s532_s21, 4  ;;  %vm387_vm2 = vcmask 0   ;;  %s398_s22 = int_to_ptr.vmem [resolvable:$true] %s397_s22 }
   0x7   :  { %478 = vmatpush3.bf16.msra.mxu1 %v475_v9  ;;  %v487_v19 = vpack.c.bf16 %v230_v18, %v229_v17  ;;  %v371_v27 = vld [vmem:[%s692_s2 + $0x8] sm:$0x3]  ;;  %497 = vset.pattern.permute.xlu0 %v531_v28  ;;  %v413_v33 = vld [vmem:[%s699_s9] ss:$0 sm:$0xff]  ;;  %s506_s6 = scalar_lea.vmem %s398_s22, 16  ;;  %s510_s23 = scalar_lea.vmem %s398_s22, 32 }
   0x8   :  { %480 = vmatprep.subr.bf16.mxu1 %v479_v13  ;;  %496 = vset.pattern.permute.xlu1 %v531_v28  ;;  %v410_v34 = vld [vmem:[%s697_s7] ss:$0 sm:$0xff]  ;;  %v361_v56 = vld [vmem:[%s693_s3 + $0x8] sm:$0x3]  ;;  %p507_p0 = scmp.ne.s32.totalorder %s398_s22, %s506_s6  ;;  %p511_p1 = scmp.lt.s32.totalorder %s398_s22, %s398_s22 }
   0x9   :  { %474 = vmatpush3.bf16.msra.mxu0 %v471_v6  ;;  %v367_v0 = vld [vmem:[%s691_s1 + $0x8] sm:$0x3]  ;;  %v370_v6 = vld [vmem:[%s692_s2] sm:$0xff]  ;;  %p512_p2 = scmp.lt.s32.totalorder %s510_s23, %s506_s6 }
   0xa   :  { %484 = vmatprep.subr.bf16.mxu0 %v483_v16  ;;  %v366_v14 = vld [vmem:[%s691_s1] sm:$0xff] }
   0xb   :  { %482 = vmatpush3.bf16.msra.mxu1 %v479_v13  ;;  %p513_p3 = por %p512_p2, %p511_p1 }
   0xc   :  { %443 = vmatmul.mubr.msk.f32.vlgmr.msra.gmra.mrb[0].mxu0 %vm51_vm0, %v39_v10  ;;  %v360_v10 = vld [vmem:[%s693_s3] sm:$0xff] }
   0xd   :  { %486 = vmatpush3.bf16.msra.mxu0 %v483_v16  ;;  %p514_p4 = pnand %p513_p3, %p507_p0 }
   0xe   :  { %488 = vmatprep.subr.bf16.mxu0 %v487_v19 }
  0x11   :  { %490 = vmatpush3.bf16.msra.mxu0 %v487_v19 }
  0xdf   :  { %v444_v21 = vpop.f32.mrb[0].mxu0 }
  0xe0   :  { %v130_v22 = vadd.f32 %v444_v21, %v407_v20  ;;  %v124_v23 = vpop.f32.mrb[1].mxu0 }
  0xe1   :  { %v125_v24 = vadd.f32 %v407_v20, %v124_v23 }
  0xe2   :  { %v134_v26 = vmax.f32 %v130_v22, 0.0 }
  0xe3   :  { %v133_v25 = vmax.f32 %v125_v24, 0.0 }
  0xe5   :  { %238 = vrot.lane.b32.xlu0 %v133_v25, %s530_s25  ;;  %453 = vmatprep.mubr.msk.f32.mxu1 %vm51_vm0, %v133_v25 }
  0xe6   :  { %454 = vmatmul.mubr.msk.f32.vlgmr.msra.gmra.mrb[0].mxu1 %vm51_vm0, %v134_v26 }
  0xe9   :  { %240 = vrot.lane.b32.xlu0 %v134_v26, %s530_s25 }
  0xed   :  { %379 = vperm.xlu0 %497, %v371_v27  }
 0x157   :  { %v239_v29 = vpop.permute.xlu0 %238 }
 0x158   :  { %464 = vmatprep.mubr.msk.f32.mxu0 %vm51_vm0, %v239_v29 }
 0x15b   :  { %v241_v30 = vpop.permute.xlu0 %240 }
 0x15c   :  { %465 = vmatmul.mubr.msk.f32.vlgmr.msra.gmra.mrb[2].mxu0 %vm51_vm0, %v241_v30 }
 0x16c   :  { %v380_v3 = vpop.permute.xlu0 %379 }
 0x1b9   :  { %v455_v31 = vpop.f32.mrb[0].mxu1 }
 0x1ba   :  { %v218_v32 = vpop.f32.mrb[1].mxu1  ;;  %v224_v39 = vadd.f32 %v455_v31, %v410_v34 }
 0x1bb   :  { %v219_v51 = vadd.f32 %v410_v34, %v218_v32 }
 0x1bc   :  { %v328_v44 = vmul.f32 %v224_v39, %v224_v39 }
 0x1bd   :  { %v327_v53 = vmul.f32 %v219_v51, %v219_v51 }
 0x22f   :  { %v466_v35 = vpop.f32.mrb[2].mxu0 }
 0x230   :  { %v318_v36 = vadd.f32 %v466_v35, %v413_v33  ;;  %v312_v37 = vpop.f32.mrb[3].mxu0 }
 0x231   :  { %v313_v38 = vadd.f32 %v413_v33, %v312_v37 }
 0x232   :  { %v322_v40 = vand.u32 2147483647, %v318_v36 }
 0x233   :  { %v321_v41 = vand.u32 2147483647, %v313_v38 }
 0x234   :  { %v324_v42 = vsub.f32 0.0, %v322_v40 }
 0x235   :  { %v323_v43 = vsub.f32 0.0, %v321_v41 }
 0x236   :  { %v326_v45 = vadd.f32 1.0, %v324_v42  ;;  %v333_v46 = vmul.f32 1.442695, %v324_v42  ;;  %v355_v47 = vmul.f32 0.5, %v324_v42 }
 0x237   :  { %v331_v48 = vmul.f32 1.442695, %v323_v43  ;;  %v325_v52 = vadd.f32 1.0, %v323_v43  ;;  %v354_v7 = vmul.f32 0.5, %v323_v43 }
 0x238   :  { %498 = vpow2.f32 %v333_v46  ;;  %v358_v49 = vmul.f32 1.442695, %v355_v47  ;;  %v330_v50 = vsub.f32 %v326_v45, %v328_v44 }
 0x239   :  { %500 = vpow2.f32 %v331_v48  ;;  %v329_v55 = vsub.f32 %v325_v52, %v327_v53  ;;  %v356_v8 = vmul.f32 1.442695, %v354_v7 }
 0x23a   :  { %502 = vpow2.f32 %v358_v49 }
 0x23b   :  { %504 = vpow2.f32 %v356_v8 }
 0x242   :  { %v499_v54 = vpop.eup %498 }
 0x243   :  { %v501_v57 = vpop.eup %500  ;;  %v336_v58 = vsub.f32 %v330_v50, %v499_v54 }
 0x244   :  { %v503_v59 = vpop.eup %502  ;;  %v335_v60 = vsub.f32 %v329_v55, %v501_v57 }
 0x245   :  { %v339_v61 = vsel %vm338_vm1, %v336_v58, 0.0  ;;  %v363_v62 = vmul.f32 %v503_v59, %v361_v56  ;;  %v505_v9 = vpop.eup %504 }
 0x246   :  { %v337_v63 = vsel %vm51_vm0, %v335_v60, 0.0  ;;  %v362_v11 = vmul.f32 %v505_v9, %v360_v10 }
 0x247   :  { %v340_v1 = vadd.f32 %v339_v61, %v337_v63  ;;  %v365_v2 = vadd.f32 %v363_v62, %v224_v39 }
 0x248   :  { %v364_v12 = vadd.f32 %v362_v11, %v219_v51 }
 0x249   :  { %341 = vadd.xlane.f32.xlu1 %v340_v1  ;;  %v369_v4 = vadd.f32 %v367_v0, %v365_v2 }
 0x24a   :  { %v368_v17 = vadd.f32 %v366_v14, %v364_v12 }
 0x24b   :  { %v383_v5 = vadd.f32 %v380_v3, %v369_v4 }
 0x24d   :  { %385 = vst.msk [vmem:[%s700_s10 + $0x8] sm:$0x3] %vm338_vm1, %v383_v5 }
 0x25a   :  { %374 = vperm.xlu1 %496, %v370_v6  }
 0x2d6   :  { %v342_v13 = vpop.xlane.xlu1 %341 }
 0x2d7   :  { %v343_v15 = vrot.slane %v342_v13, 4 }
 0x2d9   :  { %v344_v16 = vadd.f32 %v343_v15, %v342_v13 }
 0x2da   :  { %v375_v18 = vpop.permute.xlu1 %374 }
 0x2db   :  { %v345_v19 = vrot.slane %v344_v16, 2  ;;  %v382_v20 = vadd.f32 %v375_v18, %v368_v17 }
 0x2dd   :  { %384 = vst.msk [vmem:[%s700_s10] sm:$0xff] %vm51_vm0, %v382_v20  ;;  %v346_v21 = vadd.f32 %v345_v19, %v344_v16 }
 0x2df   :  { %v347_v22 = vrot.slane %v346_v21, 1 }
 0x2e1   :  { %v348_v23 = vadd.f32 %v347_v22, %v346_v21 }
 0x2e3   :  { %491 = vpush %v348_v23 }
 0x314   :  { %s492_s3 = spop %491 }
 0x315   :  { %s350_s0 = smul.f32 -0.5, %s492_s3 }
 0x317   :  { %s353_s1 = smul.f32 0.015625, %s350_s0 }
 0x319   :  { %v386_v24 = vstv %s353_s1 }
 0x31a   :  { %388 = vst.msk [vmem:[#allocation2] sm:$0x1] %vm387_vm2, %v386_v24 }
 0x31b   :  { %517 = shalt.err (!%p514_p4)
}
 0x31c   :  { %s518_s25 = scalar_lea.hbm %s701_s11, 16 }
 0x31d   :  { %p519_p5 = scmp.ne.s32.totalorder %s701_s11, %s518_s25  ;;  %p522_p6 = scmp.lt.u32.totalorder %s518_s25, %s701_s11 }
 0x31f   :  { %p524_p7 = pnand %p522_p6, %p519_p5 }
 0x321   :  { %527 = shalt.err (!%p524_p7)
}
 0x322   :  { %400 = dma.vmem_to_hbm [thread:$0]  %s398_s22, 16, %s701_s11, [#allocation3]  }
 0x323   :  { %528 = dma.done.wait [#allocation3], 16  }
 0x324   :  { %529 = vsyncadd [#allocation3], 4294967280 }
 0x325   :  { %406 = vsyncpa [#allocation3], 1 }

// kernel: eq.1
= control target key start
LH: loop header
LB: loop body
LE: loop exit
PB: predicated region body
PF: predicated region fallthrough
CT: control target
= control target key end

     0   :  { %vm7_vm0 = vcmask 56320   ;;  %vm13_vm1 = vcmask 113720   ;;  %s39_s0 = inlined_call_operand.vmem [shape: s32[2,7], index: 0, kind: input, shape index: {}]   ;;  %s40_s1 = inlined_call_operand.vmem [shape: s32[14], index: 1, kind: output, shape index: {}]  }
   0x1   :  { %v4_v0 = vld [vmem:[%s39_s0] sm:$0x3]  ;;  %s22_s0 = smov 7  }
   0x2   :  { %5 = vst [vmem:[#allocation1] sm:$0x3] %v4_v0 }
   0x9   :  { %v10_v1 = vld [vmem:[#allocation1 + $0x1] sm:$0x1]   ;;  %v6_v2 = vld [vmem:[#allocation1] sm:$0x1]  }
   0xa   :  { %11 = vrot.lane.b32.xlu0 %v10_v1, %s22_s0  ;;  %8 = vst.msk [vmem:[#allocation0] sm:$0x1] %vm7_vm0, %v6_v2  }
  0x7c   :  { %v12_v3 = vpop.permute.xlu0 %11  }
  0x7d   :  { %14 = vst.msk [vmem:[#allocation0] sm:$0x1] %vm13_vm1, %v12_v3  }
  0x84   :  { %v18_v4 = vld [vmem:[#allocation0] sm:$0x1] }
  0x85   :  { %20 = vst [vmem:[%s40_s1] sm:$0x1] %v18_v4 }

// kernel: forward.21
= control target key start
LH: loop header
LB: loop body
LE: loop exit
PB: predicated region body
PF: predicated region fallthrough
CT: control target
= control target key end

     0   :  { %vm41_vm0 = vcmask 261120   ;;  %v407_v20 = vmov 0   ;;  %vm329_vm3 = vcmask 162816   ;;  %s532_s0 = inlined_call_operand.vmem [shape: f32[16,32], index: 0, kind: input, shape index: {}]   ;;  %s533_s3 = inlined_call_operand.vmem [shape: f32[32,32], index: 3, kind: input, shape index: {}]   ;;  %s534_s5 = inlined_call_operand.<no memory space> [shape: f32[1,1], index: 5, kind: input, shape index: {}]   ;;  %s535_s1 = inlined_call_operand.vmem [shape: f32[1,32], index: 1, kind: input, shape index: {}]   ;;  %s536_s2 = inlined_call_operand.vmem [shape: f32[1,32], index: 2, kind: input, shape index: {}]   ;;  %s537_s4 = inlined_call_operand.vmem [shape: f32[1,32], index: 4, kind: input, shape index: {}]   ;;  %s538_s8 = inlined_call_operand.vmem [shape: f32[32,20], index: 8, kind: input, shape index: {}]   ;;  %s539_s6 = inlined_call_operand.vmem [shape: f32[1,32], index: 6, kind: input, shape index: {}]   ;;  %s540_s7 = inlined_call_operand.vmem [shape: f32[1,32], index: 7, kind: input, shape index: {}]   ;;  %s541_s9 = inlined_call_operand.vmem [shape: f32[1,20], index: 9, kind: input, shape index: {}]   ;;  %s542_s10 = inlined_call_operand.vmem [shape: f32[16,20], index: 10, kind: output, shape index: {}]  }
   0x1   :  { %v37_v0 = vld [vmem:[%s532_s0] sm:$0xff]  ;;  %v38_v1 = vld [vmem:[%s532_s0 + $0x8] sm:$0xff]  ;;  %v87_v16 = vld [vmem:[%s533_s3 + $0x10] sm:$0xff]  ;;  %398 = vset.pattern.permute.xlu0 %v407_v20  ;;  %v15_v21 = vstv %s534_s5 }
   0x2   :  { %v42_v2 = vsel %vm41_vm0, %v37_v0, 0.0  ;;  %v45_v3 = vsel %vm41_vm0, %v38_v1, 0.0  ;;  %v85_v14 = vld [vmem:[%s533_s3] sm:$0xff]  ;;  %v86_v15 = vld [vmem:[%s533_s3 + $0x8] sm:$0xff]  ;;  %v88_v18 = vld [vmem:[%s533_s3 + $0x18] sm:$0xff] }
   0x3   :  { %43 = vadd.xlane.f32.xlu0 %v42_v2  ;;  %v381_v17 = vpack.c.bf16 %v86_v15, %v85_v14  ;;  %v385_v19 = vpack.c.bf16 %v88_v18, %v87_v16  ;;  %16 = vst [vmem:[#allocation2] sm:$0x1] %v15_v21  ;;  %v336_v30 = vld [vmem:[%s535_s1] ss:$0 sm:$0xff]  ;;  %v238_v62 = vld [vmem:[%s538_s8 + $0x8] sm:$0xff]  ;;  %v239_v63 = vld [vmem:[%s538_s8 + $0x10] sm:$0xff] }
   0x4   :  { %v337_v32 = vld [vmem:[%s536_s2] ss:$0 sm:$0xff] }
   0x5   :  { %382 = vmatprep.subr.bf16.mxu0 %v381_v17  ;;  %v338_v39 = vld [vmem:[%s537_s4] ss:$0 sm:$0xff] }
   0x6   :  { %384 = vmatpush3.bf16.msra.mxu0 %v381_v17  ;;  %v237_v61 = vld [vmem:[%s538_s8] sm:$0xff] }
   0x7   :  { %46 = vadd.xlane.f32.xlu0 %v45_v3  ;;  %386 = vmatprep.subr.bf16.mxu0 %v385_v19 }
   0xa   :  { %388 = vmatpush3.bf16.msra.mxu0 %v385_v19  ;;  %v341_v22 = vld [vmem:[#allocation2] ss:$0 sm:$0xff] }
   0xb   :  { %v344_v19 = vld [vmem:[%s541_s9] ss:$0 sm:$0xff] }
  0x1d   :  { %186 = vperm.xlu0 %398, %v341_v22  }
  0x90   :  { %v44_v4 = vpop.xlane.xlu0 %43 }
  0x91   :  { %v49_v5 = vmul.f32 0.03125, %v44_v4 }
  0x93   :  { %v51_v6 = vsub.f32 %v37_v0, %v49_v5  ;;  %v389_v0 = vpack.c.bf16 %v238_v62, %v237_v61 }
  0x94   :  { %v47_v7 = vpop.xlane.xlu0 %46 }
  0x95   :  { %v50_v8 = vmul.f32 0.03125, %v47_v7  ;;  %v53_v9 = vmul.f32 %v51_v6, %v51_v6  ;;  %390 = vmatprep.subr.bf16.mxu1 %v389_v0 }
  0x96   :  { %392 = vmatpush3.bf16.msra.mxu1 %v389_v0 }
  0x97   :  { %v52_v10 = vsub.f32 %v38_v1, %v50_v8  ;;  %v55_v11 = vsel %vm41_vm0, %v53_v9, 0.0  ;;  %v240_v1 = vld [vmem:[%s538_s8 + $0x18] sm:$0xff] }
  0x98   :  { %56 = vadd.xlane.f32.xlu1 %v55_v11  ;;  %v393_v2 = vpack.c.bf16 %v240_v1, %v239_v63 }
  0x99   :  { %v54_v12 = vmul.f32 %v52_v10, %v52_v10 }
  0x9a   :  { %394 = vmatprep.subr.bf16.mxu1 %v393_v2 }
  0x9b   :  { %v58_v13 = vsel %vm41_vm0, %v54_v12, 0.0  ;;  %396 = vmatpush3.bf16.msra.mxu1 %v393_v2  ;;  %v343_v12 = vld [vmem:[%s540_s7] ss:$0 sm:$0xff] }
  0x9c   :  { %59 = vadd.xlane.f32.xlu1 %v58_v13  ;;  %v187_v43 = vpop.permute.xlu0 %186 }
 0x125   :  { %v57_v23 = vpop.xlane.xlu1 %56 }
 0x126   :  { %v61_v24 = vmul.f32 0.03125, %v57_v23 }
 0x128   :  { %v63_v25 = vadd.f32 1e-05, %v61_v24 }
 0x129   :  { %v60_v26 = vpop.xlane.xlu1 %59 }
 0x12a   :  { %399 = vrsqrt.f32 %v63_v25  ;;  %v62_v27 = vmul.f32 0.03125, %v60_v26 }
 0x12c   :  { %v64_v28 = vadd.f32 1e-05, %v62_v27 }
 0x12e   :  { %401 = vrsqrt.f32 %v64_v28 }
 0x134   :  { %v400_v29 = vpop.eup %399 }
 0x135   :  { %v67_v31 = vmul.f32 %v400_v29, %v51_v6 }
 0x137   :  { %v75_v33 = vmul.f32 %v336_v30, %v67_v31 }
 0x138   :  { %v402_v34 = vpop.eup %401 }
 0x139   :  { %v68_v35 = vmul.f32 %v402_v34, %v52_v10  ;;  %v83_v36 = vadd.f32 %v337_v32, %v75_v33  ;;  %v342_v10 = vld [vmem:[%s539_s6] ss:$0 sm:$0xff] }
 0x13b   :  { %v76_v37 = vmul.f32 %v336_v30, %v68_v35  ;;  %367 = vmatprep.mubr.msk.f32.mxu0 %vm41_vm0, %v83_v36 }
 0x13d   :  { %v84_v38 = vadd.f32 %v337_v32, %v76_v37 }
 0x13f   :  { %368 = vmatmul.mubr.msk.f32.vlgmr.msra.gmra.mrb[0].mxu0 %vm41_vm0, %v84_v38 }
 0x212   :  { %v369_v40 = vpop.f32.mrb[0].mxu0 }
 0x213   :  { %v174_v41 = vadd.f32 %v369_v40, %v338_v39  ;;  %v168_v42 = vpop.f32.mrb[1].mxu0 }
 0x214   :  { %v169_v44 = vadd.f32 %v338_v39, %v168_v42 }
 0x215   :  { %v190_v46 = vmul.f32 %v187_v43, %v174_v41  ;;  %vm178_vm2 = vcmp.ge.f32.partialorder %v174_v41, 0.0 }
 0x216   :  { %v189_v45 = vmul.f32 %v187_v43, %v169_v44  ;;  %vm177_vm1 = vcmp.ge.f32.partialorder %v169_v44, 0.0 }
 0x217   :  { %v192_v49 = vsel %vm178_vm2, %v174_v41, %v190_v46 }
 0x218   :  { %v191_v47 = vsel %vm177_vm1, %v169_v44, %v189_v45  ;;  %v198_v50 = vsel %vm41_vm0, %v192_v49, 0.0 }
 0x219   :  { %v195_v48 = vsel %vm41_vm0, %v191_v47, 0.0 }
 0x21a   :  { %196 = vadd.xlane.f32.xlu1 %v195_v48 }
 0x21e   :  { %199 = vadd.xlane.f32.xlu1 %v198_v50 }
 0x2a7   :  { %v197_v51 = vpop.xlane.xlu1 %196 }
 0x2a8   :  { %v201_v52 = vmul.f32 0.03125, %v197_v51 }
 0x2aa   :  { %v203_v53 = vsub.f32 %v191_v47, %v201_v52 }
 0x2ab   :  { %v200_v54 = vpop.xlane.xlu1 %199 }
 0x2ac   :  { %v202_v55 = vmul.f32 0.03125, %v200_v54  ;;  %v205_v56 = vmul.f32 %v203_v53, %v203_v53 }
 0x2ae   :  { %v204_v57 = vsub.f32 %v192_v49, %v202_v55  ;;  %v207_v58 = vsel %vm41_vm0, %v205_v56, 0.0 }
 0x2af   :  { %208 = vadd.xlane.f32.xlu1 %v207_v58 }
 0x2b0   :  { %v206_v59 = vmul.f32 %v204_v57, %v204_v57 }
 0x2b2   :  { %v210_v60 = vsel %vm41_vm0, %v206_v59, 0.0 }
 0x2b3   :  { %211 = vadd.xlane.f32.xlu1 %v210_v60 }
 0x33c   :  { %v209_v3 = vpop.xlane.xlu1 %208 }
 0x33d   :  { %v213_v4 = vmul.f32 0.03125, %v209_v3 }
 0x33f   :  { %v215_v5 = vadd.f32 1e-05, %v213_v4 }
 0x340   :  { %v212_v6 = vpop.xlane.xlu1 %211 }
 0x341   :  { %403 = vrsqrt.f32 %v215_v5  ;;  %v214_v7 = vmul.f32 0.03125, %v212_v6 }
 0x343   :  { %v216_v8 = vadd.f32 1e-05, %v214_v7 }
 0x345   :  { %405 = vrsqrt.f32 %v216_v8 }
 0x34b   :  { %v404_v9 = vpop.eup %403 }
 0x34c   :  { %v219_v11 = vmul.f32 %v404_v9, %v203_v53 }
 0x34e   :  { %v227_v13 = vmul.f32 %v342_v10, %v219_v11 }
 0x34f   :  { %v406_v14 = vpop.eup %405 }
 0x350   :  { %v220_v15 = vmul.f32 %v406_v14, %v204_v57  ;;  %v235_v16 = vadd.f32 %v343_v12, %v227_v13 }
 0x352   :  { %v228_v17 = vmul.f32 %v342_v10, %v220_v15  ;;  %378 = vmatprep.mubr.msk.f32.mxu1 %vm41_vm0, %v235_v16 }
 0x354   :  { %v236_v18 = vadd.f32 %v343_v12, %v228_v17 }
 0x356   :  { %379 = vmatmul.mubr.msk.f32.vlgmr.msra.gmra.mrb[0].mxu1 %vm41_vm0, %v236_v18 }
 0x429   :  { %v380_v20 = vpop.f32.mrb[0].mxu1 }
 0x42a   :  { %v326_v21 = vadd.f32 %v380_v20, %v344_v19  ;;  %v320_v22 = vpop.f32.mrb[1].mxu1 }
 0x42b   :  { %v321_v23 = vadd.f32 %v344_v19, %v320_v22 }
 0x42c   :  { %331 = vst.msk [vmem:[%s542_s10 + $0x8] sm:$0xff] %vm329_vm3, %v326_v21 }
 0x42d   :  { %330 = vst.msk [vmem:[%s542_s10] sm:$0xff] %vm329_vm3, %v321_v23 }

// kernel: forward.22
= control target key start
LH: loop header
LB: loop body
LE: loop exit
PB: predicated region body
PF: predicated region fallthrough
CT: control target
= control target key end

     0   :  { %vm17_vm0 = vcmask 162816   ;;  %vm21_vm1 = vcmask 160768   ;;  %s207_s0 = inlined_call_operand.vmem [shape: f32[14,20], index: 0, kind: input, shape index: {}]   ;;  %s208_s1 = inlined_call_operand.vmem [shape: f32[14,20], index: 1, kind: input, shape index: {}]   ;;  %s209_s2 = inlined_call_operand.vmem [shape: f32[14,1], index: 2, kind: input, shape index: {}]   ;;  %s210_s3 = inlined_call_operand.hbm [shape: f32[1,1], index: 3, kind: output, shape index: {}]  }
   0x1   :  { %v15_v0 = vld [vmem:[%s207_s0] sm:$0xff]  ;;  %v16_v1 = vld [vmem:[%s207_s0 + $0x8] sm:$0x3f] }
   0x2   :  { %v18_v2 = vsel %vm17_vm0, %v15_v0, -inf }
   0x3   :  { %8 = vsyncpa [#allocation3], 0  ;;  %19 = vmax.xlane.f32.xlu0 %v18_v2  ;;  %v22_v3 = vsel %vm21_vm1, %v16_v1, -inf  ;;  %v43_v20 = vld [vmem:[%s208_s1] sm:$0xff]  ;;  %v44_v25 = vld [vmem:[%s208_s1 + $0x8] sm:$0x3f] }
   0x4   :  { %v55_v30 = vld [vmem:[%s209_s2] sm:$0xff]  ;;  %v56_v31 = vld [vmem:[%s209_s2 + $0x8] sm:$0x3f]  ;;  %vm59_vm2 = vcmask 7168   ;;  %vm61_vm3 = vcmask 5120   ;;  %s149_s23 = smov 1.0  }
   0x5   :  { %v73_v32 = vsel %vm59_vm2, %v55_v30, 0.0  ;;  %v74_v33 = vsel %vm61_vm3, %v56_v31, 0.0  ;;  %s150_s25 = smov [#allocation2]   ;;  %vm91_vm4 = vcmask 0  }
   0x6   :  { %v75_v34 = vadd.f32 %v74_v33, %v73_v32  ;;  %s99_s26 = sshll.u32 %s150_s25, 4  ;;  %s100_s26 = int_to_ptr.vmem [resolvable:$true] %s99_s26 }
   0x7   :  { %23 = vmax.xlane.f32.xlu0 %v22_v3  ;;  %s125_s29 = scalar_lea.vmem %s100_s26, 16  ;;  %s129_s30 = scalar_lea.vmem %s100_s26, 32 }
   0x8   :  { %p126_p0 = scmp.ne.s32.totalorder %s100_s26, %s125_s29  ;;  %p130_p1 = scmp.lt.s32.totalorder %s100_s26, %s100_s26 }
   0x9   :  { %p131_p2 = scmp.lt.s32.totalorder %s129_s30, %s125_s29 }
   0xb   :  { %p132_p3 = por %p131_p2, %p130_p1 }
   0xd   :  { %p133_p4 = pnand %p132_p3, %p126_p0 }
  0x90   :  { %v20_v4 = vpop.xlane.xlu0 %19 }
  0x91   :  { %v25_v5 = vsub.f32 %v15_v0, %v20_v4 }
  0x93   :  { %v27_v6 = vmul.f32 1.442695, %v25_v5 }
  0x94   :  { %v24_v7 = vpop.xlane.xlu0 %23 }
  0x95   :  { %115 = vpow2.f32 %v27_v6  ;;  %v26_v8 = vsub.f32 %v16_v1, %v24_v7 }
  0x97   :  { %v29_v9 = vmul.f32 1.442695, %v26_v8 }
  0x99   :  { %117 = vpow2.f32 %v29_v9 }
  0x9f   :  { %v116_v10 = vpop.eup %115 }
  0xa0   :  { %v31_v11 = vsel %vm17_vm0, %v116_v10, 0.0 }
  0xa1   :  { %32 = vadd.xlane.f32.xlu1 %v31_v11 }
  0xa3   :  { %v118_v12 = vpop.eup %117 }
  0xa4   :  { %v34_v13 = vsel %vm21_vm1, %v118_v12, 0.0 }
  0xa5   :  { %35 = vadd.xlane.f32.xlu1 %v34_v13 }
 0x12e   :  { %v33_v14 = vpop.xlane.xlu1 %32 }
 0x12f   :  { %119 = vlog2.f32 %v33_v14 }
 0x132   :  { %v36_v15 = vpop.xlane.xlu1 %35 }
 0x133   :  { %121 = vlog2.f32 %v36_v15 }
 0x139   :  { %v120_v16 = vpop.eup %119 }
 0x13a   :  { %v38_v17 = vmul.f32 0.6931472, %v120_v16 }
 0x13c   :  { %v41_v18 = vadd.f32 %v38_v17, %v20_v4 }
 0x13d   :  { %v122_v19 = vpop.eup %121 }
 0x13e   :  { %v40_v21 = vmul.f32 0.6931472, %v122_v19  ;;  %v45_v22 = vsub.f32 %v41_v18, %v15_v0 }
 0x140   :  { %v42_v23 = vadd.f32 %v40_v21, %v24_v7  ;;  %v47_v24 = vmul.f32 %v45_v22, %v43_v20 }
 0x142   :  { %v49_v26 = vsel %vm17_vm0, %v47_v24, 0.0  ;;  %v46_v27 = vsub.f32 %v42_v23, %v16_v1 }
 0x143   :  { %50 = vadd.xlane.f32.xlu0 %v49_v26 }
 0x144   :  { %v48_v28 = vmul.f32 %v46_v27, %v44_v25 }
 0x146   :  { %v52_v29 = vsel %vm21_vm1, %v48_v28, 0.0 }
 0x147   :  { %53 = vadd.xlane.f32.xlu1 %v52_v29 }
 0x14b   :  { %76 = vadd.xlane.f32.xlu1 %v75_v34 }
 0x1d0   :  { %v51_v35 = vpop.xlane.xlu0 %50 }
 0x1d1   :  { %v57_v36 = vmul.f32 %v55_v30, %v51_v35 }
 0x1d3   :  { %v60_v39 = vsel %vm59_vm2, %v57_v36, 0.0 }
 0x1d4   :  { %v54_v37 = vpop.xlane.xlu1 %53 }
 0x1d5   :  { %v58_v38 = vmul.f32 %v56_v31, %v54_v37 }
 0x1d7   :  { %v62_v40 = vsel %vm61_vm3, %v58_v38, 0.0 }
 0x1d8   :  { %v63_v41 = vadd.f32 %v62_v40, %v60_v39  ;;  %v77_v42 = vpop.xlane.xlu1 %76 }
 0x1d9   :  { %v78_v43 = vrot.slane %v77_v42, 4 }
 0x1da   :  { %64 = vadd.xlane.f32.xlu0 %v63_v41 }
 0x1db   :  { %v79_v44 = vadd.f32 %v78_v43, %v77_v42 }
 0x1dd   :  { %v80_v45 = vrot.slane %v79_v44, 2 }
 0x1df   :  { %v81_v49 = vadd.f32 %v80_v45, %v79_v44 }
 0x1e1   :  { %v82_v52 = vrot.slane %v81_v49, 1 }
 0x1e3   :  { %v83_v55 = vadd.f32 %v82_v52, %v81_v49 }
 0x267   :  { %v65_v46 = vpop.xlane.xlu0 %64 }
 0x268   :  { %v66_v47 = vrot.slane %v65_v46, 4 }
 0x26a   :  { %v67_v48 = vadd.f32 %v66_v47, %v65_v46 }
 0x26c   :  { %v68_v50 = vrot.slane %v67_v48, 2 }
 0x26e   :  { %v69_v51 = vadd.f32 %v68_v50, %v67_v48 }
 0x270   :  { %v70_v53 = vrot.slane %v69_v51, 1 }
 0x272   :  { %v71_v54 = vadd.f32 %v70_v53, %v69_v51 }
 0x274   :  { %107 = vpush %v71_v54 }
 0x275   :  { %109 = vpush %v83_v55 }
 0x2a5   :  { %s108_s1 = spop %107 }
 0x2a6   :  { %s110_s2 = spop %109 }
 0x2a7   :  { %s85_s24 = smax.f32 %s149_s23, %s110_s2 }
 0x2a8   :  { %v86_v56 = vstv %s85_s24 }
 0x2a9   :  { %123 = vrcp.f32 %v86_v56 }
 0x2b3   :  { %v124_v57 = vpop.eup %123 }
 0x2b4   :  { %111 = vpush %v124_v57 }
 0x2e5   :  { %s112_s27 = spop %111 }
 0x2e6   :  { %s89_s28 = smul.f32 %s112_s27, %s108_s1 }
 0x2e8   :  { %v90_v58 = vstv %s89_s28 }
 0x2e9   :  { %92 = vst.msk [vmem:[#allocation2] sm:$0x1] %vm91_vm4, %v90_v58 }
 0x2ea   :  { %136 = shalt.err (!%p133_p4)
}
 0x2eb   :  { %s137_s6 = scalar_lea.hbm %s210_s3, 16 }
 0x2ec   :  { %p138_p5 = scmp.ne.s32.totalorder %s210_s3, %s137_s6  ;;  %p141_p6 = scmp.lt.u32.totalorder %s137_s6, %s210_s3 }
 0x2ee   :  { %p143_p7 = pnand %p141_p6, %p138_p5 }
 0x2f0   :  { %146 = shalt.err (!%p143_p7)
}
 0x2f1   :  { %102 = dma.vmem_to_hbm [thread:$0]  %s100_s26, 16, %s210_s3, [#allocation3]  }
 0x2f2   :  { %147 = dma.done.wait [#allocation3], 16  }
 0x2f3   :  { %148 = vsyncadd [#allocation3], 4294967280 }
 0x2f4   :  { %106 = vsyncpa [#allocation3], 1 }

// kernel: forward.16
= control target key start
LH: loop header
LB: loop body
LE: loop exit
PB: predicated region body
PF: predicated region fallthrough
CT: control target
= control target key end

     0   :  { %vm77_vm0 = vcmask 261120   ;;  %vm81_vm1 = vcmask 254976   ;;  %vm216_vm2 = vcmask 64512   ;;  %s3885_s29 = smov 120   ;;  %s3886_s30 = smov 80   ;;  %vm314_vm4 = vcmask 74752   ;;  %s4536_s0 = inlined_call_operand.vmem [shape: f32[2,10,32], index: 0, kind: input, shape index: {}]   ;;  %s4537_s4 = inlined_call_operand.vmem [shape: f32[32,96], index: 4, kind: input, shape index: {}]   ;;  %s4538_s2 = inlined_call_operand.vmem [shape: f32[1,32], index: 2, kind: input, shape index: {}]   ;;  %s4539_s3 = inlined_call_operand.vmem [shape: f32[1,32], index: 3, kind: input, shape index: {}]   ;;  %s4540_s5 = inlined_call_operand.vmem [shape: f32[1,96], index: 5, kind: input, shape index: {}]   ;;  %s4541_s1 = inlined_call_operand.vmem [shape: f32[2,1,10], index: 1, kind: input, shape index: {}]   ;;  %s4542_s6 = inlined_call_operand.vmem [shape: f32[32,32], index: 6, kind: input, shape index: {}]   ;;  %s4543_s7 = inlined_call_operand.vmem [shape: f32[1,32], index: 7, kind: input, shape index: {}]   ;;  %s4544_s10 = inlined_call_operand.vmem [shape: f32[32,64], index: 10, kind: input, shape index: {}]   ;;  %s4545_s12 = inlined_call_operand.vmem [shape: f32[64,32], index: 12, kind: input, shape index: {}]   ;;  %s4546_s8 = inlined_call_operand.vmem [shape: f32[1,32], index: 8, kind: input, shape index: {}]   ;;  %s4547_s9 = inlined_call_operand.vmem [shape: f32[1,32], index: 9, kind: input, shape index: {}]   ;;  %s4548_s11 = inlined_call_operand.vmem [shape: f32[1,64], index: 11, kind: input, shape index: {}]   ;;  %s4549_s13 = inlined_call_operand.vmem [shape: f32[1,32], index: 13, kind: input, shape index: {}]   ;;  %s4550_s14 = inlined_call_operand.vmem [shape: f32[2,10,32], index: 14, kind: output, shape index: {}]  }
   0x1   :  { %v3973_v0 = vld [vmem:[%s4536_s0] sm:$0xff]  ;;  %v3978_v1 = vld [vmem:[%s4536_s0 + $0x8] sm:$0x3]  ;;  %v49_v16 = vld [vmem:[%s4537_s4 + $0x10] sm:$0xff]  ;;  %s3887_s15 = smov 112   ;;  %vm310_vm5 = vcmask 80896  }
   0x2   :  { %v78_v2 = vsel %vm77_vm0, %v3973_v0, 0.0  ;;  %v82_v3 = vsel %vm81_vm1, %v3978_v1, 0.0  ;;  %v47_v14 = vld [vmem:[%s4537_s4] sm:$0xff]  ;;  %v48_v15 = vld [vmem:[%s4537_s4 + $0x8] sm:$0xff]  ;;  %v50_v18 = vld [vmem:[%s4537_s4 + $0x18] sm:$0xff]  ;;  %s3888_s18 = smov 64  }
   0x3   :  { %79 = vadd.xlane.f32.xlu0 %v78_v2  ;;  %v3997_v17 = vpack.c.bf16 %v48_v15, %v47_v14  ;;  %v4002_v19 = vpack.c.bf16 %v50_v18, %v49_v16  ;;  %v4011_v27 = vld [vmem:[%s4538_s2] ss:$0 sm:$0xff]  ;;  %vm4057_vm3 = vmpackc.low %vm216_vm2, %vm216_vm2  ;;  %s3889_s19 = smov 72   ;;  %s3890_s20 = smov 104   ;;  %vm345_vm6 = vcmask 1041408   ;;  %vm3892_vm7 = vmmov 1  }
   0x4   :  { %v4016_v29 = vld [vmem:[%s4539_s3] ss:$0 sm:$0xff]  ;;  %s3883_s3 = smov 88   ;;  %s3891_s21 = smov 56   ;;  %vm4111_vm8 = vmpackc.low %vm345_vm6, %vm3892_vm7  ;;  %vm1513_vm9 = vcmask 523264  }
   0x5   :  { %3540 = vmatprep.subr.bf16.mxu1 %v3997_v17  ;;  %v4027_v36 = vld [vmem:[%s4540_s5] ss:$0 sm:$0xff]  ;;  %s3884_s5 = smov 96   ;;  %s3893_s25 = smov 48  }
   0x6   :  { %3542 = vmatpush3.bf16.msra.mxu1 %v3997_v17  ;;  %v4082_v60 = vld [vmem:[%s4541_s1] ss:$0 sm:$0xff]  ;;  %s3894_s2 = smov 40  }
   0x7   :  { %83 = vadd.xlane.f32.xlu0 %v82_v3  ;;  %3544 = vmatprep.subr.bf16.mxu1 %v4002_v19 }
   0xa   :  { %3546 = vmatpush3.bf16.msra.mxu1 %v4002_v19 }
  0x90   :  { %v80_v4 = vpop.xlane.xlu0 %79 }
  0x91   :  { %v86_v5 = vmul.f32 0.03125, %v80_v4 }
  0x93   :  { %v88_v6 = vsub.f32 %v3973_v0, %v86_v5 }
  0x94   :  { %v84_v7 = vpop.xlane.xlu0 %83 }
  0x95   :  { %v87_v8 = vmul.f32 0.03125, %v84_v7  ;;  %v90_v9 = vmul.f32 %v88_v6, %v88_v6 }
  0x97   :  { %v89_v10 = vsub.f32 %v3978_v1, %v87_v8  ;;  %v92_v11 = vsel %vm77_vm0, %v90_v9, 0.0 }
  0x98   :  { %93 = vadd.xlane.f32.xlu1 %v92_v11 }
  0x99   :  { %v91_v12 = vmul.f32 %v89_v10, %v89_v10 }
  0x9b   :  { %v95_v13 = vsel %vm81_vm1, %v91_v12, 0.0 }
  0x9c   :  { %96 = vadd.xlane.f32.xlu1 %v95_v13 }
 0x125   :  { %v94_v20 = vpop.xlane.xlu1 %93 }
 0x126   :  { %v98_v21 = vmul.f32 0.03125, %v94_v20 }
 0x128   :  { %v100_v22 = vadd.f32 1e-05, %v98_v21 }
 0x129   :  { %v97_v23 = vpop.xlane.xlu1 %96 }
 0x12a   :  { %3803 = vrsqrt.f32 %v100_v22  ;;  %v99_v24 = vmul.f32 0.03125, %v97_v23 }
 0x12c   :  { %v101_v25 = vadd.f32 1e-05, %v99_v24 }
 0x12e   :  { %3805 = vrsqrt.f32 %v101_v25 }
 0x134   :  { %v3804_v26 = vpop.eup %3803 }
 0x135   :  { %v104_v28 = vmul.f32 %v3804_v26, %v88_v6 }
 0x137   :  { %v112_v30 = vmul.f32 %v4011_v27, %v104_v28 }
 0x138   :  { %v3806_v31 = vpop.eup %3805 }
 0x139   :  { %v120_v32 = vadd.f32 %v4016_v29, %v112_v30  ;;  %v105_v33 = vmul.f32 %v3806_v31, %v89_v10 }
 0x13b   :  { %3313 = vmatprep.mubr.msk.f32.mxu1 %vm77_vm0, %v120_v32  ;;  %v113_v34 = vmul.f32 %v4011_v27, %v105_v33 }
 0x13d   :  { %v121_v35 = vadd.f32 %v4016_v29, %v113_v34 }
 0x13f   :  { %3314 = vmatmul.mubr.msk.f32.vlgmr.msra.gmra.mrb[0].mxu1 %vm77_vm0, %v121_v35 }
 0x212   :  { %v3315_v37 = vpop.f32.mrb[0].mxu1 }
 0x213   :  { %v4030_v38 = vadd.f32 %v3315_v37, %v4027_v36  ;;  %v200_v39 = vpop.f32.mrb[1].mxu1 }
 0x214   :  { %v4033_v40 = vadd.f32 %v4027_v36, %v200_v39 }
 0x216   :  { %3320 = vmatprep.mubr.msk.f32.mxu1 %vm216_vm2, %v4033_v40  ;;  %v4039_v41 = vpack.i.bf16 %v4030_v38, %v4033_v40 }
 0x218   :  { %3729 = vrot.lane.b32.xlu1 %v4039_v41, %s3883_s3  ;;  %3724 = vrot.lane.b32.xlu0 %v4039_v41, %s3884_s5 }
 0x21c   :  { %423 = vrot.lane.b32.xlu1 %v4033_v40, %s3885_s29  ;;  %3734 = vrot.lane.b32.xlu0 %v4039_v41, %s3886_s30 }
 0x220   :  { %425 = vrot.lane.b32.xlu1 %v4030_v38, %s3885_s29  ;;  %792 = vrot.lane.b32.xlu0 %v4030_v38, %s3887_s15 }
 0x224   :  { %790 = vrot.lane.b32.xlu1 %v4033_v40, %s3887_s15 }
 0x28a   :  { %v3730_v42 = vpop.permute.xlu1 %3729  ;;  %v3725_v43 = vpop.permute.xlu0 %3724 }
 0x28b   :  { %v3732_v44 = vunpack.i.h.bf16 %v3730_v42  ;;  %v3731_v45 = vunpack.i.l.bf16 %v3730_v42  ;;  %v3727_v46 = vunpack.i.h.bf16 %v3725_v43  ;;  %v3726_v47 = vunpack.i.l.bf16 %v3725_v43 }
 0x28d   :  { %v3547_v49 = vpack.c.bf16 %v3727_v46, %v3726_v47  ;;  %v3559_v50 = vpack.c.bf16 %v3732_v44, %v3731_v45 }
 0x28e   :  { %v3735_v51 = vpop.permute.xlu0 %3734  ;;  %v424_v52 = vpop.permute.xlu1 %423 }
 0x28f   :  { %3549 = vmatprep.subr.msk.bf16.mxu1 %vm4057_vm3, %v3547_v49  ;;  %v3737_v53 = vunpack.i.h.bf16 %v3735_v51  ;;  %v3736_v54 = vunpack.i.l.bf16 %v3735_v51 }
 0x290   :  { %3552 = vmatpush3.bf16.xpose.msk.msra.mxu1 %vm4057_vm3, %v3547_v49 }
 0x291   :  { %3561 = vmatprep.subr.msk.bf16.mxu1 %vm4057_vm3, %v3559_v50  ;;  %v3571_v55 = vpack.c.bf16 %v3737_v53, %v3736_v54 }
 0x292   :  { %v426_v56 = vpop.permute.xlu1 %425  ;;  %v793_v58 = vpop.permute.xlu0 %792 }
 0x296   :  { %v791_v57 = vpop.permute.xlu1 %790 }
 0x297   :  { %3321 = vmatmul.mubr.msk.f32.vlgmr.msra.gmra.mrb[2].mxu1 %vm216_vm2, %v4030_v38 }
 0x298   :  { %3564 = vmatpush3.bf16.xpose.msk.msra.mxu1 %vm4057_vm3, %v3559_v50  ;;  %3334 = vmatprep.mubr.msk.f32.mxu1 %vm216_vm2, %v424_v52 }
 0x299   :  { %3573 = vmatprep.subr.msk.bf16.mxu1 %vm4057_vm3, %v3571_v55 }
 0x29f   :  { %3335 = vmatmul.mubr.msk.f32.vlgmr.msra.gmra.mrb[4].mxu1 %vm216_vm2, %v426_v56 }
 0x2a0   :  { %3576 = vmatpush3.bf16.xpose.msk.msra.mxu1 %vm4057_vm3, %v3571_v55  ;;  %3358 = vmatprep.mubr.msk.f32.mxu1 %vm216_vm2, %v791_v57 }
 0x2a7   :  { %3359 = vmatmul.mubr.msk.f32.vlgmr.msra.gmra.mrb[6].mxu1 %vm216_vm2, %v793_v58 }
 0x36a   :  { %v3322_v59 = vpop.f32.mrb[2].mxu1 }
 0x36b   :  { %v301_v61 = vmul.f32 0.35355338, %v3322_v59  ;;  %v291_v62 = vpop.f32.mrb[3].mxu1 }
 0x36c   :  { %v300_v63 = vmul.f32 0.35355338, %v291_v62 }
 0x36d   :  { %v309_v2 = vadd.f32 %v4082_v60, %v301_v61 }
 0x36e   :  { %v308_v3 = vadd.f32 %v4082_v60, %v300_v63 }
 0x36f   :  { %v315_v4 = vsel %vm314_vm4, %v309_v2, -inf }
 0x370   :  { %316 = vmax.xlane.f32.xlu0 %v315_v4  ;;  %v311_v5 = vsel %vm310_vm5, %v308_v3, -inf }
 0x371   :  { %312 = vmax.xlane.f32.xlu1 %v311_v5 }
 0x372   :  { %v3336_v6 = vpop.f32.mrb[4].mxu1 }
 0x373   :  { %v505_v7 = vpop.f32.mrb[5].mxu1  ;;  %v515_v8 = vmul.f32 0.35355338, %v3336_v6 }
 0x374   :  { %v514_v9 = vmul.f32 0.35355338, %v505_v7 }
 0x375   :  { %v517_v12 = vadd.f32 %v4082_v60, %v515_v8 }
 0x376   :  { %v516_v10 = vadd.f32 %v4082_v60, %v514_v9 }
 0x377   :  { %v521_v15 = vsel %vm314_vm4, %v517_v12, -inf }
 0x378   :  { %v518_v11 = vsel %vm310_vm5, %v516_v10, -inf }
 0x379   :  { %519 = vmax.xlane.f32.xlu0 %v518_v11 }
 0x37a   :  { %v3360_v13 = vpop.f32.mrb[6].mxu1 }
 0x37b   :  { %v872_v14 = vpop.f32.mrb[7].mxu1  ;;  %v882_v46 = vmul.f32 0.35355338, %v3360_v13 }
 0x37c   :  { %v881_v44 = vmul.f32 0.35355338, %v872_v14 }
 0x37d   :  { %522 = vmax.xlane.f32.xlu0 %v521_v15  ;;  %v884_v49 = vadd.f32 %v4082_v60, %v882_v46 }
 0x37e   :  { %v883_v45 = vadd.f32 %v4082_v60, %v881_v44 }
 0x37f   :  { %v888_v50 = vsel %vm314_vm4, %v884_v49, -inf }
 0x380   :  { %v885_v47 = vsel %vm310_vm5, %v883_v45, -inf }
 0x3fd   :  { %v317_v16 = vpop.xlane.xlu0 %316 }
 0x3fe   :  { %v319_v18 = vsub.f32 %v309_v2, %v317_v16  ;;  %v313_v20 = vpop.xlane.xlu1 %312 }
 0x3ff   :  { %v318_v21 = vsub.f32 %v308_v3, %v313_v20 }
 0x400   :  { %v322_v22 = vmul.f32 1.442695, %v319_v18 }
 0x401   :  { %v320_v23 = vmul.f32 1.442695, %v318_v21 }
 0x402   :  { %3807 = vpow2.f32 %v322_v22 }
 0x403   :  { %3809 = vpow2.f32 %v320_v23 }
 0x406   :  { %v520_v24 = vpop.xlane.xlu0 %519 }
 0x407   :  { %v524_v25 = vsub.f32 %v516_v10, %v520_v24 }
 0x409   :  { %v526_v26 = vmul.f32 1.442695, %v524_v25 }
 0x40a   :  { %v523_v28 = vpop.xlane.xlu0 %522 }
 0x40b   :  { %3811 = vpow2.f32 %v526_v26  ;;  %v525_v30 = vsub.f32 %v517_v12, %v523_v28  ;;  %v4137_v28 = vld [vmem:[%s4542_s6 + $0x8] sm:$0xff] }
 0x40c   :  { %v3808_v31 = vpop.eup %3807 }
 0x40d   :  { %v3810_v32 = vpop.eup %3809  ;;  %v528_v33 = vmul.f32 1.442695, %v525_v30  ;;  %v327_v34 = vsel %vm314_vm4, %v3808_v31, 0.0  ;;  %v4144_v30 = vld [vmem:[%s4542_s6] sm:$0xff] }
 0x40e   :  { %328 = vadd.xlane.f32.xlu0 %v327_v34  ;;  %v324_v35 = vsel %vm310_vm5, %v3810_v32, 0.0 }
 0x40f   :  { %3813 = vpow2.f32 %v528_v33  ;;  %325 = vadd.xlane.f32.xlu1 %v324_v35 }
 0x415   :  { %v3812_v37 = vpop.eup %3811 }
 0x416   :  { %v530_v39 = vsel %vm310_vm5, %v3812_v37, 0.0 }
 0x417   :  { %531 = vadd.xlane.f32.xlu1 %v530_v39 }
 0x419   :  { %v3814_v42 = vpop.eup %3813 }
 0x41a   :  { %v533_v43 = vsel %vm314_vm4, %v3814_v42, 0.0 }
 0x41b   :  { %534 = vadd.xlane.f32.xlu0 %v533_v43 }
 0x428   :  { %3739 = vrot.lane.b32.xlu1 %v4039_v41, %s3888_s18 }
 0x42c   :  { %3749 = vrot.lane.b32.xlu1 %v4039_v41, %s3889_s19 }
 0x430   :  { %1078 = vrot.lane.b32.xlu1 %v4033_v40, %s3890_s20 }
 0x431   :  { %3744 = vrot.lane.b32.xlu0 %v4039_v41, %s3891_s21 }
 0x434   :  { %1080 = vrot.lane.b32.xlu1 %v4030_v38, %s3890_s20 }
 0x450   :  { %886 = vmax.xlane.f32.xlu0 %v885_v47 }
 0x458   :  { %889 = vmax.xlane.f32.xlu1 %v888_v50 }
 0x49b   :  { %v329_v51 = vpop.xlane.xlu0 %328 }
 0x49c   :  { %v326_v40 = vpop.xlane.xlu1 %325 }
 0x49d   :  { %3815 = vrcp.f32 %v326_v40 }
 0x49e   :  { %3817 = vrcp.f32 %v329_v51 }
 0x4a4   :  { %v532_v52 = vpop.xlane.xlu1 %531 }
 0x4a5   :  { %3819 = vrcp.f32 %v532_v52 }
 0x4a7   :  { %v3816_v53 = vpop.eup %3815 }
 0x4a8   :  { %v535_v38 = vpop.xlane.xlu0 %534  ;;  %v3740_v54 = vpop.permute.xlu1 %3739  ;;  %v331_v55 = vmul.f32 %v3816_v53, %v3810_v32 }
 0x4a9   :  { %3821 = vrcp.f32 %v535_v38  ;;  %v3742_v56 = vunpack.i.h.bf16 %v3740_v54  ;;  %v3741_v57 = vunpack.i.l.bf16 %v3740_v54  ;;  %v3818_v61 = vpop.eup %3817 }
 0x4aa   :  { %3327 = vmatprep.mubr.msk.f32.mxu0 %vm310_vm5, %v331_v55  ;;  %v333_v9 = vmul.f32 %v3818_v61, %v3808_v31 }
 0x4ab   :  { %v3553_v59 = vpack.c.bf16 %v3742_v56, %v3741_v57  ;;  %v4167_v56 = vld [vmem:[%s4542_s6 + $0x10] sm:$0xff] }
 0x4ac   :  { %v3745_v62 = vpop.permute.xlu0 %3744  ;;  %v3750_v63 = vpop.permute.xlu1 %3749 }
 0x4ad   :  { %v3747_v2 = vunpack.i.h.bf16 %v3745_v62  ;;  %v3746_v3 = vunpack.i.l.bf16 %v3745_v62  ;;  %v3752_v4 = vunpack.i.h.bf16 %v3750_v63  ;;  %v3751_v5 = vunpack.i.l.bf16 %v3750_v63  ;;  %3555 = vmatprep.subr.msk.bf16.mxu0 %vm4111_vm8, %v3553_v59 }
 0x4ae   :  { %3558 = vmatpush3.bf16.msk.msra.mxu0 %vm4111_vm8, %v3553_v59 }
 0x4af   :  { %v3820_v6 = vpop.eup %3819  ;;  %v3565_v7 = vpack.c.bf16 %v3747_v2, %v3746_v3  ;;  %v3583_v8 = vpack.c.bf16 %v3752_v4, %v3751_v5 }
 0x4b0   :  { %v1079_v10 = vpop.permute.xlu1 %1078  ;;  %v537_v11 = vmul.f32 %v3820_v6, %v3812_v37 }
 0x4b1   :  { %3328 = vmatmul.mubr.msk.f32.vlgmr.msra.gmra.mrb[0].mxu0 %vm310_vm5, %v333_v9  ;;  %3567 = vmatprep.subr.msk.bf16.mxu0 %vm4111_vm8, %v3565_v7 }
 0x4b2   :  { %3585 = vmatprep.subr.msk.bf16.mxu1 %vm4057_vm3, %v3583_v8  ;;  %3377 = vmatprep.mubr.msk.f32.mxu1 %vm216_vm2, %v1079_v10 }
 0x4b3   :  { %v3822_v12 = vpop.eup %3821  ;;  %3570 = vmatpush3.bf16.msk.msra.mxu0 %vm4111_vm8, %v3565_v7  ;;  %3341 = vmatprep.mubr.msk.f32.mxu0 %vm310_vm5, %v537_v11 }
 0x4b4   :  { %v539_v13 = vmul.f32 %v3822_v12, %v3814_v42  ;;  %3588 = vmatpush3.bf16.xpose.msk.msra.mxu1 %vm4057_vm3, %v3583_v8  ;;  %v1081_v14 = vpop.permute.xlu1 %1080  ;;  %3344 = vmatprep.subr.mxu0 %v4137_v28 }
 0x4b6   :  { %3342 = vmatmul.mubr.msk.f32.vlgmr.msra.gmra.mrb[2].mxu0 %vm310_vm5, %v539_v13 }
 0x4b7   :  { %3345 = vmatpush3.msra.mxu0 %v4137_v28 }
 0x4b8   :  { %3349 = vmatprep.subr.mxu0 %v4144_v30 }
 0x4bb   :  { %3378 = vmatmul.mubr.msk.f32.vlgmr.msra.gmra.mrb[8].mxu1 %vm216_vm2, %v1081_v14  ;;  %v4180_v14 = vld [vmem:[%s4542_s6 + $0x18] sm:$0xff] }
 0x4dd   :  { %v887_v15 = vpop.xlane.xlu0 %886 }
 0x4de   :  { %v891_v16 = vsub.f32 %v883_v45, %v887_v15 }
 0x4e0   :  { %v893_v21 = vmul.f32 1.442695, %v891_v16 }
 0x4e5   :  { %v890_v18 = vpop.xlane.xlu1 %889 }
 0x4e6   :  { %v892_v20 = vsub.f32 %v884_v49, %v890_v18 }
 0x4e8   :  { %v895_v22 = vmul.f32 1.442695, %v892_v20 }
 0x4ea   :  { %3823 = vpow2.f32 %v895_v22  ;;  %v4195_v22 = vld [vmem:[%s4543_s7] ss:$0 sm:$0xff] }
 0x4eb   :  { %3825 = vpow2.f32 %v893_v21 }
 0x4f4   :  { %v3824_v23 = vpop.eup %3823 }
 0x4f5   :  { %v900_v24 = vsel %vm314_vm4, %v3824_v23, 0.0  ;;  %v3826_v25 = vpop.eup %3825 }
 0x4f6   :  { %901 = vadd.xlane.f32.xlu0 %v900_v24  ;;  %v897_v26 = vsel %vm310_vm5, %v3826_v25, 0.0 }
 0x4fa   :  { %898 = vadd.xlane.f32.xlu0 %v897_v26 }
 0x510   :  { %3754 = vrot.lane.b32.xlu0 %v4039_v41, %s3893_s25 }
 0x583   :  { %v902_v31 = vpop.xlane.xlu0 %901 }
 0x584   :  { %v3329_v32 = vpop.f32.mrb[0].mxu0 }
 0x585   :  { %v414_v33 = vpop.f32.mrb[1].mxu0 }
 0x587   :  { %v899_v34 = vpop.xlane.xlu0 %898 }
 0x588   :  { %3827 = vrcp.f32 %v899_v34  ;;  %v4210_v34 = vld [vmem:[%s4536_s0 + $0x10] sm:$0xff] }
 0x589   :  { %3829 = vrcp.f32 %v902_v31  ;;  %v3343_v35 = vpop.f32.mrb[2].mxu0 }
 0x58a   :  { %v619_v37 = vpop.f32.mrb[3].mxu0 }
 0x58b   :  { %v3755_v39 = vpop.permute.xlu0 %3754  ;;  %3346 = vmatprep.mubr.msk.f32.mxu0 %vm216_vm2, %v619_v37 }
 0x58c   :  { %v3757_v42 = vunpack.i.h.bf16 %v3755_v39  ;;  %v3756_v43 = vunpack.i.l.bf16 %v3755_v39  ;;  %3347 = vmatmul.mubr.msk.f32.vlgmr.msra.gmra.mrb[4].mxu0 %vm216_vm2, %v3343_v35  ;;  %v4219_v35 = vld [vmem:[%s4536_s0 + $0x18] sm:$0x3] }
 0x58d   :  { %3351 = vmatprep.mubr.msk.f32.mxu0 %vm216_vm2, %v414_v33  ;;  %3350 = vmatpush3.msra.mxu0 %v4144_v30  ;;  %v1605_v37 = vsel %vm81_vm1, %v4219_v35, 0.0 }
 0x58e   :  { %v3577_v44 = vpack.c.bf16 %v3757_v42, %v3756_v43  ;;  %v3379_v45 = vpop.f32.mrb[8].mxu1 }
 0x58f   :  { %v1160_v46 = vpop.f32.mrb[9].mxu1  ;;  %v1170_v47 = vmul.f32 0.35355338, %v3379_v45 }
 0x590   :  { %v1169_v49 = vmul.f32 0.35355338, %v1160_v46  ;;  %3579 = vmatprep.subr.msk.bf16.mxu0 %vm4111_vm8, %v3577_v44 }
 0x591   :  { %v1172_v38 = vadd.f32 %v4082_v60, %v1170_v47 }
 0x592   :  { %v3828_v50 = vpop.eup %3827  ;;  %v1171_v40 = vadd.f32 %v4082_v60, %v1169_v49 }
 0x593   :  { %v3830_v51 = vpop.eup %3829  ;;  %v904_v52 = vmul.f32 %v3828_v50, %v3826_v25  ;;  %v1176_v55 = vsel %vm314_vm4, %v1172_v38, -inf }
 0x594   :  { %v1173_v53 = vsel %vm310_vm5, %v1171_v40, -inf  ;;  %3352 = vmatmul.mubr.msk.f32.vlgmr.msra.gmra.mrb[4].mxu0 %vm216_vm2, %v3329_v32  ;;  %v906_v54 = vmul.f32 %v3830_v51, %v3824_v23 }
 0x595   :  { %1174 = vmax.xlane.f32.xlu1 %v1173_v53  ;;  %3582 = vmatpush3.bf16.msk.msra.mxu0 %vm4111_vm8, %v3577_v44 }
 0x596   :  { %3365 = vmatprep.mubr.msk.f32.mxu0 %vm310_vm5, %v904_v52  ;;  %3368 = vmatprep.subr.mxu0 %v4167_v56 }
 0x598   :  { %3366 = vmatmul.mubr.msk.f32.vlgmr.msra.gmra.mrb[6].mxu0 %vm310_vm5, %v906_v54 }
 0x599   :  { %1177 = vmax.xlane.f32.xlu1 %v1176_v55  ;;  %3369 = vmatpush3.msra.mxu0 %v4167_v56 }
 0x622   :  { %v1175_v60 = vpop.xlane.xlu1 %1174 }
 0x623   :  { %v1179_v57 = vsub.f32 %v1171_v40, %v1175_v60 }
 0x625   :  { %v1181_v62 = vmul.f32 1.442695, %v1179_v57 }
 0x626   :  { %v1178_v59 = vpop.xlane.xlu1 %1177 }
 0x627   :  { %v1180_v61 = vsub.f32 %v1172_v38, %v1178_v59 }
 0x629   :  { %v1183_v63 = vmul.f32 1.442695, %v1180_v61 }
 0x62b   :  { %3831 = vpow2.f32 %v1183_v63  ;;  %v58_v63 = vld [vmem:[%s4544_s10 + $0x8] sm:$0xff] }
 0x62c   :  { %3833 = vpow2.f32 %v1181_v62  ;;  %v57_v62 = vld [vmem:[%s4544_s10] sm:$0xff] }
 0x635   :  { %v3832_v2 = vpop.eup %3831 }
 0x636   :  { %v1188_v3 = vsel %vm314_vm4, %v3832_v2, 0.0  ;;  %v3834_v4 = vpop.eup %3833 }
 0x637   :  { %1189 = vadd.xlane.f32.xlu1 %v1188_v3  ;;  %v1185_v5 = vsel %vm310_vm5, %v3834_v4, 0.0  ;;  %v59_v3 = vld [vmem:[%s4544_s10 + $0x10] sm:$0xff] }
 0x63b   :  { %1186 = vadd.xlane.f32.xlu1 %v1185_v5 }
 0x64c   :  { %3759 = vrot.lane.b32.xlu1 %v4039_v41, %s3894_s2 }
 0x66b   :  { %v3367_v6 = vpop.f32.mrb[6].mxu0 }
 0x66c   :  { %v986_v7 = vpop.f32.mrb[7].mxu0 }
 0x66d   :  { %3370 = vmatprep.mubr.msk.f32.mxu0 %vm216_vm2, %v986_v7  ;;  %v63_v7 = vld [vmem:[%s4545_s12 + $0x8] sm:$0xff] }
 0x66e   :  { %3371 = vmatmul.mubr.msk.f32.vlgmr.msra.gmra.mrb[4].mxu0 %vm216_vm2, %v3367_v6  ;;  %v62_v6 = vld [vmem:[%s4545_s12] sm:$0xff] }
 0x6c4   :  { %v1190_v8 = vpop.xlane.xlu1 %1189 }
 0x6c5   :  { %3835 = vrcp.f32 %v1190_v8  ;;  %v64_v8 = vld [vmem:[%s4545_s12 + $0x10] sm:$0xff] }
 0x6c8   :  { %v1187_v9 = vpop.xlane.xlu1 %1186 }
 0x6c9   :  { %3837 = vrcp.f32 %v1187_v9  ;;  %v4277_v9 = vpack.c.bf16 %v63_v7, %v62_v6 }
 0x6cc   :  { %v3760_v10 = vpop.permute.xlu1 %3759 }
 0x6cd   :  { %v3762_v11 = vunpack.i.h.bf16 %v3760_v10  ;;  %v3761_v12 = vunpack.i.l.bf16 %v3760_v10  ;;  %v65_v10 = vld [vmem:[%s4545_s12 + $0x18] sm:$0xff] }
 0x6cf   :  { %v3589_v13 = vpack.c.bf16 %v3762_v11, %v3761_v12  ;;  %v3836_v41 = vpop.eup %3835  ;;  %v4282_v11 = vpack.c.bf16 %v65_v10, %v64_v8  ;;  %v66_v12 = vld [vmem:[%s4545_s12 + $0x20] sm:$0xff] }
 0x6d0   :  { %v1194_v18 = vmul.f32 %v3836_v41, %v3832_v2  ;;  %v4253_v2 = vpack.c.bf16 %v58_v63, %v57_v62 }
 0x6d1   :  { %3591 = vmatprep.subr.msk.bf16.mxu0 %vm4111_vm8, %v3589_v13 }
 0x6d2   :  { %3594 = vmatpush3.bf16.msk.msra.mxu0 %vm4111_vm8, %v3589_v13  ;;  %3596 = vmatprep.subr.bf16.mxu1 %v4253_v2  ;;  %v67_v13 = vld [vmem:[%s4545_s12 + $0x28] sm:$0xff] }
 0x6d3   :  { %v3838_v15 = vpop.eup %3837  ;;  %3387 = vmatprep.subr.mxu0 %v4180_v14  ;;  %3598 = vmatpush3.bf16.msra.mxu1 %v4253_v2  ;;  %v4293_v41 = vpack.c.bf16 %v67_v13, %v66_v12 }
 0x6d4   :  { %v1192_v16 = vmul.f32 %v3838_v15, %v3834_v4  ;;  %v60_v4 = vld [vmem:[%s4544_s10 + $0x18] sm:$0xff] }
 0x6d5   :  { %v4263_v5 = vpack.c.bf16 %v60_v4, %v59_v3 }
 0x6d6   :  { %3384 = vmatprep.mubr.msk.f32.mxu0 %vm310_vm5, %v1192_v16 }
 0x6d7   :  { %3385 = vmatmul.mubr.msk.f32.vlgmr.msra.gmra.mrb[8].mxu0 %vm310_vm5, %v1194_v18  ;;  %3600 = vmatprep.subr.bf16.mxu1 %v4263_v5 }
 0x6d8   :  { %3388 = vmatpush3.msra.mxu0 %v4180_v14  ;;  %3602 = vmatpush3.bf16.msra.mxu1 %v4263_v5 }
 0x6d9   :  { %3620 = vmatprep.subr.bf16.mxu1 %v3997_v17  ;;  %3604 = vmatprep.subr.bf16.mxu0 %v4277_v9 }
 0x7aa   :  { %v3386_v20 = vpop.f32.mrb[8].mxu0 }
 0x7ab   :  { %v1274_v21 = vpop.f32.mrb[9].mxu0 }
 0x7ac   :  { %3389 = vmatprep.mubr.msk.f32.mxu0 %vm216_vm2, %v1274_v21 }
 0x7ad   :  { %3390 = vmatmul.mubr.msk.f32.vlgmr.msra.gmra.mrb[4].mxu0 %vm216_vm2, %v3386_v20 }
 0x7ae   :  { %3606 = vmatpush3.bf16.msra.mxu0 %v4277_v9 }
 0x7af   :  { %3608 = vmatprep.subr.bf16.mxu0 %v4282_v11 }
 0x7b2   :  { %3610 = vmatpush3.bf16.msra.mxu0 %v4282_v11 }
 0x7b3   :  { %3612 = vmatprep.subr.bf16.mxu0 %v4293_v41 }
 0x7b6   :  { %3614 = vmatpush3.bf16.msra.mxu0 %v4293_v41 }
 0x880   :  { %v3391_v23 = vpop.f32.mrb[4].mxu0 }
 0x881   :  { %v1367_v24 = vadd.f32 %v3391_v23, %v3978_v1  ;;  %v1355_v25 = vpop.f32.mrb[5].mxu0 }
 0x882   :  { %v1366_v26 = vadd.f32 %v1355_v25, %v3973_v0  ;;  %v1602_v0 = vsel %vm77_vm0, %v4210_v34, 0.0 }
 0x883   :  { %v4200_v31 = vadd.f32 %v4195_v22, %v1367_v24 }
 0x884   :  { %v4203_v32 = vadd.f32 %v4195_v22, %v1366_v26 }
 0x885   :  { %v1379_v33 = vsel %vm81_vm1, %v4200_v31, 0.0 }
 0x886   :  { %1380 = vadd.xlane.f32.xlu1 %v1379_v33  ;;  %v1376_v1 = vsel %vm77_vm0, %v4203_v32, 0.0 }
 0x887   :  { %1377 = vadd.xlane.f32.xlu0 %v1376_v1 }
 0x88b   :  { %1603 = vadd.xlane.f32.xlu0 %v1602_v0 }
 0x88f   :  { %1606 = vadd.xlane.f32.xlu0 %v1605_v37 }
 0x913   :  { %v1381_v39 = vpop.xlane.xlu1 %1380 }
 0x914   :  { %v1383_v42 = vmul.f32 0.03125, %v1381_v39  ;;  %v1378_v43 = vpop.xlane.xlu0 %1377  ;;  %v4301_v39 = vld [vmem:[%s4546_s8] ss:$0 sm:$0xff] }
 0x915   :  { %v1382_v44 = vmul.f32 0.03125, %v1378_v43  ;;  %v4307_v43 = vld [vmem:[%s4547_s9] ss:$0 sm:$0xff] }
 0x916   :  { %v4224_v45 = vsub.f32 %v4200_v31, %v1383_v42 }
 0x917   :  { %v4227_v46 = vsub.f32 %v4203_v32, %v1382_v44 }
 0x918   :  { %v1604_v47 = vpop.xlane.xlu0 %1603  ;;  %v1387_v52 = vmul.f32 %v4224_v45, %v4224_v45 }
 0x919   :  { %v1608_v49 = vmul.f32 0.03125, %v1604_v47  ;;  %v1386_v50 = vmul.f32 %v4227_v46, %v4227_v46 }
 0x91a   :  { %v1391_v60 = vsel %vm81_vm1, %v1387_v52, 0.0 }
 0x91b   :  { %v4232_v40 = vsub.f32 %v4210_v34, %v1608_v49  ;;  %v1388_v51 = vsel %vm77_vm0, %v1386_v50, 0.0 }
 0x91c   :  { %1389 = vadd.xlane.f32.xlu0 %v1388_v51  ;;  %v1607_v53 = vpop.xlane.xlu0 %1606 }
 0x91d   :  { %v1609_v38 = vmul.f32 0.03125, %v1607_v53  ;;  %v1612_v54 = vmul.f32 %v4232_v40, %v4232_v40 }
 0x91f   :  { %v4240_v55 = vsub.f32 %v4219_v35, %v1609_v38  ;;  %v1614_v57 = vsel %vm77_vm0, %v1612_v54, 0.0 }
 0x920   :  { %1392 = vadd.xlane.f32.xlu0 %v1391_v60 }
 0x921   :  { %v1613_v59 = vmul.f32 %v4240_v55, %v4240_v55 }
 0x923   :  { %v1617_v61 = vsel %vm81_vm1, %v1613_v59, 0.0 }
 0x924   :  { %1615 = vadd.xlane.f32.xlu0 %v1614_v57  ;;  %1618 = vadd.xlane.f32.xlu1 %v1617_v61 }
 0x9a9   :  { %v1390_v15 = vpop.xlane.xlu0 %1389 }
 0x9aa   :  { %v1394_v16 = vmul.f32 0.03125, %v1390_v15 }
 0x9ac   :  { %v1396_v18 = vadd.f32 1e-05, %v1394_v16 }
 0x9ad   :  { %v1393_v20 = vpop.xlane.xlu0 %1392 }
 0x9ae   :  { %3839 = vrsqrt.f32 %v1396_v18  ;;  %v1395_v21 = vmul.f32 0.03125, %v1393_v20 }
 0x9b0   :  { %v1397_v23 = vadd.f32 1e-05, %v1395_v21 }
 0x9b1   :  { %v1619_v24 = vpop.xlane.xlu1 %1618  ;;  %v1616_v25 = vpop.xlane.xlu0 %1615 }
 0x9b2   :  { %3841 = vrsqrt.f32 %v1397_v23  ;;  %v1621_v26 = vmul.f32 0.03125, %v1619_v24  ;;  %v1620_v33 = vmul.f32 0.03125, %v1616_v25 }
 0x9b4   :  { %v1623_v1 = vadd.f32 1e-05, %v1621_v26  ;;  %v1622_v0 = vadd.f32 1e-05, %v1620_v33 }
 0x9b6   :  { %3843 = vrsqrt.f32 %v1623_v1 }
 0x9b7   :  { %3845 = vrsqrt.f32 %v1622_v0 }
 0x9b8   :  { %v3840_v37 = vpop.eup %3839 }
 0x9b9   :  { %v1400_v42 = vmul.f32 %v3840_v37, %v4227_v46 }
 0x9bb   :  { %v1408_v44 = vmul.f32 %v4301_v39, %v1400_v42  ;;  %v4393_v42 = vld [vmem:[%s4549_s13] ss:$0 sm:$0xff] }
 0x9bc   :  { %v3842_v47 = vpop.eup %3841 }
 0x9bd   :  { %v1401_v49 = vmul.f32 %v3842_v47, %v4224_v45  ;;  %v1416_v50 = vadd.f32 %v4307_v43, %v1408_v44 }
 0x9bf   :  { %3400 = vmatprep.mubr.msk.f32.mxu1 %vm77_vm0, %v1416_v50  ;;  %v1409_v51 = vmul.f32 %v4301_v39, %v1401_v49 }
 0x9c0   :  { %v3844_v52 = vpop.eup %3843 }
 0x9c1   :  { %v3846_v53 = vpop.eup %3845  ;;  %v1627_v46 = vmul.f32 %v3844_v52, %v4240_v55  ;;  %v1417_v38 = vadd.f32 %v4307_v43, %v1409_v51 }
 0x9c2   :  { %v1626_v54 = vmul.f32 %v3846_v53, %v4232_v40  ;;  %v69_v40 = vld [vmem:[%s4545_s12 + $0x38] sm:$0xff] }
 0x9c3   :  { %3401 = vmatmul.mubr.msk.f32.vlgmr.msra.gmra.mrb[10].mxu1 %vm77_vm0, %v1417_v38  ;;  %v1629_v60 = vmul.f32 %v4011_v27, %v1627_v46  ;;  %v4410_v46 = vld [vmem:[%s4541_s1 + $0x1] ss:$0 sm:$0xff] }
 0x9c4   :  { %3622 = vmatpush3.bf16.msra.mxu1 %v3997_v17  ;;  %v1628_v45 = vmul.f32 %v4011_v27, %v1626_v54  ;;  %v68_v17 = vld [vmem:[%s4545_s12 + $0x30] sm:$0xff] }
 0x9c5   :  { %3624 = vmatprep.subr.bf16.mxu1 %v4002_v19  ;;  %v1631_v55 = vadd.f32 %v4016_v29, %v1629_v60  ;;  %v4333_v59 = vpack.c.bf16 %v69_v40, %v68_v17 }
 0x9c6   :  { %v1630_v57 = vadd.f32 %v4016_v29, %v1628_v45 }
 0x9c7   :  { %3616 = vmatprep.subr.bf16.mxu0 %v4333_v59 }
 0x9c8   :  { %3626 = vmatpush3.bf16.msra.mxu1 %v4002_v19  ;;  %3430 = vmatprep.mubr.msk.f32.mxu1 %vm77_vm0, %v1630_v57  ;;  %v4340_v19 = vld [vmem:[%s4548_s11] ss:$0 sm:$0xff] }
 0x9c9   :  { %3618 = vmatpush3.bf16.msra.mxu0 %v4333_v59 }
 0x9cb   :  { %3431 = vmatmul.mubr.msk.f32.vlgmr.msra.gmra.mrb[12].mxu1 %vm77_vm0, %v1631_v55 }
 0xa96   :  { %v3402_v27 = vpop.f32.mrb[10].mxu1 }
 0xa97   :  { %v1502_v29 = vadd.f32 %v3402_v27, %v4340_v19  ;;  %v1496_v61 = vpop.f32.mrb[11].mxu1 }
 0xa98   :  { %v1497_v62 = vadd.f32 %v4340_v19, %v1496_v61 }
 0xa99   :  { %v1506_v3 = vmax.f32 %v1502_v29, 0.0 }
 0xa9a   :  { %v1505_v63 = vmax.f32 %v1497_v62, 0.0 }
 0xa9c   :  { %3419 = vmatprep.mubr.msk.f32.mxu0 %vm1513_vm9, %v1505_v63 }
 0xa9d   :  { %3420 = vmatmul.mubr.msk.f32.vlgmr.msra.gmra.mrb[10].mxu0 %vm1513_vm9, %v1506_v3 }
 0xa9e   :  { %v3432_v4 = vpop.f32.mrb[12].mxu1 }
 0xa9f   :  { %v4347_v6 = vadd.f32 %v3432_v4, %v4027_v36  ;;  %v1704_v7 = vpop.f32.mrb[13].mxu1 }
 0xaa0   :  { %v4350_v8 = vadd.f32 %v4027_v36, %v1704_v7 }
 0xaa2   :  { %3437 = vmatprep.mubr.msk.f32.mxu1 %vm216_vm2, %v4350_v8  ;;  %v4356_v10 = vpack.i.bf16 %v4347_v6, %v4350_v8 }
 0xaa4   :  { %3769 = vrot.lane.b32.xlu1 %v4356_v10, %s3883_s3  ;;  %3764 = vrot.lane.b32.xlu0 %v4356_v10, %s3884_s5 }
 0xaa8   :  { %1924 = vrot.lane.b32.xlu1 %v4350_v8, %s3885_s29  ;;  %3774 = vrot.lane.b32.xlu0 %v4356_v10, %s3886_s30 }
 0xaac   :  { %1926 = vrot.lane.b32.xlu1 %v4347_v6, %s3885_s29  ;;  %2293 = vrot.lane.b32.xlu0 %v4347_v6, %s3887_s15 }
 0xab0   :  { %2291 = vrot.lane.b32.xlu1 %v4350_v8, %s3887_s15 }
 0xb16   :  { %v3770_v36 = vpop.permute.xlu1 %3769  ;;  %v3765_v12 = vpop.permute.xlu0 %3764 }
 0xb17   :  { %v3772_v13 = vunpack.i.h.bf16 %v3770_v36  ;;  %v3771_v15 = vunpack.i.l.bf16 %v3770_v36  ;;  %v3767_v16 = vunpack.i.h.bf16 %v3765_v12  ;;  %v3766_v18 = vunpack.i.l.bf16 %v3765_v12 }
 0xb19   :  { %v3627_v20 = vpack.c.bf16 %v3767_v16, %v3766_v18  ;;  %v3639_v21 = vpack.c.bf16 %v3772_v13, %v3771_v15 }
 0xb1a   :  { %v3775_v23 = vpop.permute.xlu0 %3774  ;;  %v1925_v24 = vpop.permute.xlu1 %1924 }
 0xb1b   :  { %3629 = vmatprep.subr.msk.bf16.mxu1 %vm4057_vm3, %v3627_v20  ;;  %v3777_v25 = vunpack.i.h.bf16 %v3775_v23  ;;  %v3776_v26 = vunpack.i.l.bf16 %v3775_v23 }
 0xb1c   :  { %3632 = vmatpush3.bf16.xpose.msk.msra.mxu1 %vm4057_vm3, %v3627_v20 }
 0xb1d   :  { %3641 = vmatprep.subr.msk.bf16.mxu1 %vm4057_vm3, %v3639_v21  ;;  %v3651_v33 = vpack.c.bf16 %v3777_v25, %v3776_v26 }
 0xb1e   :  { %v1927_v1 = vpop.permute.xlu1 %1926  ;;  %v2294_v37 = vpop.permute.xlu0 %2293 }
 0xb22   :  { %v2292_v0 = vpop.permute.xlu1 %2291 }
 0xb23   :  { %3438 = vmatmul.mubr.msk.f32.vlgmr.msra.gmra.mrb[14].mxu1 %vm216_vm2, %v4347_v6 }
 0xb24   :  { %3644 = vmatpush3.bf16.xpose.msk.msra.mxu1 %vm4057_vm3, %v3639_v21  ;;  %3451 = vmatprep.mubr.msk.f32.mxu1 %vm216_vm2, %v1925_v24 }
 0xb25   :  { %3653 = vmatprep.subr.msk.bf16.mxu1 %vm4057_vm3, %v3651_v33 }
 0xb2b   :  { %3452 = vmatmul.mubr.msk.f32.vlgmr.msra.gmra.mrb[16].mxu1 %vm216_vm2, %v1927_v1 }
 0xb2c   :  { %3656 = vmatpush3.bf16.xpose.msk.msra.mxu1 %vm4057_vm3, %v3651_v33  ;;  %3475 = vmatprep.mubr.msk.f32.mxu1 %vm216_vm2, %v2292_v0 }
 0xb33   :  { %3476 = vmatmul.mubr.msk.f32.vlgmr.msra.gmra.mrb[18].mxu1 %vm216_vm2, %v2294_v37 }
 0xb70   :  { %v3421_v44 = vpop.f32.mrb[10].mxu0 }
 0xb71   :  { %v1592_v47 = vadd.f32 %v3421_v44, %v4393_v42  ;;  %v1586_v49 = vpop.f32.mrb[11].mxu0 }
 0xb72   :  { %v1587_v50 = vadd.f32 %v4393_v42, %v1586_v49 }
 0xb73   :  { %v1596_v51 = vadd.f32 %v1592_v47, %v4200_v31 }
 0xb74   :  { %v1595_v52 = vadd.f32 %v1587_v50, %v4203_v32 }
 0xb75   :  { %1598 = vst.msk [vmem:[%s4550_s14 + $0x8] sm:$0x3] %vm81_vm1, %v1596_v51 }
 0xb76   :  { %1597 = vst.msk [vmem:[%s4550_s14] sm:$0xff] %vm77_vm0, %v1595_v52 }
 0xbf6   :  { %v3439_v53 = vpop.f32.mrb[14].mxu1 }
 0xbf7   :  { %v1805_v38 = vmul.f32 0.35355338, %v3439_v53  ;;  %v1795_v31 = vpop.f32.mrb[15].mxu1 }
 0xbf8   :  { %v1804_v54 = vmul.f32 0.35355338, %v1795_v31 }
 0xbf9   :  { %v1813_v32 = vadd.f32 %v4410_v46, %v1805_v38 }
 0xbfa   :  { %v1812_v45 = vadd.f32 %v4410_v46, %v1804_v54 }
 0xbfb   :  { %v1817_v60 = vsel %vm314_vm4, %v1813_v32, -inf }
 0xbfc   :  { %1818 = vmax.xlane.f32.xlu0 %v1817_v60  ;;  %v1814_v57 = vsel %vm310_vm5, %v1812_v45, -inf }
 0xbfd   :  { %1815 = vmax.xlane.f32.xlu1 %v1814_v57 }
 0xbfe   :  { %v3453_v55 = vpop.f32.mrb[16].mxu1 }
 0xbff   :  { %v2006_v17 = vpop.f32.mrb[17].mxu1  ;;  %v2016_v40 = vmul.f32 0.35355338, %v3453_v55 }
 0xc00   :  { %v2015_v27 = vmul.f32 0.35355338, %v2006_v17 }
 0xc01   :  { %v2018_v62 = vadd.f32 %v4410_v46, %v2016_v40 }
 0xc02   :  { %v2017_v29 = vadd.f32 %v4410_v46, %v2015_v27 }
 0xc03   :  { %v2022_v4 = vsel %vm314_vm4, %v2018_v62, -inf }
 0xc04   :  { %v2019_v61 = vsel %vm310_vm5, %v2017_v29, -inf }
 0xc05   :  { %2020 = vmax.xlane.f32.xlu0 %v2019_v61 }
 0xc06   :  { %v3477_v63 = vpop.f32.mrb[18].mxu1 }
 0xc07   :  { %v2373_v3 = vpop.f32.mrb[19].mxu1  ;;  %v2383_v52 = vmul.f32 0.35355338, %v3477_v63 }
 0xc08   :  { %v2382_v50 = vmul.f32 0.35355338, %v2373_v3 }
 0xc09   :  { %2023 = vmax.xlane.f32.xlu0 %v2022_v4  ;;  %v2385_v38 = vadd.f32 %v4410_v46, %v2383_v52 }
 0xc0a   :  { %v2384_v51 = vadd.f32 %v4410_v46, %v2382_v50 }
 0xc0b   :  { %v2389_v31 = vsel %vm314_vm4, %v2385_v38, -inf }
 0xc0c   :  { %v2386_v53 = vsel %vm310_vm5, %v2384_v51, -inf }
 0xc89   :  { %v1819_v7 = vpop.xlane.xlu0 %1818 }
 0xc8a   :  { %v1821_v36 = vsub.f32 %v1813_v32, %v1819_v7  ;;  %v1816_v12 = vpop.xlane.xlu1 %1815 }
 0xc8b   :  { %v1820_v13 = vsub.f32 %v1812_v45, %v1816_v12 }
 0xc8c   :  { %v1824_v15 = vmul.f32 1.442695, %v1821_v36 }
 0xc8d   :  { %v1822_v16 = vmul.f32 1.442695, %v1820_v13 }
 0xc8e   :  { %3847 = vpow2.f32 %v1824_v15 }
 0xc8f   :  { %3849 = vpow2.f32 %v1822_v16 }
 0xc92   :  { %v2021_v18 = vpop.xlane.xlu0 %2020 }
 0xc93   :  { %v2025_v20 = vsub.f32 %v2017_v29, %v2021_v18 }
 0xc95   :  { %v2027_v21 = vmul.f32 1.442695, %v2025_v20 }
 0xc96   :  { %v2024_v23 = vpop.xlane.xlu0 %2023 }
 0xc97   :  { %3851 = vpow2.f32 %v2027_v21  ;;  %v2026_v24 = vsub.f32 %v2018_v62, %v2024_v23 }
 0xc98   :  { %v3848_v25 = vpop.eup %3847 }
 0xc99   :  { %v3850_v26 = vpop.eup %3849  ;;  %v2029_v33 = vmul.f32 1.442695, %v2026_v24  ;;  %v1829_v1 = vsel %vm314_vm4, %v3848_v25, 0.0 }
 0xc9a   :  { %1830 = vadd.xlane.f32.xlu0 %v1829_v1  ;;  %v1826_v0 = vsel %vm310_vm5, %v3850_v26, 0.0 }
 0xc9b   :  { %3853 = vpow2.f32 %v2029_v33  ;;  %1827 = vadd.xlane.f32.xlu1 %v1826_v0 }
 0xca1   :  { %v3852_v37 = vpop.eup %3851 }
 0xca2   :  { %v2031_v44 = vsel %vm310_vm5, %v3852_v37, 0.0 }
 0xca3   :  { %2032 = vadd.xlane.f32.xlu1 %v2031_v44 }
 0xca5   :  { %v3854_v47 = vpop.eup %3853 }
 0xca6   :  { %v2034_v49 = vsel %vm314_vm4, %v3854_v47, 0.0 }
 0xca7   :  { %2035 = vadd.xlane.f32.xlu0 %v2034_v49 }
 0xcb4   :  { %3779 = vrot.lane.b32.xlu1 %v4356_v10, %s3888_s18 }
 0xcb8   :  { %3789 = vrot.lane.b32.xlu1 %v4356_v10, %s3889_s19 }
 0xcbc   :  { %2579 = vrot.lane.b32.xlu1 %v4350_v8, %s3890_s20 }
 0xcbd   :  { %3784 = vrot.lane.b32.xlu0 %v4356_v10, %s3891_s21 }
 0xcc0   :  { %2581 = vrot.lane.b32.xlu1 %v4347_v6, %s3890_s20 }
 0xcdc   :  { %2387 = vmax.xlane.f32.xlu0 %v2386_v53 }
 0xce4   :  { %2390 = vmax.xlane.f32.xlu1 %v2389_v31 }
 0xd27   :  { %v1831_v8 = vpop.xlane.xlu0 %1830 }
 0xd28   :  { %v1828_v54 = vpop.xlane.xlu1 %1827 }
 0xd29   :  { %3855 = vrcp.f32 %v1828_v54 }
 0xd2a   :  { %3857 = vrcp.f32 %v1831_v8 }
 0xd30   :  { %v2033_v32 = vpop.xlane.xlu1 %2032 }
 0xd31   :  { %3859 = vrcp.f32 %v2033_v32 }
 0xd33   :  { %v3856_v45 = vpop.eup %3855 }
 0xd34   :  { %v2036_v6 = vpop.xlane.xlu0 %2035  ;;  %v3780_v60 = vpop.permute.xlu1 %3779  ;;  %v1833_v57 = vmul.f32 %v3856_v45, %v3850_v26 }
 0xd35   :  { %3861 = vrcp.f32 %v2036_v6  ;;  %v3782_v55 = vunpack.i.h.bf16 %v3780_v60  ;;  %v3781_v17 = vunpack.i.l.bf16 %v3780_v60  ;;  %v3858_v27 = vpop.eup %3857 }
 0xd36   :  { %3444 = vmatprep.mubr.msk.f32.mxu0 %vm310_vm5, %v1833_v57  ;;  %v1835_v36 = vmul.f32 %v3858_v27, %v3848_v25 }
 0xd37   :  { %v3633_v40 = vpack.c.bf16 %v3782_v55, %v3781_v17 }
 0xd38   :  { %v3785_v29 = vpop.permute.xlu0 %3784  ;;  %v3790_v61 = vpop.permute.xlu1 %3789 }
 0xd39   :  { %v3787_v62 = vunpack.i.h.bf16 %v3785_v29  ;;  %v3786_v63 = vunpack.i.l.bf16 %v3785_v29  ;;  %v3792_v3 = vunpack.i.h.bf16 %v3790_v61  ;;  %v3791_v4 = vunpack.i.l.bf16 %v3790_v61  ;;  %3635 = vmatprep.subr.msk.bf16.mxu0 %vm4111_vm8, %v3633_v40 }
 0xd3a   :  { %3638 = vmatpush3.bf16.msk.msra.mxu0 %vm4111_vm8, %v3633_v40 }
 0xd3b   :  { %v3860_v7 = vpop.eup %3859  ;;  %v3645_v12 = vpack.c.bf16 %v3787_v62, %v3786_v63  ;;  %v3663_v13 = vpack.c.bf16 %v3792_v3, %v3791_v4 }
 0xd3c   :  { %v2580_v15 = vpop.permute.xlu1 %2579  ;;  %v2038_v16 = vmul.f32 %v3860_v7, %v3852_v37 }
 0xd3d   :  { %3445 = vmatmul.mubr.msk.f32.vlgmr.msra.gmra.mrb[12].mxu0 %vm310_vm5, %v1835_v36  ;;  %3647 = vmatprep.subr.msk.bf16.mxu0 %vm4111_vm8, %v3645_v12 }
 0xd3e   :  { %3665 = vmatprep.subr.msk.bf16.mxu1 %vm4057_vm3, %v3663_v13  ;;  %3494 = vmatprep.mubr.msk.f32.mxu1 %vm216_vm2, %v2580_v15 }
 0xd3f   :  { %v3862_v18 = vpop.eup %3861  ;;  %3650 = vmatpush3.bf16.msk.msra.mxu0 %vm4111_vm8, %v3645_v12  ;;  %3458 = vmatprep.mubr.msk.f32.mxu0 %vm310_vm5, %v2038_v16 }
 0xd40   :  { %v2040_v20 = vmul.f32 %v3862_v18, %v3854_v47  ;;  %3668 = vmatpush3.bf16.xpose.msk.msra.mxu1 %vm4057_vm3, %v3663_v13  ;;  %3461 = vmatprep.subr.mxu0 %v4137_v28  ;;  %v2582_v21 = vpop.permute.xlu1 %2581 }
 0xd41   :  { %3676 = vmatprep.subr.bf16.mxu1 %v4253_v2 }
 0xd42   :  { %3459 = vmatmul.mubr.msk.f32.vlgmr.msra.gmra.mrb[14].mxu0 %vm310_vm5, %v2040_v20 }
 0xd43   :  { %3462 = vmatpush3.msra.mxu0 %v4137_v28 }
 0xd44   :  { %3466 = vmatprep.subr.mxu0 %v4144_v30 }
 0xd47   :  { %3495 = vmatmul.mubr.msk.f32.vlgmr.msra.gmra.mrb[20].mxu1 %vm216_vm2, %v2582_v21 }
 0xd48   :  { %3678 = vmatpush3.bf16.msra.mxu1 %v4253_v2 }
 0xd49   :  { %3680 = vmatprep.subr.bf16.mxu1 %v4263_v5 }
 0xd4c   :  { %3682 = vmatpush3.bf16.msra.mxu1 %v4263_v5 }
 0xd69   :  { %v2388_v48 = vpop.xlane.xlu0 %2387 }
 0xd6a   :  { %v2392_v23 = vsub.f32 %v2384_v51, %v2388_v48 }
 0xd6c   :  { %v2394_v26 = vmul.f32 1.442695, %v2392_v23 }
 0xd71   :  { %v2391_v24 = vpop.xlane.xlu1 %2390 }
 0xd72   :  { %v2393_v25 = vsub.f32 %v2385_v38, %v2391_v24 }
 0xd74   :  { %v2396_v33 = vmul.f32 1.442695, %v2393_v25 }
 0xd76   :  { %3863 = vpow2.f32 %v2396_v33 }
 0xd77   :  { %3865 = vpow2.f32 %v2394_v26 }
 0xd80   :  { %v3864_v28 = vpop.eup %3863 }
 0xd81   :  { %v2401_v1 = vsel %vm314_vm4, %v3864_v28, 0.0  ;;  %v3866_v0 = vpop.eup %3865 }
 0xd82   :  { %2402 = vadd.xlane.f32.xlu0 %v2401_v1  ;;  %v2398_v37 = vsel %vm310_vm5, %v3866_v0, 0.0 }
 0xd86   :  { %2399 = vadd.xlane.f32.xlu0 %v2398_v37 }
 0xd9c   :  { %3794 = vrot.lane.b32.xlu0 %v4356_v10, %s3893_s25 }
 0xe0f   :  { %v2403_v2 = vpop.xlane.xlu0 %2402 }
 0xe10   :  { %v3446_v5 = vpop.f32.mrb[12].mxu0 }
 0xe11   :  { %v1915_v44 = vpop.f32.mrb[13].mxu0 }
 0xe13   :  { %v2400_v47 = vpop.xlane.xlu0 %2399 }
 0xe14   :  { %3867 = vrcp.f32 %v2400_v47 }
 0xe15   :  { %3869 = vrcp.f32 %v2403_v2  ;;  %v3460_v49 = vpop.f32.mrb[14].mxu0 }
 0xe16   :  { %v2120_v50 = vpop.f32.mrb[15].mxu0 }
 0xe17   :  { %v3795_v51 = vpop.permute.xlu0 %3794  ;;  %3463 = vmatprep.mubr.msk.f32.mxu0 %vm216_vm2, %v2120_v50 }
 0xe18   :  { %v3797_v52 = vunpack.i.h.bf16 %v3795_v51  ;;  %v3796_v53 = vunpack.i.l.bf16 %v3795_v51  ;;  %3464 = vmatmul.mubr.msk.f32.vlgmr.msra.gmra.mrb[16].mxu0 %vm216_vm2, %v3460_v49 }
 0xe19   :  { %3468 = vmatprep.mubr.msk.f32.mxu0 %vm216_vm2, %v1915_v44  ;;  %3467 = vmatpush3.msra.mxu0 %v4144_v30 }
 0xe1a   :  { %v3657_v38 = vpack.c.bf16 %v3797_v52, %v3796_v53  ;;  %v3496_v31 = vpop.f32.mrb[20].mxu1 }
 0xe1b   :  { %v2661_v54 = vpop.f32.mrb[21].mxu1  ;;  %v2671_v8 = vmul.f32 0.35355338, %v3496_v31 }
 0xe1c   :  { %v2670_v32 = vmul.f32 0.35355338, %v2661_v54  ;;  %3659 = vmatprep.subr.msk.bf16.mxu0 %vm4111_vm8, %v3657_v38 }
 0xe1d   :  { %v2673_v17 = vadd.f32 %v4410_v46, %v2671_v8 }
 0xe1e   :  { %v3868_v45 = vpop.eup %3867  ;;  %v2672_v6 = vadd.f32 %v4410_v46, %v2670_v32 }
 0xe1f   :  { %v3870_v60 = vpop.eup %3869  ;;  %v2405_v57 = vmul.f32 %v3868_v45, %v3866_v0  ;;  %v2677_v40 = vsel %vm314_vm4, %v2673_v17, -inf }
 0xe20   :  { %v2674_v55 = vsel %vm310_vm5, %v2672_v6, -inf  ;;  %3469 = vmatmul.mubr.msk.f32.vlgmr.msra.gmra.mrb[16].mxu0 %vm216_vm2, %v3446_v5  ;;  %v2407_v30 = vmul.f32 %v3870_v60, %v3864_v28 }
 0xe21   :  { %2675 = vmax.xlane.f32.xlu1 %v2674_v55  ;;  %3662 = vmatpush3.bf16.msk.msra.mxu0 %vm4111_vm8, %v3657_v38 }
 0xe22   :  { %3482 = vmatprep.mubr.msk.f32.mxu0 %vm310_vm5, %v2405_v57  ;;  %3485 = vmatprep.subr.mxu0 %v4167_v56 }
 0xe24   :  { %3483 = vmatmul.mubr.msk.f32.vlgmr.msra.gmra.mrb[18].mxu0 %vm310_vm5, %v2407_v30 }
 0xe25   :  { %2678 = vmax.xlane.f32.xlu1 %v2677_v40  ;;  %3486 = vmatpush3.msra.mxu0 %v4167_v56 }
 0xeae   :  { %v2676_v27 = vpop.xlane.xlu1 %2675 }
 0xeaf   :  { %v2680_v29 = vsub.f32 %v2672_v6, %v2676_v27 }
 0xeb1   :  { %v2682_v62 = vmul.f32 1.442695, %v2680_v29 }
 0xeb2   :  { %v2679_v61 = vpop.xlane.xlu1 %2678 }
 0xeb3   :  { %v2681_v46 = vsub.f32 %v2673_v17, %v2679_v61 }
 0xeb5   :  { %v2684_v63 = vmul.f32 1.442695, %v2681_v46 }
 0xeb7   :  { %3871 = vpow2.f32 %v2684_v63 }
 0xeb8   :  { %3873 = vpow2.f32 %v2682_v62 }
 0xec1   :  { %v3872_v3 = vpop.eup %3871 }
 0xec2   :  { %v2689_v4 = vsel %vm314_vm4, %v3872_v3, 0.0  ;;  %v3874_v7 = vpop.eup %3873 }
 0xec3   :  { %2690 = vadd.xlane.f32.xlu1 %v2689_v4  ;;  %v2686_v36 = vsel %vm310_vm5, %v3874_v7, 0.0 }
 0xec7   :  { %2687 = vadd.xlane.f32.xlu1 %v2686_v36 }
 0xed8   :  { %3799 = vrot.lane.b32.xlu1 %v4356_v10, %s3894_s2 }
 0xef7   :  { %v3484_v56 = vpop.f32.mrb[18].mxu0 }
 0xef8   :  { %v2487_v12 = vpop.f32.mrb[19].mxu0 }
 0xef9   :  { %3487 = vmatprep.mubr.msk.f32.mxu0 %vm216_vm2, %v2487_v12 }
 0xefa   :  { %3488 = vmatmul.mubr.msk.f32.vlgmr.msra.gmra.mrb[16].mxu0 %vm216_vm2, %v3484_v56 }
 0xf50   :  { %v2691_v13 = vpop.xlane.xlu1 %2690 }
 0xf51   :  { %3875 = vrcp.f32 %v2691_v13 }
 0xf54   :  { %v2688_v15 = vpop.xlane.xlu1 %2687 }
 0xf55   :  { %3877 = vrcp.f32 %v2688_v15 }
 0xf58   :  { %v3800_v16 = vpop.permute.xlu1 %3799 }
 0xf59   :  { %v3802_v18 = vunpack.i.h.bf16 %v3800_v16  ;;  %v3801_v20 = vunpack.i.l.bf16 %v3800_v16 }
 0xf5b   :  { %v3669_v21 = vpack.c.bf16 %v3802_v18, %v3801_v20  ;;  %v3876_v48 = vpop.eup %3875 }
 0xf5c   :  { %v2695_v24 = vmul.f32 %v3876_v48, %v3872_v3 }
 0xf5d   :  { %3671 = vmatprep.subr.msk.bf16.mxu0 %vm4111_vm8, %v3669_v21 }
 0xf5e   :  { %3674 = vmatpush3.bf16.msk.msra.mxu0 %vm4111_vm8, %v3669_v21 }
 0xf5f   :  { %v3878_v10 = vpop.eup %3877  ;;  %3504 = vmatprep.subr.mxu0 %v4180_v14 }
 0xf60   :  { %v2693_v23 = vmul.f32 %v3878_v10, %v3874_v7 }
 0xf62   :  { %3501 = vmatprep.mubr.msk.f32.mxu0 %vm310_vm5, %v2693_v23 }
 0xf63   :  { %3502 = vmatmul.mubr.msk.f32.vlgmr.msra.gmra.mrb[20].mxu0 %vm310_vm5, %v2695_v24 }
 0xf64   :  { %3505 = vmatpush3.msra.mxu0 %v4180_v14 }
 0xf65   :  { %3684 = vmatprep.subr.bf16.mxu0 %v4277_v9 }
0x1036   :  { %v3503_v25 = vpop.f32.mrb[20].mxu0 }
0x1037   :  { %v2775_v26 = vpop.f32.mrb[21].mxu0 }
0x1038   :  { %3506 = vmatprep.mubr.msk.f32.mxu0 %vm216_vm2, %v2775_v26 }
0x1039   :  { %3507 = vmatmul.mubr.msk.f32.vlgmr.msra.gmra.mrb[16].mxu0 %vm216_vm2, %v3503_v25 }
0x103a   :  { %3686 = vmatpush3.bf16.msra.mxu0 %v4277_v9 }
0x103b   :  { %3688 = vmatprep.subr.bf16.mxu0 %v4282_v11 }
0x103e   :  { %3690 = vmatpush3.bf16.msra.mxu0 %v4282_v11 }
0x103f   :  { %3692 = vmatprep.subr.bf16.mxu0 %v4293_v41 }
0x1042   :  { %3694 = vmatpush3.bf16.msra.mxu0 %v4293_v41 }
0x1043   :  { %3696 = vmatprep.subr.bf16.mxu0 %v4333_v59 }
0x1046   :  { %3698 = vmatpush3.bf16.msra.mxu0 %v4333_v59 }
0x110c   :  { %v3508_v58 = vpop.f32.mrb[16].mxu0 }
0x110d   :  { %v2868_v14 = vadd.f32 %v3508_v58, %v4219_v35  ;;  %v2856_v33 = vpop.f32.mrb[17].mxu0 }
0x110e   :  { %v2867_v28 = vadd.f32 %v4210_v34, %v2856_v33 }
0x110f   :  { %v2870_v9 = vadd.f32 %v4195_v22, %v2868_v14 }
0x1110   :  { %v2869_v1 = vadd.f32 %v4195_v22, %v2867_v28 }
0x1111   :  { %v2874_v11 = vsel %vm81_vm1, %v2870_v9, 0.0 }
0x1112   :  { %2875 = vadd.xlane.f32.xlu1 %v2874_v11  ;;  %v2871_v0 = vsel %vm77_vm0, %v2869_v1, 0.0 }
0x1113   :  { %2872 = vadd.xlane.f32.xlu0 %v2871_v0 }
0x119f   :  { %v2876_v41 = vpop.xlane.xlu1 %2875 }
0x11a0   :  { %v2878_v37 = vmul.f32 0.03125, %v2876_v41  ;;  %v2873_v2 = vpop.xlane.xlu0 %2872 }
0x11a1   :  { %v2877_v59 = vmul.f32 0.03125, %v2873_v2 }
0x11a2   :  { %v2880_v5 = vsub.f32 %v2870_v9, %v2878_v37 }
0x11a3   :  { %v2879_v44 = vsub.f32 %v2869_v1, %v2877_v59 }
0x11a4   :  { %v2882_v34 = vmul.f32 %v2880_v5, %v2880_v5 }
0x11a5   :  { %v2881_v35 = vmul.f32 %v2879_v44, %v2879_v44 }
0x11a6   :  { %v2886_v49 = vsel %vm81_vm1, %v2882_v34, 0.0 }
0x11a7   :  { %v2883_v47 = vsel %vm77_vm0, %v2881_v35, 0.0 }
0x11a8   :  { %2884 = vadd.xlane.f32.xlu0 %v2883_v47 }
0x11ac   :  { %2887 = vadd.xlane.f32.xlu0 %v2886_v49 }
0x1235   :  { %v2885_v22 = vpop.xlane.xlu0 %2884 }
0x1236   :  { %v2889_v50 = vmul.f32 0.03125, %v2885_v22 }
0x1238   :  { %v2891_v51 = vadd.f32 1e-05, %v2889_v50 }
0x1239   :  { %v2888_v52 = vpop.xlane.xlu0 %2887 }
0x123a   :  { %3879 = vrsqrt.f32 %v2891_v51  ;;  %v2890_v53 = vmul.f32 0.03125, %v2888_v52 }
0x123c   :  { %v2892_v38 = vadd.f32 1e-05, %v2890_v53 }
0x123e   :  { %3881 = vrsqrt.f32 %v2892_v38 }
0x1244   :  { %v3880_v31 = vpop.eup %3879 }
0x1245   :  { %v2895_v54 = vmul.f32 %v3880_v31, %v2879_v44 }
0x1247   :  { %v2897_v8 = vmul.f32 %v4301_v39, %v2895_v54 }
0x1248   :  { %v3882_v32 = vpop.eup %3881 }
0x1249   :  { %v2896_v45 = vmul.f32 %v3882_v32, %v2880_v5  ;;  %v2899_v6 = vadd.f32 %v4307_v43, %v2897_v8 }
0x124b   :  { %v2898_v60 = vmul.f32 %v4301_v39, %v2896_v45  ;;  %3517 = vmatprep.mubr.msk.f32.mxu1 %vm77_vm0, %v2899_v6 }
0x124d   :  { %v2900_v57 = vadd.f32 %v4307_v43, %v2898_v60 }
0x124f   :  { %3518 = vmatmul.mubr.msk.f32.vlgmr.msra.gmra.mrb[22].mxu1 %vm77_vm0, %v2900_v57 }
0x1322   :  { %v3519_v55 = vpop.f32.mrb[22].mxu1 }
0x1323   :  { %v2979_v17 = vadd.f32 %v3519_v55, %v4340_v19  ;;  %v2973_v30 = vpop.f32.mrb[23].mxu1 }
0x1324   :  { %v2974_v40 = vadd.f32 %v4340_v19, %v2973_v30 }
0x1325   :  { %v2983_v29 = vmax.f32 %v2979_v17, 0.0 }
0x1326   :  { %v2982_v27 = vmax.f32 %v2974_v40, 0.0 }
0x1328   :  { %3536 = vmatprep.mubr.msk.f32.mxu0 %vm1513_vm9, %v2982_v27 }
0x1329   :  { %3537 = vmatmul.mubr.msk.f32.vlgmr.msra.gmra.mrb[22].mxu0 %vm1513_vm9, %v2983_v29 }
0x13fc   :  { %v3538_v61 = vpop.f32.mrb[22].mxu0 }
0x13fd   :  { %v3062_v39 = vadd.f32 %v3538_v61, %v4393_v42  ;;  %v3056_v46 = vpop.f32.mrb[23].mxu0 }
0x13fe   :  { %v3057_v43 = vadd.f32 %v4393_v42, %v3056_v46 }
0x13ff   :  { %v3066_v62 = vadd.f32 %v3062_v39, %v2870_v9 }
0x1400   :  { %v3065_v63 = vadd.f32 %v3057_v43, %v2869_v1 }
0x1401   :  { %3172 = vst.msk [vmem:[%s4550_s14 + $0x18] sm:$0x3] %vm81_vm1, %v3066_v62 }
0x1402   :  { %3171 = vst.msk [vmem:[%s4550_s14 + $0x10] sm:$0xff] %vm77_vm0, %v3065_v63 }

// kernel: forward.19
= control target key start
LH: loop header
LB: loop body
LE: loop exit
PB: predicated region body
PF: predicated region fallthrough
CT: control target
= control target key end

     0   :  { %vm126_vm0 = vcmask 261120   ;;  %v5978_v7 = vmov 0.0|0.0   ;;  %vm5979_vm1 = vmmov 0   ;;  %v5980_v11 = vmov 0.0   ;;  %s6953_s30 = smov 88   ;;  %s6947_s26 = smov 80   ;;  %s6907_s0 = inlined_call_operand.vmem [shape: f32[2,8,32], index: 0, kind: input, shape index: {}]   ;;  %s6908_s6 = inlined_call_operand.vmem [shape: f32[32,96], index: 6, kind: input, shape index: {}]   ;;  %s6909_s4 = inlined_call_operand.vmem [shape: f32[1,32], index: 4, kind: input, shape index: {}]   ;;  %s6910_s5 = inlined_call_operand.vmem [shape: f32[1,32], index: 5, kind: input, shape index: {}]   ;;  %s6911_s7 = inlined_call_operand.vmem [shape: f32[1,96], index: 7, kind: input, shape index: {}]   ;;  %s6912_s2 = inlined_call_operand.vmem [shape: f32[8,8], index: 2, kind: input, shape index: {}]   ;;  %s6913_s8 = inlined_call_operand.vmem [shape: f32[32,32], index: 8, kind: input, shape index: {}]   ;;  %s6914_s9 = inlined_call_operand.vmem [shape: f32[1,32], index: 9, kind: input, shape index: {}]   ;;  %s6915_s14 = inlined_call_operand.vmem [shape: f32[32,64], index: 14, kind: input, shape index: {}]   ;;  %s6916_s1 = inlined_call_operand.vmem [shape: f32[2,10,32], index: 1, kind: input, shape index: {}]   ;;  %s6917_s12 = inlined_call_operand.vmem [shape: f32[32,32], index: 12, kind: input, shape index: {}]   ;;  %s6918_s10 = inlined_call_operand.vmem [shape: f32[1,32], index: 10, kind: input, shape index: {}]   ;;  %s6919_s11 = inlined_call_operand.vmem [shape: f32[1,32], index: 11, kind: input, shape index: {}]   ;;  %s6920_s15 = inlined_call_operand.vmem [shape: f32[1,64], index: 15, kind: input, shape index: {}]   ;;  %s6921_s13 = inlined_call_operand.vmem [shape: f32[1,32], index: 13, kind: input, shape index: {}]   ;;  %s6922_s3 = inlined_call_operand.vmem [shape: f32[2,1,10], index: 3, kind: input, shape index: {}]   ;;  %s6923_s16 = inlined_call_operand.vmem [shape: f32[32,32], index: 16, kind: input, shape index: {}]   ;;  %s6924_s17 = inlined_call_operand.vmem [shape: f32[1,32], index: 17, kind: input, shape index: {}]   ;;  %s6925_s20 = inlined_call_operand.vmem [shape: f32[32,64], index: 20, kind: input, shape index: {}]   ;;  %s6926_s22 = inlined_call_operand.vmem [shape: f32[64,32], index: 22, kind: input, shape index: {}]   ;;  %s6927_s18 = inlined_call_operand.vmem [shape: f32[1,32], index: 18, kind: input, shape index: {}]   ;;  %s6928_s19 = inlined_call_operand.vmem [shape: f32[1,32], index: 19, kind: input, shape index: {}]   ;;  %s6929_s21 = inlined_call_operand.vmem [shape: f32[1,64], index: 21, kind: input, shape index: {}]   ;;  %s6930_s23 = inlined_call_operand.vmem [shape: f32[1,32], index: 23, kind: input, shape index: {}]   ;;  %s6931_s24 = inlined_call_operand.vmem [shape: f32[2,8,32], index: 24, kind: output, shape index: {}]  }
   0x1   :  { %6959 = sst [smem:[#allocation2_spill]] %s6907_s0  ;;  %5671 = vmatprep.subr.bf16.mxu0 %v5978_v7  ;;  %5281 = vmatprep.mubr.msk.f32.mxu0 %vm5979_vm1, %v5980_v11  ;;  %s6957_s0 = smov 120   ;;  %vm237_vm2 = vcmask 64512   ;;  %vm1485_vm4 = vcmask 80896   ;;  %vm1505_vm5 = vcmask 1041408   ;;  %vm5992_vm6 = vmmov 1  }
   0x2   :  { %6960 = sst [smem:[#allocation3_spill]] %s6908_s6  ;;  %s6968_s27 = sld [smem:[#allocation2_spill]]  ;;  %5289 = vmatprep.subr.mxu1 %v5980_v11  ;;  %5291 = vmatprep.mubr.msk.f32.mxu1 %vm5979_vm1, %v5980_v11  ;;  %vm6362_vm3 = vmpackc.low %vm237_vm2, %vm237_vm2  ;;  %vm2518_vm8 = vcmask 523264  }
   0x3   :  { %6961 = sst [smem:[#allocation4_spill]] %s6909_s4  ;;  %s6969_s4 = sld [smem:[#allocation3_spill]]  ;;  %vm6397_vm7 = vmpackc.low %vm1505_vm5, %vm5992_vm6 }
   0x4   :  { %6962 = sst [smem:[#allocation5_spill]] %s6910_s5  ;;  %s6970_s6 = sld [smem:[#allocation4_spill]] }
   0x5   :  { %6963 = sst [smem:[#allocation6_spill]] %s6911_s7  ;;  %s6971_s28 = sld [smem:[#allocation5_spill]] }
   0x6   :  { %6964 = sst [smem:[#allocation7_spill]] %s6912_s2  ;;  %s6972_s29 = sld [smem:[#allocation6_spill]] }
   0x7   :  { %6965 = sst [smem:[#allocation8_spill]] %s6913_s8  ;;  %s6943_s7 = smov 56  }
   0x8   :  { %6966 = sst [smem:[#allocation9_spill]] %s6914_s9  ;;  %v6121_v0 = vld [vmem:[%s6968_s27] sm:$0xff]  ;;  %s6955_s9 = smov 96  }
   0x9   :  { %6967 = sst [smem:[#allocation10_spill]] %s6915_s14  ;;  %v127_v1 = vsel %vm126_vm0, %v6121_v0, 0.0  ;;  %v78_v8 = vld [vmem:[%s6969_s4] sm:$0xff]  ;;  %v79_v9 = vld [vmem:[%s6969_s4 + $0x8] sm:$0xff]  ;;  %v80_v10 = vld [vmem:[%s6969_s4 + $0x10] sm:$0xff]  ;;  %s6973_s14 = sld [smem:[#allocation7_spill]] }
   0xa   :  { %128 = vadd.xlane.f32.xlu0 %v127_v1  ;;  %v6139_v12 = vpack.c.bf16 %v79_v9, %v78_v8  ;;  %v81_v13 = vld [vmem:[%s6969_s4 + $0x18] sm:$0xff]  ;;  %v4989_v19 = vld [vmem:[%s6970_s6] ss:$0 sm:$0xff]  ;;  %s6941_s2 = smov 64   ;;  %s6951_s8 = smov 112  }
   0xb   :  { %v6148_v14 = vpack.c.bf16 %v81_v13, %v80_v10  ;;  %v4990_v21 = vld [vmem:[%s6971_s28] ss:$0 sm:$0xff]  ;;  %s6974_s25 = sld [smem:[#allocation8_spill]]  ;;  %s6942_s4 = smov 48  }
   0xc   :  { %5673 = vmatpush3.bf16.msra.mxu0 %v6139_v12  ;;  %v4991_v24 = vld [vmem:[%s6972_s29] ss:$0 sm:$0xff]  ;;  %s6949_s5 = smov 104  }
   0xd   :  { %5674 = vmatprep.subr.bf16.mxu0 %v5978_v7 }
   0xf   :  { %v6187_v32 = vld [vmem:[%s6973_s14] sm:$0xff] }
  0x10   :  { %5676 = vmatpush3.bf16.msra.mxu0 %v6148_v14 }
  0x11   :  { %5284 = vmatprep.subr.mxu0 %v5980_v11  ;;  %v6206_v52 = vld [vmem:[%s6974_s25 + $0x8] sm:$0xff]  ;;  %v83_v61 = vld [vmem:[%s6974_s25] sm:$0xff] }
  0x97   :  { %v129_v2 = vpop.xlane.xlu0 %128 }
  0x98   :  { %v131_v3 = vmul.f32 0.03125, %v129_v2 }
  0x9a   :  { %v132_v4 = vsub.f32 %v6121_v0, %v131_v3 }
  0x9c   :  { %v133_v5 = vmul.f32 %v132_v4, %v132_v4 }
  0x9e   :  { %v134_v6 = vsel %vm126_vm0, %v133_v5, 0.0 }
  0x9f   :  { %135 = vadd.xlane.f32.xlu0 %v134_v6 }
 0x12c   :  { %v136_v15 = vpop.xlane.xlu0 %135 }
 0x12d   :  { %v137_v16 = vmul.f32 0.03125, %v136_v15 }
 0x12f   :  { %v138_v17 = vadd.f32 1e-05, %v137_v16 }
 0x131   :  { %5896 = vrsqrt.f32 %v138_v17 }
 0x13b   :  { %v5897_v18 = vpop.eup %5896 }
 0x13c   :  { %v140_v20 = vmul.f32 %v5897_v18, %v132_v4 }
 0x13e   :  { %v147_v22 = vmul.f32 %v4989_v19, %v140_v20 }
 0x140   :  { %v154_v23 = vadd.f32 %v4990_v21, %v147_v22 }
 0x142   :  { %5282 = vmatmul.mubr.msk.f32.vlgmr.msra.gmra.mrb[0].mxu0 %vm126_vm0, %v154_v23 }
 0x143   :  { %5286 = vmatprep.mubr.msk.f32.mxu0 %vm5979_vm1, %v5980_v11 }
 0x215   :  { %v230_v25 = vpop.f32.mrb[0].mxu0 }
 0x216   :  { %v6165_v26 = vadd.f32 %v4991_v24, %v230_v25  ;;  %v5283_v27 = vpop.f32.mrb[1].mxu0 }
 0x218   :  { %401 = vrot.lane.b32.xlu0 %v6165_v26, %s6957_s0  ;;  %235 = vrot.lane.b32.xlu1 %v6165_v26, %s6955_s9  ;;  %s6984_s0 = smov 112  }
 0x21c   :  { %403 = vrot.lane.b32.xlu1 %v6165_v26, %s6953_s30  ;;  %s6983_s30 = smov 88  }
 0x28a   :  { %v236_v28 = vpop.permute.xlu1 %235  ;;  %v402_v30 = vpop.permute.xlu0 %401 }
 0x28b   :  { %5285 = vmatpush3.xpose.msk.msra.mxu0 %vm237_vm2, %v236_v28 }
 0x28c   :  { %5294 = vmatprep.subr.mxu0 %v5980_v11 }
 0x28e   :  { %5287 = vmatmul.mubr.msk.f32.vlgmr.msra.gmra.mrb[2].mxu0 %vm237_vm2, %v6165_v26  ;;  %v404_v29 = vpop.permute.xlu1 %403 }
 0x28f   :  { %5295 = vmatpush3.xpose.msk.msra.mxu0 %vm237_vm2, %v404_v29  ;;  %5296 = vmatprep.mubr.msk.f32.mxu0 %vm5979_vm1, %v5980_v11 }
 0x290   :  { %5304 = vmatprep.subr.mxu0 %v5980_v11 }
 0x292   :  { %5297 = vmatmul.mubr.msk.f32.vlgmr.msra.gmra.mrb[4].mxu0 %vm237_vm2, %v402_v30 }
 0x293   :  { %5306 = vmatprep.mubr.msk.f32.mxu0 %vm5979_vm1, %v5980_v11  ;;  %5305 = vmatpush3.msra.mxu0 %v6206_v52 }
 0x294   :  { %5314 = vmatprep.subr.mxu0 %v5980_v11 }
 0x361   :  { %v308_v31 = vpop.f32.mrb[2].mxu0 }
 0x362   :  { %v312_v33 = vmul.f32 0.35355338, %v308_v31  ;;  %v5288_v34 = vpop.f32.mrb[3].mxu0  ;;  %v6254_v31 = vld [vmem:[%s6974_s25 + $0x10] sm:$0xff] }
 0x364   :  { %v313_v35 = vadd.f32 %v312_v33, %v6187_v32 }
 0x365   :  { %v475_v36 = vpop.f32.mrb[4].mxu0 }
 0x366   :  { %v479_v37 = vmul.f32 0.35355338, %v475_v36  ;;  %v5298_v38 = vpop.f32.mrb[5].mxu0  ;;  %v314_v39 = vsel %vm237_vm2, %v313_v35, -inf }
 0x367   :  { %315 = vmax.xlane.f32.xlu1 %v314_v39 }
 0x368   :  { %v480_v40 = vadd.f32 %v479_v37, %v6187_v32 }
 0x36a   :  { %v481_v41 = vsel %vm237_vm2, %v480_v40, -inf }
 0x36b   :  { %482 = vmax.xlane.f32.xlu0 %v481_v41 }
 0x381   :  { %492 = vrot.lane.b32.xlu0 %v6165_v26, %s6943_s7  ;;  %s6946_s7 = smov 40  }
 0x3f4   :  { %v316_v42 = vpop.xlane.xlu1 %315 }
 0x3f5   :  { %v317_v43 = vsub.f32 %v313_v35, %v316_v42 }
 0x3f7   :  { %v318_v44 = vmul.f32 1.442695, %v317_v43 }
 0x3f8   :  { %v483_v45 = vpop.xlane.xlu0 %482 }
 0x3f9   :  { %5898 = vpow2.f32 %v318_v44  ;;  %v484_v46 = vsub.f32 %v480_v40, %v483_v45  ;;  %v6269_v45 = vld [vmem:[%s6974_s25 + $0x18] sm:$0xff] }
 0x3fb   :  { %v485_v47 = vmul.f32 1.442695, %v484_v46 }
 0x3fc   :  { %v493_v58 = vpop.permute.xlu0 %492 }
 0x3fd   :  { %5900 = vpow2.f32 %v485_v47 }
 0x403   :  { %v5899_v48 = vpop.eup %5898 }
 0x404   :  { %v320_v49 = vsel %vm237_vm2, %v5899_v48, 0.0 }
 0x405   :  { %321 = vadd.xlane.f32.xlu1 %v320_v49 }
 0x407   :  { %v5901_v50 = vpop.eup %5900 }
 0x408   :  { %v487_v51 = vsel %vm237_vm2, %v5901_v50, 0.0 }
 0x409   :  { %488 = vadd.xlane.f32.xlu1 %v487_v51 }
 0x41a   :  { %325 = vrot.lane.b32.xlu1 %v6165_v26, %s6941_s2  ;;  %s6944_s2 = smov 72  }
 0x41e   :  { %716 = vrot.lane.b32.xlu1 %v6165_v26, %s6947_s26 }
 0x422   :  { %714 = vrot.lane.b32.xlu1 %v6165_v26, %s6951_s8  ;;  %s6992_s8 = sld [smem:[#allocation9_spill]] }
 0x492   :  { %v322_v53 = vpop.xlane.xlu1 %321 }
 0x493   :  { %5902 = vrcp.f32 %v322_v53 }
 0x496   :  { %v489_v54 = vpop.xlane.xlu1 %488 }
 0x497   :  { %5904 = vrcp.f32 %v489_v54 }
 0x49a   :  { %v326_v55 = vpop.permute.xlu1 %325 }
 0x49b   :  { %5290 = vmatpush3.msra.mxu1 %v326_v55 }
 0x49c   :  { %5299 = vmatprep.subr.mxu1 %v5980_v11 }
 0x49d   :  { %v5903_v56 = vpop.eup %5902 }
 0x49e   :  { %v324_v57 = vmul.f32 %v5903_v56, %v5899_v48  ;;  %v717_v1 = vpop.permute.xlu1 %716 }
 0x4a0   :  { %5292 = vmatmul.mubr.msk.f32.vlgmr.msra.gmra.mrb[0].mxu1 %vm237_vm2, %v324_v57 }
 0x4a1   :  { %v5905_v59 = vpop.eup %5904  ;;  %5300 = vmatpush3.msra.mxu1 %v493_v58  ;;  %5301 = vmatprep.mubr.msk.f32.mxu1 %vm5979_vm1, %v5980_v11 }
 0x4a2   :  { %v491_v60 = vmul.f32 %v5905_v59, %v5901_v50  ;;  %5309 = vmatprep.subr.mxu1 %v5980_v11  ;;  %v715_v4 = vpop.permute.xlu1 %714 }
 0x4a4   :  { %5302 = vmatmul.mubr.msk.f32.vlgmr.msra.gmra.mrb[2].mxu1 %vm237_vm2, %v491_v60 }
 0x4a5   :  { %5311 = vmatprep.mubr.msk.f32.mxu1 %vm5979_vm1, %v5980_v11  ;;  %5310 = vmatpush3.msra.mxu1 %v83_v61 }
 0x4a6   :  { %5319 = vmatprep.subr.mxu1 %v5980_v11 }
 0x573   :  { %v397_v62 = vpop.f32.mrb[0].mxu1 }
 0x574   :  { %v5293_v63 = vpop.f32.mrb[1].mxu1  ;;  %5312 = vmatmul.mubr.msk.f32.vlgmr.msra.gmra.mrb[4].mxu1 %vm237_vm2, %v397_v62 }
 0x575   :  { %5321 = vmatprep.mubr.msk.f32.mxu1 %vm5979_vm1, %v5980_v11 }
 0x577   :  { %v564_v2 = vpop.f32.mrb[2].mxu1 }
 0x578   :  { %v5303_v3 = vpop.f32.mrb[3].mxu1  ;;  %5307 = vmatmul.mubr.msk.f32.vlgmr.msra.gmra.mrb[6].mxu0 %vm237_vm2, %v564_v2 }
 0x579   :  { %5315 = vmatpush3.xpose.msk.msra.mxu0 %vm237_vm2, %v717_v1  ;;  %5316 = vmatprep.mubr.msk.f32.mxu0 %vm5979_vm1, %v5980_v11 }
 0x57a   :  { %5324 = vmatprep.subr.mxu0 %v5980_v11 }
 0x57c   :  { %5317 = vmatmul.mubr.msk.f32.vlgmr.msra.gmra.mrb[8].mxu0 %vm237_vm2, %v715_v4 }
 0x57d   :  { %5326 = vmatprep.mubr.msk.f32.mxu0 %vm5979_vm1, %v5980_v11  ;;  %5325 = vmatpush3.msra.mxu0 %v6254_v31 }
 0x57e   :  { %5334 = vmatprep.subr.mxu0 %v5980_v11 }
 0x647   :  { %v710_v5 = vpop.f32.mrb[4].mxu1 }
 0x648   :  { %v5313_v6 = vpop.f32.mrb[5].mxu1 }
 0x64b   :  { %v637_v8 = vpop.f32.mrb[6].mxu0 }
 0x64c   :  { %v711_v9 = vadd.f32 %v710_v5, %v637_v8  ;;  %v5308_v10 = vpop.f32.mrb[7].mxu0 }
 0x64d   :  { %v125_v10 = vld [vmem:[%s6916_s1 + $0x8] sm:$0x3] }
 0x64f   :  { %v788_v13 = vpop.f32.mrb[8].mxu0 }
 0x650   :  { %v792_v15 = vmul.f32 0.35355338, %v788_v13  ;;  %v5318_v16 = vpop.f32.mrb[9].mxu0  ;;  %v88_v13 = vld [vmem:[%s6917_s12] sm:$0xff] }
 0x652   :  { %v793_v17 = vadd.f32 %v792_v15, %v6187_v32  ;;  %v89_v15 = vld [vmem:[%s6917_s12 + $0x8] sm:$0xff] }
 0x653   :  { %v6324_v16 = vpack.c.bf16 %v89_v15, %v88_v13 }
 0x654   :  { %v794_v18 = vsel %vm237_vm2, %v793_v17, -inf }
 0x655   :  { %795 = vmax.xlane.f32.xlu1 %v794_v18  ;;  %v91_v18 = vld [vmem:[%s6917_s12 + $0x18] sm:$0xff] }
 0x666   :  { %805 = vrot.lane.b32.xlu1 %v6165_v26, %s6942_s4 }
 0x66a   :  { %955 = vrot.lane.b32.xlu1 %v6165_v26, %s6949_s5 }
 0x6e2   :  { %v796_v19 = vpop.xlane.xlu1 %795 }
 0x6e3   :  { %v797_v20 = vsub.f32 %v793_v17, %v796_v19  ;;  %v90_v17 = vld [vmem:[%s6917_s12 + $0x10] sm:$0xff]  ;;  %s6985_s12 = smov 104  }
 0x6e4   :  { %v6334_v19 = vpack.c.bf16 %v91_v18, %v90_v17 }
 0x6e5   :  { %v798_v21 = vmul.f32 1.442695, %v797_v20 }
 0x6e6   :  { %v806_v22 = vpop.permute.xlu1 %805 }
 0x6e7   :  { %5906 = vpow2.f32 %v798_v21  ;;  %5320 = vmatpush3.msra.mxu1 %v806_v22 }
 0x6e8   :  { %5329 = vmatprep.subr.mxu1 %v5980_v11 }
 0x6ea   :  { %v956_v30 = vpop.permute.xlu1 %955 }
 0x6f1   :  { %v5907_v23 = vpop.eup %5906 }
 0x6f2   :  { %v800_v24 = vsel %vm237_vm2, %v5907_v23, 0.0 }
 0x6f3   :  { %801 = vadd.xlane.f32.xlu0 %v800_v24  ;;  %v6341_v24 = vld [vmem:[%s6918_s10] ss:$0 sm:$0xff]  ;;  %s6979_s10 = smov 120  }
 0x709   :  { %957 = vrot.lane.b32.xlu0 %v6165_v26, %s6944_s2  ;;  %s6976_s2 = sld [smem:[#allocation10_spill]] }
 0x70f   :  { %v93_v3 = vld [vmem:[%s6976_s2] sm:$0xff]  ;;  %v95_v5 = vld [vmem:[%s6976_s2 + $0x10] sm:$0xff]  ;;  %v96_v6 = vld [vmem:[%s6976_s2 + $0x18] sm:$0xff] }
 0x710   :  { %v6303_v8 = vpack.c.bf16 %v96_v6, %v95_v5  ;;  %v6416_v6 = vld [vmem:[%s6923_s16] sm:$0xff] }
 0x780   :  { %v802_v25 = vpop.xlane.xlu0 %801 }
 0x781   :  { %5908 = vrcp.f32 %v802_v25 }
 0x784   :  { %v958_v29 = vpop.permute.xlu0 %957 }
 0x78b   :  { %v5909_v27 = vpop.eup %5908 }
 0x78c   :  { %v804_v28 = vmul.f32 %v5909_v27, %v5907_v23  ;;  %v6346_v27 = vld [vmem:[%s6919_s11] ss:$0 sm:$0xff]  ;;  %s6987_s11 = smov 72  }
 0x78e   :  { %5322 = vmatmul.mubr.msk.f32.vlgmr.msra.gmra.mrb[6].mxu1 %vm237_vm2, %v804_v28 }
 0x78f   :  { %5330 = vmatpush3.xpose.msk.msra.mxu1 %vm237_vm2, %v958_v29  ;;  %5331 = vmatprep.mubr.msk.f32.mxu1 %vm5979_vm1, %v5980_v11 }
 0x790   :  { %5339 = vmatprep.subr.mxu1 %v5980_v11 }
 0x792   :  { %5332 = vmatmul.mubr.msk.f32.vlgmr.msra.gmra.mrb[8].mxu1 %vm237_vm2, %v956_v30  ;;  %v6356_v30 = vld [vmem:[%s6920_s15] ss:$0 sm:$0xff] }
 0x793   :  { %5341 = vmatprep.mubr.msk.f32.mxu1 %vm5979_vm1, %v5980_v11  ;;  %5340 = vmatpush3.msra.mxu1 %v6269_v45 }
 0x861   :  { %v877_v33 = vpop.f32.mrb[6].mxu1 }
 0x862   :  { %v5323_v34 = vpop.f32.mrb[7].mxu1  ;;  %5327 = vmatmul.mubr.msk.f32.vlgmr.msra.gmra.mrb[10].mxu0 %vm237_vm2, %v877_v33 }
 0x863   :  { %5336 = vmatprep.mubr.msk.f32.mxu0 %vm5979_vm1, %v5980_v11 }
 0x865   :  { %v1029_v35 = vpop.f32.mrb[8].mxu1 }
 0x866   :  { %v1033_v36 = vmul.f32 0.35355338, %v1029_v35  ;;  %v5333_v37 = vpop.f32.mrb[9].mxu1 }
 0x868   :  { %v1034_v38 = vadd.f32 %v1033_v36, %v6187_v32 }
 0x86a   :  { %v1035_v39 = vsel %vm237_vm2, %v1034_v38, -inf }
 0x86b   :  { %1036 = vmax.xlane.f32.xlu1 %v1035_v39 }
 0x8f8   :  { %v1037_v40 = vpop.xlane.xlu1 %1036 }
 0x8f9   :  { %v1038_v41 = vsub.f32 %v1034_v38, %v1037_v40  ;;  %v6376_v40 = vld [vmem:[%s6921_s13] ss:$0 sm:$0xff]  ;;  %s6980_s13 = smov 96  }
 0x8fb   :  { %v1039_v42 = vmul.f32 1.442695, %v1038_v41 }
 0x8fd   :  { %5910 = vpow2.f32 %v1039_v42 }
 0x907   :  { %v5911_v43 = vpop.eup %5910 }
 0x908   :  { %v1041_v44 = vsel %vm237_vm2, %v5911_v43, 0.0 }
 0x909   :  { %1042 = vadd.xlane.f32.xlu0 %v1041_v44 }
 0x91f   :  { %1046 = vrot.lane.b32.xlu0 %v6165_v26, %s6946_s7  ;;  %s6975_s7 = sld [smem:[#allocation9_spill]] }
 0x925   :  { %v5009_v57 = vld [vmem:[%s6975_s7] ss:$0 sm:$0xff] }
 0x935   :  { %v950_v32 = vpop.f32.mrb[10].mxu0 }
 0x936   :  { %v954_v46 = vadd.f32 %v950_v32, %v711_v9  ;;  %v5328_v47 = vpop.f32.mrb[11].mxu0  ;;  %v124_v9 = vld [vmem:[%s6916_s1] sm:$0xff] }
 0x937   :  { %v6390_v32 = vld [vmem:[%s6922_s3] ss:$0 sm:$0xff] }
 0x996   :  { %v1043_v48 = vpop.xlane.xlu0 %1042 }
 0x997   :  { %5912 = vrcp.f32 %v1043_v48 }
 0x99a   :  { %v1047_v49 = vpop.permute.xlu0 %1046 }
 0x99b   :  { %5335 = vmatpush3.msra.mxu0 %v1047_v49 }
 0x99c   :  { %5677 = vmatprep.subr.bf16.mxu0 %v5978_v7 }
 0x9a1   :  { %v5913_v50 = vpop.eup %5912 }
 0x9a2   :  { %v1045_v51 = vmul.f32 %v5913_v50, %v5911_v43 }
 0x9a4   :  { %5337 = vmatmul.mubr.msk.f32.vlgmr.msra.gmra.mrb[12].mxu0 %vm237_vm2, %v1045_v51 }
 0x9a5   :  { %5352 = vmatprep.mubr.msk.f32.mxu0 %vm5979_vm1, %v5980_v11  ;;  %5679 = vmatpush3.bf16.msra.mxu0 %v6324_v16 }
 0x9a6   :  { %5680 = vmatprep.subr.bf16.mxu0 %v5978_v7 }
 0x9a9   :  { %5682 = vmatpush3.bf16.msra.mxu0 %v6334_v19 }
 0x9aa   :  { %5691 = vmatprep.subr.bf16.mxu0 %v5978_v7 }
 0xa77   :  { %v1118_v26 = vpop.f32.mrb[12].mxu0 }
 0xa78   :  { %v5338_v53 = vpop.f32.mrb[13].mxu0  ;;  %5342 = vmatmul.mubr.msk.f32.vlgmr.msra.gmra.mrb[10].mxu1 %vm237_vm2, %v1118_v26 }
 0xa79   :  { %5363 = vmatprep.mubr.msk.f32.mxu1 %vm126_vm0, %v124_v9 }
 0xb4b   :  { %v1191_v54 = vpop.f32.mrb[10].mxu1 }
 0xb4c   :  { %v1195_v55 = vadd.f32 %v1191_v54, %v954_v46  ;;  %v5343_v56 = vpop.f32.mrb[11].mxu1 }
 0xb4e   :  { %v1196_v58 = vadd.f32 %v1195_v55, %v6121_v0  ;;  %v94_v0 = vld [vmem:[%s6976_s2 + $0x8] sm:$0xff]  ;;  %s6986_s2 = smov 80  }
 0xb4f   :  { %v6293_v4 = vpack.c.bf16 %v94_v0, %v93_v3 }
 0xb50   :  { %v6281_v59 = vadd.f32 %v5009_v57, %v1196_v58 }
 0xb51   :  { %5684 = vmatprep.subr.bf16.mxu1 %v6293_v4 }
 0xb52   :  { %v1204_v60 = vsel %vm126_vm0, %v6281_v59, 0.0  ;;  %5686 = vmatpush3.bf16.msra.mxu1 %v6293_v4 }
 0xb53   :  { %1205 = vadd.xlane.f32.xlu1 %v1204_v60  ;;  %5688 = vmatprep.subr.bf16.mxu1 %v6303_v8 }
 0xb56   :  { %5690 = vmatpush3.bf16.msra.mxu1 %v6303_v8 }
 0xb57   :  { %5695 = vmatprep.subr.bf16.mxu1 %v5978_v7 }
 0xb59   :  { %5364 = vmatmul.mubr.msk.f32.vlgmr.msra.gmra.mrb[12].mxu1 %vm126_vm0, %v125_v10 }
 0xb5a   :  { %5377 = vmatprep.mubr.msk.f32.mxu1 %vm5979_vm1, %v5980_v11 }
 0xbe0   :  { %v1206_v61 = vpop.xlane.xlu1 %1205 }
 0xbe1   :  { %v1207_v62 = vmul.f32 0.03125, %v1206_v61 }
 0xbe3   :  { %v1208_v63 = vsub.f32 %v6281_v59, %v1207_v62 }
 0xbe5   :  { %v1209_v1 = vmul.f32 %v1208_v63, %v1208_v63 }
 0xbe7   :  { %v1210_v2 = vsel %vm126_vm0, %v1209_v1, 0.0 }
 0xbe8   :  { %1211 = vadd.xlane.f32.xlu1 %v1210_v2 }
 0xc2c   :  { %v5365_v33 = vpop.f32.mrb[12].mxu1 }
 0xc2d   :  { %v1394_v34 = vadd.f32 %v5365_v33, %v6356_v30  ;;  %v1388_v35 = vpop.f32.mrb[13].mxu1 }
 0xc2e   :  { %v1389_v36 = vadd.f32 %v6356_v30, %v1388_v35 }
 0xc30   :  { %v6366_v38 = vpack.i.bf16 %v1394_v34, %v1389_v36  ;;  %v5692_v39 = vpack.c.bf16 %v1394_v34, %v1389_v36 }
 0xc32   :  { %5832 = vrot.lane.b32.xlu0 %v6366_v38, %s6979_s10 }
 0xc75   :  { %v1212_v20 = vpop.xlane.xlu1 %1211 }
 0xc76   :  { %v1213_v21 = vmul.f32 0.03125, %v1212_v20 }
 0xc78   :  { %v1214_v22 = vadd.f32 1e-05, %v1213_v21 }
 0xc7a   :  { %5914 = vrsqrt.f32 %v1214_v22 }
 0xc84   :  { %v5915_v23 = vpop.eup %5914 }
 0xc85   :  { %v1216_v25 = vmul.f32 %v5915_v23, %v1208_v63 }
 0xc87   :  { %v1223_v28 = vmul.f32 %v6341_v24, %v1216_v25 }
 0xc89   :  { %v1230_v29 = vadd.f32 %v6346_v27, %v1223_v28 }
 0xc8b   :  { %5353 = vmatmul.mubr.msk.f32.vlgmr.msra.gmra.mrb[14].mxu0 %vm126_vm0, %v1230_v29 }
 0xc8c   :  { %5370 = vmatprep.mubr.msk.f32.mxu0 %vm5979_vm1, %v5980_v11  ;;  %5694 = vmatpush3.bf16.xpose.msk.msra.mxu0 %vm6362_vm3, %v5692_v39 }
 0xc8d   :  { %5703 = vmatprep.subr.bf16.mxu0 %v5978_v7 }
 0xca4   :  { %v5833_v62 = vpop.permute.xlu0 %5832 }
 0xca5   :  { %v5835_v1 = vunpack.i.h.bf16 %v5833_v62  ;;  %v5834_v2 = vunpack.i.l.bf16 %v5833_v62 }
 0xca7   :  { %v5700_v0 = vpack.c.bf16 %v5835_v1, %v5834_v2 }
 0xd5e   :  { %v1306_v41 = vpop.f32.mrb[14].mxu0 }
 0xd5f   :  { %v6379_v42 = vadd.f32 %v6376_v40, %v1306_v41  ;;  %v5354_v43 = vpop.f32.mrb[15].mxu0 }
 0xd61   :  { %1578 = vrot.lane.b32.xlu0 %v6379_v42, %s6979_s10  ;;  %5371 = vmatmul.mubr.msk.f32.vlgmr.msra.gmra.mrb[16].mxu0 %vm237_vm2, %v6379_v42 }
 0xd62   :  { %5391 = vmatprep.mubr.msk.f32.mxu0 %vm5979_vm1, %v5980_v11 }
 0xdd3   :  { %v1579_v5 = vpop.permute.xlu0 %1578 }
 0xe34   :  { %v1473_v44 = vpop.f32.mrb[16].mxu0 }
 0xe35   :  { %v1477_v46 = vmul.f32 0.35355338, %v1473_v44  ;;  %v5372_v47 = vpop.f32.mrb[17].mxu0 }
 0xe37   :  { %v1484_v48 = vadd.f32 %v6390_v32, %v1477_v46  ;;  %v6442_v46 = vld [vmem:[%s6923_s16 + $0x8] sm:$0xff] }
 0xe39   :  { %v1486_v49 = vsel %vm1485_vm4, %v1484_v48, -inf }
 0xe3a   :  { %1487 = vmax.xlane.f32.xlu1 %v1486_v49 }
 0xec7   :  { %v1488_v50 = vpop.xlane.xlu1 %1487 }
 0xec8   :  { %v1489_v51 = vsub.f32 %v1484_v48, %v1488_v50 }
 0xeca   :  { %v1490_v26 = vmul.f32 1.442695, %v1489_v51 }
 0xecc   :  { %5916 = vpow2.f32 %v1490_v26 }
 0xed6   :  { %v5917_v53 = vpop.eup %5916 }
 0xed7   :  { %v1492_v54 = vsel %vm1485_vm4, %v5917_v53, 0.0 }
 0xed8   :  { %1493 = vadd.xlane.f32.xlu1 %v1492_v54 }
 0xee9   :  { %5827 = vrot.lane.b32.xlu1 %v6366_v38, %s6980_s13 }
 0xf65   :  { %v1494_v55 = vpop.xlane.xlu1 %1493 }
 0xf66   :  { %5918 = vrcp.f32 %v1494_v55 }
 0xf69   :  { %v5828_v56 = vpop.permute.xlu1 %5827 }
 0xf6a   :  { %v5830_v57 = vunpack.i.h.bf16 %v5828_v56  ;;  %v5829_v58 = vunpack.i.l.bf16 %v5828_v56 }
 0xf6c   :  { %v5696_v61 = vpack.c.bf16 %v5830_v57, %v5829_v58 }
 0xf6e   :  { %5698 = vmatpush3.bf16.msk.msra.mxu1 %vm6397_vm7, %v5696_v61 }
 0xf6f   :  { %5699 = vmatprep.subr.bf16.mxu1 %v5978_v7 }
 0xf70   :  { %v5919_v63 = vpop.eup %5918 }
 0xf71   :  { %v1496_v3 = vmul.f32 %v5919_v63, %v5917_v53 }
 0xf73   :  { %5378 = vmatmul.mubr.msk.f32.vlgmr.msra.gmra.mrb[14].mxu1 %vm1485_vm4, %v1496_v3 }
 0xf74   :  { %5384 = vmatprep.mubr.msk.f32.mxu1 %vm5979_vm1, %v5980_v11 }
 0xf77   :  { %5702 = vmatpush3.bf16.xpose.msk.msra.mxu1 %vm6362_vm3, %v5700_v0 }
 0xf78   :  { %5399 = vmatprep.subr.mxu1 %v5980_v11 }
 0xf7e   :  { %5385 = vmatmul.mubr.msk.f32.vlgmr.msra.gmra.mrb[16].mxu1 %vm237_vm2, %v1579_v5 }
 0xf7f   :  { %5401 = vmatprep.mubr.msk.f32.mxu1 %vm5979_vm1, %v5980_v11  ;;  %5400 = vmatpush3.msra.mxu1 %v6416_v6 }
 0xf80   :  { %5711 = vmatprep.subr.bf16.mxu1 %v5978_v7 }
0x1046   :  { %v1574_v9 = vpop.f32.mrb[14].mxu1 }
0x1047   :  { %v5379_v10 = vpop.f32.mrb[15].mxu1  ;;  %5402 = vmatmul.mubr.msk.f32.vlgmr.msra.gmra.mrb[18].mxu1 %vm237_vm2, %v1574_v9 }
0x1048   :  { %5415 = vmatprep.mubr.msk.f32.mxu1 %vm5979_vm1, %v5980_v11 }
0x1051   :  { %v1656_v13 = vpop.f32.mrb[16].mxu1 }
0x1052   :  { %v1660_v15 = vmul.f32 0.35355338, %v1656_v13  ;;  %v5386_v17 = vpop.f32.mrb[17].mxu1 }
0x1054   :  { %v1661_v18 = vadd.f32 %v6390_v32, %v1660_v15 }
0x1056   :  { %v1662_v20 = vsel %vm1485_vm4, %v1661_v18, -inf }
0x1057   :  { %1663 = vmax.xlane.f32.xlu0 %v1662_v20 }
0x106d   :  { %5837 = vrot.lane.b32.xlu0 %v6366_v38, %s6983_s30 }
0x1071   :  { %1899 = vrot.lane.b32.xlu0 %v6379_v42, %s6984_s0 }
0x1075   :  { %5847 = vrot.lane.b32.xlu0 %v6366_v38, %s6985_s12 }
0x10e4   :  { %v1664_v21 = vpop.xlane.xlu0 %1663 }
0x10e5   :  { %v1665_v22 = vsub.f32 %v1661_v18, %v1664_v21 }
0x10e7   :  { %v1666_v23 = vmul.f32 1.442695, %v1665_v22 }
0x10e8   :  { %v5838_v25 = vpop.permute.xlu0 %5837 }
0x10e9   :  { %5920 = vpow2.f32 %v1666_v23  ;;  %v5840_v28 = vunpack.i.h.bf16 %v5838_v25  ;;  %v5839_v29 = vunpack.i.l.bf16 %v5838_v25 }
0x10eb   :  { %v5704_v33 = vpack.c.bf16 %v5840_v28, %v5839_v29 }
0x10ec   :  { %v1900_v47 = vpop.permute.xlu0 %1899 }
0x10ed   :  { %5706 = vmatpush3.bf16.msk.msra.mxu0 %vm6397_vm7, %v5704_v33 }
0x10ee   :  { %5394 = vmatprep.subr.mxu0 %v5980_v11 }
0x10f0   :  { %v5848_v26 = vpop.permute.xlu0 %5847 }
0x10f1   :  { %v5850_v54 = vunpack.i.h.bf16 %v5848_v26  ;;  %v5849_v55 = vunpack.i.l.bf16 %v5848_v26 }
0x10f3   :  { %v5921_v34 = vpop.eup %5920  ;;  %v5716_v56 = vpack.c.bf16 %v5850_v54, %v5849_v55  ;;  %v6501_v54 = vld [vmem:[%s6923_s16 + $0x18] sm:$0xff] }
0x10f4   :  { %v1668_v35 = vsel %vm1485_vm4, %v5921_v34, 0.0 }
0x10f5   :  { %1669 = vadd.xlane.f32.xlu1 %v1668_v35 }
0x1106   :  { %5842 = vrot.lane.b32.xlu1 %v6366_v38, %s6984_s0 }
0x110a   :  { %2148 = vrot.lane.b32.xlu1 %v6379_v42, %s6985_s12 }
0x111a   :  { %v1895_v36 = vpop.f32.mrb[18].mxu1 }
0x111b   :  { %v5403_v39 = vpop.f32.mrb[19].mxu1 }
0x1182   :  { %v1670_v41 = vpop.xlane.xlu1 %1669 }
0x1183   :  { %5922 = vrcp.f32 %v1670_v41 }
0x1186   :  { %v5843_v42 = vpop.permute.xlu1 %5842 }
0x1187   :  { %v5845_v48 = vunpack.i.h.bf16 %v5843_v42  ;;  %v5844_v49 = vunpack.i.l.bf16 %v5843_v42 }
0x1189   :  { %v5708_v50 = vpack.c.bf16 %v5845_v48, %v5844_v49 }
0x118a   :  { %v2149_v57 = vpop.permute.xlu1 %2148 }
0x118d   :  { %v5923_v43 = vpop.eup %5922 }
0x118e   :  { %v1672_v44 = vmul.f32 %v5923_v43, %v5921_v34 }
0x1190   :  { %5392 = vmatmul.mubr.msk.f32.vlgmr.msra.gmra.mrb[18].mxu0 %vm1485_vm4, %v1672_v44  ;;  %v6485_v44 = vld [vmem:[%s6923_s16 + $0x10] sm:$0xff] }
0x1191   :  { %5395 = vmatpush3.msra.mxu0 %v6442_v46  ;;  %5396 = vmatprep.mubr.msk.f32.mxu0 %vm5979_vm1, %v5980_v11 }
0x1192   :  { %5707 = vmatprep.subr.bf16.mxu0 %v5978_v7 }
0x1263   :  { %v1749_v51 = vpop.f32.mrb[18].mxu0 }
0x1264   :  { %v5393_v53 = vpop.f32.mrb[19].mxu0  ;;  %5397 = vmatmul.mubr.msk.f32.vlgmr.msra.gmra.mrb[20].mxu0 %vm237_vm2, %v1749_v51 }
0x1265   :  { %5710 = vmatpush3.bf16.xpose.msk.msra.mxu0 %vm6362_vm3, %v5708_v50  ;;  %5408 = vmatprep.mubr.msk.f32.mxu0 %vm5979_vm1, %v5980_v11 }
0x1266   :  { %5715 = vmatprep.subr.bf16.mxu0 %v5978_v7 }
0x126c   :  { %5409 = vmatmul.mubr.msk.f32.vlgmr.msra.gmra.mrb[22].mxu0 %vm237_vm2, %v1900_v47 }
0x126d   :  { %5718 = vmatpush3.bf16.xpose.msk.msra.mxu0 %vm6362_vm3, %v5716_v56  ;;  %5427 = vmatprep.mubr.msk.f32.mxu0 %vm5979_vm1, %v5980_v11 }
0x126e   :  { %5723 = vmatprep.subr.bf16.mxu0 %v5978_v7 }
0x1274   :  { %5428 = vmatmul.mubr.msk.f32.vlgmr.msra.gmra.mrb[24].mxu0 %vm237_vm2, %v2149_v57 }
0x1275   :  { %5450 = vmatprep.mubr.msk.f32.mxu0 %vm5979_vm1, %v5980_v11 }
0x1337   :  { %v1822_v58 = vpop.f32.mrb[20].mxu0 }
0x1338   :  { %v6464_v61 = vadd.f32 %v1895_v36, %v1822_v58  ;;  %v5398_v62 = vpop.f32.mrb[21].mxu0 }
0x133f   :  { %v1977_v63 = vpop.f32.mrb[22].mxu0 }
0x1340   :  { %v1981_v1 = vmul.f32 0.35355338, %v1977_v63  ;;  %v5410_v2 = vpop.f32.mrb[23].mxu0  ;;  %v6512_v63 = vld [vmem:[%s6968_s27 + $0x8] sm:$0xff] }
0x1342   :  { %v1982_v3 = vadd.f32 %v6390_v32, %v1981_v1  ;;  %v2599_v1 = vsel %vm126_vm0, %v6512_v63, 0.0 }
0x1344   :  { %v1983_v0 = vsel %vm1485_vm4, %v1982_v3, -inf }
0x1345   :  { %1984 = vmax.xlane.f32.xlu0 %v1983_v0  ;;  %v6519_v0 = vld [vmem:[%s6924_s17] ss:$0 sm:$0xff] }
0x1347   :  { %v2226_v5 = vpop.f32.mrb[24].mxu0 }
0x1348   :  { %v5429_v9 = vpop.f32.mrb[25].mxu0  ;;  %v2230_v22 = vmul.f32 0.35355338, %v2226_v5 }
0x134a   :  { %v2231_v28 = vadd.f32 %v6390_v32, %v2230_v22 }
0x134c   :  { %v2232_v29 = vsel %vm1485_vm4, %v2231_v28, -inf }
0x135b   :  { %5852 = vrot.lane.b32.xlu0 %v6366_v38, %s6986_s2 }
0x13d2   :  { %v1985_v10 = vpop.xlane.xlu0 %1984 }
0x13d3   :  { %v1986_v13 = vsub.f32 %v1982_v3, %v1985_v10 }
0x13d5   :  { %v1987_v15 = vmul.f32 1.442695, %v1986_v13 }
0x13d6   :  { %v5853_v17 = vpop.permute.xlu0 %5852 }
0x13d7   :  { %5924 = vpow2.f32 %v1987_v15  ;;  %v5855_v18 = vunpack.i.h.bf16 %v5853_v17  ;;  %v5854_v20 = vunpack.i.l.bf16 %v5853_v17 }
0x13d9   :  { %v5712_v21 = vpack.c.bf16 %v5855_v18, %v5854_v20 }
0x13db   :  { %5714 = vmatpush3.bf16.msk.msra.mxu1 %vm6397_vm7, %v5712_v21 }
0x13dc   :  { %5418 = vmatprep.subr.mxu1 %v5980_v11 }
0x13e1   :  { %v5925_v23 = vpop.eup %5924 }
0x13e2   :  { %v1989_v25 = vsel %vm1485_vm4, %v5925_v23, 0.0 }
0x13e3   :  { %1990 = vadd.xlane.f32.xlu1 %v1989_v25 }
0x13e7   :  { %2233 = vmax.xlane.f32.xlu1 %v2232_v29  ;;  %v104_v29 = vld [vmem:[%s6925_s20 + $0x8] sm:$0xff] }
0x1470   :  { %v1991_v33 = vpop.xlane.xlu1 %1990 }
0x1471   :  { %5926 = vrcp.f32 %v1991_v33 }
0x1474   :  { %v2234_v34 = vpop.xlane.xlu1 %2233 }
0x1475   :  { %v2235_v35 = vsub.f32 %v2231_v28, %v2234_v34  ;;  %v103_v28 = vld [vmem:[%s6925_s20] sm:$0xff]  ;;  %v105_v34 = vld [vmem:[%s6925_s20 + $0x10] sm:$0xff] }
0x1476   :  { %v6537_v33 = vpack.c.bf16 %v104_v29, %v103_v28  ;;  %v5974_v28 = vld [vmem:[%s6972_s29] ss:$0 sm:$0xff] }
0x1477   :  { %v2236_v36 = vmul.f32 1.442695, %v2235_v35  ;;  %v106_v35 = vld [vmem:[%s6925_s20 + $0x18] sm:$0xff] }
0x1478   :  { %5725 = vmatpush3.bf16.msra.mxu0 %v6537_v33 }
0x1479   :  { %5928 = vpow2.f32 %v2236_v36  ;;  %5726 = vmatprep.subr.bf16.mxu0 %v5978_v7  ;;  %v6547_v36 = vpack.c.bf16 %v106_v35, %v105_v34 }
0x147b   :  { %v5927_v39 = vpop.eup %5926 }
0x147c   :  { %v1993_v41 = vmul.f32 %v5927_v39, %v5925_v23  ;;  %5728 = vmatpush3.bf16.msra.mxu0 %v6547_v36  ;;  %v108_v39 = vld [vmem:[%s6926_s22] sm:$0xff] }
0x147d   :  { %5741 = vmatprep.subr.bf16.mxu0 %v5978_v7 }
0x147e   :  { %5416 = vmatmul.mubr.msk.f32.vlgmr.msra.gmra.mrb[20].mxu1 %vm1485_vm4, %v1993_v41  ;;  %v109_v41 = vld [vmem:[%s6926_s22 + $0x8] sm:$0xff] }
0x147f   :  { %5420 = vmatprep.mubr.msk.f32.mxu1 %vm5979_vm1, %v5980_v11  ;;  %5419 = vmatpush3.msra.mxu1 %v6485_v44 }
0x1480   :  { %5719 = vmatprep.subr.bf16.mxu1 %v5978_v7 }
0x1483   :  { %v5929_v43 = vpop.eup %5928 }
0x1484   :  { %v2238_v32 = vsel %vm1485_vm4, %v5929_v43, 0.0 }
0x1485   :  { %2239 = vadd.xlane.f32.xlu1 %v2238_v32  ;;  %v6560_v32 = vpack.c.bf16 %v109_v41, %v108_v39 }
0x1496   :  { %5857 = vrot.lane.b32.xlu1 %v6366_v38, %s6987_s11 }
0x14ba   :  { %2600 = vadd.xlane.f32.xlu1 %v2599_v1  ;;  %v6589_v1 = vld [vmem:[%s6928_s19] ss:$0 sm:$0xff]  ;;  %s6991_s19 = smov 40  }
0x1512   :  { %v2240_v42 = vpop.xlane.xlu1 %2239 }
0x1513   :  { %5930 = vrcp.f32 %v2240_v42  ;;  %v111_v42 = vld [vmem:[%s6926_s22 + $0x18] sm:$0xff] }
0x1516   :  { %v5858_v47 = vpop.permute.xlu1 %5857 }
0x1517   :  { %v5860_v48 = vunpack.i.h.bf16 %v5858_v47  ;;  %v5859_v49 = vunpack.i.l.bf16 %v5858_v47 }
0x1519   :  { %v5720_v51 = vpack.c.bf16 %v5860_v48, %v5859_v49  ;;  %v112_v48 = vld [vmem:[%s6926_s22 + $0x20] sm:$0xff]  ;;  %v113_v49 = vld [vmem:[%s6926_s22 + $0x28] sm:$0xff] }
0x151d   :  { %v5931_v50 = vpop.eup %5930 }
0x151e   :  { %v2242_v38 = vmul.f32 %v5931_v50, %v5929_v43  ;;  %v110_v43 = vld [vmem:[%s6926_s22 + $0x10] sm:$0xff]  ;;  %v6576_v50 = vpack.c.bf16 %v113_v49, %v112_v48 }
0x151f   :  { %v6566_v47 = vpack.c.bf16 %v111_v42, %v110_v43  ;;  %v6655_v43 = vld [vmem:[%s6930_s23] ss:$0 sm:$0xff]  ;;  %s6988_s23 = smov 56  }
0x1547   :  { %v2601_v13 = vpop.xlane.xlu1 %2600 }
0x1548   :  { %v2602_v15 = vmul.f32 0.03125, %v2601_v13 }
0x154a   :  { %v2603_v20 = vsub.f32 %v6512_v63, %v2602_v15  ;;  %v5973_v15 = vld [vmem:[%s6971_s28] ss:$0 sm:$0xff] }
0x154c   :  { %v2604_v23 = vmul.f32 %v2603_v20, %v2603_v20 }
0x1551   :  { %v2070_v26 = vpop.f32.mrb[20].mxu1 }
0x1552   :  { %v5417_v53 = vpop.f32.mrb[21].mxu1  ;;  %5421 = vmatmul.mubr.msk.f32.vlgmr.msra.gmra.mrb[22].mxu1 %vm237_vm2, %v2070_v26 }
0x1553   :  { %5722 = vmatpush3.bf16.msk.msra.mxu1 %vm6397_vm7, %v5720_v51  ;;  %5434 = vmatprep.mubr.msk.f32.mxu1 %vm5979_vm1, %v5980_v11 }
0x1554   :  { %5437 = vmatprep.subr.mxu1 %v5980_v11 }
0x1556   :  { %5435 = vmatmul.mubr.msk.f32.vlgmr.msra.gmra.mrb[24].mxu1 %vm1485_vm4, %v2242_v38 }
0x1557   :  { %5439 = vmatprep.mubr.msk.f32.mxu1 %vm5979_vm1, %v5980_v11  ;;  %5438 = vmatpush3.msra.mxu1 %v6501_v54 }
0x1558   :  { %5729 = vmatprep.subr.bf16.mxu1 %v5978_v7 }
0x1625   :  { %v2143_v55 = vpop.f32.mrb[22].mxu1 }
0x1626   :  { %v2147_v56 = vadd.f32 %v2143_v55, %v6464_v61  ;;  %v5422_v57 = vpop.f32.mrb[23].mxu1 }
0x1629   :  { %v2319_v58 = vpop.f32.mrb[24].mxu1 }
0x162a   :  { %v5436_v62 = vpop.f32.mrb[25].mxu1  ;;  %5440 = vmatmul.mubr.msk.f32.vlgmr.msra.gmra.mrb[26].mxu1 %vm237_vm2, %v2319_v58  ;;  %v6584_v58 = vld [vmem:[%s6927_s18] ss:$0 sm:$0xff] }
0x162b   :  { %5469 = vmatprep.mubr.msk.f32.mxu1 %vm5979_vm1, %v5980_v11  ;;  %5731 = vmatpush3.bf16.msra.mxu1 %v6560_v32 }
0x162c   :  { %5732 = vmatprep.subr.bf16.mxu1 %v5978_v7 }
0x162f   :  { %5734 = vmatpush3.bf16.msra.mxu1 %v6566_v47 }
0x1630   :  { %5735 = vmatprep.subr.bf16.mxu1 %v5978_v7 }
0x1633   :  { %5737 = vmatpush3.bf16.msra.mxu1 %v6576_v50 }
0x1634   :  { %5738 = vmatprep.subr.bf16.mxu1 %v5978_v7 }
0x16fd   :  { %v2392_v2 = vpop.f32.mrb[26].mxu1 }
0x16fe   :  { %v2396_v3 = vadd.f32 %v2392_v2, %v2147_v56  ;;  %v5441_v61 = vpop.f32.mrb[27].mxu1 }
0x1700   :  { %v2397_v5 = vadd.f32 %v2396_v3, %v6281_v59  ;;  %v2605_v59 = vsel %vm126_vm0, %v2604_v23, 0.0 }
0x1702   :  { %v6523_v9 = vadd.f32 %v6519_v0, %v2397_v5 }
0x1704   :  { %v2405_v10 = vsel %vm126_vm0, %v6523_v9, 0.0 }
0x1705   :  { %2406 = vadd.xlane.f32.xlu0 %v2405_v10  ;;  %v5972_v10 = vld [vmem:[%s6970_s6] ss:$0 sm:$0xff] }
0x1792   :  { %v2407_v17 = vpop.xlane.xlu0 %2406 }
0x1793   :  { %v2408_v18 = vmul.f32 0.03125, %v2407_v17 }
0x1795   :  { %v2409_v21 = vsub.f32 %v6523_v9, %v2408_v18 }
0x1797   :  { %v2410_v22 = vmul.f32 %v2409_v21, %v2409_v21 }
0x1799   :  { %v2411_v25 = vsel %vm126_vm0, %v2410_v22, 0.0 }
0x179a   :  { %2412 = vadd.xlane.f32.xlu0 %v2411_v25 }
0x179e   :  { %2606 = vadd.xlane.f32.xlu0 %v2605_v59 }
0x1827   :  { %v2413_v51 = vpop.xlane.xlu0 %2412 }
0x1828   :  { %v2414_v26 = vmul.f32 0.03125, %v2413_v51 }
0x182a   :  { %v2415_v53 = vadd.f32 1e-05, %v2414_v26 }
0x182b   :  { %v2607_v38 = vpop.xlane.xlu0 %2606 }
0x182c   :  { %5932 = vrsqrt.f32 %v2415_v53  ;;  %v2608_v55 = vmul.f32 0.03125, %v2607_v38  ;;  %v6666_v38 = vld [vmem:[%s6973_s14] sm:$0xff]  ;;  %s6989_s14 = smov 64  }
0x182e   :  { %v2609_v56 = vadd.f32 1e-05, %v2608_v55 }
0x1830   :  { %5934 = vrsqrt.f32 %v2609_v56 }
0x1836   :  { %v5933_v57 = vpop.eup %5932 }
0x1837   :  { %v2417_v62 = vmul.f32 %v5933_v57, %v2409_v21 }
0x1839   :  { %v2424_v2 = vmul.f32 %v6584_v58, %v2417_v62 }
0x183a   :  { %v5935_v3 = vpop.eup %5934 }
0x183b   :  { %v2611_v61 = vmul.f32 %v5935_v3, %v2603_v20  ;;  %v2431_v5 = vadd.f32 %v6589_v1, %v2424_v2  ;;  %v6622_v20 = vld [vmem:[%s6929_s21] ss:$0 sm:$0xff] }
0x183d   :  { %5451 = vmatmul.mubr.msk.f32.vlgmr.msra.gmra.mrb[26].mxu0 %vm126_vm0, %v2431_v5  ;;  %v2612_v13 = vmul.f32 %v5972_v10, %v2611_v61 }
0x183e   :  { %5743 = vmatpush3.bf16.msra.mxu0 %v6139_v12  ;;  %5480 = vmatprep.mubr.msk.f32.mxu0 %vm5979_vm1, %v5980_v11  ;;  %v114_v12 = vld [vmem:[%s6926_s22 + $0x30] sm:$0xff] }
0x183f   :  { %5744 = vmatprep.subr.bf16.mxu0 %v5978_v7  ;;  %v2613_v17 = vadd.f32 %v5973_v15, %v2612_v13 }
0x1842   :  { %5746 = vmatpush3.bf16.msra.mxu0 %v6148_v14  ;;  %v115_v14 = vld [vmem:[%s6926_s22 + $0x38] sm:$0xff] }
0x1843   :  { %5483 = vmatprep.subr.mxu0 %v5980_v11  ;;  %v6615_v18 = vpack.c.bf16 %v115_v14, %v114_v12 }
0x1845   :  { %5481 = vmatmul.mubr.msk.f32.vlgmr.msra.gmra.mrb[28].mxu0 %vm126_vm0, %v2613_v17  ;;  %5740 = vmatpush3.bf16.msra.mxu1 %v6615_v18 }
0x1846   :  { %5485 = vmatprep.mubr.msk.f32.mxu0 %vm5979_vm1, %v5980_v11  ;;  %5488 = vmatprep.subr.mxu1 %v5980_v11 }
0x1910   :  { %v2507_v21 = vpop.f32.mrb[26].mxu0 }
0x1911   :  { %v2508_v22 = vadd.f32 %v6622_v20, %v2507_v21  ;;  %v5452_v23 = vpop.f32.mrb[27].mxu0 }
0x1913   :  { %v2511_v25 = vmax.f32 %v2508_v22, 0.0 }
0x1915   :  { %5470 = vmatmul.mubr.msk.f32.vlgmr.msra.gmra.mrb[28].mxu1 %vm2518_vm8, %v2511_v25 }
0x1916   :  { %5490 = vmatprep.mubr.msk.f32.mxu1 %vm5979_vm1, %v5980_v11 }
0x1918   :  { %v2683_v59 = vpop.f32.mrb[28].mxu0 }
0x1919   :  { %v6631_v29 = vadd.f32 %v5974_v28, %v2683_v59  ;;  %v5482_v34 = vpop.f32.mrb[29].mxu0 }
0x191b   :  { %2855 = vrot.lane.b32.xlu1 %v6631_v29, %s6983_s30  ;;  %2688 = vrot.lane.b32.xlu0 %v6631_v29, %s6980_s13 }
0x191f   :  { %2853 = vrot.lane.b32.xlu0 %v6631_v29, %s6979_s10 }
0x198d   :  { %v2689_v35 = vpop.permute.xlu0 %2688  ;;  %v2856_v39 = vpop.permute.xlu1 %2855 }
0x198e   :  { %5484 = vmatpush3.xpose.msk.msra.mxu0 %vm237_vm2, %v2689_v35 }
0x198f   :  { %5493 = vmatprep.subr.mxu0 %v5980_v11 }
0x1991   :  { %5486 = vmatmul.mubr.msk.f32.vlgmr.msra.gmra.mrb[30].mxu0 %vm237_vm2, %v6631_v29  ;;  %v2854_v41 = vpop.permute.xlu0 %2853 }
0x1992   :  { %5494 = vmatpush3.xpose.msk.msra.mxu0 %vm237_vm2, %v2856_v39  ;;  %5495 = vmatprep.mubr.msk.f32.mxu0 %vm5979_vm1, %v5980_v11 }
0x1993   :  { %5503 = vmatprep.subr.mxu0 %v5980_v11 }
0x1995   :  { %5496 = vmatmul.mubr.msk.f32.vlgmr.msra.gmra.mrb[32].mxu0 %vm237_vm2, %v2854_v41 }
0x1996   :  { %5504 = vmatpush3.msra.mxu0 %v6206_v52  ;;  %5505 = vmatprep.mubr.msk.f32.mxu0 %vm5979_vm1, %v5980_v11 }
0x1997   :  { %5513 = vmatprep.subr.mxu0 %v5980_v11 }
0x19e8   :  { %v2588_v42 = vpop.f32.mrb[28].mxu1 }
0x19e9   :  { %v2589_v48 = vadd.f32 %v6655_v43, %v2588_v42  ;;  %v5471_v49 = vpop.f32.mrb[29].mxu1  ;;  %v5976_v42 = vld [vmem:[%s6974_s25] sm:$0xff]  ;;  %s6990_s25 = smov 48  }
0x19eb   :  { %v2592_v51 = vadd.f32 %v2589_v48, %v6523_v9 }
0x19ed   :  { %2593 = vst.msk [vmem:[%s6931_s24] sm:$0xff] %vm126_vm0, %v2592_v51 }
0x1a64   :  { %v2760_v52 = vpop.f32.mrb[30].mxu0 }
0x1a65   :  { %v2764_v26 = vmul.f32 0.35355338, %v2760_v52  ;;  %v5487_v53 = vpop.f32.mrb[31].mxu0 }
0x1a67   :  { %v2765_v55 = vadd.f32 %v6666_v38, %v2764_v26 }
0x1a68   :  { %v2927_v56 = vpop.f32.mrb[32].mxu0 }
0x1a69   :  { %v2931_v57 = vmul.f32 0.35355338, %v2927_v56  ;;  %v5497_v62 = vpop.f32.mrb[33].mxu0  ;;  %v2766_v9 = vsel %vm237_vm2, %v2765_v55, -inf }
0x1a6a   :  { %2767 = vmax.xlane.f32.xlu1 %v2766_v9 }
0x1a6b   :  { %v2932_v2 = vadd.f32 %v6666_v38, %v2931_v57 }
0x1a6d   :  { %v2933_v3 = vsel %vm237_vm2, %v2932_v2, -inf }
0x1a6e   :  { %2934 = vmax.xlane.f32.xlu0 %v2933_v3 }
0x1af7   :  { %v2768_v61 = vpop.xlane.xlu1 %2767 }
0x1af8   :  { %v2769_v5 = vsub.f32 %v2765_v55, %v2768_v61 }
0x1afa   :  { %v2770_v10 = vmul.f32 1.442695, %v2769_v5 }
0x1afb   :  { %v2935_v13 = vpop.xlane.xlu0 %2934 }
0x1afc   :  { %5936 = vpow2.f32 %v2770_v10  ;;  %v2936_v15 = vsub.f32 %v2932_v2, %v2935_v13 }
0x1afe   :  { %v2937_v17 = vmul.f32 1.442695, %v2936_v15 }
0x1b00   :  { %5938 = vpow2.f32 %v2937_v17 }
0x1b06   :  { %v5937_v12 = vpop.eup %5936 }
0x1b07   :  { %v2772_v14 = vsel %vm237_vm2, %v5937_v12, 0.0 }
0x1b08   :  { %2773 = vadd.xlane.f32.xlu0 %v2772_v14 }
0x1b0a   :  { %v5939_v21 = vpop.eup %5938 }
0x1b0b   :  { %v2939_v22 = vsel %vm237_vm2, %v5939_v21, 0.0 }
0x1b0c   :  { %2940 = vadd.xlane.f32.xlu1 %v2939_v22 }
0x1b1d   :  { %2944 = vrot.lane.b32.xlu1 %v6631_v29, %s6988_s23 }
0x1b1e   :  { %2777 = vrot.lane.b32.xlu0 %v6631_v29, %s6989_s14 }
0x1b21   :  { %3168 = vrot.lane.b32.xlu1 %v6631_v29, %s6986_s2 }
0x1b22   :  { %3166 = vrot.lane.b32.xlu0 %v6631_v29, %s6984_s0 }
0x1b95   :  { %v2774_v23 = vpop.xlane.xlu0 %2773 }
0x1b96   :  { %5940 = vrcp.f32 %v2774_v23 }
0x1b99   :  { %v2941_v25 = vpop.xlane.xlu1 %2940  ;;  %v2778_v59 = vpop.permute.xlu0 %2777 }
0x1b9a   :  { %5942 = vrcp.f32 %v2941_v25  ;;  %5489 = vmatpush3.msra.mxu1 %v2778_v59 }
0x1b9b   :  { %5498 = vmatprep.subr.mxu1 %v5980_v11 }
0x1b9d   :  { %v2945_v35 = vpop.permute.xlu1 %2944  ;;  %v3167_v53 = vpop.permute.xlu0 %3166 }
0x1ba0   :  { %v5941_v28 = vpop.eup %5940 }
0x1ba1   :  { %v2776_v34 = vmul.f32 %v5941_v28, %v5937_v12  ;;  %v3169_v52 = vpop.permute.xlu1 %3168 }
0x1ba3   :  { %5491 = vmatmul.mubr.msk.f32.vlgmr.msra.gmra.mrb[30].mxu1 %vm237_vm2, %v2776_v34 }
0x1ba4   :  { %v5943_v39 = vpop.eup %5942  ;;  %5499 = vmatpush3.msra.mxu1 %v2945_v35  ;;  %5500 = vmatprep.mubr.msk.f32.mxu1 %vm5979_vm1, %v5980_v11 }
0x1ba5   :  { %v2943_v41 = vmul.f32 %v5943_v39, %v5939_v21  ;;  %5508 = vmatprep.subr.mxu1 %v5980_v11 }
0x1ba7   :  { %5501 = vmatmul.mubr.msk.f32.vlgmr.msra.gmra.mrb[32].mxu1 %vm237_vm2, %v2943_v41 }
0x1ba8   :  { %5509 = vmatpush3.msra.mxu1 %v5976_v42  ;;  %5510 = vmatprep.mubr.msk.f32.mxu1 %vm5979_vm1, %v5980_v11 }
0x1ba9   :  { %5518 = vmatprep.subr.mxu1 %v5980_v11 }
0x1c76   :  { %v2849_v48 = vpop.f32.mrb[30].mxu1 }
0x1c77   :  { %v5492_v49 = vpop.f32.mrb[31].mxu1  ;;  %5511 = vmatmul.mubr.msk.f32.vlgmr.msra.gmra.mrb[34].mxu1 %vm237_vm2, %v2849_v48 }
0x1c78   :  { %5520 = vmatprep.mubr.msk.f32.mxu1 %vm5979_vm1, %v5980_v11 }
0x1c7a   :  { %v3016_v51 = vpop.f32.mrb[32].mxu1 }
0x1c7b   :  { %v5502_v26 = vpop.f32.mrb[33].mxu1  ;;  %5506 = vmatmul.mubr.msk.f32.vlgmr.msra.gmra.mrb[34].mxu0 %vm237_vm2, %v3016_v51 }
0x1c7c   :  { %5514 = vmatpush3.xpose.msk.msra.mxu0 %vm237_vm2, %v3169_v52  ;;  %5515 = vmatprep.mubr.msk.f32.mxu0 %vm5979_vm1, %v5980_v11 }
0x1c7d   :  { %5523 = vmatprep.subr.mxu0 %v5980_v11 }
0x1c7f   :  { %5516 = vmatmul.mubr.msk.f32.vlgmr.msra.gmra.mrb[36].mxu0 %vm237_vm2, %v3167_v53 }
0x1c80   :  { %5524 = vmatpush3.msra.mxu0 %v6254_v31  ;;  %5525 = vmatprep.mubr.msk.f32.mxu0 %vm5979_vm1, %v5980_v11 }
0x1c81   :  { %5533 = vmatprep.subr.mxu0 %v5980_v11 }
0x1d4a   :  { %v3162_v55 = vpop.f32.mrb[34].mxu1 }
0x1d4b   :  { %v5512_v56 = vpop.f32.mrb[35].mxu1 }
0x1d4e   :  { %v3089_v57 = vpop.f32.mrb[34].mxu0 }
0x1d4f   :  { %v3163_v62 = vadd.f32 %v3162_v55, %v3089_v57  ;;  %v5507_v9 = vpop.f32.mrb[35].mxu0 }
0x1d52   :  { %v3240_v2 = vpop.f32.mrb[36].mxu0 }
0x1d53   :  { %v3244_v3 = vmul.f32 0.35355338, %v3240_v2  ;;  %v5517_v61 = vpop.f32.mrb[37].mxu0 }
0x1d55   :  { %v3245_v5 = vadd.f32 %v6666_v38, %v3244_v3 }
0x1d57   :  { %v3246_v10 = vsel %vm237_vm2, %v3245_v5, -inf }
0x1d58   :  { %3247 = vmax.xlane.f32.xlu1 %v3246_v10 }
0x1d69   :  { %3409 = vrot.lane.b32.xlu1 %v6631_v29, %s6987_s11 }
0x1d6d   :  { %3407 = vrot.lane.b32.xlu1 %v6631_v29, %s6985_s12 }
0x1de5   :  { %v3248_v31 = vpop.xlane.xlu1 %3247 }
0x1de6   :  { %v3249_v13 = vsub.f32 %v3245_v5, %v3248_v31 }
0x1de8   :  { %v3250_v15 = vmul.f32 1.442695, %v3249_v13 }
0x1de9   :  { %v3410_v23 = vpop.permute.xlu1 %3409 }
0x1dea   :  { %5944 = vpow2.f32 %v3250_v15 }
0x1ded   :  { %v3408_v59 = vpop.permute.xlu1 %3407 }
0x1df4   :  { %v5945_v17 = vpop.eup %5944 }
0x1df5   :  { %v3252_v12 = vsel %vm237_vm2, %v5945_v17, 0.0 }
0x1df6   :  { %3253 = vadd.xlane.f32.xlu0 %v3252_v12  ;;  %v5051_v12 = vld [vmem:[%s6916_s1 + $0x18] sm:$0x3] }
0x1e0c   :  { %3257 = vrot.lane.b32.xlu0 %v6631_v29, %s6990_s25 }
0x1e83   :  { %v3254_v14 = vpop.xlane.xlu0 %3253 }
0x1e84   :  { %5946 = vrcp.f32 %v3254_v14 }
0x1e87   :  { %v3258_v21 = vpop.permute.xlu0 %3257 }
0x1e88   :  { %5519 = vmatpush3.msra.mxu1 %v3258_v21 }
0x1e89   :  { %5528 = vmatprep.subr.mxu1 %v5980_v11 }
0x1e8e   :  { %v5947_v22 = vpop.eup %5946 }
0x1e8f   :  { %v3256_v25 = vmul.f32 %v5947_v22, %v5945_v17 }
0x1e91   :  { %5521 = vmatmul.mubr.msk.f32.vlgmr.msra.gmra.mrb[36].mxu1 %vm237_vm2, %v3256_v25 }
0x1e92   :  { %5529 = vmatpush3.xpose.msk.msra.mxu1 %vm237_vm2, %v3410_v23  ;;  %5530 = vmatprep.mubr.msk.f32.mxu1 %vm5979_vm1, %v5980_v11 }
0x1e93   :  { %5538 = vmatprep.subr.mxu1 %v5980_v11 }
0x1e95   :  { %5531 = vmatmul.mubr.msk.f32.vlgmr.msra.gmra.mrb[38].mxu1 %vm237_vm2, %v3408_v59 }
0x1e96   :  { %5539 = vmatpush3.msra.mxu1 %v6269_v45  ;;  %5540 = vmatprep.mubr.msk.f32.mxu1 %vm5979_vm1, %v5980_v11 }
0x1e97   :  { %5754 = vmatprep.subr.bf16.mxu1 %v6293_v4 }
0x1f64   :  { %v3329_v28 = vpop.f32.mrb[36].mxu1 }
0x1f65   :  { %v5522_v34 = vpop.f32.mrb[37].mxu1  ;;  %5526 = vmatmul.mubr.msk.f32.vlgmr.msra.gmra.mrb[38].mxu0 %vm237_vm2, %v3329_v28 }
0x1f66   :  { %5535 = vmatprep.mubr.msk.f32.mxu0 %vm5979_vm1, %v5980_v11 }
0x1f68   :  { %v3481_v35 = vpop.f32.mrb[38].mxu1 }
0x1f69   :  { %v3485_v39 = vmul.f32 0.35355338, %v3481_v35  ;;  %v5532_v41 = vpop.f32.mrb[39].mxu1 }
0x1f6b   :  { %v3486_v42 = vadd.f32 %v6666_v38, %v3485_v39 }
0x1f6d   :  { %v3487_v48 = vsel %vm237_vm2, %v3486_v42, -inf }
0x1f6e   :  { %3488 = vmax.xlane.f32.xlu0 %v3487_v48 }
0x1f84   :  { %3498 = vrot.lane.b32.xlu0 %v6631_v29, %s6991_s19 }
0x1ffb   :  { %v3489_v45 = vpop.xlane.xlu0 %3488 }
0x1ffc   :  { %v3490_v49 = vsub.f32 %v3486_v42, %v3489_v45 }
0x1ffe   :  { %v3491_v51 = vmul.f32 1.442695, %v3490_v49 }
0x1fff   :  { %v3499_v52 = vpop.permute.xlu0 %3498 }
0x2000   :  { %5948 = vpow2.f32 %v3491_v51  ;;  %5534 = vmatpush3.msra.mxu0 %v3499_v52 }
0x2001   :  { %5747 = vmatprep.subr.bf16.mxu0 %v5978_v7 }
0x200a   :  { %v5949_v26 = vpop.eup %5948 }
0x200b   :  { %v3493_v53 = vsel %vm237_vm2, %v5949_v26, 0.0 }
0x200c   :  { %3494 = vadd.xlane.f32.xlu1 %v3493_v53  ;;  %v6793_v53 = vld [vmem:[%s6922_s3 + $0x1] ss:$0 sm:$0xff] }
0x2038   :  { %v3402_v55 = vpop.f32.mrb[38].mxu0 }
0x2039   :  { %v3406_v38 = vadd.f32 %v3402_v55, %v3163_v62  ;;  %v5527_v56 = vpop.f32.mrb[39].mxu0 }
0x2099   :  { %v3495_v57 = vpop.xlane.xlu1 %3494 }
0x209a   :  { %5950 = vrcp.f32 %v3495_v57 }
0x20a4   :  { %v5951_v9 = vpop.eup %5950 }
0x20a5   :  { %v3497_v2 = vmul.f32 %v5951_v9, %v5949_v26 }
0x20a7   :  { %5536 = vmatmul.mubr.msk.f32.vlgmr.msra.gmra.mrb[40].mxu0 %vm237_vm2, %v3497_v2 }
0x20a8   :  { %5749 = vmatpush3.bf16.msra.mxu0 %v6324_v16  ;;  %5551 = vmatprep.mubr.msk.f32.mxu0 %vm5979_vm1, %v5980_v11 }
0x20a9   :  { %5750 = vmatprep.subr.bf16.mxu0 %v5978_v7 }
0x20ac   :  { %5752 = vmatpush3.bf16.msra.mxu0 %v6334_v19  ;;  %v5977_v19 = vld [vmem:[%s6992_s8] ss:$0 sm:$0xff] }
0x20ad   :  { %5761 = vmatprep.subr.bf16.mxu0 %v5978_v7 }
0x217a   :  { %v3570_v29 = vpop.f32.mrb[40].mxu0 }
0x217b   :  { %v5537_v62 = vpop.f32.mrb[41].mxu0  ;;  %5541 = vmatmul.mubr.msk.f32.vlgmr.msra.gmra.mrb[40].mxu1 %vm237_vm2, %v3570_v29 }
0x217c   :  { %5756 = vmatpush3.bf16.msra.mxu1 %v6293_v4 }
0x217d   :  { %5758 = vmatprep.subr.bf16.mxu1 %v6303_v8 }
0x2180   :  { %5760 = vmatpush3.bf16.msra.mxu1 %v6303_v8 }
0x2181   :  { %5765 = vmatprep.subr.bf16.mxu1 %v5978_v7 }
0x224e   :  { %v3643_v16 = vpop.f32.mrb[40].mxu1 }
0x224f   :  { %v3647_v3 = vadd.f32 %v3643_v16, %v3406_v38  ;;  %v5542_v61 = vpop.f32.mrb[41].mxu1 }
0x2251   :  { %v3648_v5 = vadd.f32 %v6512_v63, %v3647_v3  ;;  %v5050_v63 = vld [vmem:[%s6916_s1 + $0x10] sm:$0xff] }
0x2252   :  { %5562 = vmatprep.mubr.msk.f32.mxu1 %vm126_vm0, %v5050_v63 }
0x2253   :  { %v6752_v10 = vadd.f32 %v5977_v19, %v3648_v5  ;;  %5563 = vmatmul.mubr.msk.f32.vlgmr.msra.gmra.mrb[42].mxu1 %vm126_vm0, %v5051_v12 }
0x2254   :  { %5576 = vmatprep.mubr.msk.f32.mxu1 %vm5979_vm1, %v5980_v11 }
0x2255   :  { %v3650_v4 = vsel %vm126_vm0, %v6752_v10, 0.0 }
0x2256   :  { %3651 = vadd.xlane.f32.xlu1 %v3650_v4 }
0x22e3   :  { %v3652_v31 = vpop.xlane.xlu1 %3651 }
0x22e4   :  { %v3653_v13 = vmul.f32 0.03125, %v3652_v31 }
0x22e6   :  { %v3654_v8 = vsub.f32 %v6752_v10, %v3653_v13 }
0x22e8   :  { %v3655_v15 = vmul.f32 %v3654_v8, %v3654_v8 }
0x22ea   :  { %v3656_v17 = vsel %vm126_vm0, %v3655_v15, 0.0 }
0x22eb   :  { %3657 = vadd.xlane.f32.xlu1 %v3656_v17 }
0x2326   :  { %v5564_v34 = vpop.f32.mrb[42].mxu1 }
0x2327   :  { %v3816_v35 = vadd.f32 %v5564_v34, %v6356_v30  ;;  %v3810_v39 = vpop.f32.mrb[43].mxu1 }
0x2328   :  { %v3811_v41 = vadd.f32 %v6356_v30, %v3810_v39 }
0x232a   :  { %v6775_v42 = vpack.i.bf16 %v3816_v35, %v3811_v41  ;;  %v5762_v48 = vpack.c.bf16 %v3816_v35, %v3811_v41 }
0x232c   :  { %5862 = vrot.lane.b32.xlu0 %v6775_v42, %s6980_s13 }
0x2378   :  { %v3658_v14 = vpop.xlane.xlu1 %3657 }
0x2379   :  { %v3659_v21 = vmul.f32 0.03125, %v3658_v14 }
0x237b   :  { %v3660_v22 = vadd.f32 1e-05, %v3659_v21 }
0x237d   :  { %5952 = vrsqrt.f32 %v3660_v22 }
0x2387   :  { %v5953_v23 = vpop.eup %5952 }
0x2388   :  { %v3662_v25 = vmul.f32 %v5953_v23, %v3654_v8 }
0x238a   :  { %v3663_v59 = vmul.f32 %v6341_v24, %v3662_v25 }
0x238c   :  { %v3664_v28 = vadd.f32 %v6346_v27, %v3663_v59 }
0x238e   :  { %5552 = vmatmul.mubr.msk.f32.vlgmr.msra.gmra.mrb[42].mxu0 %vm126_vm0, %v3664_v28 }
0x238f   :  { %5569 = vmatprep.mubr.msk.f32.mxu0 %vm5979_vm1, %v5980_v11  ;;  %5764 = vmatpush3.bf16.xpose.msk.msra.mxu0 %vm6362_vm3, %v5762_v48 }
0x2390   :  { %5773 = vmatprep.subr.bf16.mxu0 %v5978_v7 }
0x239e   :  { %v5863_v24 = vpop.permute.xlu0 %5862 }
0x239f   :  { %v5865_v27 = vunpack.i.h.bf16 %v5863_v24  ;;  %v5864_v45 = vunpack.i.l.bf16 %v5863_v24 }
0x23a1   :  { %v5766_v49 = vpack.c.bf16 %v5865_v27, %v5864_v45 }
0x23a3   :  { %5768 = vmatpush3.bf16.msk.msra.mxu1 %vm6397_vm7, %v5766_v49 }
0x23a4   :  { %5769 = vmatprep.subr.bf16.mxu1 %v5978_v7 }
0x2461   :  { %v3734_v30 = vpop.f32.mrb[42].mxu0 }
0x2462   :  { %v3735_v51 = vadd.f32 %v6376_v40, %v3734_v30  ;;  %v5553_v52 = vpop.f32.mrb[43].mxu0 }
0x2464   :  { %3999 = vrot.lane.b32.xlu0 %v3735_v51, %s6979_s10  ;;  %5570 = vmatmul.mubr.msk.f32.vlgmr.msra.gmra.mrb[44].mxu0 %vm237_vm2, %v3735_v51 }
0x2465   :  { %5590 = vmatprep.mubr.msk.f32.mxu0 %vm5979_vm1, %v5980_v11 }
0x24d6   :  { %v4000_v13 = vpop.permute.xlu0 %3999 }
0x2537   :  { %v3896_v26 = vpop.f32.mrb[44].mxu0 }
0x2538   :  { %v3900_v55 = vmul.f32 0.35355338, %v3896_v26  ;;  %v5571_v38 = vpop.f32.mrb[45].mxu0 }
0x253a   :  { %v3907_v56 = vadd.f32 %v6793_v53, %v3900_v55 }
0x253c   :  { %v3908_v40 = vsel %vm1485_vm4, %v3907_v56, -inf }
0x253d   :  { %3909 = vmax.xlane.f32.xlu1 %v3908_v40 }
0x25ca   :  { %v3910_v57 = vpop.xlane.xlu1 %3909 }
0x25cb   :  { %v3911_v9 = vsub.f32 %v3907_v56, %v3910_v57 }
0x25cd   :  { %v3912_v2 = vmul.f32 1.442695, %v3911_v9 }
0x25cf   :  { %5954 = vpow2.f32 %v3912_v2 }
0x25d9   :  { %v5955_v29 = vpop.eup %5954 }
0x25da   :  { %v3914_v62 = vsel %vm1485_vm4, %v5955_v29, 0.0 }
0x25db   :  { %3915 = vadd.xlane.f32.xlu1 %v3914_v62 }
0x25ec   :  { %5867 = vrot.lane.b32.xlu1 %v6775_v42, %s6979_s10 }
0x2668   :  { %v3916_v16 = vpop.xlane.xlu1 %3915 }
0x2669   :  { %5956 = vrcp.f32 %v3916_v16 }
0x266c   :  { %v5868_v3 = vpop.permute.xlu1 %5867 }
0x266d   :  { %v5870_v61 = vunpack.i.h.bf16 %v5868_v3  ;;  %v5869_v5 = vunpack.i.l.bf16 %v5868_v3 }
0x266f   :  { %v5770_v31 = vpack.c.bf16 %v5870_v61, %v5869_v5 }
0x2673   :  { %v5957_v19 = vpop.eup %5956 }
0x2674   :  { %v3918_v4 = vmul.f32 %v5957_v19, %v5955_v29 }
0x2676   :  { %5577 = vmatmul.mubr.msk.f32.vlgmr.msra.gmra.mrb[44].mxu1 %vm1485_vm4, %v3918_v4 }
0x2677   :  { %5772 = vmatpush3.bf16.xpose.msk.msra.mxu1 %vm6362_vm3, %v5770_v31  ;;  %5583 = vmatprep.mubr.msk.f32.mxu1 %vm5979_vm1, %v5980_v11 }
0x2678   :  { %5598 = vmatprep.subr.mxu1 %v5980_v11 }
0x267e   :  { %5584 = vmatmul.mubr.msk.f32.vlgmr.msra.gmra.mrb[46].mxu1 %vm237_vm2, %v4000_v13 }
0x267f   :  { %5599 = vmatpush3.msra.mxu1 %v6416_v6  ;;  %5600 = vmatprep.mubr.msk.f32.mxu1 %vm5979_vm1, %v5980_v11 }
0x2680   :  { %5781 = vmatprep.subr.bf16.mxu1 %v5978_v7 }
0x2749   :  { %v3995_v8 = vpop.f32.mrb[44].mxu1 }
0x274a   :  { %v5578_v15 = vpop.f32.mrb[45].mxu1  ;;  %5601 = vmatmul.mubr.msk.f32.vlgmr.msra.gmra.mrb[48].mxu1 %vm237_vm2, %v3995_v8 }
0x274b   :  { %5614 = vmatprep.mubr.msk.f32.mxu1 %vm5979_vm1, %v5980_v11 }
0x2751   :  { %v4077_v17 = vpop.f32.mrb[46].mxu1 }
0x2752   :  { %v4081_v63 = vmul.f32 0.35355338, %v4077_v17  ;;  %v5585_v12 = vpop.f32.mrb[47].mxu1 }
0x2754   :  { %v4082_v14 = vadd.f32 %v6793_v53, %v4081_v63 }
0x2756   :  { %v4083_v21 = vsel %vm1485_vm4, %v4082_v14, -inf }
0x2757   :  { %4084 = vmax.xlane.f32.xlu0 %v4083_v21 }
0x276d   :  { %5872 = vrot.lane.b32.xlu0 %v6775_v42, %s6983_s30 }
0x2771   :  { %4320 = vrot.lane.b32.xlu0 %v3735_v51, %s6984_s0 }
0x2775   :  { %5882 = vrot.lane.b32.xlu0 %v6775_v42, %s6985_s12 }
0x2779   :  { %4569 = vrot.lane.b32.xlu0 %v3735_v51, %s6985_s12 }
0x27e4   :  { %v4085_v6 = vpop.xlane.xlu0 %4084 }
0x27e5   :  { %v4086_v22 = vsub.f32 %v4082_v14, %v4085_v6 }
0x27e7   :  { %v4087_v23 = vmul.f32 1.442695, %v4086_v22 }
0x27e8   :  { %v5873_v25 = vpop.permute.xlu0 %5872 }
0x27e9   :  { %5958 = vpow2.f32 %v4087_v23  ;;  %v5875_v59 = vunpack.i.h.bf16 %v5873_v25  ;;  %v5874_v28 = vunpack.i.l.bf16 %v5873_v25 }
0x27eb   :  { %v5774_v34 = vpack.c.bf16 %v5875_v59, %v5874_v28 }
0x27ec   :  { %v4321_v30 = vpop.permute.xlu0 %4320 }
0x27ed   :  { %5776 = vmatpush3.bf16.msk.msra.mxu0 %vm6397_vm7, %v5774_v34 }
0x27ee   :  { %5593 = vmatprep.subr.mxu0 %v5980_v11 }
0x27f0   :  { %v5883_v38 = vpop.permute.xlu0 %5882 }
0x27f1   :  { %v5884_v40 = vunpack.i.l.bf16 %v5883_v38 }
0x27f3   :  { %v5959_v35 = vpop.eup %5958 }
0x27f4   :  { %v4089_v39 = vsel %vm1485_vm4, %v5959_v35, 0.0  ;;  %v4570_v9 = vpop.permute.xlu0 %4569 }
0x27f5   :  { %4090 = vadd.xlane.f32.xlu1 %v4089_v39 }
0x2806   :  { %5877 = vrot.lane.b32.xlu1 %v6775_v42, %s6984_s0 }
0x281d   :  { %v4316_v41 = vpop.f32.mrb[48].mxu1 }
0x281e   :  { %v5602_v48 = vpop.f32.mrb[49].mxu1 }
0x2882   :  { %v4091_v24 = vpop.xlane.xlu1 %4090 }
0x2883   :  { %5960 = vrcp.f32 %v4091_v24 }
0x2886   :  { %v5878_v49 = vpop.permute.xlu1 %5877 }
0x2887   :  { %v5880_v51 = vunpack.i.h.bf16 %v5878_v49  ;;  %v5879_v52 = vunpack.i.l.bf16 %v5878_v49 }
0x2889   :  { %v5778_v26 = vpack.c.bf16 %v5880_v51, %v5879_v52 }
0x288d   :  { %v5961_v27 = vpop.eup %5960 }
0x288e   :  { %v4093_v45 = vmul.f32 %v5961_v27, %v5959_v35 }
0x2890   :  { %5591 = vmatmul.mubr.msk.f32.vlgmr.msra.gmra.mrb[46].mxu0 %vm1485_vm4, %v4093_v45 }
0x2891   :  { %5594 = vmatpush3.msra.mxu0 %v6442_v46  ;;  %5595 = vmatprep.mubr.msk.f32.mxu0 %vm5979_vm1, %v5980_v11  ;;  %v5885_v46 = vunpack.i.h.bf16 %v5883_v38 }
0x2892   :  { %5777 = vmatprep.subr.bf16.mxu0 %v5978_v7 }
0x2893   :  { %v5786_v57 = vpack.c.bf16 %v5885_v46, %v5884_v40 }
0x2963   :  { %v4170_v55 = vpop.f32.mrb[46].mxu0 }
0x2964   :  { %v5592_v56 = vpop.f32.mrb[47].mxu0  ;;  %5596 = vmatmul.mubr.msk.f32.vlgmr.msra.gmra.mrb[48].mxu0 %vm237_vm2, %v4170_v55 }
0x2965   :  { %5780 = vmatpush3.bf16.xpose.msk.msra.mxu0 %vm6362_vm3, %v5778_v26  ;;  %5607 = vmatprep.mubr.msk.f32.mxu0 %vm5979_vm1, %v5980_v11 }
0x2966   :  { %5785 = vmatprep.subr.bf16.mxu0 %v5978_v7 }
0x296c   :  { %5608 = vmatmul.mubr.msk.f32.vlgmr.msra.gmra.mrb[50].mxu0 %vm237_vm2, %v4321_v30 }
0x296d   :  { %5788 = vmatpush3.bf16.xpose.msk.msra.mxu0 %vm6362_vm3, %v5786_v57  ;;  %5626 = vmatprep.mubr.msk.f32.mxu0 %vm5979_vm1, %v5980_v11 }
0x296e   :  { %5793 = vmatprep.subr.bf16.mxu0 %v5978_v7 }
0x2974   :  { %5627 = vmatmul.mubr.msk.f32.vlgmr.msra.gmra.mrb[52].mxu0 %vm237_vm2, %v4570_v9 }
0x2975   :  { %5795 = vmatpush3.bf16.msra.mxu0 %v6537_v33  ;;  %5649 = vmatprep.mubr.msk.f32.mxu0 %vm5979_vm1, %v5980_v11 }
0x2976   :  { %5796 = vmatprep.subr.bf16.mxu0 %v5978_v7 }
0x2979   :  { %5798 = vmatpush3.bf16.msra.mxu0 %v6547_v36 }
0x2a37   :  { %v4243_v2 = vpop.f32.mrb[48].mxu0 }
0x2a38   :  { %v6851_v37 = vadd.f32 %v4316_v41, %v4243_v2  ;;  %v5597_v29 = vpop.f32.mrb[49].mxu0 }
0x2a3f   :  { %v4398_v62 = vpop.f32.mrb[50].mxu0 }
0x2a40   :  { %v4402_v16 = vmul.f32 0.35355338, %v4398_v62  ;;  %v5609_v3 = vpop.f32.mrb[51].mxu0 }
0x2a42   :  { %v4403_v61 = vadd.f32 %v6793_v53, %v4402_v16 }
0x2a44   :  { %v4404_v5 = vsel %vm1485_vm4, %v4403_v61, -inf }
0x2a45   :  { %4405 = vmax.xlane.f32.xlu1 %v4404_v5 }
0x2a47   :  { %v4647_v33 = vpop.f32.mrb[52].mxu0 }
0x2a48   :  { %v4651_v19 = vmul.f32 0.35355338, %v4647_v33  ;;  %v5628_v4 = vpop.f32.mrb[53].mxu0 }
0x2a4a   :  { %v4652_v31 = vadd.f32 %v6793_v53, %v4651_v19 }
0x2a4c   :  { %v4653_v13 = vsel %vm1485_vm4, %v4652_v31, -inf }
0x2a4d   :  { %4654 = vmax.xlane.f32.xlu1 %v4653_v13 }
0x2ad2   :  { %v4406_v36 = vpop.xlane.xlu1 %4405 }
0x2ad3   :  { %v4407_v8 = vsub.f32 %v4403_v61, %v4406_v36 }
0x2ad5   :  { %v4408_v15 = vmul.f32 1.442695, %v4407_v8 }
0x2ad7   :  { %5962 = vpow2.f32 %v4408_v15 }
0x2ada   :  { %v4655_v17 = vpop.xlane.xlu1 %4654 }
0x2adb   :  { %v4656_v63 = vsub.f32 %v4652_v31, %v4655_v17 }
0x2add   :  { %v4657_v12 = vmul.f32 1.442695, %v4656_v63 }
0x2adf   :  { %5964 = vpow2.f32 %v4657_v12 }
0x2ae1   :  { %v5963_v14 = vpop.eup %5962 }
0x2ae2   :  { %v4410_v21 = vsel %vm1485_vm4, %v5963_v14, 0.0 }
0x2ae3   :  { %4411 = vadd.xlane.f32.xlu0 %v4410_v21 }
0x2ae9   :  { %v5965_v6 = vpop.eup %5964 }
0x2aea   :  { %v4659_v22 = vsel %vm1485_vm4, %v5965_v6, 0.0 }
0x2aeb   :  { %4660 = vadd.xlane.f32.xlu1 %v4659_v22 }
0x2af9   :  { %5887 = vrot.lane.b32.xlu0 %v6775_v42, %s6986_s2 }
0x2afc   :  { %5892 = vrot.lane.b32.xlu1 %v6775_v42, %s6987_s11 }
0x2b70   :  { %v4412_v53 = vpop.xlane.xlu0 %4411 }
0x2b71   :  { %5966 = vrcp.f32 %v4412_v53 }
0x2b74   :  { %v5888_v23 = vpop.permute.xlu0 %5887 }
0x2b75   :  { %v5890_v25 = vunpack.i.h.bf16 %v5888_v23  ;;  %v5889_v59 = vunpack.i.l.bf16 %v5888_v23 }
0x2b77   :  { %v5782_v28 = vpack.c.bf16 %v5890_v25, %v5889_v59 }
0x2b78   :  { %v4661_v42 = vpop.xlane.xlu1 %4660 }
0x2b79   :  { %5784 = vmatpush3.bf16.msk.msra.mxu1 %vm6397_vm7, %v5782_v28  ;;  %5968 = vrcp.f32 %v4661_v42 }
0x2b7a   :  { %5617 = vmatprep.subr.mxu1 %v5980_v11 }
0x2b7b   :  { %v5967_v34 = vpop.eup %5966 }
0x2b7c   :  { %v4414_v35 = vmul.f32 %v5967_v34, %v5963_v14  ;;  %v5893_v39 = vpop.permute.xlu1 %5892 }
0x2b7d   :  { %v5895_v41 = vunpack.i.h.bf16 %v5893_v39  ;;  %v5894_v48 = vunpack.i.l.bf16 %v5893_v39 }
0x2b7e   :  { %5615 = vmatmul.mubr.msk.f32.vlgmr.msra.gmra.mrb[50].mxu1 %vm1485_vm4, %v4414_v35 }
0x2b7f   :  { %5618 = vmatpush3.msra.mxu1 %v6485_v44  ;;  %5619 = vmatprep.mubr.msk.f32.mxu1 %vm5979_vm1, %v5980_v11  ;;  %v5790_v27 = vpack.c.bf16 %v5895_v41, %v5894_v48 }
0x2b80   :  { %5789 = vmatprep.subr.bf16.mxu1 %v5978_v7 }
0x2b83   :  { %v5969_v24 = vpop.eup %5968 }
0x2b84   :  { %v4663_v44 = vmul.f32 %v5969_v24, %v5965_v6 }
0x2c51   :  { %v4491_v45 = vpop.f32.mrb[50].mxu1 }
0x2c52   :  { %v5616_v49 = vpop.f32.mrb[51].mxu1  ;;  %5620 = vmatmul.mubr.msk.f32.vlgmr.msra.gmra.mrb[52].mxu1 %vm237_vm2, %v4491_v45 }
0x2c53   :  { %5792 = vmatpush3.bf16.msk.msra.mxu1 %vm6397_vm7, %v5790_v27  ;;  %5633 = vmatprep.mubr.msk.f32.mxu1 %vm5979_vm1, %v5980_v11 }
0x2c54   :  { %5636 = vmatprep.subr.mxu1 %v5980_v11 }
0x2c56   :  { %5634 = vmatmul.mubr.msk.f32.vlgmr.msra.gmra.mrb[54].mxu1 %vm1485_vm4, %v4663_v44 }
0x2c57   :  { %5637 = vmatpush3.msra.mxu1 %v6501_v54  ;;  %5638 = vmatprep.mubr.msk.f32.mxu1 %vm5979_vm1, %v5980_v11 }
0x2c58   :  { %5799 = vmatprep.subr.bf16.mxu1 %v5978_v7 }
0x2d25   :  { %v4564_v30 = vpop.f32.mrb[52].mxu1 }
0x2d26   :  { %v4568_v51 = vadd.f32 %v4564_v30, %v6851_v37  ;;  %v5621_v60 = vpop.f32.mrb[53].mxu1 }
0x2d29   :  { %v4740_v52 = vpop.f32.mrb[54].mxu1 }
0x2d2a   :  { %v5635_v26 = vpop.f32.mrb[55].mxu1  ;;  %5639 = vmatmul.mubr.msk.f32.vlgmr.msra.gmra.mrb[56].mxu1 %vm237_vm2, %v4740_v52 }
0x2d2b   :  { %5801 = vmatpush3.bf16.msra.mxu1 %v6560_v32  ;;  %5668 = vmatprep.mubr.msk.f32.mxu1 %vm5979_vm1, %v5980_v11 }
0x2d2c   :  { %5802 = vmatprep.subr.bf16.mxu1 %v5978_v7 }
0x2d2f   :  { %5804 = vmatpush3.bf16.msra.mxu1 %v6566_v47 }
0x2d30   :  { %5805 = vmatprep.subr.bf16.mxu1 %v5978_v7 }
0x2d33   :  { %5807 = vmatpush3.bf16.msra.mxu1 %v6576_v50 }
0x2d34   :  { %5808 = vmatprep.subr.bf16.mxu1 %v5978_v7 }
0x2d37   :  { %5810 = vmatpush3.bf16.msra.mxu1 %v6615_v18 }
0x2dfd   :  { %v4813_v54 = vpop.f32.mrb[56].mxu1 }
0x2dfe   :  { %v4817_v55 = vadd.f32 %v4813_v54, %v4568_v51  ;;  %v5640_v38 = vpop.f32.mrb[57].mxu1 }
0x2e00   :  { %v4818_v32 = vadd.f32 %v4817_v55, %v6752_v10 }
0x2e02   :  { %v4819_v56 = vadd.f32 %v6519_v0, %v4818_v32 }
0x2e04   :  { %v4820_v11 = vsel %vm126_vm0, %v4819_v56, 0.0 }
0x2e05   :  { %4821 = vadd.xlane.f32.xlu0 %v4820_v11 }
0x2e92   :  { %v4822_v46 = vpop.xlane.xlu0 %4821 }
0x2e93   :  { %v4823_v47 = vmul.f32 0.03125, %v4822_v46 }
0x2e95   :  { %v4824_v40 = vsub.f32 %v4819_v56, %v4823_v47 }
0x2e97   :  { %v4825_v57 = vmul.f32 %v4824_v40, %v4824_v40 }
0x2e99   :  { %v4826_v50 = vsel %vm126_vm0, %v4825_v57, 0.0 }
0x2e9a   :  { %4827 = vadd.xlane.f32.xlu1 %v4826_v50 }
0x2f27   :  { %v4828_v7 = vpop.xlane.xlu1 %4827 }
0x2f28   :  { %v4829_v9 = vmul.f32 0.03125, %v4828_v7 }
0x2f2a   :  { %v4830_v18 = vadd.f32 1e-05, %v4829_v9 }
0x2f2c   :  { %5970 = vrsqrt.f32 %v4830_v18 }
0x2f36   :  { %v5971_v2 = vpop.eup %5970 }
0x2f37   :  { %v4832_v37 = vmul.f32 %v5971_v2, %v4824_v40 }
0x2f39   :  { %v4833_v10 = vmul.f32 %v6584_v58, %v4832_v37 }
0x2f3b   :  { %v4834_v0 = vadd.f32 %v6589_v1, %v4833_v10 }
0x2f3d   :  { %5650 = vmatmul.mubr.msk.f32.vlgmr.msra.gmra.mrb[54].mxu0 %vm126_vm0, %v4834_v0 }
0x3010   :  { %v4904_v29 = vpop.f32.mrb[54].mxu0 }
0x3011   :  { %v4905_v62 = vadd.f32 %v6622_v20, %v4904_v29  ;;  %v5651_v16 = vpop.f32.mrb[55].mxu0 }
0x3013   :  { %v4908_v3 = vmax.f32 %v4905_v62, 0.0 }
0x3015   :  { %5669 = vmatmul.mubr.msk.f32.vlgmr.msra.gmra.mrb[58].mxu1 %vm2518_vm8, %v4908_v3 }
0x30e8   :  { %v4978_v61 = vpop.f32.mrb[58].mxu1 }
0x30e9   :  { %v4979_v5 = vadd.f32 %v6655_v43, %v4978_v61  ;;  %v5670_v33 = vpop.f32.mrb[59].mxu1 }
0x30eb   :  { %v4982_v19 = vadd.f32 %v4979_v5, %v4819_v56 }
0x30ed   :  { %5100 = vst.msk [vmem:[%s6931_s24 + $0x8] sm:$0xff] %vm126_vm0, %v4982_v19 }

</bundles_post_ra>
